<compile_context>
chip_gen: v5e
topology: v5e:2x2
jax: 0.10.0
libtpu: 0.0.40
codegen_flags: <defaults>
</compile_context>

<pallas_src>
import jax
import jax.numpy as jnp
from jax.experimental import pallas as pl
from jax.experimental.pallas import tpu as pltpu


# ---------------------------------------------------------------------------
# helpers (plain-JAX glue: layout plumbing only, no heavy compute)
# ---------------------------------------------------------------------------
def _round_up(x, m):
    return ((x + m - 1) // m) * m


def _im2col(x, kh, kw, stride, pad):
    """x: (B,H,W,C) -> (B*oh*ow, kh*kw*C), feature order (kh, kw, C)."""
    if pad:
        x = jnp.pad(x, ((0, 0), (pad, pad), (pad, pad), (0, 0)))
    B, H, W, C = x.shape
    oh = (H - kh) // stride + 1
    ow = (W - kw) // stride + 1
    cols = []
    for i in range(kh):
        for j in range(kw):
            cols.append(x[:, i:i + stride * (oh - 1) + 1:stride,
                          j:j + stride * (ow - 1) + 1:stride, :])
    patches = jnp.concatenate(cols, axis=-1)  # (B, oh, ow, kh*kw*C)
    return patches.reshape(B * oh * ow, kh * kw * C), B, oh, ow


# ---------------------------------------------------------------------------
# conv1: gridded matmul with fused bias + ReLU (weights resident)
# ---------------------------------------------------------------------------
def _conv1_kernel(x_ref, w_ref, b_ref, o_ref):
    acc = jnp.dot(x_ref[...], w_ref[...], preferred_element_type=jnp.float32)
    o_ref[...] = jnp.maximum(acc + b_ref[...], 0.0)


def conv1_matmul(x, w, b):
    M, K = x.shape
    _, N = w.shape
    if M % 512 == 0:
        tm = 512
    elif M % 256 == 0:
        tm = 256
    else:
        tm = M  # single full block (legal: equals full array dims)
    cost = pl.CostEstimate(flops=2 * M * K * N, transcendentals=0,
                           bytes_accessed=4 * (M * K + K * N + N + M * N))
    return pl.pallas_call(
        _conv1_kernel,
        out_shape=jax.ShapeDtypeStruct((M, N), jnp.float32),
        grid_spec=pltpu.PrefetchScalarGridSpec(
            num_scalar_prefetch=0,
            grid=(M // tm,),
            in_specs=[pl.BlockSpec((tm, K), lambda i: (i, 0)),
                      pl.BlockSpec((K, N), lambda i: (0, 0)),
                      pl.BlockSpec((1, N), lambda i: (0, 0))],
            out_specs=pl.BlockSpec((tm, N), lambda i: (i, 0))),
        compiler_params=pltpu.CompilerParams(
            dimension_semantics=("parallel",)),
        cost_estimate=cost,
    )(x, w, b.reshape(1, N))


# ---------------------------------------------------------------------------
# conv2: implicit GEMM over the 25 taps of a stride-2 5x5 conv.
# Input is pre-split (in glue) into 4 parity phases laid out as
# (B, 4*10, 10, Cin): phase index = 2*row_parity + col_parity; within a phase
# each tap's contribution is a contiguous 8x8 window -> unit-stride slices.
# ---------------------------------------------------------------------------
def _conv2_kernel(x_ref, w_ref, b_ref, o_ref, acc_ref):
    # x_ref: (TB, 40, 10, Cin); w_ref: (25, Cin, Cout); o_ref: (TB, 64, Cout)
    acc_ref[...] = jnp.zeros_like(acc_ref)
    for ki in range(5):                      # kernel row: ki = 2*a + p
        a, p = ki // 2, ki % 2
        for kj in range(5):                  # kernel col: kj = 2*c + q
            c, q = kj // 2, kj % 2
            rb = (2 * p + q) * 10 + a        # row base inside the phase slab
            patch = x_ref[:, rb:rb + 8, c:c + 8, :]      # (TB, 8, 8, Cin)
            acc_ref[...] += jnp.dot(
                patch.reshape(-1, patch.shape[-1]),      # (TB*64, Cin)
                w_ref[ki * 5 + kj],                      # (Cin, Cout)
                preferred_element_type=jnp.float32)
    o_ref[...] = (acc_ref[...] + b_ref[...]).reshape(o_ref.shape)


def conv2_implicit_gemm(phases, w, b, tb):
    Bp = phases.shape[0]
    cin, cout = w.shape[1], w.shape[2]
    cost = pl.CostEstimate(
        flops=2 * Bp * 64 * 25 * cin * cout, transcendentals=0,
        bytes_accessed=4 * (phases.size + w.size + cout + Bp * 64 * cout))
    return pl.pallas_call(
        _conv2_kernel,
        out_shape=jax.ShapeDtypeStruct((Bp, 64, cout), jnp.float32),
        grid_spec=pltpu.PrefetchScalarGridSpec(
            num_scalar_prefetch=0,
            grid=(Bp // tb,),
            in_specs=[pl.BlockSpec((tb, 40, 10, cin), lambda i: (i, 0, 0, 0)),
                      pl.BlockSpec((25, cin, cout), lambda i: (0, 0, 0)),
                      pl.BlockSpec((1, cout), lambda i: (0, 0))],
            out_specs=pl.BlockSpec((tb, 64, cout), lambda i: (i, 0, 0)),
            scratch_shapes=[pltpu.VMEM((tb * 64, cout), jnp.float32)]),
        compiler_params=pltpu.CompilerParams(
            dimension_semantics=("parallel",)),
        cost_estimate=cost,
    )(phases, w, b.reshape(1, cout))


# ---------------------------------------------------------------------------
# fused head: conv3 (as matmul) + ReLU + concat (via split fc1 weight) + MLP
# ---------------------------------------------------------------------------
def _head_kernel(xs_ref, sd_ref, od_ref, w3c_ref, b3c_ref,
                 w1s_ref, w1m_ref, w1o_ref, b1_ref,
                 w2_ref, b2_ref, w3_ref, b3_ref, o_ref):
    # conv3 over the flattened (8*8*128) feature map, then ReLU (end of the
    # spatial_feature Sequential).
    spatial = jnp.dot(xs_ref[...], w3c_ref[...],
                      preferred_element_type=jnp.float32) + b3c_ref[...]
    spatial = jnp.maximum(spatial, 0.0)
    # fc1 on cat([subject, spatial, object]) == sum of three row-block dots.
    h1 = (jnp.dot(sd_ref[...], w1s_ref[...], preferred_element_type=jnp.float32)
          + jnp.dot(spatial, w1m_ref[...], preferred_element_type=jnp.float32)
          + jnp.dot(od_ref[...], w1o_ref[...], preferred_element_type=jnp.float32)
          + b1_ref[...])
    h2 = jnp.dot(jnp.maximum(h1, 0.0), w2_ref[...],
                 preferred_element_type=jnp.float32) + b2_ref[...]
    o_ref[...] = jnp.dot(jnp.maximum(h2, 0.0), w3_ref[...],
                         preferred_element_type=jnp.float32) + b3_ref[...]


def head_fused(xs, sd, od, params, num_objects, tb):
    Bp, K3 = xs.shape
    no = num_objects
    w3c = params["conv3_w"].reshape(K3, 64)
    w1 = params["fc1_w"]
    w1s, w1m, w1o = w1[:no], w1[no:no + 64], w1[no + 64:no + 64 + no]
    flops = 2 * Bp * (K3 * 64 + (64 + 2 * no) * 256 + 256 * 256 + 256 * 2)
    bytes_acc = 4 * (xs.size + sd.size + od.size + w3c.size + w1.size
                     + params["fc2_w"].size + params["fc3_w"].size
                     + Bp * 2 + 3 * 256 + 64 + 2)
    cost = pl.CostEstimate(flops=flops, transcendentals=0,
                           bytes_accessed=bytes_acc)

    def res(shape):  # resident operand: constant index_map
        return pl.BlockSpec(shape, lambda i: (0,) * len(shape))

    return pl.pallas_call(
        _head_kernel,
        out_shape=jax.ShapeDtypeStruct((Bp, 2), jnp.float32),
        grid_spec=pltpu.PrefetchScalarGridSpec(
            num_scalar_prefetch=0,
            grid=(Bp // tb,),
            in_specs=[pl.BlockSpec((tb, K3), lambda i: (i, 0)),
                      pl.BlockSpec((tb, no), lambda i: (i, 0)),
                      pl.BlockSpec((tb, no), lambda i: (i, 0)),
                      res((K3, 64)), res((1, 64)),
                      res((no, 256)), res((64, 256)), res((no, 256)),
                      res((1, 256)),
                      res((256, 256)), res((1, 256)),
                      res((256, 2)), res((1, 2))],
            out_specs=pl.BlockSpec((tb, 2), lambda i: (i, 0))),
        compiler_params=pltpu.CompilerParams(
            dimension_semantics=("parallel",)),
        cost_estimate=cost,
    )(xs, sd, od,
      w3c, params["conv3_b"].reshape(1, 64),
      w1s, w1m, w1o, params["fc1_b"].reshape(1, 256),
      params["fc2_w"], params["fc2_b"].reshape(1, 256),
      params["fc3_w"], params["fc3_b"].reshape(1, 2))


# ---------------------------------------------------------------------------
# PairFiltering forward
# ---------------------------------------------------------------------------
def pair_filtering_forward(params, mask_nchw, subject_dist, object_dist):
    B = mask_nchw.shape[0]
    no = subject_dist.shape[1]
    x = jnp.transpose(mask_nchw, (0, 2, 3, 1)).astype(jnp.float32)   # NHWC

    # conv1 (3->96, k5, s2, p2) + ReLU: im2col glue (K=75, unpadded) + matmul
    patches, _, oh, ow = _im2col(x, 5, 5, 2, 2)                      # (B*256, 75)
    y1 = conv1_matmul(patches, params["conv1_w"].reshape(-1, 96),
                      params["conv1_b"])
    x1 = y1.reshape(B, oh, ow, 96)                                   # (B,16,16,96)

    # conv2 (96->128, k5, s2, p2): parity-phase split (pure rearrangement)
    x1p = jnp.pad(x1, ((0, 0), (2, 2), (2, 2), (0, 0)))              # (B,20,20,96)
    phases = jnp.stack(
        [x1p[:, p::2, q::2, :] for p in (0, 1) for q in (0, 1)],
        axis=1).reshape(B, 40, 10, 96)

    # batch/pair tiling shared by conv2 + fused head (pad once, slice once at
    # the very end -- no intermediate post-call slices).
    tb2 = 8 if B >= 8 else B
    bp = _round_up(B, tb2)
    tbh = 128 if bp > 128 else bp        # 2 buffers * 128 * 8192 * 4B = 8 MiB
    bp = _round_up(bp, tbh)
    sd = subject_dist.astype(jnp.float32)
    od = object_dist.astype(jnp.float32)
    if bp > B:
        phases = jnp.pad(phases, ((0, bp - B), (0, 0), (0, 0), (0, 0)))
        sd = jnp.pad(sd, ((0, bp - B), (0, 0)))
        od = jnp.pad(od, ((0, bp - B), (0, 0)))

    y2 = conv2_implicit_gemm(phases, params["conv2_w"].reshape(25, 96, 128),
                             params["conv2_b"], tb2)                 # (bp,64,128)

    # conv3 + ReLU + concat + fc1/fc2/fc3 in one kernel. The reshape below is
    # layout-identical (row-major (h,w,c) flatten), i.e. free.
    xs = y2.reshape(bp, 64 * 128)
    out = head_fused(xs, sd, od, params, no, tbh)                    # (bp, 2)
    return out[:B]


# ---------------------------------------------------------------------------
# pure-JAX reference (sanity check)
# ---------------------------------------------------------------------------
def reference_forward(params, mask_nchw, subject_dist, object_dist):
    dn = ("NHWC", "HWIO", "NHWC")
    hp = jax.lax.Precision.HIGHEST
    x = jnp.transpose(mask_nchw, (0, 2, 3, 1)).astype(jnp.float32)
    x = jax.lax.conv_general_dilated(x, params["conv1_w"], (2, 2),
                                     [(2, 2), (2, 2)], dimension_numbers=dn,
                                     precision=hp) + params["conv1_b"]
    x = jax.nn.relu(x)
    x = jax.lax.conv_general_dilated(x, params["conv2_w"], (2, 2),
                                     [(2, 2), (2, 2)], dimension_numbers=dn,
                                     precision=hp) + params["conv2_b"]
    x = jax.lax.conv_general_dilated(x, params["conv3_w"], (1, 1),
                                     [(0, 0), (0, 0)], dimension_numbers=dn,
                                     precision=hp) + params["conv3_b"]
    x = jax.nn.relu(x)
    feat = jnp.concatenate([subject_dist, x.reshape(-1, 64), object_dist], 1)
    h = jnp.dot(feat, params["fc1_w"], precision=hp) + params["fc1_b"]
    h = jnp.dot(jax.nn.relu(h), params["fc2_w"], precision=hp) + params["fc2_b"]
    return jnp.dot(jax.nn.relu(h), params["fc3_w"], precision=hp) + params["fc3_b"]


if __name__ == "__main__":
    B = 2
    num_objects = 16          # args.num_objects
    H = W = 32                # mask spatial size implied by .view(-1, 64)

    key = jax.random.PRNGKey(0)
    keys = jax.random.split(key, 16)

    def init(k, shape, scale=0.05):
        return scale * jax.random.normal(k, shape, dtype=jnp.float32)

    params = {
        "conv1_w": init(keys[0], (5, 5, 3, 96)),
        "conv1_b": init(keys[1], (96,)),
        "conv2_w": init(keys[2], (5, 5, 96, 128)),
        "conv2_b": init(keys[3], (128,)),
        "conv3_w": init(keys[4], (8, 8, 128, 64)),
        "conv3_b": init(keys[5], (64,)),
        "fc1_w": init(keys[6], (64 + 2 * num_objects, 256)),
        "fc1_b": init(keys[7], (256,)),
        "fc2_w": init(keys[8], (256, 256)),
        "fc2_b": init(keys[9], (256,)),
        "fc3_w": init(keys[10], (256, 2)),
        "fc3_b": init(keys[11], (2,)),
    }

    mask = jax.random.uniform(keys[12], (B, 3, H, W), dtype=jnp.float32)
    subject_dist = jax.random.uniform(keys[13], (B, num_objects),
                                      dtype=jnp.float32)
    object_dist = jax.random.uniform(keys[14], (B, num_objects),
                                     dtype=jnp.float32)

    fwd = jax.jit(pair_filtering_forward)
    out = jax.block_until_ready(fwd(params, mask, subject_dist, object_dist))
    assert out.shape == (B, 2), out.shape

    ref = jax.block_until_ready(
        reference_forward(params, mask, subject_dist, object_dist))
    assert jnp.allclose(out, ref, atol=2e-3, rtol=2e-3), (out, ref)

    print("KERNEL_OK")
</pallas_src>

<mosaic_0001>
module attributes {stable_mosaic.version = 11 : i64} {
  func.func @_conv1_kernel(%arg0: i32, %arg1: memref<512x75xf32, #tpu.memory_space<vmem>>, %arg2: memref<75x96xf32, #tpu.memory_space<vmem>>, %arg3: memref<1x96xf32, #tpu.memory_space<vmem>>, %arg4: memref<512x96xf32, #tpu.memory_space<vmem>>) attributes {dimension_semantics = [#tpu.dimension_semantics<parallel>], iteration_bounds = array<i64: 1>, scalar_prefetch = 0 : i64, scratch_operands = 0 : i64, tpu.core_type = #tpu.core_type<tc>, window_params = [{transform_indices = @transform_0, window_bounds = array<i64: 512, 75>}, {pipeline_mode = #tpu.pipeline_mode<synchronous>, transform_indices = @transform_1, window_bounds = array<i64: 75, 96>}, {pipeline_mode = #tpu.pipeline_mode<synchronous>, transform_indices = @transform_2, window_bounds = array<i64: 1, 96>}, {transform_indices = @transform_3, window_bounds = array<i64: 512, 96>}]} {
    %c0 = arith.constant 0 : index
    %c0_0 = arith.constant 0 : index
    %0 = vector.load %arg1[%c0, %c0_0] : memref<512x75xf32, #tpu.memory_space<vmem>>, vector<512x75xf32>
    %c0_1 = arith.constant 0 : index
    %c0_2 = arith.constant 0 : index
    %1 = vector.load %arg2[%c0_1, %c0_2] : memref<75x96xf32, #tpu.memory_space<vmem>>, vector<75x96xf32>
    %cst = arith.constant dense<0.000000e+00> : vector<512x96xf32>
    %2 = tpu.matmul %0, %1, %cst {dimension_numbers = #tpu.dot_dimension_numbers<[1], [0], [0], [1], [0, 0, 1, 1], [], []>} : vector<512x75xf32>, vector<75x96xf32>, vector<512x96xf32> -> vector<512x96xf32>
    %c0_3 = arith.constant 0 : index
    %c0_4 = arith.constant 0 : index
    %3 = vector.load %arg3[%c0_3, %c0_4] : memref<1x96xf32, #tpu.memory_space<vmem>>, vector<1x96xf32>
    %4 = vector.broadcast %3 : vector<1x96xf32> to vector<512x96xf32>
    %5 = arith.addf %2, %4 : vector<512x96xf32>
    %cst_5 = arith.constant 0.000000e+00 : f32
    %6 = vector.broadcast %cst_5 : f32 to vector<512x96xf32>
    %7 = arith.maximumf %5, %6 : vector<512x96xf32>
    %c0_6 = arith.constant 0 : index
    %c0_7 = arith.constant 0 : index
    %8 = vector.load %arg4[%c0_6, %c0_7] : memref<512x96xf32, #tpu.memory_space<vmem>>, vector<512x96xf32>
    tpu.vector_store %arg4[%c0_6, %c0_7], %7 {strides = array<i32>} : memref<512x96xf32, #tpu.memory_space<vmem>>, vector<512x96xf32>,
    return
  }
  func.func @transform_0(%arg0: i32) -> (i32, i32) {
    %c0_i32 = arith.constant 0 : i32
    %c0_i32_0 = arith.constant 0 : i32
    return %arg0, %c0_i32 : i32, i32
  }
  func.func @transform_1(%arg0: i32) -> (i32, i32) {
    %c0_i32 = arith.constant 0 : i32
    %c0_i32_0 = arith.constant 0 : i32
    %c0_i32_1 = arith.constant 0 : i32
    return %c0_i32, %c0_i32_0 : i32, i32
  }
  func.func @transform_2(%arg0: i32) -> (i32, i32) {
    %c0_i32 = arith.constant 0 : i32
    %c0_i32_0 = arith.constant 0 : i32
    %c0_i32_1 = arith.constant 0 : i32
    return %c0_i32, %c0_i32_0 : i32, i32
  }
  func.func @transform_3(%arg0: i32) -> (i32, i32) {
    %c0_i32 = arith.constant 0 : i32
    %c0_i32_0 = arith.constant 0 : i32
    return %arg0, %c0_i32 : i32, i32
  }
}

module attributes {stable_mosaic.version = 11 : i64} {
  func.func @_conv2_kernel(%arg0: i32, %arg1: memref<2x40x10x96xf32, #tpu.memory_space<vmem>>, %arg2: memref<25x96x128xf32, #tpu.memory_space<vmem>>, %arg3: memref<1x128xf32, #tpu.memory_space<vmem>>, %arg4: memref<2x64x128xf32, #tpu.memory_space<vmem>>, %arg5: memref<128x128xf32, #tpu.memory_space<vmem>>) attributes {dimension_semantics = [#tpu.dimension_semantics<parallel>], iteration_bounds = array<i64: 1>, scalar_prefetch = 0 : i64, scratch_operands = 1 : i64, tpu.core_type = #tpu.core_type<tc>, window_params = [{transform_indices = @transform_0, window_bounds = array<i64: 2, 40, 10, 96>}, {pipeline_mode = #tpu.pipeline_mode<synchronous>, transform_indices = @transform_1, window_bounds = array<i64: 25, 96, 128>}, {pipeline_mode = #tpu.pipeline_mode<synchronous>, transform_indices = @transform_2, window_bounds = array<i64: 1, 128>}, {transform_indices = @transform_3, window_bounds = array<i64: 2, 64, 128>}]} {
    %cst = arith.constant 0.000000e+00 : f32
    %0 = vector.broadcast %cst : f32 to vector<128x128xf32>
    %c0 = arith.constant 0 : index
    %c0_0 = arith.constant 0 : index
    %1 = vector.load %arg5[%c0, %c0_0] : memref<128x128xf32, #tpu.memory_space<vmem>>, vector<128x128xf32>
    tpu.vector_store %arg5[%c0, %c0_0], %0 {strides = array<i32>} : memref<128x128xf32, #tpu.memory_space<vmem>>, vector<128x128xf32>,
    %c0_1 = arith.constant 0 : index
    %c0_2 = arith.constant 0 : index
    %c0_3 = arith.constant 0 : index
    %c0_4 = arith.constant 0 : index
    %2 = vector.load %arg1[%c0_1, %c0_2, %c0_3, %c0_4] : memref<2x40x10x96xf32, #tpu.memory_space<vmem>>, vector<2x8x8x96xf32>
    %c0_5 = arith.constant 0 : index
    %c0_6 = arith.constant 0 : index
    %3 = vector.load %arg5[%c0_5, %c0_6] : memref<128x128xf32, #tpu.memory_space<vmem>>, vector<128x128xf32>
    %4 = vector.shape_cast %2 : vector<2x8x8x96xf32> to vector<128x96xf32>
    %c0_7 = arith.constant 0 : index
    %c0_8 = arith.constant 0 : index
    %c0_9 = arith.constant 0 : index
    %5 = vector.load %arg2[%c0_7, %c0_8, %c0_9] : memref<25x96x128xf32, #tpu.memory_space<vmem>>, vector<1x96x128xf32>
    %6 = vector.shape_cast %5 : vector<1x96x128xf32> to vector<96x128xf32>
    %cst_10 = arith.constant dense<0.000000e+00> : vector<128x128xf32>
    %7 = tpu.matmul %4, %6, %cst_10 {dimension_numbers = #tpu.dot_dimension_numbers<[1], [0], [0], [1], [0, 0, 1, 1], [], []>} : vector<128x96xf32>, vector<96x128xf32>, vector<128x128xf32> -> vector<128x128xf32>
    %8 = arith.addf %3, %7 : vector<128x128xf32>
    %c0_11 = arith.constant 0 : index
    %c0_12 = arith.constant 0 : index
    %9 = vector.load %arg5[%c0_11, %c0_12] : memref<128x128xf32, #tpu.memory_space<vmem>>, vector<128x128xf32>
    tpu.vector_store %arg5[%c0_11, %c0_12], %8 {strides = array<i32>} : memref<128x128xf32, #tpu.memory_space<vmem>>, vector<128x128xf32>,
    %c0_13 = arith.constant 0 : index
    %c10 = arith.constant 10 : index
    %c0_14 = arith.constant 0 : index
    %c0_15 = arith.constant 0 : index
    %10 = vector.load %arg1[%c0_13, %c10, %c0_14, %c0_15] : memref<2x40x10x96xf32, #tpu.memory_space<vmem>>, vector<2x8x8x96xf32>
    %c0_16 = arith.constant 0 : index
    %c0_17 = arith.constant 0 : index
    %11 = vector.load %arg5[%c0_16, %c0_17] : memref<128x128xf32, #tpu.memory_space<vmem>>, vector<128x128xf32>
    %12 = vector.shape_cast %10 : vector<2x8x8x96xf32> to vector<128x96xf32>
    %c1 = arith.constant 1 : index
    %c0_18 = arith.constant 0 : index
    %c0_19 = arith.constant 0 : index
    %13 = vector.load %arg2[%c1, %c0_18, %c0_19] : memref<25x96x128xf32, #tpu.memory_space<vmem>>, vector<1x96x128xf32>
    %14 = vector.shape_cast %13 : vector<1x96x128xf32> to vector<96x128xf32>
    %cst_20 = arith.constant dense<0.000000e+00> : vector<128x128xf32>
    %15 = tpu.matmul %12, %14, %cst_20 {dimension_numbers = #tpu.dot_dimension_numbers<[1], [0], [0], [1], [0, 0, 1, 1], [], []>} : vector<128x96xf32>, vector<96x128xf32>, vector<128x128xf32> -> vector<128x128xf32>
    %16 = arith.addf %11, %15 : vector<128x128xf32>
    %c0_21 = arith.constant 0 : index
    %c0_22 = arith.constant 0 : index
    %17 = vector.load %arg5[%c0_21, %c0_22] : memref<128x128xf32, #tpu.memory_space<vmem>>, vector<128x128xf32>
    tpu.vector_store %arg5[%c0_21, %c0_22], %16 {strides = array<i32>} : memref<128x128xf32, #tpu.memory_space<vmem>>, vector<128x128xf32>,
    %c0_23 = arith.constant 0 : index
    %c0_24 = arith.constant 0 : index
    %c1_25 = arith.constant 1 : index
    %c0_26 = arith.constant 0 : index
    %18 = vector.load %arg1[%c0_23, %c0_24, %c1_25, %c0_26] : memref<2x40x10x96xf32, #tpu.memory_space<vmem>>, vector<2x8x8x96xf32>
    %c0_27 = arith.constant 0 : index
    %c0_28 = arith.constant 0 : index
    %19 = vector.load %arg5[%c0_27, %c0_28] : memref<128x128xf32, #tpu.memory_space<vmem>>, vector<128x128xf32>
    %20 = vector.shape_cast %18 : vector<2x8x8x96xf32> to vector<128x96xf32>
    %c2 = arith.constant 2 : index
    %c0_29 = arith.constant 0 : index
    %c0_30 = arith.constant 0 : index
    %21 = vector.load %arg2[%c2, %c0_29, %c0_30] : memref<25x96x128xf32, #tpu.memory_space<vmem>>, vector<1x96x128xf32>
    %22 = vector.shape_cast %21 : vector<1x96x128xf32> to vector<96x128xf32>
    %cst_31 = arith.constant dense<0.000000e+00> : vector<128x128xf32>
    %23 = tpu.matmul %20, %22, %cst_31 {dimension_numbers = #tpu.dot_dimension_numbers<[1], [0], [0], [1], [0, 0, 1, 1], [], []>} : vector<128x96xf32>, vector<96x128xf32>, vector<128x128xf32> -> vector<128x128xf32>
    %24 = arith.addf %19, %23 : vector<128x128xf32>
    %c0_32 = arith.constant 0 : index
    %c0_33 = arith.constant 0 : index
    %25 = vector.load %arg5[%c0_32, %c0_33] : memref<128x128xf32, #tpu.memory_space<vmem>>, vector<128x128xf32>
    tpu.vector_store %arg5[%c0_32, %c0_33], %24 {strides = array<i32>} : memref<128x128xf32, #tpu.memory_space<vmem>>, vector<128x128xf32>,
    %c0_34 = arith.constant 0 : index
    %c10_35 = arith.constant 10 : index
    %c1_36 = arith.constant 1 : index
    %c0_37 = arith.constant 0 : index
    %26 = vector.load %arg1[%c0_34, %c10_35, %c1_36, %c0_37] : memref<2x40x10x96xf32, #tpu.memory_space<vmem>>, vector<2x8x8x96xf32>
    %c0_38 = arith.constant 0 : index
    %c0_39 = arith.constant 0 : index
    %27 = vector.load %arg5[%c0_38, %c0_39] : memref<128x128xf32, #tpu.memory_space<vmem>>, vector<128x128xf32>
    %28 = vector.shape_cast %26 : vector<2x8x8x96xf32> to vector<128x96xf32>
    %c3 = arith.constant 3 : index
    %c0_40 = arith.constant 0 : index
    %c0_41 = arith.constant 0 : index
    %29 = vector.load %arg2[%c3, %c0_40, %c0_41] : memref<25x96x128xf32, #tpu.memory_space<vmem>>, vector<1x96x128xf32>
    %30 = vector.shape_cast %29 : vector<1x96x128xf32> to vector<96x128xf32>
    %cst_42 = arith.constant dense<0.000000e+00> : vector<128x128xf32>
    %31 = tpu.matmul %28, %30, %cst_42 {dimension_numbers = #tpu.dot_dimension_numbers<[1], [0], [0], [1], [0, 0, 1, 1], [], []>} : vector<128x96xf32>, vector<96x128xf32>, vector<128x128xf32> -> vector<128x128xf32>
    %32 = arith.addf %27, %31 : vector<128x128xf32>
    %c0_43 = arith.constant 0 : index
    %c0_44 = arith.constant 0 : index
    %33 = vector.load %arg5[%c0_43, %c0_44] : memref<128x128xf32, #tpu.memory_space<vmem>>, vector<128x128xf32>
    tpu.vector_store %arg5[%c0_43, %c0_44], %32 {strides = array<i32>} : memref<128x128xf32, #tpu.memory_space<vmem>>, vector<128x128xf32>,
    %c0_45 = arith.constant 0 : index
    %c0_46 = arith.constant 0 : index
    %c2_47 = arith.constant 2 : index
    %c0_48 = arith.constant 0 : index
    %34 = vector.load %arg1[%c0_45, %c0_46, %c2_47, %c0_48] : memref<2x40x10x96xf32, #tpu.memory_space<vmem>>, vector<2x8x8x96xf32>
    %c0_49 = arith.constant 0 : index
    %c0_50 = arith.constant 0 : index
    %35 = vector.load %arg5[%c0_49, %c0_50] : memref<128x128xf32, #tpu.memory_space<vmem>>, vector<128x128xf32>
    %36 = vector.shape_cast %34 : vector<2x8x8x96xf32> to vector<128x96xf32>
    %c4 = arith.constant 4 : index
    %c0_51 = arith.constant 0 : index
    %c0_52 = arith.constant 0 : index
    %37 = vector.load %arg2[%c4, %c0_51, %c0_52] : memref<25x96x128xf32, #tpu.memory_space<vmem>>, vector<1x96x128xf32>
    %38 = vector.shape_cast %37 : vector<1x96x128xf32> to vector<96x128xf32>
    %cst_53 = arith.constant dense<0.000000e+00> : vector<128x128xf32>
    %39 = tpu.matmul %36, %38, %cst_53 {dimension_numbers = #tpu.dot_dimension_numbers<[1], [0], [0], [1], [0, 0, 1, 1], [], []>} : vector<128x96xf32>, vector<96x128xf32>, vector<128x128xf32> -> vector<128x128xf32>
    %40 = arith.addf %35, %39 : vector<128x128xf32>
    %c0_54 = arith.constant 0 : index
    %c0_55 = arith.constant 0 : index
    %41 = vector.load %arg5[%c0_54, %c0_55] : memref<128x128xf32, #tpu.memory_space<vmem>>, vector<128x128xf32>
    tpu.vector_store %arg5[%c0_54, %c0_55], %40 {strides = array<i32>} : memref<128x128xf32, #tpu.memory_space<vmem>>, vector<128x128xf32>,
    %c0_56 = arith.constant 0 : index
    %c20 = arith.constant 20 : index
    %c0_57 = arith.constant 0 : index
    %c0_58 = arith.constant 0 : index
    %42 = vector.load %arg1[%c0_56, %c20, %c0_57, %c0_58] : memref<2x40x10x96xf32, #tpu.memory_space<vmem>>, vector<2x8x8x96xf32>
    %c0_59 = arith.constant 0 : index
    %c0_60 = arith.constant 0 : index
    %43 = vector.load %arg5[%c0_59, %c0_60] : memref<128x128xf32, #tpu.memory_space<vmem>>, vector<128x128xf32>
    %44 = vector.shape_cast %42 : vector<2x8x8x96xf32> to vector<128x96xf32>
    %c5 = arith.constant 5 : index
    %c0_61 = arith.constant 0 : index
    %c0_62 = arith.constant 0 : index
    %45 = vector.load %arg2[%c5, %c0_61, %c0_62] : memref<25x96x128xf32, #tpu.memory_space<vmem>>, vector<1x96x128xf32>
    %46 = vector.shape_cast %45 : vector<1x96x128xf32> to vector<96x128xf32>
    %cst_63 = arith.constant dense<0.000000e+00> : vector<128x128xf32>
    %47 = tpu.matmul %44, %46, %cst_63 {dimension_numbers = #tpu.dot_dimension_numbers<[1], [0], [0], [1], [0, 0, 1, 1], [], []>} : vector<128x96xf32>, vector<96x128xf32>, vector<128x128xf32> -> vector<128x128xf32>
    %48 = arith.addf %43, %47 : vector<128x128xf32>
    %c0_64 = arith.constant 0 : index
    %c0_65 = arith.constant 0 : index
    %49 = vector.load %arg5[%c0_64, %c0_65] : memref<128x128xf32, #tpu.memory_space<vmem>>, vector<128x128xf32>
    tpu.vector_store %arg5[%c0_64, %c0_65], %48 {strides = array<i32>} : memref<128x128xf32, #tpu.memory_space<vmem>>, vector<128x128xf32>,
    %c0_66 = arith.constant 0 : index
    %c30 = arith.constant 30 : index
    %c0_67 = arith.constant 0 : index
    %c0_68 = arith.constant 0 : index
    %50 = vector.load %arg1[%c0_66, %c30, %c0_67, %c0_68] : memref<2x40x10x96xf32, #tpu.memory_space<vmem>>, vector<2x8x8x96xf32>
    %c0_69 = arith.constant 0 : index
    %c0_70 = arith.constant 0 : index
    %51 = vector.load %arg5[%c0_69, %c0_70] : memref<128x128xf32, #tpu.memory_space<vmem>>, vector<128x128xf32>
    %52 = vector.shape_cast %50 : vector<2x8x8x96xf32> to vector<128x96xf32>
    %c6 = arith.constant 6 : index
    %c0_71 = arith.constant 0 : index
    %c0_72 = arith.constant 0 : index
    %53 = vector.load %arg2[%c6, %c0_71, %c0_72] : memref<25x96x128xf32, #tpu.memory_space<vmem>>, vector<1x96x128xf32>
    %54 = vector.shape_cast %53 : vector<1x96x128xf32> to vector<96x128xf32>
    %cst_73 = arith.constant dense<0.000000e+00> : vector<128x128xf32>
    %55 = tpu.matmul %52, %54, %cst_73 {dimension_numbers = #tpu.dot_dimension_numbers<[1], [0], [0], [1], [0, 0, 1, 1], [], []>} : vector<128x96xf32>, vector<96x128xf32>, vector<128x128xf32> -> vector<128x128xf32>
    %56 = arith.addf %51, %55 : vector<128x128xf32>
    %c0_74 = arith.constant 0 : index
    %c0_75 = arith.constant 0 : index
    %57 = vector.load %arg5[%c0_74, %c0_75] : memref<128x128xf32, #tpu.memory_space<vmem>>, vector<128x128xf32>
    tpu.vector_store %arg5[%c0_74, %c0_75], %56 {strides = array<i32>} : memref<128x128xf32, #tpu.memory_space<vmem>>, vector<128x128xf32>,
    %c0_76 = arith.constant 0 : index
    %c20_77 = arith.constant 20 : index
    %c1_78 = arith.constant 1 : index
    %c0_79 = arith.constant 0 : index
    %58 = vector.load %arg1[%c0_76, %c20_77, %c1_78, %c0_79] : memref<2x40x10x96xf32, #tpu.memory_space<vmem>>, vector<2x8x8x96xf32>
    %c0_80 = arith.constant 0 : index
    %c0_81 = arith.constant 0 : index
    %59 = vector.load %arg5[%c0_80, %c0_81] : memref<128x128xf32, #tpu.memory_space<vmem>>, vector<128x128xf32>
    %60 = vector.shape_cast %58 : vector<2x8x8x96xf32> to vector<128x96xf32>
    %c7 = arith.constant 7 : index
    %c0_82 = arith.constant 0 : index
    %c0_83 = arith.constant 0 : index
    %61 = vector.load %arg2[%c7, %c0_82, %c0_83] : memref<25x96x128xf32, #tpu.memory_space<vmem>>, vector<1x96x128xf32>
    %62 = vector.shape_cast %61 : vector<1x96x128xf32> to vector<96x128xf32>
    %cst_84 = arith.constant dense<0.000000e+00> : vector<128x128xf32>
    %63 = tpu.matmul %60, %62, %cst_84 {dimension_numbers = #tpu.dot_dimension_numbers<[1], [0], [0], [1], [0, 0, 1, 1], [], []>} : vector<128x96xf32>, vector<96x128xf32>, vector<128x128xf32> -> vector<128x128xf32>
    %64 = arith.addf %59, %63 : vector<128x128xf32>
    %c0_85 = arith.constant 0 : index
    %c0_86 = arith.constant 0 : index
    %65 = vector.load %arg5[%c0_85, %c0_86] : memref<128x128xf32, #tpu.memory_space<vmem>>, vector<128x128xf32>
    tpu.vector_store %arg5[%c0_85, %c0_86], %64 {strides = array<i32>} : memref<128x128xf32, #tpu.memory_space<vmem>>, vector<128x128xf32>,
    %c0_87 = arith.constant 0 : index
    %c30_88 = arith.constant 30 : index
    %c1_89 = arith.constant 1 : index
    %c0_90 = arith.constant 0 : index
    %66 = vector.load %arg1[%c0_87, %c30_88, %c1_89, %c0_90] : memref<2x40x10x96xf32, #tpu.memory_space<vmem>>, vector<2x8x8x96xf32>
    %c0_91 = arith.constant 0 : index
    %c0_92 = arith.constant 0 : index
    %67 = vector.load %arg5[%c0_91, %c0_92] : memref<128x128xf32, #tpu.memory_space<vmem>>, vector<128x128xf32>
    %68 = vector.shape_cast %66 : vector<2x8x8x96xf32> to vector<128x96xf32>
    %c8 = arith.constant 8 : index
    %c0_93 = arith.constant 0 : index
    %c0_94 = arith.constant 0 : index
    %69 = vector.load %arg2[%c8, %c0_93, %c0_94] : memref<25x96x128xf32, #tpu.memory_space<vmem>>, vector<1x96x128xf32>
    %70 = vector.shape_cast %69 : vector<1x96x128xf32> to vector<96x128xf32>
    %cst_95 = arith.constant dense<0.000000e+00> : vector<128x128xf32>
    %71 = tpu.matmul %68, %70, %cst_95 {dimension_numbers = #tpu.dot_dimension_numbers<[1], [0], [0], [1], [0, 0, 1, 1], [], []>} : vector<128x96xf32>, vector<96x128xf32>, vector<128x128xf32> -> vector<128x128xf32>
    %72 = arith.addf %67, %71 : vector<128x128xf32>
    %c0_96 = arith.constant 0 : index
    %c0_97 = arith.constant 0 : index
    %73 = vector.load %arg5[%c0_96, %c0_97] : memref<128x128xf32, #tpu.memory_space<vmem>>, vector<128x128xf32>
    tpu.vector_store %arg5[%c0_96, %c0_97], %72 {strides = array<i32>} : memref<128x128xf32, #tpu.memory_space<vmem>>, vector<128x128xf32>,
    %c0_98 = arith.constant 0 : index
    %c20_99 = arith.constant 20 : index
    %c2_100 = arith.constant 2 : index
    %c0_101 = arith.constant 0 : index
    %74 = vector.load %arg1[%c0_98, %c20_99, %c2_100, %c0_101] : memref<2x40x10x96xf32, #tpu.memory_space<vmem>>, vector<2x8x8x96xf32>
    %c0_102 = arith.constant 0 : index
    %c0_103 = arith.constant 0 : index
    %75 = vector.load %arg5[%c0_102, %c0_103] : memref<128x128xf32, #tpu.memory_space<vmem>>, vector<128x128xf32>
    %76 = vector.shape_cast %74 : vector<2x8x8x96xf32> to vector<128x96xf32>
    %c9 = arith.constant 9 : index
    %c0_104 = arith.constant 0 : index
    %c0_105 = arith.constant 0 : index
    %77 = vector.load %arg2[%c9, %c0_104, %c0_105] : memref<25x96x128xf32, #tpu.memory_space<vmem>>, vector<1x96x128xf32>
    %78 = vector.shape_cast %77 : vector<1x96x128xf32> to vector<96x128xf32>
    %cst_106 = arith.constant dense<0.000000e+00> : vector<128x128xf32>
    %79 = tpu.matmul %76, %78, %cst_106 {dimension_numbers = #tpu.dot_dimension_numbers<[1], [0], [0], [1], [0, 0, 1, 1], [], []>} : vector<128x96xf32>, vector<96x128xf32>, vector<128x128xf32> -> vector<128x128xf32>
    %80 = arith.addf %75, %79 : vector<128x128xf32>
    %c0_107 = arith.constant 0 : index
    %c0_108 = arith.constant 0 : index
    %81 = vector.load %arg5[%c0_107, %c0_108] : memref<128x128xf32, #tpu.memory_space<vmem>>, vector<128x128xf32>
    tpu.vector_store %arg5[%c0_107, %c0_108], %80 {strides = array<i32>} : memref<128x128xf32, #tpu.memory_space<vmem>>, vector<128x128xf32>,
    %c0_109 = arith.constant 0 : index
    %c1_110 = arith.constant 1 : index
    %c0_111 = arith.constant 0 : index
    %c0_112 = arith.constant 0 : index
    %82 = vector.load %arg1[%c0_109, %c1_110, %c0_111, %c0_112] : memref<2x40x10x96xf32, #tpu.memory_space<vmem>>, vector<2x8x8x96xf32>
    %c0_113 = arith.constant 0 : index
    %c0_114 = arith.constant 0 : index
    %83 = vector.load %arg5[%c0_113, %c0_114] : memref<128x128xf32, #tpu.memory_space<vmem>>, vector<128x128xf32>
    %84 = vector.shape_cast %82 : vector<2x8x8x96xf32> to vector<128x96xf32>
    %c10_115 = arith.constant 10 : index
    %c0_116 = arith.constant 0 : index
    %c0_117 = arith.constant 0 : index
    %85 = vector.load %arg2[%c10_115, %c0_116, %c0_117] : memref<25x96x128xf32, #tpu.memory_space<vmem>>, vector<1x96x128xf32>
    %86 = vector.shape_cast %85 : vector<1x96x128xf32> to vector<96x128xf32>
    %cst_118 = arith.constant dense<0.000000e+00> : vector<128x128xf32>
    %87 = tpu.matmul %84, %86, %cst_118 {dimension_numbers = #tpu.dot_dimension_numbers<[1], [0], [0], [1], [0, 0, 1, 1], [], []>} : vector<128x96xf32>, vector<96x128xf32>, vector<128x128xf32> -> vector<128x128xf32>
    %88 = arith.addf %83, %87 : vector<128x128xf32>
    %c0_119 = arith.constant 0 : index
    %c0_120 = arith.constant 0 : index
    %89 = vector.load %arg5[%c0_119, %c0_120] : memref<128x128xf32, #tpu.memory_space<vmem>>, vector<128x128xf32>
    tpu.vector_store %arg5[%c0_119, %c0_120], %88 {strides = array<i32>} : memref<128x128xf32, #tpu.memory_space<vmem>>, vector<128x128xf32>,
    %c0_121 = arith.constant 0 : index
    %c11 = arith.constant 11 : index
    %c0_122 = arith.constant 0 : index
    %c0_123 = arith.constant 0 : index
    %90 = vector.load %arg1[%c0_121, %c11, %c0_122, %c0_123] : memref<2x40x10x96xf32, #tpu.memory_space<vmem>>, vector<2x8x8x96xf32>
    %c0_124 = arith.constant 0 : index
    %c0_125 = arith.constant 0 : index
    %91 = vector.load %arg5[%c0_124, %c0_125] : memref<128x128xf32, #tpu.memory_space<vmem>>, vector<128x128xf32>
    %92 = vector.shape_cast %90 : vector<2x8x8x96xf32> to vector<128x96xf32>
    %c11_126 = arith.constant 11 : index
    %c0_127 = arith.constant 0 : index
    %c0_128 = arith.constant 0 : index
    %93 = vector.load %arg2[%c11_126, %c0_127, %c0_128] : memref<25x96x128xf32, #tpu.memory_space<vmem>>, vector<1x96x128xf32>
    %94 = vector.shape_cast %93 : vector<1x96x128xf32> to vector<96x128xf32>
    %cst_129 = arith.constant dense<0.000000e+00> : vector<128x128xf32>
    %95 = tpu.matmul %92, %94, %cst_129 {dimension_numbers = #tpu.dot_dimension_numbers<[1], [0], [0], [1], [0, 0, 1, 1], [], []>} : vector<128x96xf32>, vector<96x128xf32>, vector<128x128xf32> -> vector<128x128xf32>
    %96 = arith.addf %91, %95 : vector<128x128xf32>
    %c0_130 = arith.constant 0 : index
    %c0_131 = arith.constant 0 : index
    %97 = vector.load %arg5[%c0_130, %c0_131] : memref<128x128xf32, #tpu.memory_space<vmem>>, vector<128x128xf32>
    tpu.vector_store %arg5[%c0_130, %c0_131], %96 {strides = array<i32>} : memref<128x128xf32, #tpu.memory_space<vmem>>, vector<128x128xf32>,
    %c0_132 = arith.constant 0 : index
    %c1_133 = arith.constant 1 : index
    %c1_134 = arith.constant 1 : index
    %c0_135 = arith.constant 0 : index
    %98 = vector.load %arg1[%c0_132, %c1_133, %c1_134, %c0_135] : memref<2x40x10x96xf32, #tpu.memory_space<vmem>>, vector<2x8x8x96xf32>
    %c0_136 = arith.constant 0 : index
    %c0_137 = arith.constant 0 : index
    %99 = vector.load %arg5[%c0_136, %c0_137] : memref<128x128xf32, #tpu.memory_space<vmem>>, vector<128x128xf32>
    %100 = vector.shape_cast %98 : vector<2x8x8x96xf32> to vector<128x96xf32>
    %c12 = arith.constant 12 : index
    %c0_138 = arith.constant 0 : index
    %c0_139 = arith.constant 0 : index
    %101 = vector.load %arg2[%c12, %c0_138, %c0_139] : memref<25x96x128xf32, #tpu.memory_space<vmem>>, vector<1x96x128xf32>
    %102 = vector.shape_cast %101 : vector<1x96x128xf32> to vector<96x128xf32>
    %cst_140 = arith.constant dense<0.000000e+00> : vector<128x128xf32>
    %103 = tpu.matmul %100, %102, %cst_140 {dimension_numbers = #tpu.dot_dimension_numbers<[1], [0], [0], [1], [0, 0, 1, 1], [], []>} : vector<128x96xf32>, vector<96x128xf32>, vector<128x128xf32> -> vector<128x128xf32>
    %104 = arith.addf %99, %103 : vector<128x128xf32>
    %c0_141 = arith.constant 0 : index
    %c0_142 = arith.constant 0 : index
    %105 = vector.load %arg5[%c0_141, %c0_142] : memref<128x128xf32, #tpu.memory_space<vmem>>, vector<128x128xf32>
    tpu.vector_store %arg5[%c0_141, %c0_142], %104 {strides = array<i32>} : memref<128x128xf32, #tpu.memory_space<vmem>>, vector<128x128xf32>,
    %c0_143 = arith.constant 0 : index
    %c11_144 = arith.constant 11 : index
    %c1_145 = arith.constant 1 : index
    %c0_146 = arith.constant 0 : index
    %106 = vector.load %arg1[%c0_143, %c11_144, %c1_145, %c0_146] : memref<2x40x10x96xf32, #tpu.memory_space<vmem>>, vector<2x8x8x96xf32>
    %c0_147 = arith.constant 0 : index
    %c0_148 = arith.constant 0 : index
    %107 = vector.load %arg5[%c0_147, %c0_148] : memref<128x128xf32, #tpu.memory_space<vmem>>, vector<128x128xf32>
    %108 = vector.shape_cast %106 : vector<2x8x8x96xf32> to vector<128x96xf32>
    %c13 = arith.constant 13 : index
    %c0_149 = arith.constant 0 : index
    %c0_150 = arith.constant 0 : index
    %109 = vector.load %arg2[%c13, %c0_149, %c0_150] : memref<25x96x128xf32, #tpu.memory_space<vmem>>, vector<1x96x128xf32>
    %110 = vector.shape_cast %109 : vector<1x96x128xf32> to vector<96x128xf32>
    %cst_151 = arith.constant dense<0.000000e+00> : vector<128x128xf32>
    %111 = tpu.matmul %108, %110, %cst_151 {dimension_numbers = #tpu.dot_dimension_numbers<[1], [0], [0], [1], [0, 0, 1, 1], [], []>} : vector<128x96xf32>, vector<96x128xf32>, vector<128x128xf32> -> vector<128x128xf32>
    %112 = arith.addf %107, %111 : vector<128x128xf32>
    %c0_152 = arith.constant 0 : index
    %c0_153 = arith.constant 0 : index
    %113 = vector.load %arg5[%c0_152, %c0_153] : memref<128x128xf32, #tpu.memory_space<vmem>>, vector<128x128xf32>
    tpu.vector_store %arg5[%c0_152, %c0_153], %112 {strides = array<i32>} : memref<128x128xf32, #tpu.memory_space<vmem>>, vector<128x128xf32>,
    %c0_154 = arith.constant 0 : index
    %c1_155 = arith.constant 1 : index
    %c2_156 = arith.constant 2 : index
    %c0_157 = arith.constant 0 : index
    %114 = vector.load %arg1[%c0_154, %c1_155, %c2_156, %c0_157] : memref<2x40x10x96xf32, #tpu.memory_space<vmem>>, vector<2x8x8x96xf32>
    %c0_158 = arith.constant 0 : index
    %c0_159 = arith.constant 0 : index
    %115 = vector.load %arg5[%c0_158, %c0_159] : memref<128x128xf32, #tpu.memory_space<vmem>>, vector<128x128xf32>
    %116 = vector.shape_cast %114 : vector<2x8x8x96xf32> to vector<128x96xf32>
    %c14 = arith.constant 14 : index
    %c0_160 = arith.constant 0 : index
    %c0_161 = arith.constant 0 : index
    %117 = vector.load %arg2[%c14, %c0_160, %c0_161] : memref<25x96x128xf32, #tpu.memory_space<vmem>>, vector<1x96x128xf32>
    %118 = vector.shape_cast %117 : vector<1x96x128xf32> to vector<96x128xf32>
    %cst_162 = arith.constant dense<0.000000e+00> : vector<128x128xf32>
    %119 = tpu.matmul %116, %118, %cst_162 {dimension_numbers = #tpu.dot_dimension_numbers<[1], [0], [0], [1], [0, 0, 1, 1], [], []>} : vector<128x96xf32>, vector<96x128xf32>, vector<128x128xf32> -> vector<128x128xf32>
    %120 = arith.addf %115, %119 : vector<128x128xf32>
    %c0_163 = arith.constant 0 : index
    %c0_164 = arith.constant 0 : index
    %121 = vector.load %arg5[%c0_163, %c0_164] : memref<128x128xf32, #tpu.memory_space<vmem>>, vector<128x128xf32>
    tpu.vector_store %arg5[%c0_163, %c0_164], %120 {strides = array<i32>} : memref<128x128xf32, #tpu.memory_space<vmem>>, vector<128x128xf32>,
    %c0_165 = arith.constant 0 : index
    %c21 = arith.constant 21 : index
    %c0_166 = arith.constant 0 : index
    %c0_167 = arith.constant 0 : index
    %122 = vector.load %arg1[%c0_165, %c21, %c0_166, %c0_167] : memref<2x40x10x96xf32, #tpu.memory_space<vmem>>, vector<2x8x8x96xf32>
    %c0_168 = arith.constant 0 : index
    %c0_169 = arith.constant 0 : index
    %123 = vector.load %arg5[%c0_168, %c0_169] : memref<128x128xf32, #tpu.memory_space<vmem>>, vector<128x128xf32>
    %124 = vector.shape_cast %122 : vector<2x8x8x96xf32> to vector<128x96xf32>
    %c15 = arith.constant 15 : index
    %c0_170 = arith.constant 0 : index
    %c0_171 = arith.constant 0 : index
    %125 = vector.load %arg2[%c15, %c0_170, %c0_171] : memref<25x96x128xf32, #tpu.memory_space<vmem>>, vector<1x96x128xf32>
    %126 = vector.shape_cast %125 : vector<1x96x128xf32> to vector<96x128xf32>
    %cst_172 = arith.constant dense<0.000000e+00> : vector<128x128xf32>
    %127 = tpu.matmul %124, %126, %cst_172 {dimension_numbers = #tpu.dot_dimension_numbers<[1], [0], [0], [1], [0, 0, 1, 1], [], []>} : vector<128x96xf32>, vector<96x128xf32>, vector<128x128xf32> -> vector<128x128xf32>
    %128 = arith.addf %123, %127 : vector<128x128xf32>
    %c0_173 = arith.constant 0 : index
    %c0_174 = arith.constant 0 : index
    %129 = vector.load %arg5[%c0_173, %c0_174] : memref<128x128xf32, #tpu.memory_space<vmem>>, vector<128x128xf32>
    tpu.vector_store %arg5[%c0_173, %c0_174], %128 {strides = array<i32>} : memref<128x128xf32, #tpu.memory_space<vmem>>, vector<128x128xf32>,
    %c0_175 = arith.constant 0 : index
    %c31 = arith.constant 31 : index
    %c0_176 = arith.constant 0 : index
    %c0_177 = arith.constant 0 : index
    %130 = vector.load %arg1[%c0_175, %c31, %c0_176, %c0_177] : memref<2x40x10x96xf32, #tpu.memory_space<vmem>>, vector<2x8x8x96xf32>
    %c0_178 = arith.constant 0 : index
    %c0_179 = arith.constant 0 : index
    %131 = vector.load %arg5[%c0_178, %c0_179] : memref<128x128xf32, #tpu.memory_space<vmem>>, vector<128x128xf32>
    %132 = vector.shape_cast %130 : vector<2x8x8x96xf32> to vector<128x96xf32>
    %c16 = arith.constant 16 : index
    %c0_180 = arith.constant 0 : index
    %c0_181 = arith.constant 0 : index
    %133 = vector.load %arg2[%c16, %c0_180, %c0_181] : memref<25x96x128xf32, #tpu.memory_space<vmem>>, vector<1x96x128xf32>
    %134 = vector.shape_cast %133 : vector<1x96x128xf32> to vector<96x128xf32>
    %cst_182 = arith.constant dense<0.000000e+00> : vector<128x128xf32>
    %135 = tpu.matmul %132, %134, %cst_182 {dimension_numbers = #tpu.dot_dimension_numbers<[1], [0], [0], [1], [0, 0, 1, 1], [], []>} : vector<128x96xf32>, vector<96x128xf32>, vector<128x128xf32> -> vector<128x128xf32>
    %136 = arith.addf %131, %135 : vector<128x128xf32>
    %c0_183 = arith.constant 0 : index
    %c0_184 = arith.constant 0 : index
    %137 = vector.load %arg5[%c0_183, %c0_184] : memref<128x128xf32, #tpu.memory_space<vmem>>, vector<128x128xf32>
    tpu.vector_store %arg5[%c0_183, %c0_184], %136 {strides = array<i32>} : memref<128x128xf32, #tpu.memory_space<vmem>>, vector<128x128xf32>,
    %c0_185 = arith.constant 0 : index
    %c21_186 = arith.constant 21 : index
    %c1_187 = arith.constant 1 : index
    %c0_188 = arith.constant 0 : index
    %138 = vector.load %arg1[%c0_185, %c21_186, %c1_187, %c0_188] : memref<2x40x10x96xf32, #tpu.memory_space<vmem>>, vector<2x8x8x96xf32>
    %c0_189 = arith.constant 0 : index
    %c0_190 = arith.constant 0 : index
    %139 = vector.load %arg5[%c0_189, %c0_190] : memref<128x128xf32, #tpu.memory_space<vmem>>, vector<128x128xf32>
    %140 = vector.shape_cast %138 : vector<2x8x8x96xf32> to vector<128x96xf32>
    %c17 = arith.constant 17 : index
    %c0_191 = arith.constant 0 : index
    %c0_192 = arith.constant 0 : index
    %141 = vector.load %arg2[%c17, %c0_191, %c0_192] : memref<25x96x128xf32, #tpu.memory_space<vmem>>, vector<1x96x128xf32>
    %142 = vector.shape_cast %141 : vector<1x96x128xf32> to vector<96x128xf32>
    %cst_193 = arith.constant dense<0.000000e+00> : vector<128x128xf32>
    %143 = tpu.matmul %140, %142, %cst_193 {dimension_numbers = #tpu.dot_dimension_numbers<[1], [0], [0], [1], [0, 0, 1, 1], [], []>} : vector<128x96xf32>, vector<96x128xf32>, vector<128x128xf32> -> vector<128x128xf32>
    %144 = arith.addf %139, %143 : vector<128x128xf32>
    %c0_194 = arith.constant 0 : index
    %c0_195 = arith.constant 0 : index
    %145 = vector.load %arg5[%c0_194, %c0_195] : memref<128x128xf32, #tpu.memory_space<vmem>>, vector<128x128xf32>
    tpu.vector_store %arg5[%c0_194, %c0_195], %144 {strides = array<i32>} : memref<128x128xf32, #tpu.memory_space<vmem>>, vector<128x128xf32>,
    %c0_196 = arith.constant 0 : index
    %c31_197 = arith.constant 31 : index
    %c1_198 = arith.constant 1 : index
    %c0_199 = arith.constant 0 : index
    %146 = vector.load %arg1[%c0_196, %c31_197, %c1_198, %c0_199] : memref<2x40x10x96xf32, #tpu.memory_space<vmem>>, vector<2x8x8x96xf32>
    %c0_200 = arith.constant 0 : index
    %c0_201 = arith.constant 0 : index
    %147 = vector.load %arg5[%c0_200, %c0_201] : memref<128x128xf32, #tpu.memory_space<vmem>>, vector<128x128xf32>
    %148 = vector.shape_cast %146 : vector<2x8x8x96xf32> to vector<128x96xf32>
    %c18 = arith.constant 18 : index
    %c0_202 = arith.constant 0 : index
    %c0_203 = arith.constant 0 : index
    %149 = vector.load %arg2[%c18, %c0_202, %c0_203] : memref<25x96x128xf32, #tpu.memory_space<vmem>>, vector<1x96x128xf32>
    %150 = vector.shape_cast %149 : vector<1x96x128xf32> to vector<96x128xf32>
    %cst_204 = arith.constant dense<0.000000e+00> : vector<128x128xf32>
    %151 = tpu.matmul %148, %150, %cst_204 {dimension_numbers = #tpu.dot_dimension_numbers<[1], [0], [0], [1], [0, 0, 1, 1], [], []>} : vector<128x96xf32>, vector<96x128xf32>, vector<128x128xf32> -> vector<128x128xf32>
    %152 = arith.addf %147, %151 : vector<128x128xf32>
    %c0_205 = arith.constant 0 : index
    %c0_206 = arith.constant 0 : index
    %153 = vector.load %arg5[%c0_205, %c0_206] : memref<128x128xf32, #tpu.memory_space<vmem>>, vector<128x128xf32>
    tpu.vector_store %arg5[%c0_205, %c0_206], %152 {strides = array<i32>} : memref<128x128xf32, #tpu.memory_space<vmem>>, vector<128x128xf32>,
    %c0_207 = arith.constant 0 : index
    %c21_208 = arith.constant 21 : index
    %c2_209 = arith.constant 2 : index
    %c0_210 = arith.constant 0 : index
    %154 = vector.load %arg1[%c0_207, %c21_208, %c2_209, %c0_210] : memref<2x40x10x96xf32, #tpu.memory_space<vmem>>, vector<2x8x8x96xf32>
    %c0_211 = arith.constant 0 : index
    %c0_212 = arith.constant 0 : index
    %155 = vector.load %arg5[%c0_211, %c0_212] : memref<128x128xf32, #tpu.memory_space<vmem>>, vector<128x128xf32>
    %156 = vector.shape_cast %154 : vector<2x8x8x96xf32> to vector<128x96xf32>
    %c19 = arith.constant 19 : index
    %c0_213 = arith.constant 0 : index
    %c0_214 = arith.constant 0 : index
    %157 = vector.load %arg2[%c19, %c0_213, %c0_214] : memref<25x96x128xf32, #tpu.memory_space<vmem>>, vector<1x96x128xf32>
    %158 = vector.shape_cast %157 : vector<1x96x128xf32> to vector<96x128xf32>
    %cst_215 = arith.constant dense<0.000000e+00> : vector<128x128xf32>
    %159 = tpu.matmul %156, %158, %cst_215 {dimension_numbers = #tpu.dot_dimension_numbers<[1], [0], [0], [1], [0, 0, 1, 1], [], []>} : vector<128x96xf32>, vector<96x128xf32>, vector<128x128xf32> -> vector<128x128xf32>
    %160 = arith.addf %155, %159 : vector<128x128xf32>
    %c0_216 = arith.constant 0 : index
    %c0_217 = arith.constant 0 : index
    %161 = vector.load %arg5[%c0_216, %c0_217] : memref<128x128xf32, #tpu.memory_space<vmem>>, vector<128x128xf32>
    tpu.vector_store %arg5[%c0_216, %c0_217], %160 {strides = array<i32>} : memref<128x128xf32, #tpu.memory_space<vmem>>, vector<128x128xf32>,
    %c0_218 = arith.constant 0 : index
    %c2_219 = arith.constant 2 : index
    %c0_220 = arith.constant 0 : index
    %c0_221 = arith.constant 0 : index
    %162 = vector.load %arg1[%c0_218, %c2_219, %c0_220, %c0_221] : memref<2x40x10x96xf32, #tpu.memory_space<vmem>>, vector<2x8x8x96xf32>
    %c0_222 = arith.constant 0 : index
    %c0_223 = arith.constant 0 : index
    %163 = vector.load %arg5[%c0_222, %c0_223] : memref<128x128xf32, #tpu.memory_space<vmem>>, vector<128x128xf32>
    %164 = vector.shape_cast %162 : vector<2x8x8x96xf32> to vector<128x96xf32>
    %c20_224 = arith.constant 20 : index
    %c0_225 = arith.constant 0 : index
    %c0_226 = arith.constant 0 : index
    %165 = vector.load %arg2[%c20_224, %c0_225, %c0_226] : memref<25x96x128xf32, #tpu.memory_space<vmem>>, vector<1x96x128xf32>
    %166 = vector.shape_cast %165 : vector<1x96x128xf32> to vector<96x128xf32>
    %cst_227 = arith.constant dense<0.000000e+00> : vector<128x128xf32>
    %167 = tpu.matmul %164, %166, %cst_227 {dimension_numbers = #tpu.dot_dimension_numbers<[1], [0], [0], [1], [0, 0, 1, 1], [], []>} : vector<128x96xf32>, vector<96x128xf32>, vector<128x128xf32> -> vector<128x128xf32>
    %168 = arith.addf %163, %167 : vector<128x128xf32>
    %c0_228 = arith.constant 0 : index
    %c0_229 = arith.constant 0 : index
    %169 = vector.load %arg5[%c0_228, %c0_229] : memref<128x128xf32, #tpu.memory_space<vmem>>, vector<128x128xf32>
    tpu.vector_store %arg5[%c0_228, %c0_229], %168 {strides = array<i32>} : memref<128x128xf32, #tpu.memory_space<vmem>>, vector<128x128xf32>,
    %c0_230 = arith.constant 0 : index
    %c12_231 = arith.constant 12 : index
    %c0_232 = arith.constant 0 : index
    %c0_233 = arith.constant 0 : index
    %170 = vector.load %arg1[%c0_230, %c12_231, %c0_232, %c0_233] : memref<2x40x10x96xf32, #tpu.memory_space<vmem>>, vector<2x8x8x96xf32>
    %c0_234 = arith.constant 0 : index
    %c0_235 = arith.constant 0 : index
    %171 = vector.load %arg5[%c0_234, %c0_235] : memref<128x128xf32, #tpu.memory_space<vmem>>, vector<128x128xf32>
    %172 = vector.shape_cast %170 : vector<2x8x8x96xf32> to vector<128x96xf32>
    %c21_236 = arith.constant 21 : index
    %c0_237 = arith.constant 0 : index
    %c0_238 = arith.constant 0 : index
    %173 = vector.load %arg2[%c21_236, %c0_237, %c0_238] : memref<25x96x128xf32, #tpu.memory_space<vmem>>, vector<1x96x128xf32>
    %174 = vector.shape_cast %173 : vector<1x96x128xf32> to vector<96x128xf32>
    %cst_239 = arith.constant dense<0.000000e+00> : vector<128x128xf32>
    %175 = tpu.matmul %172, %174, %cst_239 {dimension_numbers = #tpu.dot_dimension_numbers<[1], [0], [0], [1], [0, 0, 1, 1], [], []>} : vector<128x96xf32>, vector<96x128xf32>, vector<128x128xf32> -> vector<128x128xf32>
    %176 = arith.addf %171, %175 : vector<128x128xf32>
    %c0_240 = arith.constant 0 : index
    %c0_241 = arith.constant 0 : index
    %177 = vector.load %arg5[%c0_240, %c0_241] : memref<128x128xf32, #tpu.memory_space<vmem>>, vector<128x128xf32>
    tpu.vector_store %arg5[%c0_240, %c0_241], %176 {strides = array<i32>} : memref<128x128xf32, #tpu.memory_space<vmem>>, vector<128x128xf32>,
    %c0_242 = arith.constant 0 : index
    %c2_243 = arith.constant 2 : index
    %c1_244 = arith.constant 1 : index
    %c0_245 = arith.constant 0 : index
    %178 = vector.load %arg1[%c0_242, %c2_243, %c1_244, %c0_245] : memref<2x40x10x96xf32, #tpu.memory_space<vmem>>, vector<2x8x8x96xf32>
    %c0_246 = arith.constant 0 : index
    %c0_247 = arith.constant 0 : index
    %179 = vector.load %arg5[%c0_246, %c0_247] : memref<128x128xf32, #tpu.memory_space<vmem>>, vector<128x128xf32>
    %180 = vector.shape_cast %178 : vector<2x8x8x96xf32> to vector<128x96xf32>
    %c22 = arith.constant 22 : index
    %c0_248 = arith.constant 0 : index
    %c0_249 = arith.constant 0 : index
    %181 = vector.load %arg2[%c22, %c0_248, %c0_249] : memref<25x96x128xf32, #tpu.memory_space<vmem>>, vector<1x96x128xf32>
    %182 = vector.shape_cast %181 : vector<1x96x128xf32> to vector<96x128xf32>
    %cst_250 = arith.constant dense<0.000000e+00> : vector<128x128xf32>
    %183 = tpu.matmul %180, %182, %cst_250 {dimension_numbers = #tpu.dot_dimension_numbers<[1], [0], [0], [1], [0, 0, 1, 1], [], []>} : vector<128x96xf32>, vector<96x128xf32>, vector<128x128xf32> -> vector<128x128xf32>
    %184 = arith.addf %179, %183 : vector<128x128xf32>
    %c0_251 = arith.constant 0 : index
    %c0_252 = arith.constant 0 : index
    %185 = vector.load %arg5[%c0_251, %c0_252] : memref<128x128xf32, #tpu.memory_space<vmem>>, vector<128x128xf32>
    tpu.vector_store %arg5[%c0_251, %c0_252], %184 {strides = array<i32>} : memref<128x128xf32, #tpu.memory_space<vmem>>, vector<128x128xf32>,
    %c0_253 = arith.constant 0 : index
    %c12_254 = arith.constant 12 : index
    %c1_255 = arith.constant 1 : index
    %c0_256 = arith.constant 0 : index
    %186 = vector.load %arg1[%c0_253, %c12_254, %c1_255, %c0_256] : memref<2x40x10x96xf32, #tpu.memory_space<vmem>>, vector<2x8x8x96xf32>
    %c0_257 = arith.constant 0 : index
    %c0_258 = arith.constant 0 : index
    %187 = vector.load %arg5[%c0_257, %c0_258] : memref<128x128xf32, #tpu.memory_space<vmem>>, vector<128x128xf32>
    %188 = vector.shape_cast %186 : vector<2x8x8x96xf32> to vector<128x96xf32>
    %c23 = arith.constant 23 : index
    %c0_259 = arith.constant 0 : index
    %c0_260 = arith.constant 0 : index
    %189 = vector.load %arg2[%c23, %c0_259, %c0_260] : memref<25x96x128xf32, #tpu.memory_space<vmem>>, vector<1x96x128xf32>
    %190 = vector.shape_cast %189 : vector<1x96x128xf32> to vector<96x128xf32>
    %cst_261 = arith.constant dense<0.000000e+00> : vector<128x128xf32>
    %191 = tpu.matmul %188, %190, %cst_261 {dimension_numbers = #tpu.dot_dimension_numbers<[1], [0], [0], [1], [0, 0, 1, 1], [], []>} : vector<128x96xf32>, vector<96x128xf32>, vector<128x128xf32> -> vector<128x128xf32>
    %192 = arith.addf %187, %191 : vector<128x128xf32>
    %c0_262 = arith.constant 0 : index
    %c0_263 = arith.constant 0 : index
    %193 = vector.load %arg5[%c0_262, %c0_263] : memref<128x128xf32, #tpu.memory_space<vmem>>, vector<128x128xf32>
    tpu.vector_store %arg5[%c0_262, %c0_263], %192 {strides = array<i32>} : memref<128x128xf32, #tpu.memory_space<vmem>>, vector<128x128xf32>,
    %c0_264 = arith.constant 0 : index
    %c2_265 = arith.constant 2 : index
    %c2_266 = arith.constant 2 : index
    %c0_267 = arith.constant 0 : index
    %194 = vector.load %arg1[%c0_264, %c2_265, %c2_266, %c0_267] : memref<2x40x10x96xf32, #tpu.memory_space<vmem>>, vector<2x8x8x96xf32>
    %c0_268 = arith.constant 0 : index
    %c0_269 = arith.constant 0 : index
    %195 = vector.load %arg5[%c0_268, %c0_269] : memref<128x128xf32, #tpu.memory_space<vmem>>, vector<128x128xf32>
    %196 = vector.shape_cast %194 : vector<2x8x8x96xf32> to vector<128x96xf32>
    %c24 = arith.constant 24 : index
    %c0_270 = arith.constant 0 : index
    %c0_271 = arith.constant 0 : index
    %197 = vector.load %arg2[%c24, %c0_270, %c0_271] : memref<25x96x128xf32, #tpu.memory_space<vmem>>, vector<1x96x128xf32>
    %198 = vector.shape_cast %197 : vector<1x96x128xf32> to vector<96x128xf32>
    %cst_272 = arith.constant dense<0.000000e+00> : vector<128x128xf32>
    %199 = tpu.matmul %196, %198, %cst_272 {dimension_numbers = #tpu.dot_dimension_numbers<[1], [0], [0], [1], [0, 0, 1, 1], [], []>} : vector<128x96xf32>, vector<96x128xf32>, vector<128x128xf32> -> vector<128x128xf32>
    %200 = arith.addf %195, %199 : vector<128x128xf32>
    %c0_273 = arith.constant 0 : index
    %c0_274 = arith.constant 0 : index
    %201 = vector.load %arg5[%c0_273, %c0_274] : memref<128x128xf32, #tpu.memory_space<vmem>>, vector<128x128xf32>
    tpu.vector_store %arg5[%c0_273, %c0_274], %200 {strides = array<i32>} : memref<128x128xf32, #tpu.memory_space<vmem>>, vector<128x128xf32>,
    %c0_275 = arith.constant 0 : index
    %c0_276 = arith.constant 0 : index
    %202 = vector.load %arg5[%c0_275, %c0_276] : memref<128x128xf32, #tpu.memory_space<vmem>>, vector<128x128xf32>
    %c0_277 = arith.constant 0 : index
    %c0_278 = arith.constant 0 : index
    %203 = vector.load %arg3[%c0_277, %c0_278] : memref<1x128xf32, #tpu.memory_space<vmem>>, vector<1x128xf32>
    %204 = vector.broadcast %203 : vector<1x128xf32> to vector<128x128xf32>
    %205 = arith.addf %202, %204 : vector<128x128xf32>
    %206 = vector.shape_cast %205 : vector<128x128xf32> to vector<2x64x128xf32>
    %c0_279 = arith.constant 0 : index
    %c0_280 = arith.constant 0 : index
    %c0_281 = arith.constant 0 : index
    %207 = vector.load %arg4[%c0_279, %c0_280, %c0_281] : memref<2x64x128xf32, #tpu.memory_space<vmem>>, vector<2x64x128xf32>
    tpu.vector_store %arg4[%c0_279, %c0_280, %c0_281], %206 {strides = array<i32>} : memref<2x64x128xf32, #tpu.memory_space<vmem>>, vector<2x64x128xf32>,
    return
  }
  func.func @transform_0(%arg0: i32) -> (i32, i32, i32, i32) {
    %c0_i32 = arith.constant 0 : i32
    %c0_i32_0 = arith.constant 0 : i32
    %c0_i32_1 = arith.constant 0 : i32
    %c0_i32_2 = arith.constant 0 : i32
    return %arg0, %c0_i32, %c0_i32_0, %c0_i32_1 : i32, i32, i32, i32
  }
  func.func @transform_1(%arg0: i32) -> (i32, i32, i32) {
    %c0_i32 = arith.constant 0 : i32
    %c0_i32_0 = arith.constant 0 : i32
    %c0_i32_1 = arith.constant 0 : i32
    %c0_i32_2 = arith.constant 0 : i32
    return %c0_i32, %c0_i32_0, %c0_i32_1 : i32, i32, i32
  }
  func.func @transform_2(%arg0: i32) -> (i32, i32) {
    %c0_i32 = arith.constant 0 : i32
    %c0_i32_0 = arith.constant 0 : i32
    %c0_i32_1 = arith.constant 0 : i32
    return %c0_i32, %c0_i32_0 : i32, i32
  }
  func.func @transform_3(%arg0: i32) -> (i32, i32, i32) {
    %c0_i32 = arith.constant 0 : i32
    %c0_i32_0 = arith.constant 0 : i32
    %c0_i32_1 = arith.constant 0 : i32
    return %arg0, %c0_i32, %c0_i32_0 : i32, i32, i32
  }
}

module attributes {stable_mosaic.version = 11 : i64} {
  func.func @_head_kernel(%arg0: i32, %arg1: memref<2x8192xf32, #tpu.memory_space<vmem>>, %arg2: memref<2x16xf32, #tpu.memory_space<vmem>>, %arg3: memref<2x16xf32, #tpu.memory_space<vmem>>, %arg4: memref<8192x64xf32, #tpu.memory_space<vmem>>, %arg5: memref<1x64xf32, #tpu.memory_space<vmem>>, %arg6: memref<16x256xf32, #tpu.memory_space<vmem>>, %arg7: memref<64x256xf32, #tpu.memory_space<vmem>>, %arg8: memref<16x256xf32, #tpu.memory_space<vmem>>, %arg9: memref<1x256xf32, #tpu.memory_space<vmem>>, %arg10: memref<256x256xf32, #tpu.memory_space<vmem>>, %arg11: memref<1x256xf32, #tpu.memory_space<vmem>>, %arg12: memref<256x2xf32, #tpu.memory_space<vmem>>, %arg13: memref<1x2xf32, #tpu.memory_space<vmem>>, %arg14: memref<2x2xf32, #tpu.memory_space<vmem>>) attributes {dimension_semantics = [#tpu.dimension_semantics<parallel>], iteration_bounds = array<i64: 1>, scalar_prefetch = 0 : i64, scratch_operands = 0 : i64, tpu.core_type = #tpu.core_type<tc>, window_params = [{transform_indices = @transform_0, window_bounds = array<i64: 2, 8192>}, {transform_indices = @transform_1, window_bounds = array<i64: 2, 16>}, {transform_indices = @transform_2, window_bounds = array<i64: 2, 16>}, {pipeline_mode = #tpu.pipeline_mode<synchronous>, transform_indices = @transform_3, window_bounds = array<i64: 8192, 64>}, {pipeline_mode = #tpu.pipeline_mode<synchronous>, transform_indices = @transform_4, window_bounds = array<i64: 1, 64>}, {pipeline_mode = #tpu.pipeline_mode<synchronous>, transform_indices = @transform_5, window_bounds = array<i64: 16, 256>}, {pipeline_mode = #tpu.pipeline_mode<synchronous>, transform_indices = @transform_6, window_bounds = array<i64: 64, 256>}, {pipeline_mode = #tpu.pipeline_mode<synchronous>, transform_indices = @transform_7, window_bounds = array<i64: 16, 256>}, {pipeline_mode = #tpu.pipeline_mode<synchronous>, transform_indices = @transform_8, window_bounds = array<i64: 1, 256>}, {pipeline_mode = #tpu.pipeline_mode<synchronous>, transform_indices = @transform_9, window_bounds = array<i64: 256, 256>}, {pipeline_mode = #tpu.pipeline_mode<synchronous>, transform_indices = @transform_10, window_bounds = array<i64: 1, 256>}, {pipeline_mode = #tpu.pipeline_mode<synchronous>, transform_indices = @transform_11, window_bounds = array<i64: 256, 2>}, {pipeline_mode = #tpu.pipeline_mode<synchronous>, transform_indices = @transform_12, window_bounds = array<i64: 1, 2>}, {transform_indices = @transform_13, window_bounds = array<i64: 2, 2>}]} {
    %c0 = arith.constant 0 : index
    %c0_0 = arith.constant 0 : index
    %0 = vector.load %arg1[%c0, %c0_0] : memref<2x8192xf32, #tpu.memory_space<vmem>>, vector<2x8192xf32>
    %c0_1 = arith.constant 0 : index
    %c0_2 = arith.constant 0 : index
    %1 = vector.load %arg4[%c0_1, %c0_2] : memref<8192x64xf32, #tpu.memory_space<vmem>>, vector<8192x64xf32>
    %cst = arith.constant dense<0.000000e+00> : vector<2x64xf32>
    %2 = tpu.matmul %0, %1, %cst {dimension_numbers = #tpu.dot_dimension_numbers<[1], [0], [0], [1], [0, 0, 1, 1], [], []>} : vector<2x8192xf32>, vector<8192x64xf32>, vector<2x64xf32> -> vector<2x64xf32>
    %c0_3 = arith.constant 0 : index
    %c0_4 = arith.constant 0 : index
    %3 = vector.load %arg5[%c0_3, %c0_4] : memref<1x64xf32, #tpu.memory_space<vmem>>, vector<1x64xf32>
    %4 = vector.broadcast %3 : vector<1x64xf32> to vector<2x64xf32>
    %5 = arith.addf %2, %4 : vector<2x64xf32>
    %cst_5 = arith.constant 0.000000e+00 : f32
    %6 = vector.broadcast %cst_5 : f32 to vector<2x64xf32>
    %7 = arith.maximumf %5, %6 : vector<2x64xf32>
    %c0_6 = arith.constant 0 : index
    %c0_7 = arith.constant 0 : index
    %8 = vector.load %arg2[%c0_6, %c0_7] : memref<2x16xf32, #tpu.memory_space<vmem>>, vector<2x16xf32>
    %c0_8 = arith.constant 0 : index
    %c0_9 = arith.constant 0 : index
    %9 = vector.load %arg6[%c0_8, %c0_9] : memref<16x256xf32, #tpu.memory_space<vmem>>, vector<16x256xf32>
    %cst_10 = arith.constant dense<0.000000e+00> : vector<2x256xf32>
    %10 = tpu.matmul %8, %9, %cst_10 {dimension_numbers = #tpu.dot_dimension_numbers<[1], [0], [0], [1], [0, 0, 1, 1], [], []>} : vector<2x16xf32>, vector<16x256xf32>, vector<2x256xf32> -> vector<2x256xf32>
    %c0_11 = arith.constant 0 : index
    %c0_12 = arith.constant 0 : index
    %11 = vector.load %arg7[%c0_11, %c0_12] : memref<64x256xf32, #tpu.memory_space<vmem>>, vector<64x256xf32>
    %cst_13 = arith.constant dense<0.000000e+00> : vector<2x256xf32>
    %12 = tpu.matmul %7, %11, %cst_13 {dimension_numbers = #tpu.dot_dimension_numbers<[1], [0], [0], [1], [0, 0, 1, 1], [], []>} : vector<2x64xf32>, vector<64x256xf32>, vector<2x256xf32> -> vector<2x256xf32>
    %13 = arith.addf %10, %12 : vector<2x256xf32>
    %c0_14 = arith.constant 0 : index
    %c0_15 = arith.constant 0 : index
    %14 = vector.load %arg3[%c0_14, %c0_15] : memref<2x16xf32, #tpu.memory_space<vmem>>, vector<2x16xf32>
    %c0_16 = arith.constant 0 : index
    %c0_17 = arith.constant 0 : index
    %15 = vector.load %arg8[%c0_16, %c0_17] : memref<16x256xf32, #tpu.memory_space<vmem>>, vector<16x256xf32>
    %cst_18 = arith.constant dense<0.000000e+00> : vector<2x256xf32>
    %16 = tpu.matmul %14, %15, %cst_18 {dimension_numbers = #tpu.dot_dimension_numbers<[1], [0], [0], [1], [0, 0, 1, 1], [], []>} : vector<2x16xf32>, vector<16x256xf32>, vector<2x256xf32> -> vector<2x256xf32>
    %17 = arith.addf %13, %16 : vector<2x256xf32>
    %c0_19 = arith.constant 0 : index
    %c0_20 = arith.constant 0 : index
    %18 = vector.load %arg9[%c0_19, %c0_20] : memref<1x256xf32, #tpu.memory_space<vmem>>, vector<1x256xf32>
    %19 = vector.broadcast %18 : vector<1x256xf32> to vector<2x256xf32>
    %20 = arith.addf %17, %19 : vector<2x256xf32>
    %cst_21 = arith.constant 0.000000e+00 : f32
    %21 = vector.broadcast %cst_21 : f32 to vector<2x256xf32>
    %22 = arith.maximumf %20, %21 : vector<2x256xf32>
    %c0_22 = arith.constant 0 : index
    %c0_23 = arith.constant 0 : index
    %23 = vector.load %arg10[%c0_22, %c0_23] : memref<256x256xf32, #tpu.memory_space<vmem>>, vector<256x256xf32>
    %cst_24 = arith.constant dense<0.000000e+00> : vector<2x256xf32>
    %24 = tpu.matmul %22, %23, %cst_24 {dimension_numbers = #tpu.dot_dimension_numbers<[1], [0], [0], [1], [0, 0, 1, 1], [], []>} : vector<2x256xf32>, vector<256x256xf32>, vector<2x256xf32> -> vector<2x256xf32>
    %c0_25 = arith.constant 0 : index
    %c0_26 = arith.constant 0 : index
    %25 = vector.load %arg11[%c0_25, %c0_26] : memref<1x256xf32, #tpu.memory_space<vmem>>, vector<1x256xf32>
    %26 = vector.broadcast %25 : vector<1x256xf32> to vector<2x256xf32>
    %27 = arith.addf %24, %26 : vector<2x256xf32>
    %cst_27 = arith.constant 0.000000e+00 : f32
    %28 = vector.broadcast %cst_27 : f32 to vector<2x256xf32>
    %29 = arith.maximumf %27, %28 : vector<2x256xf32>
    %c0_28 = arith.constant 0 : index
    %c0_29 = arith.constant 0 : index
    %30 = vector.load %arg12[%c0_28, %c0_29] : memref<256x2xf32, #tpu.memory_space<vmem>>, vector<256x2xf32>
    %cst_30 = arith.constant dense<0.000000e+00> : vector<2x2xf32>
    %31 = tpu.matmul %29, %30, %cst_30 {dimension_numbers = #tpu.dot_dimension_numbers<[1], [0], [0], [1], [0, 0, 1, 1], [], []>} : vector<2x256xf32>, vector<256x2xf32>, vector<2x2xf32> -> vector<2x2xf32>
    %c0_31 = arith.constant 0 : index
    %c0_32 = arith.constant 0 : index
    %32 = vector.load %arg13[%c0_31, %c0_32] : memref<1x2xf32, #tpu.memory_space<vmem>>, vector<1x2xf32>
    %33 = vector.broadcast %32 : vector<1x2xf32> to vector<2x2xf32>
    %34 = arith.addf %31, %33 : vector<2x2xf32>
    %c0_33 = arith.constant 0 : index
    %c0_34 = arith.constant 0 : index
    %35 = vector.load %arg14[%c0_33, %c0_34] : memref<2x2xf32, #tpu.memory_space<vmem>>, vector<2x2xf32>
    tpu.vector_store %arg14[%c0_33, %c0_34], %34 {strides = array<i32>} : memref<2x2xf32, #tpu.memory_space<vmem>>, vector<2x2xf32>,
    return
  }
  func.func @transform_0(%arg0: i32) -> (i32, i32) {
    %c0_i32 = arith.constant 0 : i32
    %c0_i32_0 = arith.constant 0 : i32
    return %arg0, %c0_i32 : i32, i32
  }
  func.func @transform_1(%arg0: i32) -> (i32, i32) {
    %c0_i32 = arith.constant 0 : i32
    %c0_i32_0 = arith.constant 0 : i32
    return %arg0, %c0_i32 : i32, i32
  }
  func.func @transform_2(%arg0: i32) -> (i32, i32) {
    %c0_i32 = arith.constant 0 : i32
    %c0_i32_0 = arith.constant 0 : i32
    return %arg0, %c0_i32 : i32, i32
  }
  func.func @transform_3(%arg0: i32) -> (i32, i32) {
    %c0_i32 = arith.constant 0 : i32
    %c0_i32_0 = arith.constant 0 : i32
    %c0_i32_1 = arith.constant 0 : i32
    return %c0_i32, %c0_i32_0 : i32, i32
  }
  func.func @transform_4(%arg0: i32) -> (i32, i32) {
    %c0_i32 = arith.constant 0 : i32
    %c0_i32_0 = arith.constant 0 : i32
    %c0_i32_1 = arith.constant 0 : i32
    return %c0_i32, %c0_i32_0 : i32, i32
  }
  func.func @transform_5(%arg0: i32) -> (i32, i32) {
    %c0_i32 = arith.constant 0 : i32
    %c0_i32_0 = arith.constant 0 : i32
    %c0_i32_1 = arith.constant 0 : i32
    return %c0_i32, %c0_i32_0 : i32, i32
  }
  func.func @transform_6(%arg0: i32) -> (i32, i32) {
    %c0_i32 = arith.constant 0 : i32
    %c0_i32_0 = arith.constant 0 : i32
    %c0_i32_1 = arith.constant 0 : i32
    return %c0_i32, %c0_i32_0 : i32, i32
  }
  func.func @transform_7(%arg0: i32) -> (i32, i32) {
    %c0_i32 = arith.constant 0 : i32
    %c0_i32_0 = arith.constant 0 : i32
    %c0_i32_1 = arith.constant 0 : i32
    return %c0_i32, %c0_i32_0 : i32, i32
  }
  func.func @transform_8(%arg0: i32) -> (i32, i32) {
    %c0_i32 = arith.constant 0 : i32
    %c0_i32_0 = arith.constant 0 : i32
    %c0_i32_1 = arith.constant 0 : i32
    return %c0_i32, %c0_i32_0 : i32, i32
  }
  func.func @transform_9(%arg0: i32) -> (i32, i32) {
    %c0_i32 = arith.constant 0 : i32
    %c0_i32_0 = arith.constant 0 : i32
    %c0_i32_1 = arith.constant 0 : i32
    return %c0_i32, %c0_i32_0 : i32, i32
  }
  func.func @transform_10(%arg0: i32) -> (i32, i32) {
    %c0_i32 = arith.constant 0 : i32
    %c0_i32_0 = arith.constant 0 : i32
    %c0_i32_1 = arith.constant 0 : i32
    return %c0_i32, %c0_i32_0 : i32, i32
  }
  func.func @transform_11(%arg0: i32) -> (i32, i32) {
    %c0_i32 = arith.constant 0 : i32
    %c0_i32_0 = arith.constant 0 : i32
    %c0_i32_1 = arith.constant 0 : i32
    return %c0_i32, %c0_i32_0 : i32, i32
  }
  func.func @transform_12(%arg0: i32) -> (i32, i32) {
    %c0_i32 = arith.constant 0 : i32
    %c0_i32_0 = arith.constant 0 : i32
    %c0_i32_1 = arith.constant 0 : i32
    return %c0_i32, %c0_i32_0 : i32, i32
  }
  func.func @transform_13(%arg0: i32) -> (i32, i32) {
    %c0_i32 = arith.constant 0 : i32
    %c0_i32_0 = arith.constant 0 : i32
    return %arg0, %c0_i32 : i32, i32
  }
}

</mosaic_0001>

<bundles_post_ra>
// kernel: pair_filtering_forward.3
= control target key start
LH: loop header
LB: loop body
LE: loop exit
PB: predicated region body
PF: predicated region fallthrough
CT: control target
= control target key end

     0   :  { %vm285_vm0 = vcmask 1042432   ;;  %vm92_vm1 = vcmask 613376   ;;  %vm562_vm2 = vcmask 785408   ;;  %s1358_s1 = inlined_call_operand.vmem [shape: f32[75,96], index: 1, kind: input, shape index: {}]   ;;  %s1359_s0 = inlined_call_operand.vmem [shape: f32[512,75], index: 0, kind: input, shape index: {}]   ;;  %s1360_s2 = inlined_call_operand.vmem [shape: f32[1,96], index: 2, kind: input, shape index: {}]   ;;  %s1361_s3 = inlined_call_operand.vmem [shape: f32[512,96], index: 3, kind: output, shape index: {}]  }
   0x1   :  { %v87_v0 = vld [vmem:[%s1358_s1 + $0x48] sm:$0x7]  ;;  %v86_v1 = vld [vmem:[%s1358_s1 + $0x40] sm:$0xff]  ;;  %v85_v2 = vld [vmem:[%s1358_s1 + $0x38] sm:$0xff] }
   0x2   :  { %697 = vmatpush.msk.msra.mxu2 %vm285_vm0, %v87_v0  ;;  %698 = vmatpush.msk.msra.mxu3 %vm285_vm0, %v87_v0  ;;  %v84_v3 = vld [vmem:[%s1358_s1 + $0x30] sm:$0xff]  ;;  %v83_v4 = vld [vmem:[%s1358_s1 + $0x28] sm:$0xff]  ;;  %v82_v5 = vld [vmem:[%s1358_s1 + $0x20] sm:$0xff] }
   0x3   :  { %631 = vmatpush.msk.msra.mxu0 %vm285_vm0, %v87_v0  ;;  %696 = vmatpush.msk.msra.mxu1 %vm285_vm0, %v87_v0  ;;  %v81_v6 = vld [vmem:[%s1358_s1 + $0x18] sm:$0xff]  ;;  %v80_v7 = vld [vmem:[%s1358_s1 + $0x10] sm:$0xff]  ;;  %v79_v8 = vld [vmem:[%s1358_s1 + $0x8] sm:$0xff] }
   0x4   :  { %700 = vmatpush.msra.mxu2 %v86_v1  ;;  %701 = vmatpush.msra.mxu3 %v86_v1  ;;  %v78_v9 = vld [vmem:[%s1358_s1] sm:$0xff]  ;;  %v47_v14 = vld [vmem:[%s1359_s0 + $0x108] sm:$0xff]  ;;  %v48_v18 = vld [vmem:[%s1359_s0 + $0x110] sm:$0xff] }
   0x5   :  { %296 = vmatpush.msra.mxu0 %v86_v1  ;;  %699 = vmatpush.msra.mxu1 %v86_v1  ;;  %v46_v10 = vld [vmem:[%s1359_s0 + $0x100] sm:$0xff]  ;;  %v63_v15 = vld [vmem:[%s1359_s0 + $0x188] sm:$0xff]  ;;  %v64_v19 = vld [vmem:[%s1359_s0 + $0x190] sm:$0xff] }
   0x6   :  { %703 = vmatpush.msra.mxu2 %v85_v2  ;;  %704 = vmatpush.msra.mxu3 %v85_v2  ;;  %v62_v11 = vld [vmem:[%s1359_s0 + $0x180] sm:$0xff]  ;;  %v15_v16 = vld [vmem:[%s1359_s0 + $0x8] sm:$0xff]  ;;  %v16_v20 = vld [vmem:[%s1359_s0 + $0x10] sm:$0xff] }
   0x7   :  { %297 = vmatpush.msra.mxu0 %v85_v2  ;;  %702 = vmatpush.msra.mxu1 %v85_v2  ;;  %v14_v12 = vld [vmem:[%s1359_s0] sm:$0xff]  ;;  %v31_v17 = vld [vmem:[%s1359_s0 + $0x88] sm:$0xff]  ;;  %v32_v21 = vld [vmem:[%s1359_s0 + $0x90] sm:$0xff] }
   0x8   :  { %706 = vmatpush.msra.mxu2 %v84_v3  ;;  %707 = vmatpush.msra.mxu3 %v84_v3  ;;  %v30_v13 = vld [vmem:[%s1359_s0 + $0x80] sm:$0xff]  ;;  %v49_v22 = vld [vmem:[%s1359_s0 + $0x118] sm:$0xff]  ;;  %v51_v30 = vld [vmem:[%s1359_s0 + $0x128] sm:$0xff] }
   0x9   :  { %298 = vmatpush.msra.mxu0 %v84_v3  ;;  %705 = vmatpush.msra.mxu1 %v84_v3  ;;  %v65_v23 = vld [vmem:[%s1359_s0 + $0x198] sm:$0xff]  ;;  %v50_v26 = vld [vmem:[%s1359_s0 + $0x120] sm:$0xff]  ;;  %v67_v31 = vld [vmem:[%s1359_s0 + $0x1a8] sm:$0xff] }
   0xa   :  { %709 = vmatpush.msra.mxu2 %v83_v4  ;;  %710 = vmatpush.msra.mxu3 %v83_v4  ;;  %v17_v24 = vld [vmem:[%s1359_s0 + $0x18] sm:$0xff]  ;;  %v66_v27 = vld [vmem:[%s1359_s0 + $0x1a0] sm:$0xff]  ;;  %v19_v32 = vld [vmem:[%s1359_s0 + $0x28] sm:$0xff] }
   0xb   :  { %299 = vmatpush.msra.mxu0 %v83_v4  ;;  %708 = vmatpush.msra.mxu1 %v83_v4  ;;  %v33_v25 = vld [vmem:[%s1359_s0 + $0x98] sm:$0xff]  ;;  %v18_v28 = vld [vmem:[%s1359_s0 + $0x20] sm:$0xff]  ;;  %v35_v33 = vld [vmem:[%s1359_s0 + $0xa8] sm:$0xff] }
   0xc   :  { %712 = vmatpush.msra.mxu2 %v82_v5  ;;  %713 = vmatpush.msra.mxu3 %v82_v5  ;;  %v34_v29 = vld [vmem:[%s1359_s0 + $0xa0] sm:$0xff]  ;;  %v52_v34 = vld [vmem:[%s1359_s0 + $0x130] sm:$0xff]  ;;  %v53_v38 = vld [vmem:[%s1359_s0 + $0x138] sm:$0xff] }
   0xd   :  { %300 = vmatpush.msra.mxu0 %v82_v5  ;;  %711 = vmatpush.msra.mxu1 %v82_v5  ;;  %v68_v35 = vld [vmem:[%s1359_s0 + $0x1b0] sm:$0xff]  ;;  %v69_v39 = vld [vmem:[%s1359_s0 + $0x1b8] sm:$0xff]  ;;  %v54_v42 = vld [vmem:[%s1359_s0 + $0x140] sm:$0xff] }
   0xe   :  { %715 = vmatpush.msra.mxu2 %v81_v6  ;;  %716 = vmatpush.msra.mxu3 %v81_v6  ;;  %v20_v36 = vld [vmem:[%s1359_s0 + $0x30] sm:$0xff]  ;;  %v21_v40 = vld [vmem:[%s1359_s0 + $0x38] sm:$0xff]  ;;  %v70_v43 = vld [vmem:[%s1359_s0 + $0x1c0] sm:$0xff] }
   0xf   :  { %301 = vmatpush.msra.mxu0 %v81_v6  ;;  %714 = vmatpush.msra.mxu1 %v81_v6  ;;  %v36_v37 = vld [vmem:[%s1359_s0 + $0xb0] sm:$0xff]  ;;  %v37_v41 = vld [vmem:[%s1359_s0 + $0xb8] sm:$0xff]  ;;  %v22_v44 = vld [vmem:[%s1359_s0 + $0x40] sm:$0xff] }
  0x10   :  { %718 = vmatpush.msra.mxu2 %v80_v7  ;;  %719 = vmatpush.msra.mxu3 %v80_v7  ;;  %v38_v45 = vld [vmem:[%s1359_s0 + $0xc0] sm:$0xff]  ;;  %v55_v46 = vld [vmem:[%s1359_s0 + $0x148] sm:$0xff]  ;;  %v56_v50 = vld [vmem:[%s1359_s0 + $0x150] sm:$0xff] }
  0x11   :  { %302 = vmatpush.msra.mxu0 %v80_v7  ;;  %717 = vmatpush.msra.mxu1 %v80_v7  ;;  %v71_v47 = vld [vmem:[%s1359_s0 + $0x1c8] sm:$0xff]  ;;  %v72_v51 = vld [vmem:[%s1359_s0 + $0x1d0] sm:$0xff]  ;;  %v57_v54 = vld [vmem:[%s1359_s0 + $0x158] sm:$0xff] }
  0x12   :  { %721 = vmatpush.msra.mxu2 %v79_v8  ;;  %722 = vmatpush.msra.mxu3 %v79_v8  ;;  %v23_v48 = vld [vmem:[%s1359_s0 + $0x48] sm:$0xff]  ;;  %v24_v52 = vld [vmem:[%s1359_s0 + $0x50] sm:$0xff]  ;;  %v73_v55 = vld [vmem:[%s1359_s0 + $0x1d8] sm:$0xff] }
  0x13   :  { %303 = vmatpush.msra.mxu0 %v79_v8  ;;  %720 = vmatpush.msra.mxu1 %v79_v8  ;;  %v39_v49 = vld [vmem:[%s1359_s0 + $0xc8] sm:$0xff]  ;;  %v40_v53 = vld [vmem:[%s1359_s0 + $0xd0] sm:$0xff]  ;;  %v25_v56 = vld [vmem:[%s1359_s0 + $0x58] sm:$0xff] }
  0x14   :  { %724 = vmatpush.msra.mxu2 %v78_v9  ;;  %725 = vmatpush.msra.mxu3 %v78_v9  ;;  %v41_v57 = vld [vmem:[%s1359_s0 + $0xd8] sm:$0xff]  ;;  %v58_v58 = vld [vmem:[%s1359_s0 + $0x160] sm:$0xff]  ;;  %v59_v62 = vld [vmem:[%s1359_s0 + $0x168] sm:$0xff] }
  0x15   :  { %664 = vmatmul.msk.f32.vlgmr.msra.gmra.mxu2 %vm92_vm1, %v46_v10  ;;  %680 = vmatmul.msk.f32.vlgmr.msra.gmra.mxu3 %vm92_vm1, %v62_v11  ;;  %v74_v59 = vld [vmem:[%s1359_s0 + $0x1e0] sm:$0xff]  ;;  %v75_v63 = vld [vmem:[%s1359_s0 + $0x1e8] sm:$0xff]  ;;  %v60_v2 = vld [vmem:[%s1359_s0 + $0x170] sm:$0xff] }
  0x16   :  { %304 = vmatpush.msra.mxu0 %v78_v9  ;;  %723 = vmatpush.msra.mxu1 %v78_v9  ;;  %v26_v60 = vld [vmem:[%s1359_s0 + $0x60] sm:$0xff]  ;;  %v27_v0 = vld [vmem:[%s1359_s0 + $0x68] sm:$0xff]  ;;  %v76_v3 = vld [vmem:[%s1359_s0 + $0x1f0] sm:$0xff] }
  0x17   :  { %632 = vmatmul.msk.f32.vlgmr.msra.gmra.mxu0 %vm92_vm1, %v14_v12  ;;  %648 = vmatmul.msk.f32.vlgmr.msra.gmra.mxu1 %vm92_vm1, %v30_v13  ;;  %v42_v61 = vld [vmem:[%s1359_s0 + $0xe0] sm:$0xff]  ;;  %v43_v1 = vld [vmem:[%s1359_s0 + $0xe8] sm:$0xff]  ;;  %v28_v4 = vld [vmem:[%s1359_s0 + $0x70] sm:$0xff] }
  0x18   :  { %v44_v5 = vld [vmem:[%s1359_s0 + $0xf0] sm:$0xff]  ;;  %v61_v6 = vld [vmem:[%s1359_s0 + $0x178] sm:$0xff]  ;;  %v1036_v10 = vld [vmem:[%s1360_s2] ss:$0 sm:$0xff] }
  0x19   :  { %v77_v7 = vld [vmem:[%s1359_s0 + $0x1f8] sm:$0xff] }
  0x1a   :  { %v29_v8 = vld [vmem:[%s1359_s0 + $0x78] sm:$0xff] }
  0x1b   :  { %v45_v9 = vld [vmem:[%s1359_s0 + $0xf8] sm:$0xff] }
  0x1d   :  { %665 = vmatmul.msk.f32.gmra.mxu2 %vm92_vm1, %v47_v14  ;;  %681 = vmatmul.msk.f32.gmra.mxu3 %vm92_vm1, %v63_v15 }
  0x1f   :  { %633 = vmatmul.msk.f32.gmra.mxu0 %vm92_vm1, %v15_v16  ;;  %649 = vmatmul.msk.f32.gmra.mxu1 %vm92_vm1, %v31_v17 }
  0x25   :  { %666 = vmatmul.msk.f32.gmra.mxu2 %vm92_vm1, %v48_v18  ;;  %682 = vmatmul.msk.f32.gmra.mxu3 %vm92_vm1, %v64_v19 }
  0x27   :  { %634 = vmatmul.msk.f32.gmra.mxu0 %vm92_vm1, %v16_v20  ;;  %650 = vmatmul.msk.f32.gmra.mxu1 %vm92_vm1, %v32_v21 }
  0x2d   :  { %667 = vmatmul.msk.f32.gmra.mxu2 %vm92_vm1, %v49_v22  ;;  %683 = vmatmul.msk.f32.gmra.mxu3 %vm92_vm1, %v65_v23 }
  0x2f   :  { %635 = vmatmul.msk.f32.gmra.mxu0 %vm92_vm1, %v17_v24  ;;  %651 = vmatmul.msk.f32.gmra.mxu1 %vm92_vm1, %v33_v25 }
  0x35   :  { %668 = vmatmul.msk.f32.gmra.mxu2 %vm92_vm1, %v50_v26  ;;  %684 = vmatmul.msk.f32.gmra.mxu3 %vm92_vm1, %v66_v27 }
  0x37   :  { %636 = vmatmul.msk.f32.gmra.mxu0 %vm92_vm1, %v18_v28  ;;  %652 = vmatmul.msk.f32.gmra.mxu1 %vm92_vm1, %v34_v29 }
  0x3d   :  { %669 = vmatmul.msk.f32.gmra.mxu2 %vm92_vm1, %v51_v30  ;;  %685 = vmatmul.msk.f32.gmra.mxu3 %vm92_vm1, %v67_v31 }
  0x3f   :  { %637 = vmatmul.msk.f32.gmra.mxu0 %vm92_vm1, %v19_v32  ;;  %653 = vmatmul.msk.f32.gmra.mxu1 %vm92_vm1, %v35_v33 }
  0x45   :  { %670 = vmatmul.msk.f32.gmra.mxu2 %vm92_vm1, %v52_v34  ;;  %686 = vmatmul.msk.f32.gmra.mxu3 %vm92_vm1, %v68_v35 }
  0x47   :  { %638 = vmatmul.msk.f32.gmra.mxu0 %vm92_vm1, %v20_v36  ;;  %654 = vmatmul.msk.f32.gmra.mxu1 %vm92_vm1, %v36_v37 }
  0x4d   :  { %671 = vmatmul.msk.f32.gmra.mxu2 %vm92_vm1, %v53_v38  ;;  %687 = vmatmul.msk.f32.gmra.mxu3 %vm92_vm1, %v69_v39 }
  0x4f   :  { %639 = vmatmul.msk.f32.gmra.mxu0 %vm92_vm1, %v21_v40  ;;  %655 = vmatmul.msk.f32.gmra.mxu1 %vm92_vm1, %v37_v41 }
  0x55   :  { %672 = vmatmul.msk.f32.gmra.mxu2 %vm92_vm1, %v54_v42  ;;  %688 = vmatmul.msk.f32.gmra.mxu3 %vm92_vm1, %v70_v43 }
  0x57   :  { %640 = vmatmul.msk.f32.gmra.mxu0 %vm92_vm1, %v22_v44  ;;  %656 = vmatmul.msk.f32.gmra.mxu1 %vm92_vm1, %v38_v45 }
  0x5d   :  { %673 = vmatmul.msk.f32.gmra.mxu2 %vm92_vm1, %v55_v46  ;;  %689 = vmatmul.msk.f32.gmra.mxu3 %vm92_vm1, %v71_v47 }
  0x5f   :  { %641 = vmatmul.msk.f32.gmra.mxu0 %vm92_vm1, %v23_v48  ;;  %657 = vmatmul.msk.f32.gmra.mxu1 %vm92_vm1, %v39_v49 }
  0x65   :  { %674 = vmatmul.msk.f32.gmra.mxu2 %vm92_vm1, %v56_v50  ;;  %690 = vmatmul.msk.f32.gmra.mxu3 %vm92_vm1, %v72_v51 }
  0x67   :  { %642 = vmatmul.msk.f32.gmra.mxu0 %vm92_vm1, %v24_v52  ;;  %658 = vmatmul.msk.f32.gmra.mxu1 %vm92_vm1, %v40_v53 }
  0x6d   :  { %675 = vmatmul.msk.f32.gmra.mxu2 %vm92_vm1, %v57_v54  ;;  %691 = vmatmul.msk.f32.gmra.mxu3 %vm92_vm1, %v73_v55 }
  0x6f   :  { %643 = vmatmul.msk.f32.gmra.mxu0 %vm92_vm1, %v25_v56  ;;  %659 = vmatmul.msk.f32.gmra.mxu1 %vm92_vm1, %v41_v57 }
  0x75   :  { %676 = vmatmul.msk.f32.gmra.mxu2 %vm92_vm1, %v58_v58  ;;  %692 = vmatmul.msk.f32.gmra.mxu3 %vm92_vm1, %v74_v59 }
  0x77   :  { %644 = vmatmul.msk.f32.gmra.mxu0 %vm92_vm1, %v26_v60  ;;  %660 = vmatmul.msk.f32.gmra.mxu1 %vm92_vm1, %v42_v61 }
  0x7d   :  { %677 = vmatmul.msk.f32.gmra.mxu2 %vm92_vm1, %v59_v62  ;;  %693 = vmatmul.msk.f32.gmra.mxu3 %vm92_vm1, %v75_v63 }
  0x7f   :  { %645 = vmatmul.msk.f32.gmra.mxu0 %vm92_vm1, %v27_v0  ;;  %661 = vmatmul.msk.f32.gmra.mxu1 %vm92_vm1, %v43_v1 }
  0x85   :  { %678 = vmatmul.msk.f32.gmra.mxu2 %vm92_vm1, %v60_v2  ;;  %694 = vmatmul.msk.f32.gmra.mxu3 %vm92_vm1, %v76_v3 }
  0x87   :  { %646 = vmatmul.msk.f32.gmra.mxu0 %vm92_vm1, %v28_v4  ;;  %662 = vmatmul.msk.f32.gmra.mxu1 %vm92_vm1, %v44_v5 }
  0x8d   :  { %679 = vmatmul.msk.f32.gmra.mxu2 %vm92_vm1, %v61_v6  ;;  %695 = vmatmul.msk.f32.gmra.mxu3 %vm92_vm1, %v77_v7 }
  0x8f   :  { %647 = vmatmul.msk.f32.gmra.mxu0 %vm92_vm1, %v29_v8  ;;  %663 = vmatmul.msk.f32.gmra.mxu1 %vm92_vm1, %v45_v9 }
  0x94   :  { %v306_v11 = vpop.f32.mrf.mxu0  ;;  %v354_v12 = vpop.f32.mrf.mxu1 }
  0x95   :  { %v307_v13 = vadd.f32 %v1036_v10, %v306_v11  ;;  %v355_v14 = vadd.f32 %v1036_v10, %v354_v12 }
  0x97   :  { %v498_v15 = vmax.f32 %v307_v13, 0.0  ;;  %v514_v16 = vmax.f32 %v355_v14, 0.0 }
  0x98   :  { %v402_v17 = vpop.f32.mrf.mxu2  ;;  %v450_v18 = vpop.f32.mrf.mxu3 }
  0x99   :  { %563 = vst.msk [vmem:[%s1361_s3] sm:$0xff] %vm562_vm2, %v498_v15  ;;  %v403_v19 = vadd.f32 %v1036_v10, %v402_v17  ;;  %v451_v20 = vadd.f32 %v1036_v10, %v450_v18 }
  0x9a   :  { %579 = vst.msk [vmem:[%s1361_s3 + $0x80] sm:$0xff] %vm562_vm2, %v514_v16 }
  0x9b   :  { %v530_v21 = vmax.f32 %v403_v19, 0.0  ;;  %v546_v22 = vmax.f32 %v451_v20, 0.0 }
  0x9c   :  { %v309_v23 = vpop.f32.mrf.mxu0  ;;  %v357_v24 = vpop.f32.mrf.mxu1 }
  0x9d   :  { %595 = vst.msk [vmem:[%s1361_s3 + $0x100] sm:$0xff] %vm562_vm2, %v530_v21  ;;  %v310_v25 = vadd.f32 %v1036_v10, %v309_v23  ;;  %v358_v26 = vadd.f32 %v1036_v10, %v357_v24 }
  0x9e   :  { %611 = vst.msk [vmem:[%s1361_s3 + $0x180] sm:$0xff] %vm562_vm2, %v546_v22 }
  0x9f   :  { %v499_v27 = vmax.f32 %v310_v25, 0.0  ;;  %v515_v28 = vmax.f32 %v358_v26, 0.0 }
  0xa0   :  { %v405_v29 = vpop.f32.mrf.mxu2  ;;  %v453_v30 = vpop.f32.mrf.mxu3 }
  0xa1   :  { %564 = vst.msk [vmem:[%s1361_s3 + $0x8] sm:$0xff] %vm562_vm2, %v499_v27  ;;  %v406_v31 = vadd.f32 %v1036_v10, %v405_v29  ;;  %v454_v32 = vadd.f32 %v1036_v10, %v453_v30 }
  0xa2   :  { %580 = vst.msk [vmem:[%s1361_s3 + $0x88] sm:$0xff] %vm562_vm2, %v515_v28 }
  0xa3   :  { %v531_v33 = vmax.f32 %v406_v31, 0.0  ;;  %v547_v34 = vmax.f32 %v454_v32, 0.0 }
  0xa4   :  { %v312_v35 = vpop.f32.mrf.mxu0  ;;  %v360_v36 = vpop.f32.mrf.mxu1 }
  0xa5   :  { %596 = vst.msk [vmem:[%s1361_s3 + $0x108] sm:$0xff] %vm562_vm2, %v531_v33  ;;  %v313_v37 = vadd.f32 %v1036_v10, %v312_v35  ;;  %v361_v38 = vadd.f32 %v1036_v10, %v360_v36 }
  0xa6   :  { %612 = vst.msk [vmem:[%s1361_s3 + $0x188] sm:$0xff] %vm562_vm2, %v547_v34 }
  0xa7   :  { %v500_v39 = vmax.f32 %v313_v37, 0.0  ;;  %v516_v40 = vmax.f32 %v361_v38, 0.0 }
  0xa8   :  { %v408_v41 = vpop.f32.mrf.mxu2  ;;  %v456_v42 = vpop.f32.mrf.mxu3 }
  0xa9   :  { %565 = vst.msk [vmem:[%s1361_s3 + $0x10] sm:$0xff] %vm562_vm2, %v500_v39  ;;  %v409_v43 = vadd.f32 %v1036_v10, %v408_v41  ;;  %v457_v44 = vadd.f32 %v1036_v10, %v456_v42 }
  0xaa   :  { %581 = vst.msk [vmem:[%s1361_s3 + $0x90] sm:$0xff] %vm562_vm2, %v516_v40 }
  0xab   :  { %v532_v45 = vmax.f32 %v409_v43, 0.0  ;;  %v548_v46 = vmax.f32 %v457_v44, 0.0 }
  0xac   :  { %v315_v47 = vpop.f32.mrf.mxu0  ;;  %v363_v48 = vpop.f32.mrf.mxu1 }
  0xad   :  { %597 = vst.msk [vmem:[%s1361_s3 + $0x110] sm:$0xff] %vm562_vm2, %v532_v45  ;;  %v316_v49 = vadd.f32 %v1036_v10, %v315_v47  ;;  %v364_v50 = vadd.f32 %v1036_v10, %v363_v48 }
  0xae   :  { %613 = vst.msk [vmem:[%s1361_s3 + $0x190] sm:$0xff] %vm562_vm2, %v548_v46 }
  0xaf   :  { %v501_v51 = vmax.f32 %v316_v49, 0.0  ;;  %v517_v52 = vmax.f32 %v364_v50, 0.0 }
  0xb0   :  { %v411_v53 = vpop.f32.mrf.mxu2  ;;  %v459_v54 = vpop.f32.mrf.mxu3 }
  0xb1   :  { %566 = vst.msk [vmem:[%s1361_s3 + $0x18] sm:$0xff] %vm562_vm2, %v501_v51  ;;  %v412_v55 = vadd.f32 %v1036_v10, %v411_v53  ;;  %v460_v56 = vadd.f32 %v1036_v10, %v459_v54 }
  0xb2   :  { %582 = vst.msk [vmem:[%s1361_s3 + $0x98] sm:$0xff] %vm562_vm2, %v517_v52 }
  0xb3   :  { %v533_v57 = vmax.f32 %v412_v55, 0.0  ;;  %v549_v58 = vmax.f32 %v460_v56, 0.0 }
  0xb4   :  { %v318_v59 = vpop.f32.mrf.mxu0  ;;  %v366_v60 = vpop.f32.mrf.mxu1 }
  0xb5   :  { %598 = vst.msk [vmem:[%s1361_s3 + $0x118] sm:$0xff] %vm562_vm2, %v533_v57  ;;  %v319_v61 = vadd.f32 %v1036_v10, %v318_v59  ;;  %v367_v62 = vadd.f32 %v1036_v10, %v366_v60 }
  0xb6   :  { %614 = vst.msk [vmem:[%s1361_s3 + $0x198] sm:$0xff] %vm562_vm2, %v549_v58 }
  0xb7   :  { %v502_v63 = vmax.f32 %v319_v61, 0.0  ;;  %v518_v0 = vmax.f32 %v367_v62, 0.0 }
  0xb8   :  { %v414_v1 = vpop.f32.mrf.mxu2  ;;  %v462_v2 = vpop.f32.mrf.mxu3 }
  0xb9   :  { %567 = vst.msk [vmem:[%s1361_s3 + $0x20] sm:$0xff] %vm562_vm2, %v502_v63  ;;  %v415_v3 = vadd.f32 %v1036_v10, %v414_v1  ;;  %v463_v4 = vadd.f32 %v1036_v10, %v462_v2 }
  0xba   :  { %583 = vst.msk [vmem:[%s1361_s3 + $0xa0] sm:$0xff] %vm562_vm2, %v518_v0 }
  0xbb   :  { %v534_v5 = vmax.f32 %v415_v3, 0.0  ;;  %v550_v6 = vmax.f32 %v463_v4, 0.0 }
  0xbc   :  { %v321_v7 = vpop.f32.mrf.mxu0  ;;  %v369_v8 = vpop.f32.mrf.mxu1 }
  0xbd   :  { %599 = vst.msk [vmem:[%s1361_s3 + $0x120] sm:$0xff] %vm562_vm2, %v534_v5  ;;  %v322_v9 = vadd.f32 %v1036_v10, %v321_v7  ;;  %v370_v11 = vadd.f32 %v1036_v10, %v369_v8 }
  0xbe   :  { %615 = vst.msk [vmem:[%s1361_s3 + $0x1a0] sm:$0xff] %vm562_vm2, %v550_v6 }
  0xbf   :  { %v503_v12 = vmax.f32 %v322_v9, 0.0  ;;  %v519_v13 = vmax.f32 %v370_v11, 0.0 }
  0xc0   :  { %v417_v14 = vpop.f32.mrf.mxu2  ;;  %v465_v15 = vpop.f32.mrf.mxu3 }
  0xc1   :  { %568 = vst.msk [vmem:[%s1361_s3 + $0x28] sm:$0xff] %vm562_vm2, %v503_v12  ;;  %v418_v16 = vadd.f32 %v1036_v10, %v417_v14  ;;  %v466_v17 = vadd.f32 %v1036_v10, %v465_v15 }
  0xc2   :  { %584 = vst.msk [vmem:[%s1361_s3 + $0xa8] sm:$0xff] %vm562_vm2, %v519_v13 }
  0xc3   :  { %v535_v18 = vmax.f32 %v418_v16, 0.0  ;;  %v551_v19 = vmax.f32 %v466_v17, 0.0 }
  0xc4   :  { %v324_v20 = vpop.f32.mrf.mxu0  ;;  %v372_v21 = vpop.f32.mrf.mxu1 }
  0xc5   :  { %600 = vst.msk [vmem:[%s1361_s3 + $0x128] sm:$0xff] %vm562_vm2, %v535_v18  ;;  %v325_v22 = vadd.f32 %v1036_v10, %v324_v20  ;;  %v373_v23 = vadd.f32 %v1036_v10, %v372_v21 }
  0xc6   :  { %616 = vst.msk [vmem:[%s1361_s3 + $0x1a8] sm:$0xff] %vm562_vm2, %v551_v19 }
  0xc7   :  { %v504_v24 = vmax.f32 %v325_v22, 0.0  ;;  %v520_v25 = vmax.f32 %v373_v23, 0.0 }
  0xc8   :  { %v420_v26 = vpop.f32.mrf.mxu2  ;;  %v468_v27 = vpop.f32.mrf.mxu3 }
  0xc9   :  { %569 = vst.msk [vmem:[%s1361_s3 + $0x30] sm:$0xff] %vm562_vm2, %v504_v24  ;;  %v421_v28 = vadd.f32 %v1036_v10, %v420_v26  ;;  %v469_v29 = vadd.f32 %v1036_v10, %v468_v27 }
  0xca   :  { %585 = vst.msk [vmem:[%s1361_s3 + $0xb0] sm:$0xff] %vm562_vm2, %v520_v25 }
  0xcb   :  { %v536_v30 = vmax.f32 %v421_v28, 0.0  ;;  %v552_v31 = vmax.f32 %v469_v29, 0.0 }
  0xcc   :  { %v327_v32 = vpop.f32.mrf.mxu0  ;;  %v375_v33 = vpop.f32.mrf.mxu1 }
  0xcd   :  { %601 = vst.msk [vmem:[%s1361_s3 + $0x130] sm:$0xff] %vm562_vm2, %v536_v30  ;;  %v328_v34 = vadd.f32 %v1036_v10, %v327_v32  ;;  %v376_v35 = vadd.f32 %v1036_v10, %v375_v33 }
  0xce   :  { %617 = vst.msk [vmem:[%s1361_s3 + $0x1b0] sm:$0xff] %vm562_vm2, %v552_v31 }
  0xcf   :  { %v505_v36 = vmax.f32 %v328_v34, 0.0  ;;  %v521_v37 = vmax.f32 %v376_v35, 0.0 }
  0xd0   :  { %v423_v38 = vpop.f32.mrf.mxu2  ;;  %v471_v39 = vpop.f32.mrf.mxu3 }
  0xd1   :  { %570 = vst.msk [vmem:[%s1361_s3 + $0x38] sm:$0xff] %vm562_vm2, %v505_v36  ;;  %v424_v40 = vadd.f32 %v1036_v10, %v423_v38  ;;  %v472_v41 = vadd.f32 %v1036_v10, %v471_v39 }
  0xd2   :  { %586 = vst.msk [vmem:[%s1361_s3 + $0xb8] sm:$0xff] %vm562_vm2, %v521_v37 }
  0xd3   :  { %v537_v42 = vmax.f32 %v424_v40, 0.0  ;;  %v553_v43 = vmax.f32 %v472_v41, 0.0 }
  0xd4   :  { %v330_v44 = vpop.f32.mrf.mxu0  ;;  %v378_v45 = vpop.f32.mrf.mxu1 }
  0xd5   :  { %602 = vst.msk [vmem:[%s1361_s3 + $0x138] sm:$0xff] %vm562_vm2, %v537_v42  ;;  %v331_v46 = vadd.f32 %v1036_v10, %v330_v44  ;;  %v379_v47 = vadd.f32 %v1036_v10, %v378_v45 }
  0xd6   :  { %618 = vst.msk [vmem:[%s1361_s3 + $0x1b8] sm:$0xff] %vm562_vm2, %v553_v43 }
  0xd7   :  { %v506_v48 = vmax.f32 %v331_v46, 0.0  ;;  %v522_v49 = vmax.f32 %v379_v47, 0.0 }
  0xd8   :  { %v426_v50 = vpop.f32.mrf.mxu2  ;;  %v474_v51 = vpop.f32.mrf.mxu3 }
  0xd9   :  { %571 = vst.msk [vmem:[%s1361_s3 + $0x40] sm:$0xff] %vm562_vm2, %v506_v48  ;;  %v427_v52 = vadd.f32 %v1036_v10, %v426_v50  ;;  %v475_v53 = vadd.f32 %v1036_v10, %v474_v51 }
  0xda   :  { %587 = vst.msk [vmem:[%s1361_s3 + $0xc0] sm:$0xff] %vm562_vm2, %v522_v49 }
  0xdb   :  { %v538_v54 = vmax.f32 %v427_v52, 0.0  ;;  %v554_v55 = vmax.f32 %v475_v53, 0.0 }
  0xdc   :  { %v333_v56 = vpop.f32.mrf.mxu0  ;;  %v381_v57 = vpop.f32.mrf.mxu1 }
  0xdd   :  { %603 = vst.msk [vmem:[%s1361_s3 + $0x140] sm:$0xff] %vm562_vm2, %v538_v54  ;;  %v334_v58 = vadd.f32 %v1036_v10, %v333_v56  ;;  %v382_v59 = vadd.f32 %v1036_v10, %v381_v57 }
  0xde   :  { %619 = vst.msk [vmem:[%s1361_s3 + $0x1c0] sm:$0xff] %vm562_vm2, %v554_v55 }
  0xdf   :  { %v507_v60 = vmax.f32 %v334_v58, 0.0  ;;  %v523_v61 = vmax.f32 %v382_v59, 0.0 }
  0xe0   :  { %v429_v62 = vpop.f32.mrf.mxu2  ;;  %v477_v63 = vpop.f32.mrf.mxu3 }
  0xe1   :  { %572 = vst.msk [vmem:[%s1361_s3 + $0x48] sm:$0xff] %vm562_vm2, %v507_v60  ;;  %v430_v0 = vadd.f32 %v1036_v10, %v429_v62  ;;  %v478_v1 = vadd.f32 %v1036_v10, %v477_v63 }
  0xe2   :  { %588 = vst.msk [vmem:[%s1361_s3 + $0xc8] sm:$0xff] %vm562_vm2, %v523_v61 }
  0xe3   :  { %v539_v2 = vmax.f32 %v430_v0, 0.0  ;;  %v555_v3 = vmax.f32 %v478_v1, 0.0 }
  0xe4   :  { %v336_v4 = vpop.f32.mrf.mxu0  ;;  %v384_v5 = vpop.f32.mrf.mxu1 }
  0xe5   :  { %604 = vst.msk [vmem:[%s1361_s3 + $0x148] sm:$0xff] %vm562_vm2, %v539_v2  ;;  %v337_v6 = vadd.f32 %v1036_v10, %v336_v4  ;;  %v385_v7 = vadd.f32 %v1036_v10, %v384_v5 }
  0xe6   :  { %620 = vst.msk [vmem:[%s1361_s3 + $0x1c8] sm:$0xff] %vm562_vm2, %v555_v3 }
  0xe7   :  { %v508_v8 = vmax.f32 %v337_v6, 0.0  ;;  %v524_v9 = vmax.f32 %v385_v7, 0.0 }
  0xe8   :  { %v432_v11 = vpop.f32.mrf.mxu2  ;;  %v480_v12 = vpop.f32.mrf.mxu3 }
  0xe9   :  { %573 = vst.msk [vmem:[%s1361_s3 + $0x50] sm:$0xff] %vm562_vm2, %v508_v8  ;;  %v433_v13 = vadd.f32 %v1036_v10, %v432_v11  ;;  %v481_v14 = vadd.f32 %v1036_v10, %v480_v12 }
  0xea   :  { %589 = vst.msk [vmem:[%s1361_s3 + $0xd0] sm:$0xff] %vm562_vm2, %v524_v9 }
  0xeb   :  { %v540_v15 = vmax.f32 %v433_v13, 0.0  ;;  %v556_v16 = vmax.f32 %v481_v14, 0.0 }
  0xec   :  { %v339_v17 = vpop.f32.mrf.mxu0  ;;  %v387_v18 = vpop.f32.mrf.mxu1 }
  0xed   :  { %605 = vst.msk [vmem:[%s1361_s3 + $0x150] sm:$0xff] %vm562_vm2, %v540_v15  ;;  %v340_v19 = vadd.f32 %v1036_v10, %v339_v17  ;;  %v388_v20 = vadd.f32 %v1036_v10, %v387_v18 }
  0xee   :  { %621 = vst.msk [vmem:[%s1361_s3 + $0x1d0] sm:$0xff] %vm562_vm2, %v556_v16 }
  0xef   :  { %v509_v21 = vmax.f32 %v340_v19, 0.0  ;;  %v525_v22 = vmax.f32 %v388_v20, 0.0 }
  0xf0   :  { %v435_v23 = vpop.f32.mrf.mxu2  ;;  %v483_v24 = vpop.f32.mrf.mxu3 }
  0xf1   :  { %574 = vst.msk [vmem:[%s1361_s3 + $0x58] sm:$0xff] %vm562_vm2, %v509_v21  ;;  %v436_v25 = vadd.f32 %v1036_v10, %v435_v23  ;;  %v484_v26 = vadd.f32 %v1036_v10, %v483_v24 }
  0xf2   :  { %590 = vst.msk [vmem:[%s1361_s3 + $0xd8] sm:$0xff] %vm562_vm2, %v525_v22 }
  0xf3   :  { %v541_v27 = vmax.f32 %v436_v25, 0.0  ;;  %v557_v28 = vmax.f32 %v484_v26, 0.0 }
  0xf4   :  { %v342_v29 = vpop.f32.mrf.mxu0  ;;  %v390_v30 = vpop.f32.mrf.mxu1 }
  0xf5   :  { %606 = vst.msk [vmem:[%s1361_s3 + $0x158] sm:$0xff] %vm562_vm2, %v541_v27  ;;  %v343_v31 = vadd.f32 %v1036_v10, %v342_v29  ;;  %v391_v32 = vadd.f32 %v1036_v10, %v390_v30 }
  0xf6   :  { %622 = vst.msk [vmem:[%s1361_s3 + $0x1d8] sm:$0xff] %vm562_vm2, %v557_v28 }
  0xf7   :  { %v510_v33 = vmax.f32 %v343_v31, 0.0  ;;  %v526_v34 = vmax.f32 %v391_v32, 0.0 }
  0xf8   :  { %v438_v35 = vpop.f32.mrf.mxu2  ;;  %v486_v36 = vpop.f32.mrf.mxu3 }
  0xf9   :  { %575 = vst.msk [vmem:[%s1361_s3 + $0x60] sm:$0xff] %vm562_vm2, %v510_v33  ;;  %v439_v37 = vadd.f32 %v1036_v10, %v438_v35  ;;  %v487_v38 = vadd.f32 %v1036_v10, %v486_v36 }
  0xfa   :  { %591 = vst.msk [vmem:[%s1361_s3 + $0xe0] sm:$0xff] %vm562_vm2, %v526_v34 }
  0xfb   :  { %v542_v39 = vmax.f32 %v439_v37, 0.0  ;;  %v558_v40 = vmax.f32 %v487_v38, 0.0 }
  0xfc   :  { %v345_v41 = vpop.f32.mrf.mxu0  ;;  %v393_v42 = vpop.f32.mrf.mxu1 }
  0xfd   :  { %607 = vst.msk [vmem:[%s1361_s3 + $0x160] sm:$0xff] %vm562_vm2, %v542_v39  ;;  %v346_v43 = vadd.f32 %v1036_v10, %v345_v41  ;;  %v394_v44 = vadd.f32 %v1036_v10, %v393_v42 }
  0xfe   :  { %623 = vst.msk [vmem:[%s1361_s3 + $0x1e0] sm:$0xff] %vm562_vm2, %v558_v40 }
  0xff   :  { %v511_v45 = vmax.f32 %v346_v43, 0.0  ;;  %v527_v46 = vmax.f32 %v394_v44, 0.0 }
 0x100   :  { %v441_v47 = vpop.f32.mrf.mxu2  ;;  %v489_v48 = vpop.f32.mrf.mxu3 }
 0x101   :  { %576 = vst.msk [vmem:[%s1361_s3 + $0x68] sm:$0xff] %vm562_vm2, %v511_v45  ;;  %v442_v49 = vadd.f32 %v1036_v10, %v441_v47  ;;  %v490_v50 = vadd.f32 %v1036_v10, %v489_v48 }
 0x102   :  { %592 = vst.msk [vmem:[%s1361_s3 + $0xe8] sm:$0xff] %vm562_vm2, %v527_v46 }
 0x103   :  { %v543_v51 = vmax.f32 %v442_v49, 0.0  ;;  %v559_v52 = vmax.f32 %v490_v50, 0.0 }
 0x104   :  { %v348_v53 = vpop.f32.mrf.mxu0  ;;  %v396_v54 = vpop.f32.mrf.mxu1 }
 0x105   :  { %608 = vst.msk [vmem:[%s1361_s3 + $0x168] sm:$0xff] %vm562_vm2, %v543_v51  ;;  %v349_v55 = vadd.f32 %v1036_v10, %v348_v53  ;;  %v397_v56 = vadd.f32 %v1036_v10, %v396_v54 }
 0x106   :  { %624 = vst.msk [vmem:[%s1361_s3 + $0x1e8] sm:$0xff] %vm562_vm2, %v559_v52 }
 0x107   :  { %v512_v57 = vmax.f32 %v349_v55, 0.0  ;;  %v528_v58 = vmax.f32 %v397_v56, 0.0 }
 0x108   :  { %v444_v59 = vpop.f32.mrf.mxu2  ;;  %v492_v60 = vpop.f32.mrf.mxu3 }
 0x109   :  { %577 = vst.msk [vmem:[%s1361_s3 + $0x70] sm:$0xff] %vm562_vm2, %v512_v57  ;;  %v445_v61 = vadd.f32 %v1036_v10, %v444_v59  ;;  %v493_v62 = vadd.f32 %v1036_v10, %v492_v60 }
 0x10a   :  { %593 = vst.msk [vmem:[%s1361_s3 + $0xf0] sm:$0xff] %vm562_vm2, %v528_v58 }
 0x10b   :  { %v544_v63 = vmax.f32 %v445_v61, 0.0  ;;  %v560_v0 = vmax.f32 %v493_v62, 0.0 }
 0x10c   :  { %v351_v1 = vpop.f32.mrf.mxu0  ;;  %v399_v2 = vpop.f32.mrf.mxu1 }
 0x10d   :  { %609 = vst.msk [vmem:[%s1361_s3 + $0x170] sm:$0xff] %vm562_vm2, %v544_v63  ;;  %v352_v3 = vadd.f32 %v1036_v10, %v351_v1  ;;  %v400_v4 = vadd.f32 %v1036_v10, %v399_v2 }
 0x10e   :  { %625 = vst.msk [vmem:[%s1361_s3 + $0x1f0] sm:$0xff] %vm562_vm2, %v560_v0 }
 0x10f   :  { %v513_v5 = vmax.f32 %v352_v3, 0.0  ;;  %v529_v6 = vmax.f32 %v400_v4, 0.0 }
 0x110   :  { %v447_v7 = vpop.f32.mrf.mxu2  ;;  %v495_v8 = vpop.f32.mrf.mxu3 }
 0x111   :  { %578 = vst.msk [vmem:[%s1361_s3 + $0x78] sm:$0xff] %vm562_vm2, %v513_v5  ;;  %v448_v9 = vadd.f32 %v1036_v10, %v447_v7  ;;  %v496_v11 = vadd.f32 %v1036_v10, %v495_v8 }
 0x112   :  { %594 = vst.msk [vmem:[%s1361_s3 + $0xf8] sm:$0xff] %vm562_vm2, %v529_v6 }
 0x113   :  { %v545_v12 = vmax.f32 %v448_v9, 0.0  ;;  %v561_v13 = vmax.f32 %v496_v11, 0.0 }
 0x115   :  { %610 = vst.msk [vmem:[%s1361_s3 + $0x178] sm:$0xff] %vm562_vm2, %v545_v12 }
 0x116   :  { %626 = vst.msk [vmem:[%s1361_s3 + $0x1f8] sm:$0xff] %vm562_vm2, %v561_v13 }

// kernel: pair_filtering_forward.5
= control target key start
LH: loop header
LB: loop body
LE: loop exit
PB: predicated region body
PF: predicated region fallthrough
CT: control target
= control target key end

     0   :  { %s6599_s0 = inlined_call_operand.vmem [shape: f32[2,8192], index: 0, kind: input, shape index: {}]   ;;  %s6600_s1 = inlined_call_operand.vmem [shape: f32[2,16], index: 1, kind: input, shape index: {}]   ;;  %s6601_s2 = inlined_call_operand.vmem [shape: f32[2,16], index: 2, kind: input, shape index: {}]   ;;  %s6602_s3 = inlined_call_operand.vmem [shape: f32[8192,64], index: 3, kind: input, shape index: {}]   ;;  %s6603_s4 = inlined_call_operand.vmem [shape: f32[1,64], index: 4, kind: input, shape index: {}]   ;;  %s6604_s5 = inlined_call_operand.vmem [shape: f32[16,256], index: 5, kind: input, shape index: {}]   ;;  %s6605_s6 = inlined_call_operand.vmem [shape: f32[64,256], index: 6, kind: input, shape index: {}]   ;;  %s6606_s7 = inlined_call_operand.vmem [shape: f32[16,256], index: 7, kind: input, shape index: {}]   ;;  %s6607_s8 = inlined_call_operand.vmem [shape: f32[1,256], index: 8, kind: input, shape index: {}]   ;;  %s6608_s9 = inlined_call_operand.vmem [shape: f32[256,256], index: 9, kind: input, shape index: {}]   ;;  %s6609_s10 = inlined_call_operand.vmem [shape: f32[1,256], index: 10, kind: input, shape index: {}]   ;;  %s6610_s11 = inlined_call_operand.vmem [shape: f32[256,2], index: 11, kind: input, shape index: {}]   ;;  %s6611_s12 = inlined_call_operand.vmem [shape: f32[1,2], index: 12, kind: input, shape index: {}]   ;;  %s6612_s13 = inlined_call_operand.hbm [shape: f32[2,2], index: 13, kind: output, shape index: {}]  }
   0x1   :  { %v76_v0 = vld [vmem:[%s6602_s3 + $0x78] sm:$0xff]  ;;  %v75_v2 = vld [vmem:[%s6602_s3 + $0x70] sm:$0xff]  ;;  %v74_v6 = vld [vmem:[%s6602_s3 + $0x68] sm:$0xff] }
   0x2   :  { %v108_v1 = vld [vmem:[%s6602_s3 + $0x178] sm:$0xff]  ;;  %1250 = vmatpush.msra.mxu0 %v76_v0  ;;  %v107_v4 = vld [vmem:[%s6602_s3 + $0x170] sm:$0xff]  ;;  %v106_v8 = vld [vmem:[%s6602_s3 + $0x168] sm:$0xff] }
   0x3   :  { %1290 = vmatpush.msra.mxu2 %v108_v1  ;;  %v92_v3 = vld [vmem:[%s6602_s3 + $0xf8] sm:$0xff]  ;;  %v91_v7 = vld [vmem:[%s6602_s3 + $0xf0] sm:$0xff]  ;;  %v90_v10 = vld [vmem:[%s6602_s3 + $0xe8] sm:$0xff] }
   0x4   :  { %v124_v5 = vld [vmem:[%s6602_s3 + $0x1f8] sm:$0xff]  ;;  %1270 = vmatpush.msra.mxu1 %v92_v3  ;;  %1251 = vmatpush.msra.mxu0 %v75_v2  ;;  %v123_v9 = vld [vmem:[%s6602_s3 + $0x1f0] sm:$0xff]  ;;  %v73_v11 = vld [vmem:[%s6602_s3 + $0x60] sm:$0xff] }
   0x5   :  { %1310 = vmatpush.msra.mxu3 %v124_v5  ;;  %1291 = vmatpush.msra.mxu2 %v107_v4  ;;  %v105_v12 = vld [vmem:[%s6602_s3 + $0x160] sm:$0xff]  ;;  %v122_v13 = vld [vmem:[%s6602_s3 + $0x1e8] sm:$0xff]  ;;  %v72_v16 = vld [vmem:[%s6602_s3 + $0x58] sm:$0xff] }
   0x6   :  { %1271 = vmatpush.msra.mxu1 %v91_v7  ;;  %1252 = vmatpush.msra.mxu0 %v74_v6  ;;  %v89_v14 = vld [vmem:[%s6602_s3 + $0xe0] sm:$0xff]  ;;  %v104_v17 = vld [vmem:[%s6602_s3 + $0x158] sm:$0xff]  ;;  %v71_v20 = vld [vmem:[%s6602_s3 + $0x50] sm:$0xff] }
   0x7   :  { %1311 = vmatpush.msra.mxu3 %v123_v9  ;;  %1292 = vmatpush.msra.mxu2 %v106_v8  ;;  %v121_v15 = vld [vmem:[%s6602_s3 + $0x1e0] sm:$0xff]  ;;  %v88_v18 = vld [vmem:[%s6602_s3 + $0xd8] sm:$0xff]  ;;  %v103_v21 = vld [vmem:[%s6602_s3 + $0x150] sm:$0xff] }
   0x8   :  { %1272 = vmatpush.msra.mxu1 %v90_v10  ;;  %1253 = vmatpush.msra.mxu0 %v73_v11  ;;  %v120_v19 = vld [vmem:[%s6602_s3 + $0x1d8] sm:$0xff]  ;;  %v87_v22 = vld [vmem:[%s6602_s3 + $0xd0] sm:$0xff]  ;;  %v70_v24 = vld [vmem:[%s6602_s3 + $0x48] sm:$0xff] }
   0x9   :  { %1312 = vmatpush.msra.mxu3 %v122_v13  ;;  %1293 = vmatpush.msra.mxu2 %v105_v12  ;;  %v119_v23 = vld [vmem:[%s6602_s3 + $0x1d0] sm:$0xff]  ;;  %v102_v25 = vld [vmem:[%s6602_s3 + $0x148] sm:$0xff]  ;;  %v69_v28 = vld [vmem:[%s6602_s3 + $0x40] sm:$0xff] }
   0xa   :  { %1273 = vmatpush.msra.mxu1 %v89_v14  ;;  %1254 = vmatpush.msra.mxu0 %v72_v16  ;;  %v86_v26 = vld [vmem:[%s6602_s3 + $0xc8] sm:$0xff]  ;;  %v101_v29 = vld [vmem:[%s6602_s3 + $0x140] sm:$0xff]  ;;  %v68_v32 = vld [vmem:[%s6602_s3 + $0x38] sm:$0xff] }
   0xb   :  { %1313 = vmatpush.msra.mxu3 %v121_v15  ;;  %1294 = vmatpush.msra.mxu2 %v104_v17  ;;  %v118_v27 = vld [vmem:[%s6602_s3 + $0x1c8] sm:$0xff]  ;;  %v85_v30 = vld [vmem:[%s6602_s3 + $0xc0] sm:$0xff]  ;;  %v100_v33 = vld [vmem:[%s6602_s3 + $0x138] sm:$0xff] }
   0xc   :  { %1274 = vmatpush.msra.mxu1 %v88_v18  ;;  %1255 = vmatpush.msra.mxu0 %v71_v20  ;;  %v117_v31 = vld [vmem:[%s6602_s3 + $0x1c0] sm:$0xff]  ;;  %v84_v34 = vld [vmem:[%s6602_s3 + $0xb8] sm:$0xff]  ;;  %v67_v36 = vld [vmem:[%s6602_s3 + $0x30] sm:$0xff] }
   0xd   :  { %1314 = vmatpush.msra.mxu3 %v120_v19  ;;  %1295 = vmatpush.msra.mxu2 %v103_v21  ;;  %v116_v35 = vld [vmem:[%s6602_s3 + $0x1b8] sm:$0xff]  ;;  %v99_v37 = vld [vmem:[%s6602_s3 + $0x130] sm:$0xff]  ;;  %v66_v40 = vld [vmem:[%s6602_s3 + $0x28] sm:$0xff] }
   0xe   :  { %1275 = vmatpush.msra.mxu1 %v87_v22  ;;  %1256 = vmatpush.msra.mxu0 %v70_v24  ;;  %v83_v38 = vld [vmem:[%s6602_s3 + $0xb0] sm:$0xff]  ;;  %v98_v41 = vld [vmem:[%s6602_s3 + $0x128] sm:$0xff]  ;;  %v65_v44 = vld [vmem:[%s6602_s3 + $0x20] sm:$0xff] }
   0xf   :  { %1315 = vmatpush.msra.mxu3 %v119_v23  ;;  %1296 = vmatpush.msra.mxu2 %v102_v25  ;;  %v115_v39 = vld [vmem:[%s6602_s3 + $0x1b0] sm:$0xff]  ;;  %v82_v42 = vld [vmem:[%s6602_s3 + $0xa8] sm:$0xff]  ;;  %v97_v45 = vld [vmem:[%s6602_s3 + $0x120] sm:$0xff] }
  0x10   :  { %1276 = vmatpush.msra.mxu1 %v86_v26  ;;  %1257 = vmatpush.msra.mxu0 %v69_v28  ;;  %v114_v43 = vld [vmem:[%s6602_s3 + $0x1a8] sm:$0xff]  ;;  %v81_v46 = vld [vmem:[%s6602_s3 + $0xa0] sm:$0xff]  ;;  %v64_v48 = vld [vmem:[%s6602_s3 + $0x18] sm:$0xff] }
  0x11   :  { %1316 = vmatpush.msra.mxu3 %v118_v27  ;;  %1297 = vmatpush.msra.mxu2 %v101_v29  ;;  %v113_v47 = vld [vmem:[%s6602_s3 + $0x1a0] sm:$0xff]  ;;  %v96_v49 = vld [vmem:[%s6602_s3 + $0x118] sm:$0xff]  ;;  %v63_v52 = vld [vmem:[%s6602_s3 + $0x10] sm:$0xff] }
  0x12   :  { %1277 = vmatpush.msra.mxu1 %v85_v30  ;;  %1258 = vmatpush.msra.mxu0 %v68_v32  ;;  %v80_v50 = vld [vmem:[%s6602_s3 + $0x98] sm:$0xff]  ;;  %v95_v53 = vld [vmem:[%s6602_s3 + $0x110] sm:$0xff]  ;;  %v62_v56 = vld [vmem:[%s6602_s3 + $0x8] sm:$0xff] }
  0x13   :  { %1317 = vmatpush.msra.mxu3 %v117_v31  ;;  %1298 = vmatpush.msra.mxu2 %v100_v33  ;;  %v112_v51 = vld [vmem:[%s6602_s3 + $0x198] sm:$0xff]  ;;  %v79_v54 = vld [vmem:[%s6602_s3 + $0x90] sm:$0xff]  ;;  %v94_v57 = vld [vmem:[%s6602_s3 + $0x108] sm:$0xff] }
  0x14   :  { %1278 = vmatpush.msra.mxu1 %v84_v34  ;;  %1259 = vmatpush.msra.mxu0 %v67_v36  ;;  %v111_v55 = vld [vmem:[%s6602_s3 + $0x190] sm:$0xff]  ;;  %v78_v58 = vld [vmem:[%s6602_s3 + $0x88] sm:$0xff]  ;;  %v61_v60 = vld [vmem:[%s6602_s3] sm:$0xff] }
  0x15   :  { %1318 = vmatpush.msra.mxu3 %v116_v35  ;;  %1299 = vmatpush.msra.mxu2 %v99_v37  ;;  %v110_v59 = vld [vmem:[%s6602_s3 + $0x188] sm:$0xff]  ;;  %v93_v61 = vld [vmem:[%s6602_s3 + $0x100] sm:$0xff]  ;;  %v140_v62 = vld [vmem:[%s6602_s3 + $0x278] sm:$0xff] }
  0x16   :  { %1279 = vmatpush.msra.mxu1 %v83_v38  ;;  %1260 = vmatpush.msra.mxu0 %v66_v40  ;;  %v172_v63 = vld [vmem:[%s6602_s3 + $0x378] sm:$0xff]  ;;  %v77_v0 = vld [vmem:[%s6602_s3 + $0x80] sm:$0xff]  ;;  %v139_v2 = vld [vmem:[%s6602_s3 + $0x270] sm:$0xff] }
  0x17   :  { %1319 = vmatpush.msra.mxu3 %v115_v39  ;;  %1300 = vmatpush.msra.mxu2 %v98_v41  ;;  %v109_v1 = vld [vmem:[%s6602_s3 + $0x180] sm:$0xff]  ;;  %v156_v3 = vld [vmem:[%s6602_s3 + $0x2f8] sm:$0xff]  ;;  %v171_v4 = vld [vmem:[%s6602_s3 + $0x370] sm:$0xff] }
  0x18   :  { %1280 = vmatpush.msra.mxu1 %v82_v42  ;;  %1261 = vmatpush.msra.mxu0 %v65_v44  ;;  %v188_v5 = vld [vmem:[%s6602_s3 + $0x3f8] sm:$0xff]  ;;  %v138_v6 = vld [vmem:[%s6602_s3 + $0x268] sm:$0xff]  ;;  %v155_v7 = vld [vmem:[%s6602_s3 + $0x2f0] sm:$0xff] }
  0x19   :  { %1320 = vmatpush.msra.mxu3 %v114_v43  ;;  %1301 = vmatpush.msra.mxu2 %v97_v45  ;;  %v170_v8 = vld [vmem:[%s6602_s3 + $0x368] sm:$0xff]  ;;  %v187_v9 = vld [vmem:[%s6602_s3 + $0x3f0] sm:$0xff]  ;;  %v137_v10 = vld [vmem:[%s6602_s3 + $0x260] sm:$0xff] }
  0x1a   :  { %1281 = vmatpush.msra.mxu1 %v81_v46  ;;  %1262 = vmatpush.msra.mxu0 %v64_v48  ;;  %v154_v11 = vld [vmem:[%s6602_s3 + $0x2e8] sm:$0xff]  ;;  %v169_v12 = vld [vmem:[%s6602_s3 + $0x360] sm:$0xff]  ;;  %v136_v14 = vld [vmem:[%s6602_s3 + $0x258] sm:$0xff] }
  0x1b   :  { %1321 = vmatpush.msra.mxu3 %v113_v47  ;;  %1302 = vmatpush.msra.mxu2 %v96_v49  ;;  %v186_v13 = vld [vmem:[%s6602_s3 + $0x3e8] sm:$0xff]  ;;  %v153_v15 = vld [vmem:[%s6602_s3 + $0x2e0] sm:$0xff]  ;;  %v168_v16 = vld [vmem:[%s6602_s3 + $0x358] sm:$0xff] }
  0x1c   :  { %1282 = vmatpush.msra.mxu1 %v80_v50  ;;  %1263 = vmatpush.msra.mxu0 %v63_v52  ;;  %v185_v17 = vld [vmem:[%s6602_s3 + $0x3e0] sm:$0xff]  ;;  %v135_v18 = vld [vmem:[%s6602_s3 + $0x250] sm:$0xff]  ;;  %v152_v19 = vld [vmem:[%s6602_s3 + $0x2d8] sm:$0xff] }
  0x1d   :  { %1322 = vmatpush.msra.mxu3 %v112_v51  ;;  %1303 = vmatpush.msra.mxu2 %v95_v53  ;;  %v167_v20 = vld [vmem:[%s6602_s3 + $0x350] sm:$0xff]  ;;  %v184_v21 = vld [vmem:[%s6602_s3 + $0x3d8] sm:$0xff]  ;;  %v134_v22 = vld [vmem:[%s6602_s3 + $0x248] sm:$0xff] }
  0x1e   :  { %1283 = vmatpush.msra.mxu1 %v79_v54  ;;  %1264 = vmatpush.msra.mxu0 %v62_v56  ;;  %v151_v23 = vld [vmem:[%s6602_s3 + $0x2d0] sm:$0xff]  ;;  %v166_v24 = vld [vmem:[%s6602_s3 + $0x348] sm:$0xff]  ;;  %v45_v26 = vld [vmem:[%s6599_s0] sm:$0xff] }
  0x1f   :  { %1323 = vmatpush.msra.mxu3 %v111_v55  ;;  %1304 = vmatpush.msra.mxu2 %v94_v57  ;;  %v183_v25 = vld [vmem:[%s6602_s3 + $0x3d0] sm:$0xff]  ;;  %v133_v27 = vld [vmem:[%s6602_s3 + $0x240] sm:$0xff]  ;;  %v150_v28 = vld [vmem:[%s6602_s3 + $0x2c8] sm:$0xff]  ;;  %1105 = vst [vmem:[#allocation1] ss:$4 sm:$0xff] %v45_v26 }
  0x20   :  { %1284 = vmatpush.msra.mxu1 %v78_v58  ;;  %1265 = vmatpush.msra.mxu0 %v61_v60  ;;  %v165_v29 = vld [vmem:[%s6602_s3 + $0x340] sm:$0xff]  ;;  %v182_v30 = vld [vmem:[%s6602_s3 + $0x3c8] sm:$0xff]  ;;  %v132_v31 = vld [vmem:[%s6602_s3 + $0x238] sm:$0xff] }
  0x21   :  { %1324 = vmatpush.msra.mxu3 %v110_v59  ;;  %1305 = vmatpush.msra.mxu2 %v93_v61  ;;  %v149_v32 = vld [vmem:[%s6602_s3 + $0x2c0] sm:$0xff]  ;;  %v164_v33 = vld [vmem:[%s6602_s3 + $0x338] sm:$0xff]  ;;  %v131_v35 = vld [vmem:[%s6602_s3 + $0x230] sm:$0xff] }
  0x22   :  { %1330 = vmatpush.msrb.mxu0 %v140_v62  ;;  %1285 = vmatpush.msra.mxu1 %v77_v0  ;;  %v181_v34 = vld [vmem:[%s6602_s3 + $0x3c0] sm:$0xff]  ;;  %v148_v36 = vld [vmem:[%s6602_s3 + $0x2b8] sm:$0xff]  ;;  %v163_v37 = vld [vmem:[%s6602_s3 + $0x330] sm:$0xff] }
  0x23   :  { %1370 = vmatpush.msrb.mxu2 %v172_v63  ;;  %1325 = vmatpush.msra.mxu3 %v109_v1  ;;  %v180_v38 = vld [vmem:[%s6602_s3 + $0x3b8] sm:$0xff]  ;;  %v130_v39 = vld [vmem:[%s6602_s3 + $0x228] sm:$0xff]  ;;  %v147_v40 = vld [vmem:[%s6602_s3 + $0x2b0] sm:$0xff] }
  0x24   :  { %1331 = vmatpush.msrb.mxu0 %v139_v2  ;;  %1350 = vmatpush.msrb.mxu1 %v156_v3  ;;  %v162_v41 = vld [vmem:[%s6602_s3 + $0x328] sm:$0xff]  ;;  %v179_v42 = vld [vmem:[%s6602_s3 + $0x3b0] sm:$0xff]  ;;  %v129_v44 = vld [vmem:[%s6602_s3 + $0x220] sm:$0xff] }
  0x25   :  { %1371 = vmatpush.msrb.mxu2 %v171_v4  ;;  %1390 = vmatpush.msrb.mxu3 %v188_v5  ;;  %v46_v43 = vld [vmem:[%s6599_s0 + $0x8] sm:$0xff]  ;;  %v47_v46 = vld [vmem:[%s6599_s0 + $0x10] sm:$0xff]  ;;  %v161_v47 = vld [vmem:[%s6602_s3 + $0x320] sm:$0xff] }
  0x26   :  { %1332 = vmatpush.msrb.mxu0 %v138_v6  ;;  %1351 = vmatpush.msrb.mxu1 %v155_v7  ;;  %v146_v45 = vld [vmem:[%s6602_s3 + $0x2a8] sm:$0xff]  ;;  %1107 = vst [vmem:[#allocation1 + $0x20] ss:$4 sm:$0xff] %v46_v43  ;;  %v1108_v48 = vld.sshfl [vmem:[#allocation1] sm:$0xff pattern:$0x73625140] }
  0x27   :  { %1372 = vmatpush.msrb.mxu2 %v170_v8  ;;  %1391 = vmatpush.msrb.mxu3 %v187_v9  ;;  %v1110_v49 = vld.sshfl [vmem:[#allocation1 + $0x10] sm:$0xff pattern:$0x73625140]  ;;  %v3388_v50 = vld.sshfl [vmem:[#allocation1 + $0x8] sm:$0xff pattern:$0x73625140] }
  0x28   :  { %1333 = vmatpush.msrb.mxu0 %v137_v10  ;;  %1352 = vmatpush.msrb.mxu1 %v154_v11  ;;  %v3390_v51 = vld.sshfl [vmem:[#allocation1 + $0x18] sm:$0xff pattern:$0x73625140]  ;;  %v178_v52 = vld [vmem:[%s6602_s3 + $0x3a8] sm:$0xff]  ;;  %v145_v54 = vld [vmem:[%s6602_s3 + $0x2a0] sm:$0xff] }
  0x29   :  { %1373 = vmatpush.msrb.mxu2 %v169_v12  ;;  %1392 = vmatpush.msrb.mxu3 %v186_v13  ;;  %v128_v53 = vld [vmem:[%s6602_s3 + $0x218] sm:$0xff]  ;;  %1116 = vst [vmem:[#allocation1] ss:$4 sm:$0xff] %v47_v46  ;;  %v177_v56 = vld [vmem:[%s6602_s3 + $0x3a0] sm:$0xff]  ;;  %v127_v57 = vld [vmem:[%s6602_s3 + $0x210] sm:$0xff] }
  0x2a   :  { %1334 = vmatpush.msrb.mxu0 %v136_v14  ;;  %1353 = vmatpush.msrb.mxu1 %v153_v15  ;;  %v160_v55 = vld [vmem:[%s6602_s3 + $0x318] sm:$0xff]  ;;  %v159_v59 = vld [vmem:[%s6602_s3 + $0x310] sm:$0xff]  ;;  %v126_v61 = vld [vmem:[%s6602_s3 + $0x208] sm:$0xff] }
  0x2b   :  { %1374 = vmatpush.msrb.mxu2 %v168_v16  ;;  %1393 = vmatpush.msrb.mxu3 %v185_v17  ;;  %v144_v58 = vld [vmem:[%s6602_s3 + $0x298] sm:$0xff]  ;;  %v143_v62 = vld [vmem:[%s6602_s3 + $0x290] sm:$0xff]  ;;  %v158_v4 = vld [vmem:[%s6602_s3 + $0x308] sm:$0xff] }
  0x2c   :  { %1335 = vmatpush.msrb.mxu0 %v135_v18  ;;  %1354 = vmatpush.msrb.mxu1 %v152_v19  ;;  %v176_v60 = vld [vmem:[%s6602_s3 + $0x398] sm:$0xff]  ;;  %v175_v5 = vld [vmem:[%s6602_s3 + $0x390] sm:$0xff]  ;;  %v125_v6 = vld [vmem:[%s6602_s3 + $0x200] sm:$0xff] }
  0x2d   :  { %1375 = vmatpush.msrb.mxu2 %v167_v20  ;;  %1394 = vmatpush.msrb.mxu3 %v184_v21  ;;  %v48_v63 = vld [vmem:[%s6599_s0 + $0x18] sm:$0xff]  ;;  %v3428_v0 = vld.sshfl [vmem:[#allocation1 + $0x30] sm:$0xff pattern:$0x73625140]  ;;  %v142_v7 = vld [vmem:[%s6602_s3 + $0x288] sm:$0xff] }
  0x2e   :  { %1336 = vmatpush.msrb.mxu0 %v134_v22  ;;  %1355 = vmatpush.msrb.mxu1 %v151_v23  ;;  %v3430_v1 = vld.sshfl [vmem:[#allocation1 + $0x20] sm:$0xff pattern:$0x73625140]  ;;  %v3432_v2 = vld.sshfl [vmem:[#allocation1 + $0x38] sm:$0xff pattern:$0x73625140] }
  0x2f   :  { %1376 = vmatpush.msrb.mxu2 %v166_v24  ;;  %1395 = vmatpush.msrb.mxu3 %v183_v25  ;;  %v3434_v3 = vld.sshfl [vmem:[#allocation1 + $0x28] sm:$0xff pattern:$0x73625140]  ;;  %v157_v8 = vld [vmem:[%s6602_s3 + $0x300] sm:$0xff]  ;;  %v204_v10 = vld [vmem:[%s6602_s3 + $0x478] sm:$0xff] }
  0x30   :  { %1337 = vmatpush.msrb.mxu0 %v133_v27  ;;  %1356 = vmatpush.msrb.mxu1 %v150_v28  ;;  %1117 = vst [vmem:[#allocation1 + $0x20] ss:$4 sm:$0xff] %v48_v63  ;;  %v174_v9 = vld [vmem:[%s6602_s3 + $0x388] sm:$0xff]  ;;  %v236_v11 = vld [vmem:[%s6602_s3 + $0x578] sm:$0xff]  ;;  %v141_v12 = vld [vmem:[%s6602_s3 + $0x280] sm:$0xff] }
  0x31   :  { %1377 = vmatpush.msrb.mxu2 %v165_v29  ;;  %1396 = vmatpush.msrb.mxu3 %v182_v30  ;;  %v173_v13 = vld [vmem:[%s6602_s3 + $0x380] sm:$0xff]  ;;  %v203_v14 = vld [vmem:[%s6602_s3 + $0x470] sm:$0xff]  ;;  %v220_v15 = vld [vmem:[%s6602_s3 + $0x4f8] sm:$0xff] }
  0x32   :  { %1338 = vmatpush.msrb.mxu0 %v132_v31  ;;  %1357 = vmatpush.msrb.mxu1 %v149_v32  ;;  %v235_v16 = vld [vmem:[%s6602_s3 + $0x570] sm:$0xff]  ;;  %v252_v17 = vld [vmem:[%s6602_s3 + $0x5f8] sm:$0xff]  ;;  %v202_v18 = vld [vmem:[%s6602_s3 + $0x468] sm:$0xff] }
  0x33   :  { %1378 = vmatpush.msrb.mxu2 %v164_v33  ;;  %1397 = vmatpush.msrb.mxu3 %v181_v34  ;;  %v219_v19 = vld [vmem:[%s6602_s3 + $0x4f0] sm:$0xff]  ;;  %v234_v20 = vld [vmem:[%s6602_s3 + $0x568] sm:$0xff]  ;;  %v201_v22 = vld [vmem:[%s6602_s3 + $0x460] sm:$0xff] }
  0x34   :  { %1339 = vmatpush.msrb.mxu0 %v131_v35  ;;  %1358 = vmatpush.msrb.mxu1 %v148_v36  ;;  %v251_v21 = vld [vmem:[%s6602_s3 + $0x5f0] sm:$0xff]  ;;  %v218_v23 = vld [vmem:[%s6602_s3 + $0x4e8] sm:$0xff]  ;;  %v233_v24 = vld [vmem:[%s6602_s3 + $0x560] sm:$0xff] }
  0x35   :  { %1379 = vmatpush.msrb.mxu2 %v163_v37  ;;  %1398 = vmatpush.msrb.mxu3 %v180_v38  ;;  %v250_v25 = vld [vmem:[%s6602_s3 + $0x5e8] sm:$0xff]  ;;  %v3504_v26 = vld.sshfl [vmem:[#allocation1] sm:$0xff pattern:$0x73625140]  ;;  %v200_v29 = vld [vmem:[%s6602_s3 + $0x458] sm:$0xff] }
  0x36   :  { %1340 = vmatpush.msrb.mxu0 %v130_v39  ;;  %1359 = vmatpush.msrb.mxu1 %v147_v40  ;;  %v3506_v27 = vld.sshfl [vmem:[#allocation1 + $0x10] sm:$0xff pattern:$0x73625140]  ;;  %v3508_v28 = vld.sshfl [vmem:[#allocation1 + $0x8] sm:$0xff pattern:$0x73625140] }
  0x37   :  { %1380 = vmatpush.msrb.mxu2 %v162_v41  ;;  %1399 = vmatpush.msrb.mxu3 %v179_v42  ;;  %v49_v30 = vld [vmem:[%s6599_s0 + $0x20] sm:$0xff]  ;;  %v3516_v31 = vld.sshfl [vmem:[#allocation1 + $0x18] sm:$0xff pattern:$0x73625140]  ;;  %v199_v35 = vld [vmem:[%s6602_s3 + $0x450] sm:$0xff] }
  0x38   :  { %1341 = vmatpush.msrb.mxu0 %v129_v44  ;;  %1360 = vmatpush.msrb.mxu1 %v146_v45  ;;  %v217_v32 = vld [vmem:[%s6602_s3 + $0x4e0] sm:$0xff]  ;;  %v232_v33 = vld [vmem:[%s6602_s3 + $0x558] sm:$0xff]  ;;  %1126 = vst [vmem:[#allocation1] ss:$4 sm:$0xff] %v49_v30  ;;  %v231_v37 = vld [vmem:[%s6602_s3 + $0x550] sm:$0xff] }
  0x39   :  { %1381 = vmatpush.msrb.mxu2 %v161_v47  ;;  %1400 = vmatpush.msrb.mxu3 %v178_v52  ;;  %v249_v34 = vld [vmem:[%s6602_s3 + $0x5e0] sm:$0xff]  ;;  %v216_v36 = vld [vmem:[%s6602_s3 + $0x4d8] sm:$0xff] }
  0x3a   :  { %1342 = vmatpush.msrb.mxu0 %v128_v53  ;;  %1361 = vmatpush.msrb.mxu1 %v145_v54 }
  0x3b   :  { %1382 = vmatpush.msrb.mxu2 %v160_v55  ;;  %1401 = vmatpush.msrb.mxu3 %v177_v56 }
  0x3c   :  { %1343 = vmatpush.msrb.mxu0 %v127_v57  ;;  %1362 = vmatpush.msrb.mxu1 %v144_v58 }
  0x3d   :  { %1383 = vmatpush.msrb.mxu2 %v159_v59  ;;  %1402 = vmatpush.msrb.mxu3 %v176_v60 }
  0x3e   :  { %1344 = vmatpush.msrb.mxu0 %v126_v61  ;;  %1363 = vmatpush.msrb.mxu1 %v143_v62 }
  0x3f   :  { %1384 = vmatpush.msrb.mxu2 %v158_v4  ;;  %1403 = vmatpush.msrb.mxu3 %v175_v5 }
  0x40   :  { %1345 = vmatpush.msrb.mxu0 %v125_v6  ;;  %1364 = vmatpush.msrb.mxu1 %v142_v7 }
  0x41   :  { %1385 = vmatpush.msrb.mxu2 %v157_v8  ;;  %1404 = vmatpush.msrb.mxu3 %v174_v9 }
  0x42   :  { %1266 = vmatmul.f32.vlgmr.msra.gmra.mxu0 %v1108_v48  ;;  %1306 = vmatmul.f32.vlgmr.msra.gmra.mxu2 %v1110_v49 }
  0x43   :  { %1410 = vmatpush.msra.mxu0 %v204_v10  ;;  %1450 = vmatpush.msra.mxu2 %v236_v11 }
  0x44   :  { %1365 = vmatpush.msrb.mxu1 %v141_v12  ;;  %1405 = vmatpush.msrb.mxu3 %v173_v13 }
  0x45   :  { %1286 = vmatmul.f32.vlgmr.msra.gmra.mxu1 %v3388_v50  ;;  %1326 = vmatmul.f32.vlgmr.msra.gmra.mxu3 %v3390_v51 }
  0x46   :  { %1411 = vmatpush.msra.mxu0 %v203_v14  ;;  %1430 = vmatpush.msra.mxu1 %v220_v15 }
  0x47   :  { %1451 = vmatpush.msra.mxu2 %v235_v16  ;;  %1470 = vmatpush.msra.mxu3 %v252_v17 }
  0x48   :  { %1412 = vmatpush.msra.mxu0 %v202_v18  ;;  %1431 = vmatpush.msra.mxu1 %v219_v19 }
  0x49   :  { %1452 = vmatpush.msra.mxu2 %v234_v20  ;;  %1471 = vmatpush.msra.mxu3 %v251_v21 }
  0x4a   :  { %1413 = vmatpush.msra.mxu0 %v201_v22  ;;  %1432 = vmatpush.msra.mxu1 %v218_v23 }
  0x4b   :  { %1453 = vmatpush.msra.mxu2 %v233_v24  ;;  %1472 = vmatpush.msra.mxu3 %v250_v25 }
  0x4c   :  { %1386 = vmatmul.f32.vlgmr.msrb.gmra.mxu2 %v3428_v0  ;;  %1414 = vmatpush.msra.mxu0 %v200_v29 }
  0x4d   :  { %1433 = vmatpush.msra.mxu1 %v217_v32  ;;  %1454 = vmatpush.msra.mxu2 %v232_v33 }
  0x4e   :  { %18 = vsyncpa [#allocation3], 0  ;;  %1473 = vmatpush.msra.mxu3 %v249_v34  ;;  %1346 = vmatmul.f32.vlgmr.msrb.gmra.mxu0 %v3430_v1  ;;  %v248_v38 = vld [vmem:[%s6602_s3 + $0x5d8] sm:$0xff]  ;;  %v198_v39 = vld [vmem:[%s6602_s3 + $0x448] sm:$0xff]  ;;  %vm2552_vm0 = vcmask 523264   ;;  %vm2596_vm1 = vcmask 130048  }
  0x4f   :  { %1406 = vmatmul.f32.vlgmr.msrb.gmra.mxu3 %v3432_v2  ;;  %1415 = vmatpush.msra.mxu0 %v199_v35  ;;  %v215_v40 = vld [vmem:[%s6602_s3 + $0x4d0] sm:$0xff]  ;;  %v230_v41 = vld [vmem:[%s6602_s3 + $0x548] sm:$0xff]  ;;  %v197_v43 = vld [vmem:[%s6602_s3 + $0x440] sm:$0xff]  ;;  %s2937_s18 = sshll.u32 %s6612_s13, 4  ;;  %vm2928_vm2 = vcmask 9216   ;;  %s2938_s18 = int_to_ptr.hbm [resolvable:$true] %s2937_s18 }
  0x50   :  { %1434 = vmatpush.msra.mxu1 %v216_v36  ;;  %1455 = vmatpush.msra.mxu2 %v231_v37  ;;  %v247_v42 = vld [vmem:[%s6602_s3 + $0x5d0] sm:$0xff]  ;;  %v214_v44 = vld [vmem:[%s6602_s3 + $0x4c8] sm:$0xff]  ;;  %v229_v45 = vld [vmem:[%s6602_s3 + $0x540] sm:$0xff] }
  0x51   :  { %1474 = vmatpush.msra.mxu3 %v248_v38  ;;  %1366 = vmatmul.f32.vlgmr.msrb.gmra.mxu1 %v3434_v3  ;;  %v246_v46 = vld [vmem:[%s6602_s3 + $0x5c8] sm:$0xff]  ;;  %v196_v47 = vld [vmem:[%s6602_s3 + $0x438] sm:$0xff]  ;;  %v213_v48 = vld [vmem:[%s6602_s3 + $0x4c0] sm:$0xff] }
  0x52   :  { %1416 = vmatpush.msra.mxu0 %v198_v39  ;;  %1435 = vmatpush.msra.mxu1 %v215_v40  ;;  %v228_v49 = vld [vmem:[%s6602_s3 + $0x538] sm:$0xff]  ;;  %v245_v50 = vld [vmem:[%s6602_s3 + $0x5c0] sm:$0xff]  ;;  %v195_v51 = vld [vmem:[%s6602_s3 + $0x430] sm:$0xff] }
  0x53   :  { %1456 = vmatpush.msra.mxu2 %v230_v41  ;;  %1475 = vmatpush.msra.mxu3 %v247_v42  ;;  %v212_v52 = vld [vmem:[%s6602_s3 + $0x4b8] sm:$0xff]  ;;  %v227_v53 = vld [vmem:[%s6602_s3 + $0x530] sm:$0xff]  ;;  %v194_v55 = vld [vmem:[%s6602_s3 + $0x428] sm:$0xff] }
  0x54   :  { %1417 = vmatpush.msra.mxu0 %v197_v43  ;;  %1436 = vmatpush.msra.mxu1 %v214_v44  ;;  %v244_v54 = vld [vmem:[%s6602_s3 + $0x5b8] sm:$0xff]  ;;  %v211_v56 = vld [vmem:[%s6602_s3 + $0x4b0] sm:$0xff]  ;;  %v226_v57 = vld [vmem:[%s6602_s3 + $0x528] sm:$0xff] }
  0x55   :  { %1457 = vmatpush.msra.mxu2 %v229_v45  ;;  %1476 = vmatpush.msra.mxu3 %v246_v46  ;;  %v243_v58 = vld [vmem:[%s6602_s3 + $0x5b0] sm:$0xff]  ;;  %v193_v59 = vld [vmem:[%s6602_s3 + $0x420] sm:$0xff]  ;;  %v210_v60 = vld [vmem:[%s6602_s3 + $0x4a8] sm:$0xff] }
  0x56   :  { %1418 = vmatpush.msra.mxu0 %v196_v47  ;;  %1437 = vmatpush.msra.mxu1 %v213_v48  ;;  %v225_v61 = vld [vmem:[%s6602_s3 + $0x520] sm:$0xff]  ;;  %v242_v62 = vld [vmem:[%s6602_s3 + $0x5a8] sm:$0xff]  ;;  %v192_v63 = vld [vmem:[%s6602_s3 + $0x418] sm:$0xff] }
  0x57   :  { %1458 = vmatpush.msra.mxu2 %v228_v49  ;;  %1477 = vmatpush.msra.mxu3 %v245_v50  ;;  %v209_v0 = vld [vmem:[%s6602_s3 + $0x4a0] sm:$0xff]  ;;  %v224_v1 = vld [vmem:[%s6602_s3 + $0x518] sm:$0xff]  ;;  %v191_v3 = vld [vmem:[%s6602_s3 + $0x410] sm:$0xff] }
  0x58   :  { %1419 = vmatpush.msra.mxu0 %v195_v51  ;;  %1438 = vmatpush.msra.mxu1 %v212_v52  ;;  %v241_v2 = vld [vmem:[%s6602_s3 + $0x5a0] sm:$0xff]  ;;  %v208_v4 = vld [vmem:[%s6602_s3 + $0x498] sm:$0xff]  ;;  %v223_v5 = vld [vmem:[%s6602_s3 + $0x510] sm:$0xff] }
  0x59   :  { %1459 = vmatpush.msra.mxu2 %v227_v53  ;;  %1478 = vmatpush.msra.mxu3 %v244_v54  ;;  %v240_v6 = vld [vmem:[%s6602_s3 + $0x598] sm:$0xff]  ;;  %v190_v7 = vld [vmem:[%s6602_s3 + $0x408] sm:$0xff]  ;;  %v207_v8 = vld [vmem:[%s6602_s3 + $0x490] sm:$0xff] }
  0x5a   :  { %1420 = vmatpush.msra.mxu0 %v194_v55  ;;  %1439 = vmatpush.msra.mxu1 %v211_v56  ;;  %v222_v9 = vld [vmem:[%s6602_s3 + $0x508] sm:$0xff]  ;;  %v239_v10 = vld [vmem:[%s6602_s3 + $0x590] sm:$0xff]  ;;  %v189_v11 = vld [vmem:[%s6602_s3 + $0x400] sm:$0xff] }
  0x5b   :  { %1460 = vmatpush.msra.mxu2 %v226_v57  ;;  %1479 = vmatpush.msra.mxu3 %v243_v58  ;;  %v206_v12 = vld [vmem:[%s6602_s3 + $0x488] sm:$0xff]  ;;  %v221_v13 = vld [vmem:[%s6602_s3 + $0x500] sm:$0xff]  ;;  %v268_v15 = vld [vmem:[%s6602_s3 + $0x678] sm:$0xff] }
  0x5c   :  { %1421 = vmatpush.msra.mxu0 %v193_v59  ;;  %1440 = vmatpush.msra.mxu1 %v210_v60  ;;  %v238_v14 = vld [vmem:[%s6602_s3 + $0x588] sm:$0xff]  ;;  %v300_v16 = vld [vmem:[%s6602_s3 + $0x778] sm:$0xff]  ;;  %v205_v17 = vld [vmem:[%s6602_s3 + $0x480] sm:$0xff] }
  0x5d   :  { %1461 = vmatpush.msra.mxu2 %v225_v61  ;;  %1480 = vmatpush.msra.mxu3 %v242_v62  ;;  %v237_v18 = vld [vmem:[%s6602_s3 + $0x580] sm:$0xff]  ;;  %v267_v19 = vld [vmem:[%s6602_s3 + $0x670] sm:$0xff]  ;;  %v284_v20 = vld [vmem:[%s6602_s3 + $0x6f8] sm:$0xff] }
  0x5e   :  { %1422 = vmatpush.msra.mxu0 %v192_v63  ;;  %1441 = vmatpush.msra.mxu1 %v209_v0  ;;  %v299_v21 = vld [vmem:[%s6602_s3 + $0x770] sm:$0xff]  ;;  %v316_v22 = vld [vmem:[%s6602_s3 + $0x7f8] sm:$0xff]  ;;  %v266_v23 = vld [vmem:[%s6602_s3 + $0x668] sm:$0xff] }
  0x5f   :  { %1462 = vmatpush.msra.mxu2 %v224_v1  ;;  %1481 = vmatpush.msra.mxu3 %v241_v2  ;;  %v283_v24 = vld [vmem:[%s6602_s3 + $0x6f0] sm:$0xff]  ;;  %v298_v25 = vld [vmem:[%s6602_s3 + $0x768] sm:$0xff]  ;;  %v3706_v29 = vld.sshfl [vmem:[#allocation1 + $0x20] sm:$0xff pattern:$0x73625140] }
  0x60   :  { %1423 = vmatpush.msra.mxu0 %v191_v3  ;;  %1442 = vmatpush.msra.mxu1 %v208_v4  ;;  %v3708_v30 = vld.sshfl [vmem:[#allocation1 + $0x30] sm:$0xff pattern:$0x73625140]  ;;  %v3710_v32 = vld.sshfl [vmem:[#allocation1 + $0x28] sm:$0xff pattern:$0x73625140] }
  0x61   :  { %1463 = vmatpush.msra.mxu2 %v223_v5  ;;  %1482 = vmatpush.msra.mxu3 %v240_v6  ;;  %v3718_v33 = vld.sshfl [vmem:[#allocation1 + $0x38] sm:$0xff pattern:$0x73625140]  ;;  %v297_v34 = vld [vmem:[%s6602_s3 + $0x760] sm:$0xff]  ;;  %v314_v35 = vld [vmem:[%s6602_s3 + $0x7e8] sm:$0xff] }
  0x62   :  { %1424 = vmatpush.msra.mxu0 %v190_v7  ;;  %1443 = vmatpush.msra.mxu1 %v207_v8  ;;  %v264_v36 = vld [vmem:[%s6602_s3 + $0x658] sm:$0xff]  ;;  %v281_v37 = vld [vmem:[%s6602_s3 + $0x6e0] sm:$0xff]  ;;  %v263_v40 = vld [vmem:[%s6602_s3 + $0x650] sm:$0xff] }
  0x63   :  { %1464 = vmatpush.msra.mxu2 %v222_v9  ;;  %1483 = vmatpush.msra.mxu3 %v239_v10  ;;  %v296_v38 = vld [vmem:[%s6602_s3 + $0x758] sm:$0xff]  ;;  %v313_v39 = vld [vmem:[%s6602_s3 + $0x7e0] sm:$0xff]  ;;  %v295_v42 = vld [vmem:[%s6602_s3 + $0x750] sm:$0xff] }
  0x64   :  { %1425 = vmatpush.msra.mxu0 %v189_v11  ;;  %1444 = vmatpush.msra.mxu1 %v206_v12  ;;  %v280_v41 = vld [vmem:[%s6602_s3 + $0x6d8] sm:$0xff]  ;;  %v262_v44 = vld [vmem:[%s6602_s3 + $0x648] sm:$0xff]  ;;  %v279_v45 = vld [vmem:[%s6602_s3 + $0x6d0] sm:$0xff] }
  0x65   :  { %1465 = vmatpush.msra.mxu2 %v221_v13  ;;  %1484 = vmatpush.msra.mxu3 %v238_v14  ;;  %v312_v43 = vld [vmem:[%s6602_s3 + $0x7d8] sm:$0xff]  ;;  %v294_v46 = vld [vmem:[%s6602_s3 + $0x748] sm:$0xff]  ;;  %v311_v47 = vld [vmem:[%s6602_s3 + $0x7d0] sm:$0xff] }
  0x66   :  { %1426 = vmatmul.f32.vlgmr.msra.gmra.mxu0 %v3504_v26  ;;  %1466 = vmatmul.f32.vlgmr.msra.gmra.mxu2 %v3506_v27  ;;  %v315_v26 = vld [vmem:[%s6602_s3 + $0x7f0] sm:$0xff]  ;;  %v265_v27 = vld [vmem:[%s6602_s3 + $0x660] sm:$0xff]  ;;  %v278_v49 = vld [vmem:[%s6602_s3 + $0x6c8] sm:$0xff] }
  0x67   :  { %1490 = vmatpush.msrb.mxu0 %v268_v15  ;;  %1530 = vmatpush.msrb.mxu2 %v300_v16  ;;  %v261_v48 = vld [vmem:[%s6602_s3 + $0x640] sm:$0xff]  ;;  %v310_v51 = vld [vmem:[%s6602_s3 + $0x7c8] sm:$0xff]  ;;  %v260_v52 = vld [vmem:[%s6602_s3 + $0x638] sm:$0xff] }
  0x68   :  { %1445 = vmatpush.msra.mxu1 %v205_v17  ;;  %1485 = vmatpush.msra.mxu3 %v237_v18  ;;  %v293_v50 = vld [vmem:[%s6602_s3 + $0x740] sm:$0xff]  ;;  %v292_v54 = vld [vmem:[%s6602_s3 + $0x738] sm:$0xff]  ;;  %v259_v56 = vld [vmem:[%s6602_s3 + $0x630] sm:$0xff] }
  0x69   :  { %1446 = vmatmul.f32.vlgmr.msra.gmra.mxu1 %v3508_v28  ;;  %1486 = vmatmul.f32.vlgmr.msra.gmra.mxu3 %v3516_v31  ;;  %v282_v28 = vld [vmem:[%s6602_s3 + $0x6e8] sm:$0xff]  ;;  %v277_v53 = vld [vmem:[%s6602_s3 + $0x6c0] sm:$0xff]  ;;  %v276_v57 = vld [vmem:[%s6602_s3 + $0x6b8] sm:$0xff] }
  0x6a   :  { %1491 = vmatpush.msrb.mxu0 %v267_v19  ;;  %1510 = vmatpush.msrb.mxu1 %v284_v20  ;;  %v50_v31 = vld [vmem:[%s6599_s0 + $0x28] sm:$0xff]  ;;  %v309_v55 = vld [vmem:[%s6602_s3 + $0x7c0] sm:$0xff]  ;;  %v291_v58 = vld [vmem:[%s6602_s3 + $0x730] sm:$0xff] }
  0x6b   :  { %1531 = vmatpush.msrb.mxu2 %v299_v21  ;;  %1550 = vmatpush.msrb.mxu3 %v316_v22  ;;  %1127 = vst [vmem:[#allocation1 + $0x20] ss:$4 sm:$0xff] %v50_v31  ;;  %v308_v59 = vld [vmem:[%s6602_s3 + $0x7b8] sm:$0xff]  ;;  %v258_v60 = vld [vmem:[%s6602_s3 + $0x628] sm:$0xff]  ;;  %v275_v61 = vld [vmem:[%s6602_s3 + $0x6b0] sm:$0xff] }
  0x6c   :  { %1492 = vmatpush.msrb.mxu0 %v266_v23  ;;  %1511 = vmatpush.msrb.mxu1 %v283_v24  ;;  %v290_v62 = vld [vmem:[%s6602_s3 + $0x728] sm:$0xff]  ;;  %v307_v63 = vld [vmem:[%s6602_s3 + $0x7b0] sm:$0xff]  ;;  %v257_v0 = vld [vmem:[%s6602_s3 + $0x620] sm:$0xff] }
  0x6d   :  { %1532 = vmatpush.msrb.mxu2 %v298_v25  ;;  %1551 = vmatpush.msrb.mxu3 %v315_v26  ;;  %v274_v1 = vld [vmem:[%s6602_s3 + $0x6a8] sm:$0xff]  ;;  %v289_v2 = vld [vmem:[%s6602_s3 + $0x720] sm:$0xff]  ;;  %v256_v4 = vld [vmem:[%s6602_s3 + $0x618] sm:$0xff] }
  0x6e   :  { %1493 = vmatpush.msrb.mxu0 %v265_v27  ;;  %1512 = vmatpush.msrb.mxu1 %v282_v28  ;;  %v306_v3 = vld [vmem:[%s6602_s3 + $0x7a8] sm:$0xff]  ;;  %v273_v5 = vld [vmem:[%s6602_s3 + $0x6a0] sm:$0xff]  ;;  %v288_v6 = vld [vmem:[%s6602_s3 + $0x718] sm:$0xff] }
  0x6f   :  { %1533 = vmatpush.msrb.mxu2 %v297_v34  ;;  %1552 = vmatpush.msrb.mxu3 %v314_v35  ;;  %v305_v7 = vld [vmem:[%s6602_s3 + $0x7a0] sm:$0xff]  ;;  %v255_v8 = vld [vmem:[%s6602_s3 + $0x610] sm:$0xff]  ;;  %v272_v9 = vld [vmem:[%s6602_s3 + $0x698] sm:$0xff] }
  0x70   :  { %1494 = vmatpush.msrb.mxu0 %v264_v36  ;;  %1513 = vmatpush.msrb.mxu1 %v281_v37  ;;  %v287_v10 = vld [vmem:[%s6602_s3 + $0x710] sm:$0xff]  ;;  %v304_v11 = vld [vmem:[%s6602_s3 + $0x798] sm:$0xff]  ;;  %v254_v12 = vld [vmem:[%s6602_s3 + $0x608] sm:$0xff] }
  0x71   :  { %1534 = vmatpush.msrb.mxu2 %v296_v38  ;;  %1553 = vmatpush.msrb.mxu3 %v313_v39  ;;  %v271_v13 = vld [vmem:[%s6602_s3 + $0x690] sm:$0xff]  ;;  %v286_v14 = vld [vmem:[%s6602_s3 + $0x708] sm:$0xff]  ;;  %v253_v16 = vld [vmem:[%s6602_s3 + $0x600] sm:$0xff] }
  0x72   :  { %1495 = vmatpush.msrb.mxu0 %v263_v40  ;;  %1514 = vmatpush.msrb.mxu1 %v280_v41  ;;  %v303_v15 = vld [vmem:[%s6602_s3 + $0x790] sm:$0xff]  ;;  %v270_v17 = vld [vmem:[%s6602_s3 + $0x688] sm:$0xff]  ;;  %v285_v18 = vld [vmem:[%s6602_s3 + $0x700] sm:$0xff] }
  0x73   :  { %1535 = vmatpush.msrb.mxu2 %v295_v42  ;;  %1554 = vmatpush.msrb.mxu3 %v312_v43  ;;  %v302_v19 = vld [vmem:[%s6602_s3 + $0x788] sm:$0xff]  ;;  %v332_v20 = vld [vmem:[%s6602_s3 + $0x878] sm:$0xff]  ;;  %v269_v22 = vld [vmem:[%s6602_s3 + $0x680] sm:$0xff] }
  0x74   :  { %1496 = vmatpush.msrb.mxu0 %v262_v44  ;;  %1515 = vmatpush.msrb.mxu1 %v279_v45  ;;  %v364_v21 = vld [vmem:[%s6602_s3 + $0x978] sm:$0xff]  ;;  %v301_v23 = vld [vmem:[%s6602_s3 + $0x780] sm:$0xff]  ;;  %v331_v24 = vld [vmem:[%s6602_s3 + $0x870] sm:$0xff] }
  0x75   :  { %1536 = vmatpush.msrb.mxu2 %v294_v46  ;;  %1555 = vmatpush.msrb.mxu3 %v311_v47  ;;  %v348_v25 = vld [vmem:[%s6602_s3 + $0x8f8] sm:$0xff]  ;;  %v363_v26 = vld [vmem:[%s6602_s3 + $0x970] sm:$0xff]  ;;  %v362_v28 = vld [vmem:[%s6602_s3 + $0x968] sm:$0xff] }
  0x76   :  { %1497 = vmatpush.msrb.mxu0 %v261_v48  ;;  %1516 = vmatpush.msrb.mxu1 %v278_v49  ;;  %v380_v27 = vld [vmem:[%s6602_s3 + $0x9f8] sm:$0xff]  ;;  %v329_v31 = vld [vmem:[%s6602_s3 + $0x860] sm:$0xff]  ;;  %v378_v35 = vld [vmem:[%s6602_s3 + $0x9e8] sm:$0xff] }
  0x77   :  { %1537 = vmatpush.msrb.mxu2 %v293_v50  ;;  %1556 = vmatpush.msrb.mxu3 %v310_v51  ;;  %v361_v34 = vld [vmem:[%s6602_s3 + $0x960] sm:$0xff]  ;;  %v328_v36 = vld [vmem:[%s6602_s3 + $0x858] sm:$0xff]  ;;  %v327_v40 = vld [vmem:[%s6602_s3 + $0x850] sm:$0xff] }
  0x78   :  { %1498 = vmatpush.msrb.mxu0 %v260_v52  ;;  %1517 = vmatpush.msrb.mxu1 %v277_v53  ;;  %v345_v37 = vld [vmem:[%s6602_s3 + $0x8e0] sm:$0xff]  ;;  %v360_v38 = vld [vmem:[%s6602_s3 + $0x958] sm:$0xff]  ;;  %v359_v42 = vld [vmem:[%s6602_s3 + $0x950] sm:$0xff] }
  0x79   :  { %1538 = vmatpush.msrb.mxu2 %v292_v54  ;;  %1557 = vmatpush.msrb.mxu3 %v309_v55  ;;  %v377_v39 = vld [vmem:[%s6602_s3 + $0x9e0] sm:$0xff]  ;;  %v344_v41 = vld [vmem:[%s6602_s3 + $0x8d8] sm:$0xff]  ;;  %v326_v44 = vld [vmem:[%s6602_s3 + $0x848] sm:$0xff] }
  0x7a   :  { %1499 = vmatpush.msrb.mxu0 %v259_v56  ;;  %1518 = vmatpush.msrb.mxu1 %v276_v57  ;;  %v376_v43 = vld [vmem:[%s6602_s3 + $0x9d8] sm:$0xff]  ;;  %v343_v45 = vld [vmem:[%s6602_s3 + $0x8d0] sm:$0xff]  ;;  %v358_v46 = vld [vmem:[%s6602_s3 + $0x948] sm:$0xff] }
  0x7b   :  { %1539 = vmatpush.msrb.mxu2 %v291_v58  ;;  %1558 = vmatpush.msrb.mxu3 %v308_v59  ;;  %v375_v47 = vld [vmem:[%s6602_s3 + $0x9d0] sm:$0xff]  ;;  %v325_v48 = vld [vmem:[%s6602_s3 + $0x840] sm:$0xff]  ;;  %v342_v49 = vld [vmem:[%s6602_s3 + $0x8c8] sm:$0xff] }
  0x7c   :  { %1500 = vmatpush.msrb.mxu0 %v258_v60  ;;  %1519 = vmatpush.msrb.mxu1 %v275_v61  ;;  %v357_v50 = vld [vmem:[%s6602_s3 + $0x940] sm:$0xff]  ;;  %v374_v51 = vld [vmem:[%s6602_s3 + $0x9c8] sm:$0xff]  ;;  %v324_v52 = vld [vmem:[%s6602_s3 + $0x838] sm:$0xff] }
  0x7d   :  { %1540 = vmatpush.msrb.mxu2 %v290_v62  ;;  %1559 = vmatpush.msrb.mxu3 %v307_v63  ;;  %v341_v53 = vld [vmem:[%s6602_s3 + $0x8c0] sm:$0xff]  ;;  %v356_v54 = vld [vmem:[%s6602_s3 + $0x938] sm:$0xff]  ;;  %v323_v56 = vld [vmem:[%s6602_s3 + $0x830] sm:$0xff] }
  0x7e   :  { %1501 = vmatpush.msrb.mxu0 %v257_v0  ;;  %1520 = vmatpush.msrb.mxu1 %v274_v1  ;;  %v373_v55 = vld [vmem:[%s6602_s3 + $0x9c0] sm:$0xff]  ;;  %v340_v57 = vld [vmem:[%s6602_s3 + $0x8b8] sm:$0xff]  ;;  %v355_v58 = vld [vmem:[%s6602_s3 + $0x930] sm:$0xff] }
  0x7f   :  { %1541 = vmatpush.msrb.mxu2 %v289_v2  ;;  %1560 = vmatpush.msrb.mxu3 %v306_v3  ;;  %v372_v59 = vld [vmem:[%s6602_s3 + $0x9b8] sm:$0xff]  ;;  %v322_v60 = vld [vmem:[%s6602_s3 + $0x828] sm:$0xff]  ;;  %v339_v61 = vld [vmem:[%s6602_s3 + $0x8b0] sm:$0xff] }
  0x80   :  { %1502 = vmatpush.msrb.mxu0 %v256_v4  ;;  %1521 = vmatpush.msrb.mxu1 %v273_v5  ;;  %v354_v62 = vld [vmem:[%s6602_s3 + $0x928] sm:$0xff]  ;;  %v371_v63 = vld [vmem:[%s6602_s3 + $0x9b0] sm:$0xff]  ;;  %v321_v0 = vld [vmem:[%s6602_s3 + $0x820] sm:$0xff] }
  0x81   :  { %1542 = vmatpush.msrb.mxu2 %v288_v6  ;;  %1561 = vmatpush.msrb.mxu3 %v305_v7  ;;  %v338_v1 = vld [vmem:[%s6602_s3 + $0x8a8] sm:$0xff]  ;;  %v353_v2 = vld [vmem:[%s6602_s3 + $0x920] sm:$0xff]  ;;  %v320_v4 = vld [vmem:[%s6602_s3 + $0x818] sm:$0xff] }
  0x82   :  { %1503 = vmatpush.msrb.mxu0 %v255_v8  ;;  %1522 = vmatpush.msrb.mxu1 %v272_v9  ;;  %v370_v3 = vld [vmem:[%s6602_s3 + $0x9a8] sm:$0xff]  ;;  %v337_v5 = vld [vmem:[%s6602_s3 + $0x8a0] sm:$0xff]  ;;  %v352_v6 = vld [vmem:[%s6602_s3 + $0x918] sm:$0xff] }
  0x83   :  { %1543 = vmatpush.msrb.mxu2 %v287_v10  ;;  %1562 = vmatpush.msrb.mxu3 %v304_v11  ;;  %v369_v7 = vld [vmem:[%s6602_s3 + $0x9a0] sm:$0xff]  ;;  %v319_v8 = vld [vmem:[%s6602_s3 + $0x810] sm:$0xff]  ;;  %v336_v9 = vld [vmem:[%s6602_s3 + $0x898] sm:$0xff] }
  0x84   :  { %1504 = vmatpush.msrb.mxu0 %v254_v12  ;;  %1523 = vmatpush.msrb.mxu1 %v271_v13  ;;  %v351_v10 = vld [vmem:[%s6602_s3 + $0x910] sm:$0xff]  ;;  %v368_v11 = vld [vmem:[%s6602_s3 + $0x998] sm:$0xff]  ;;  %v318_v12 = vld [vmem:[%s6602_s3 + $0x808] sm:$0xff] }
  0x85   :  { %1544 = vmatpush.msrb.mxu2 %v286_v14  ;;  %1563 = vmatpush.msrb.mxu3 %v303_v15  ;;  %v335_v13 = vld [vmem:[%s6602_s3 + $0x890] sm:$0xff]  ;;  %v350_v14 = vld [vmem:[%s6602_s3 + $0x908] sm:$0xff] }
  0x86   :  { %1505 = vmatpush.msrb.mxu0 %v253_v16  ;;  %1524 = vmatpush.msrb.mxu1 %v270_v17  ;;  %v367_v15 = vld [vmem:[%s6602_s3 + $0x990] sm:$0xff]  ;;  %v317_v16 = vld [vmem:[%s6602_s3 + $0x800] sm:$0xff]  ;;  %v334_v17 = vld [vmem:[%s6602_s3 + $0x888] sm:$0xff] }
  0x87   :  { %1545 = vmatpush.msrb.mxu2 %v285_v18  ;;  %1564 = vmatpush.msrb.mxu3 %v302_v19  ;;  %v349_v18 = vld [vmem:[%s6602_s3 + $0x900] sm:$0xff]  ;;  %v366_v19 = vld [vmem:[%s6602_s3 + $0x988] sm:$0xff] }
  0x88   :  { %1506 = vmatmul.f32.vlgmr.msrb.gmra.mxu0 %v3706_v29  ;;  %1546 = vmatmul.f32.vlgmr.msrb.gmra.mxu2 %v3708_v30  ;;  %v330_v29 = vld [vmem:[%s6602_s3 + $0x868] sm:$0xff]  ;;  %v347_v30 = vld [vmem:[%s6602_s3 + $0x8f0] sm:$0xff] }
  0x89   :  { %1570 = vmatpush.msra.mxu0 %v332_v20  ;;  %1610 = vmatpush.msra.mxu2 %v364_v21  ;;  %v1128_v20 = vld.sshfl [vmem:[#allocation1] sm:$0xff pattern:$0x73625140]  ;;  %v1130_v21 = vld.sshfl [vmem:[#allocation1 + $0x10] sm:$0xff pattern:$0x73625140] }
  0x8a   :  { %1525 = vmatpush.msrb.mxu1 %v269_v22  ;;  %1565 = vmatpush.msrb.mxu3 %v301_v23  ;;  %v396_v22 = vld [vmem:[%s6602_s3 + $0xa78] sm:$0xff] }
  0x8b   :  { %1526 = vmatmul.f32.vlgmr.msrb.gmra.mxu1 %v3710_v32  ;;  %1566 = vmatmul.f32.vlgmr.msrb.gmra.mxu3 %v3718_v33  ;;  %v379_v32 = vld [vmem:[%s6602_s3 + $0x9f0] sm:$0xff]  ;;  %v346_v33 = vld [vmem:[%s6602_s3 + $0x8e8] sm:$0xff]  ;;  %v428_v23 = vld [vmem:[%s6602_s3 + $0xb78] sm:$0xff] }
  0x8c   :  { %1571 = vmatpush.msra.mxu0 %v331_v24  ;;  %1590 = vmatpush.msra.mxu1 %v348_v25  ;;  %v333_v24 = vld [vmem:[%s6602_s3 + $0x880] sm:$0xff] }
  0x8d   :  { %1611 = vmatpush.msra.mxu2 %v363_v26  ;;  %1630 = vmatpush.msra.mxu3 %v380_v27  ;;  %v365_v25 = vld [vmem:[%s6602_s3 + $0x980] sm:$0xff]  ;;  %v1129_v26 = vld.sshfl [vmem:[#allocation1 + $0x8] sm:$0xff pattern:$0x73625140] }
  0x8e   :  { %1572 = vmatpush.msra.mxu0 %v330_v29  ;;  %1591 = vmatpush.msra.mxu1 %v347_v30  ;;  %v1131_v27 = vld.sshfl [vmem:[#allocation1 + $0x18] sm:$0xff pattern:$0x73625140]  ;;  %v395_v29 = vld [vmem:[%s6602_s3 + $0xa70] sm:$0xff] }
  0x8f   :  { %1612 = vmatpush.msra.mxu2 %v362_v28  ;;  %1631 = vmatpush.msra.mxu3 %v379_v32  ;;  %v412_v30 = vld [vmem:[%s6602_s3 + $0xaf8] sm:$0xff]  ;;  %v427_v28 = vld [vmem:[%s6602_s3 + $0xb70] sm:$0xff] }
  0x90   :  { %1573 = vmatpush.msra.mxu0 %v329_v31  ;;  %1592 = vmatpush.msra.mxu1 %v346_v33  ;;  %v444_v32 = vld [vmem:[%s6602_s3 + $0xbf8] sm:$0xff]  ;;  %v394_v31 = vld [vmem:[%s6602_s3 + $0xa68] sm:$0xff]  ;;  %v411_v33 = vld [vmem:[%s6602_s3 + $0xaf0] sm:$0xff] }
  0x91   :  { %1613 = vmatpush.msra.mxu2 %v361_v34  ;;  %1632 = vmatpush.msra.mxu3 %v378_v35  ;;  %v426_v34 = vld [vmem:[%s6602_s3 + $0xb68] sm:$0xff]  ;;  %v443_v35 = vld [vmem:[%s6602_s3 + $0xbf0] sm:$0xff] }
  0x92   :  { %1574 = vmatpush.msra.mxu0 %v328_v36  ;;  %1593 = vmatpush.msra.mxu1 %v345_v37  ;;  %v393_v36 = vld [vmem:[%s6602_s3 + $0xa60] sm:$0xff]  ;;  %v410_v37 = vld [vmem:[%s6602_s3 + $0xae8] sm:$0xff] }
  0x93   :  { %1614 = vmatpush.msra.mxu2 %v360_v38  ;;  %1633 = vmatpush.msra.mxu3 %v377_v39  ;;  %v425_v38 = vld [vmem:[%s6602_s3 + $0xb60] sm:$0xff]  ;;  %v442_v39 = vld [vmem:[%s6602_s3 + $0xbe8] sm:$0xff] }
  0x94   :  { %1575 = vmatpush.msra.mxu0 %v327_v40  ;;  %1594 = vmatpush.msra.mxu1 %v344_v41  ;;  %v392_v40 = vld [vmem:[%s6602_s3 + $0xa58] sm:$0xff]  ;;  %v409_v41 = vld [vmem:[%s6602_s3 + $0xae0] sm:$0xff] }
  0x95   :  { %1615 = vmatpush.msra.mxu2 %v359_v42  ;;  %1634 = vmatpush.msra.mxu3 %v376_v43  ;;  %v424_v42 = vld [vmem:[%s6602_s3 + $0xb58] sm:$0xff]  ;;  %v441_v43 = vld [vmem:[%s6602_s3 + $0xbe0] sm:$0xff] }
  0x96   :  { %1576 = vmatpush.msra.mxu0 %v326_v44  ;;  %1595 = vmatpush.msra.mxu1 %v343_v45  ;;  %v391_v44 = vld [vmem:[%s6602_s3 + $0xa50] sm:$0xff]  ;;  %v408_v45 = vld [vmem:[%s6602_s3 + $0xad8] sm:$0xff] }
  0x97   :  { %1616 = vmatpush.msra.mxu2 %v358_v46  ;;  %1635 = vmatpush.msra.mxu3 %v375_v47  ;;  %v423_v46 = vld [vmem:[%s6602_s3 + $0xb50] sm:$0xff]  ;;  %v440_v47 = vld [vmem:[%s6602_s3 + $0xbd8] sm:$0xff] }
  0x98   :  { %1577 = vmatpush.msra.mxu0 %v325_v48  ;;  %1596 = vmatpush.msra.mxu1 %v342_v49  ;;  %v390_v48 = vld [vmem:[%s6602_s3 + $0xa48] sm:$0xff]  ;;  %v407_v49 = vld [vmem:[%s6602_s3 + $0xad0] sm:$0xff] }
  0x99   :  { %1617 = vmatpush.msra.mxu2 %v357_v50  ;;  %1636 = vmatpush.msra.mxu3 %v374_v51  ;;  %v422_v50 = vld [vmem:[%s6602_s3 + $0xb48] sm:$0xff]  ;;  %v439_v51 = vld [vmem:[%s6602_s3 + $0xbd0] sm:$0xff] }
  0x9a   :  { %1578 = vmatpush.msra.mxu0 %v324_v52  ;;  %1597 = vmatpush.msra.mxu1 %v341_v53  ;;  %v389_v52 = vld [vmem:[%s6602_s3 + $0xa40] sm:$0xff]  ;;  %v406_v53 = vld [vmem:[%s6602_s3 + $0xac8] sm:$0xff] }
  0x9b   :  { %1618 = vmatpush.msra.mxu2 %v356_v54  ;;  %1637 = vmatpush.msra.mxu3 %v373_v55  ;;  %v421_v54 = vld [vmem:[%s6602_s3 + $0xb40] sm:$0xff]  ;;  %v438_v55 = vld [vmem:[%s6602_s3 + $0xbc8] sm:$0xff] }
  0x9c   :  { %1579 = vmatpush.msra.mxu0 %v323_v56  ;;  %1598 = vmatpush.msra.mxu1 %v340_v57  ;;  %v388_v56 = vld [vmem:[%s6602_s3 + $0xa38] sm:$0xff]  ;;  %v405_v57 = vld [vmem:[%s6602_s3 + $0xac0] sm:$0xff] }
  0x9d   :  { %1619 = vmatpush.msra.mxu2 %v355_v58  ;;  %1638 = vmatpush.msra.mxu3 %v372_v59  ;;  %v420_v58 = vld [vmem:[%s6602_s3 + $0xb38] sm:$0xff]  ;;  %v437_v59 = vld [vmem:[%s6602_s3 + $0xbc0] sm:$0xff] }
  0x9e   :  { %1580 = vmatpush.msra.mxu0 %v322_v60  ;;  %1599 = vmatpush.msra.mxu1 %v339_v61  ;;  %v387_v60 = vld [vmem:[%s6602_s3 + $0xa30] sm:$0xff]  ;;  %v404_v61 = vld [vmem:[%s6602_s3 + $0xab8] sm:$0xff] }
  0x9f   :  { %1620 = vmatpush.msra.mxu2 %v354_v62  ;;  %1639 = vmatpush.msra.mxu3 %v371_v63  ;;  %v419_v62 = vld [vmem:[%s6602_s3 + $0xb30] sm:$0xff]  ;;  %v436_v63 = vld [vmem:[%s6602_s3 + $0xbb8] sm:$0xff] }
  0xa0   :  { %1581 = vmatpush.msra.mxu0 %v321_v0  ;;  %1600 = vmatpush.msra.mxu1 %v338_v1  ;;  %v386_v0 = vld [vmem:[%s6602_s3 + $0xa28] sm:$0xff]  ;;  %v403_v1 = vld [vmem:[%s6602_s3 + $0xab0] sm:$0xff] }
  0xa1   :  { %1621 = vmatpush.msra.mxu2 %v353_v2  ;;  %1640 = vmatpush.msra.mxu3 %v370_v3  ;;  %v418_v2 = vld [vmem:[%s6602_s3 + $0xb28] sm:$0xff]  ;;  %v435_v3 = vld [vmem:[%s6602_s3 + $0xbb0] sm:$0xff] }
  0xa2   :  { %1582 = vmatpush.msra.mxu0 %v320_v4  ;;  %1601 = vmatpush.msra.mxu1 %v337_v5  ;;  %v385_v4 = vld [vmem:[%s6602_s3 + $0xa20] sm:$0xff]  ;;  %v402_v5 = vld [vmem:[%s6602_s3 + $0xaa8] sm:$0xff] }
  0xa3   :  { %1622 = vmatpush.msra.mxu2 %v352_v6  ;;  %1641 = vmatpush.msra.mxu3 %v369_v7  ;;  %v417_v6 = vld [vmem:[%s6602_s3 + $0xb20] sm:$0xff]  ;;  %v434_v7 = vld [vmem:[%s6602_s3 + $0xba8] sm:$0xff] }
  0xa4   :  { %1583 = vmatpush.msra.mxu0 %v319_v8  ;;  %1602 = vmatpush.msra.mxu1 %v336_v9  ;;  %v384_v8 = vld [vmem:[%s6602_s3 + $0xa18] sm:$0xff]  ;;  %v401_v9 = vld [vmem:[%s6602_s3 + $0xaa0] sm:$0xff] }
  0xa5   :  { %1623 = vmatpush.msra.mxu2 %v351_v10  ;;  %1642 = vmatpush.msra.mxu3 %v368_v11  ;;  %v416_v10 = vld [vmem:[%s6602_s3 + $0xb18] sm:$0xff]  ;;  %v433_v11 = vld [vmem:[%s6602_s3 + $0xba0] sm:$0xff] }
  0xa6   :  { %1584 = vmatpush.msra.mxu0 %v318_v12  ;;  %1603 = vmatpush.msra.mxu1 %v335_v13  ;;  %v383_v12 = vld [vmem:[%s6602_s3 + $0xa10] sm:$0xff]  ;;  %v400_v13 = vld [vmem:[%s6602_s3 + $0xa98] sm:$0xff] }
  0xa7   :  { %1624 = vmatpush.msra.mxu2 %v350_v14  ;;  %1643 = vmatpush.msra.mxu3 %v367_v15  ;;  %v415_v14 = vld [vmem:[%s6602_s3 + $0xb10] sm:$0xff]  ;;  %v432_v15 = vld [vmem:[%s6602_s3 + $0xb98] sm:$0xff] }
  0xa8   :  { %1585 = vmatpush.msra.mxu0 %v317_v16  ;;  %1604 = vmatpush.msra.mxu1 %v334_v17  ;;  %v382_v16 = vld [vmem:[%s6602_s3 + $0xa08] sm:$0xff]  ;;  %v399_v17 = vld [vmem:[%s6602_s3 + $0xa90] sm:$0xff] }
  0xa9   :  { %1625 = vmatpush.msra.mxu2 %v349_v18  ;;  %1644 = vmatpush.msra.mxu3 %v366_v19  ;;  %v51_v18 = vld [vmem:[%s6599_s0 + $0x30] sm:$0xff]  ;;  %v414_v19 = vld [vmem:[%s6602_s3 + $0xb08] sm:$0xff] }
  0xaa   :  { %1586 = vmatmul.f32.vlgmr.msra.gmra.mxu0 %v1128_v20  ;;  %1626 = vmatmul.f32.vlgmr.msra.gmra.mxu2 %v1130_v21  ;;  %v431_v20 = vld [vmem:[%s6602_s3 + $0xb90] sm:$0xff]  ;;  %1136 = vst [vmem:[#allocation1] ss:$4 sm:$0xff] %v51_v18  ;;  %v381_v21 = vld [vmem:[%s6602_s3 + $0xa00] sm:$0xff]  ;;  %v464_v18 = vld [vmem:[%s6602_s3 + $0xc98] sm:$0xff] }
  0xab   :  { %1650 = vmatpush.msrb.mxu0 %v396_v22  ;;  %1690 = vmatpush.msrb.mxu2 %v428_v23  ;;  %v398_v22 = vld [vmem:[%s6602_s3 + $0xa88] sm:$0xff]  ;;  %v413_v23 = vld [vmem:[%s6602_s3 + $0xb00] sm:$0xff] }
  0xac   :  { %1605 = vmatpush.msra.mxu1 %v333_v24  ;;  %1645 = vmatpush.msra.mxu3 %v365_v25  ;;  %v430_v24 = vld [vmem:[%s6602_s3 + $0xb88] sm:$0xff]  ;;  %v1132_v25 = vld.sshfl [vmem:[#allocation1 + $0x20] sm:$0xff pattern:$0x73625140] }
  0xad   :  { %1606 = vmatmul.f32.vlgmr.msra.gmra.mxu1 %v1129_v26  ;;  %1646 = vmatmul.f32.vlgmr.msra.gmra.mxu3 %v1131_v27  ;;  %v1134_v26 = vld.sshfl [vmem:[#allocation1 + $0x30] sm:$0xff pattern:$0x73625140]  ;;  %v460_v27 = vld [vmem:[%s6602_s3 + $0xc78] sm:$0xff] }
  0xae   :  { %1651 = vmatpush.msrb.mxu0 %v395_v29  ;;  %1670 = vmatpush.msrb.mxu1 %v412_v30  ;;  %v492_v29 = vld [vmem:[%s6602_s3 + $0xd78] sm:$0xff]  ;;  %v397_v30 = vld [vmem:[%s6602_s3 + $0xa80] sm:$0xff] }
  0xaf   :  { %1691 = vmatpush.msrb.mxu2 %v427_v28  ;;  %1710 = vmatpush.msrb.mxu3 %v444_v32  ;;  %v429_v28 = vld [vmem:[%s6602_s3 + $0xb80] sm:$0xff]  ;;  %v1133_v32 = vld.sshfl [vmem:[#allocation1 + $0x28] sm:$0xff pattern:$0x73625140] }
  0xb0   :  { %1652 = vmatpush.msrb.mxu0 %v394_v31  ;;  %1671 = vmatpush.msrb.mxu1 %v411_v33  ;;  %v1135_v31 = vld.sshfl [vmem:[#allocation1 + $0x38] sm:$0xff pattern:$0x73625140]  ;;  %v459_v33 = vld [vmem:[%s6602_s3 + $0xc70] sm:$0xff] }
  0xb1   :  { %1692 = vmatpush.msrb.mxu2 %v426_v34  ;;  %1711 = vmatpush.msrb.mxu3 %v443_v35  ;;  %v476_v34 = vld [vmem:[%s6602_s3 + $0xcf8] sm:$0xff]  ;;  %v491_v35 = vld [vmem:[%s6602_s3 + $0xd70] sm:$0xff] }
  0xb2   :  { %1653 = vmatpush.msrb.mxu0 %v393_v36  ;;  %1672 = vmatpush.msrb.mxu1 %v410_v37  ;;  %v508_v36 = vld [vmem:[%s6602_s3 + $0xdf8] sm:$0xff]  ;;  %v458_v37 = vld [vmem:[%s6602_s3 + $0xc68] sm:$0xff] }
  0xb3   :  { %1693 = vmatpush.msrb.mxu2 %v425_v38  ;;  %1712 = vmatpush.msrb.mxu3 %v442_v39  ;;  %v475_v38 = vld [vmem:[%s6602_s3 + $0xcf0] sm:$0xff]  ;;  %v490_v39 = vld [vmem:[%s6602_s3 + $0xd68] sm:$0xff] }
  0xb4   :  { %1654 = vmatpush.msrb.mxu0 %v392_v40  ;;  %1673 = vmatpush.msrb.mxu1 %v409_v41  ;;  %v507_v40 = vld [vmem:[%s6602_s3 + $0xdf0] sm:$0xff]  ;;  %v457_v41 = vld [vmem:[%s6602_s3 + $0xc60] sm:$0xff] }
  0xb5   :  { %1694 = vmatpush.msrb.mxu2 %v424_v42  ;;  %1713 = vmatpush.msrb.mxu3 %v441_v43  ;;  %v474_v42 = vld [vmem:[%s6602_s3 + $0xce8] sm:$0xff]  ;;  %v489_v43 = vld [vmem:[%s6602_s3 + $0xd60] sm:$0xff] }
  0xb6   :  { %1655 = vmatpush.msrb.mxu0 %v391_v44  ;;  %1674 = vmatpush.msrb.mxu1 %v408_v45  ;;  %v506_v44 = vld [vmem:[%s6602_s3 + $0xde8] sm:$0xff]  ;;  %v456_v45 = vld [vmem:[%s6602_s3 + $0xc58] sm:$0xff] }
  0xb7   :  { %1695 = vmatpush.msrb.mxu2 %v423_v46  ;;  %1714 = vmatpush.msrb.mxu3 %v440_v47  ;;  %v473_v46 = vld [vmem:[%s6602_s3 + $0xce0] sm:$0xff]  ;;  %v488_v47 = vld [vmem:[%s6602_s3 + $0xd58] sm:$0xff] }
  0xb8   :  { %1656 = vmatpush.msrb.mxu0 %v390_v48  ;;  %1675 = vmatpush.msrb.mxu1 %v407_v49  ;;  %v505_v48 = vld [vmem:[%s6602_s3 + $0xde0] sm:$0xff]  ;;  %v455_v49 = vld [vmem:[%s6602_s3 + $0xc50] sm:$0xff] }
  0xb9   :  { %1696 = vmatpush.msrb.mxu2 %v422_v50  ;;  %1715 = vmatpush.msrb.mxu3 %v439_v51  ;;  %v472_v50 = vld [vmem:[%s6602_s3 + $0xcd8] sm:$0xff]  ;;  %v487_v51 = vld [vmem:[%s6602_s3 + $0xd50] sm:$0xff] }
  0xba   :  { %1657 = vmatpush.msrb.mxu0 %v389_v52  ;;  %1676 = vmatpush.msrb.mxu1 %v406_v53  ;;  %v504_v52 = vld [vmem:[%s6602_s3 + $0xdd8] sm:$0xff]  ;;  %v454_v53 = vld [vmem:[%s6602_s3 + $0xc48] sm:$0xff] }
  0xbb   :  { %1697 = vmatpush.msrb.mxu2 %v421_v54  ;;  %1716 = vmatpush.msrb.mxu3 %v438_v55  ;;  %v471_v54 = vld [vmem:[%s6602_s3 + $0xcd0] sm:$0xff]  ;;  %v486_v55 = vld [vmem:[%s6602_s3 + $0xd48] sm:$0xff] }
  0xbc   :  { %1658 = vmatpush.msrb.mxu0 %v388_v56  ;;  %1677 = vmatpush.msrb.mxu1 %v405_v57  ;;  %v503_v56 = vld [vmem:[%s6602_s3 + $0xdd0] sm:$0xff]  ;;  %v453_v57 = vld [vmem:[%s6602_s3 + $0xc40] sm:$0xff] }
  0xbd   :  { %1698 = vmatpush.msrb.mxu2 %v420_v58  ;;  %1717 = vmatpush.msrb.mxu3 %v437_v59  ;;  %v470_v58 = vld [vmem:[%s6602_s3 + $0xcc8] sm:$0xff]  ;;  %v485_v59 = vld [vmem:[%s6602_s3 + $0xd40] sm:$0xff] }
  0xbe   :  { %1659 = vmatpush.msrb.mxu0 %v387_v60  ;;  %1678 = vmatpush.msrb.mxu1 %v404_v61  ;;  %v502_v60 = vld [vmem:[%s6602_s3 + $0xdc8] sm:$0xff]  ;;  %v452_v61 = vld [vmem:[%s6602_s3 + $0xc38] sm:$0xff] }
  0xbf   :  { %1699 = vmatpush.msrb.mxu2 %v419_v62  ;;  %1718 = vmatpush.msrb.mxu3 %v436_v63  ;;  %v469_v62 = vld [vmem:[%s6602_s3 + $0xcc0] sm:$0xff]  ;;  %v484_v63 = vld [vmem:[%s6602_s3 + $0xd38] sm:$0xff] }
  0xc0   :  { %1660 = vmatpush.msrb.mxu0 %v386_v0  ;;  %1679 = vmatpush.msrb.mxu1 %v403_v1  ;;  %v501_v0 = vld [vmem:[%s6602_s3 + $0xdc0] sm:$0xff]  ;;  %v451_v1 = vld [vmem:[%s6602_s3 + $0xc30] sm:$0xff] }
  0xc1   :  { %1700 = vmatpush.msrb.mxu2 %v418_v2  ;;  %1719 = vmatpush.msrb.mxu3 %v435_v3  ;;  %v468_v2 = vld [vmem:[%s6602_s3 + $0xcb8] sm:$0xff]  ;;  %v483_v3 = vld [vmem:[%s6602_s3 + $0xd30] sm:$0xff] }
  0xc2   :  { %1661 = vmatpush.msrb.mxu0 %v385_v4  ;;  %1680 = vmatpush.msrb.mxu1 %v402_v5  ;;  %v500_v4 = vld [vmem:[%s6602_s3 + $0xdb8] sm:$0xff]  ;;  %v450_v5 = vld [vmem:[%s6602_s3 + $0xc28] sm:$0xff] }
  0xc3   :  { %1701 = vmatpush.msrb.mxu2 %v417_v6  ;;  %1720 = vmatpush.msrb.mxu3 %v434_v7  ;;  %v467_v6 = vld [vmem:[%s6602_s3 + $0xcb0] sm:$0xff]  ;;  %v482_v7 = vld [vmem:[%s6602_s3 + $0xd28] sm:$0xff] }
  0xc4   :  { %1662 = vmatpush.msrb.mxu0 %v384_v8  ;;  %1681 = vmatpush.msrb.mxu1 %v401_v9  ;;  %v499_v8 = vld [vmem:[%s6602_s3 + $0xdb0] sm:$0xff]  ;;  %v449_v9 = vld [vmem:[%s6602_s3 + $0xc20] sm:$0xff] }
  0xc5   :  { %1702 = vmatpush.msrb.mxu2 %v416_v10  ;;  %1721 = vmatpush.msrb.mxu3 %v433_v11  ;;  %v466_v10 = vld [vmem:[%s6602_s3 + $0xca8] sm:$0xff]  ;;  %v481_v11 = vld [vmem:[%s6602_s3 + $0xd20] sm:$0xff] }
  0xc6   :  { %1663 = vmatpush.msrb.mxu0 %v383_v12  ;;  %1682 = vmatpush.msrb.mxu1 %v400_v13  ;;  %v498_v12 = vld [vmem:[%s6602_s3 + $0xda8] sm:$0xff]  ;;  %v448_v13 = vld [vmem:[%s6602_s3 + $0xc18] sm:$0xff] }
  0xc7   :  { %1703 = vmatpush.msrb.mxu2 %v415_v14  ;;  %1722 = vmatpush.msrb.mxu3 %v432_v15  ;;  %v465_v14 = vld [vmem:[%s6602_s3 + $0xca0] sm:$0xff]  ;;  %v480_v15 = vld [vmem:[%s6602_s3 + $0xd18] sm:$0xff] }
  0xc8   :  { %1664 = vmatpush.msrb.mxu0 %v382_v16  ;;  %1683 = vmatpush.msrb.mxu1 %v399_v17  ;;  %v497_v16 = vld [vmem:[%s6602_s3 + $0xda0] sm:$0xff]  ;;  %v447_v17 = vld [vmem:[%s6602_s3 + $0xc10] sm:$0xff] }
  0xc9   :  { %1704 = vmatpush.msrb.mxu2 %v414_v19  ;;  %1723 = vmatpush.msrb.mxu3 %v431_v20  ;;  %v479_v19 = vld [vmem:[%s6602_s3 + $0xd10] sm:$0xff]  ;;  %v496_v20 = vld [vmem:[%s6602_s3 + $0xd98] sm:$0xff] }
  0xca   :  { %1665 = vmatpush.msrb.mxu0 %v381_v21  ;;  %1684 = vmatpush.msrb.mxu1 %v398_v22  ;;  %v446_v21 = vld [vmem:[%s6602_s3 + $0xc08] sm:$0xff]  ;;  %v463_v22 = vld [vmem:[%s6602_s3 + $0xc90] sm:$0xff] }
  0xcb   :  { %1705 = vmatpush.msrb.mxu2 %v413_v23  ;;  %1724 = vmatpush.msrb.mxu3 %v430_v24  ;;  %v52_v23 = vld [vmem:[%s6599_s0 + $0x38] sm:$0xff]  ;;  %v478_v24 = vld [vmem:[%s6602_s3 + $0xd08] sm:$0xff] }
  0xcc   :  { %1666 = vmatmul.f32.vlgmr.msrb.gmra.mxu0 %v1132_v25  ;;  %1706 = vmatmul.f32.vlgmr.msrb.gmra.mxu2 %v1134_v26  ;;  %v495_v25 = vld [vmem:[%s6602_s3 + $0xd90] sm:$0xff]  ;;  %1137 = vst [vmem:[#allocation1 + $0x20] ss:$4 sm:$0xff] %v52_v23  ;;  %v445_v26 = vld [vmem:[%s6602_s3 + $0xc00] sm:$0xff]  ;;  %v528_v23 = vld [vmem:[%s6602_s3 + $0xe98] sm:$0xff] }
  0xcd   :  { %1730 = vmatpush.msra.mxu0 %v460_v27  ;;  %1770 = vmatpush.msra.mxu2 %v492_v29  ;;  %v462_v27 = vld [vmem:[%s6602_s3 + $0xc88] sm:$0xff]  ;;  %v477_v29 = vld [vmem:[%s6602_s3 + $0xd00] sm:$0xff] }
  0xce   :  { %1685 = vmatpush.msrb.mxu1 %v397_v30  ;;  %1725 = vmatpush.msrb.mxu3 %v429_v28  ;;  %v494_v30 = vld [vmem:[%s6602_s3 + $0xd88] sm:$0xff]  ;;  %v1138_v28 = vld.sshfl [vmem:[#allocation1] sm:$0xff pattern:$0x73625140] }
  0xcf   :  { %1686 = vmatmul.f32.vlgmr.msrb.gmra.mxu1 %v1133_v32  ;;  %1726 = vmatmul.f32.vlgmr.msrb.gmra.mxu3 %v1135_v31  ;;  %v1140_v32 = vld.sshfl [vmem:[#allocation1 + $0x10] sm:$0xff pattern:$0x73625140]  ;;  %v524_v31 = vld [vmem:[%s6602_s3 + $0xe78] sm:$0xff] }
  0xd0   :  { %1731 = vmatpush.msra.mxu0 %v459_v33  ;;  %1750 = vmatpush.msra.mxu1 %v476_v34  ;;  %v556_v33 = vld [vmem:[%s6602_s3 + $0xf78] sm:$0xff]  ;;  %v461_v34 = vld [vmem:[%s6602_s3 + $0xc80] sm:$0xff] }
  0xd1   :  { %1771 = vmatpush.msra.mxu2 %v491_v35  ;;  %1790 = vmatpush.msra.mxu3 %v508_v36  ;;  %v493_v35 = vld [vmem:[%s6602_s3 + $0xd80] sm:$0xff]  ;;  %v1139_v36 = vld.sshfl [vmem:[#allocation1 + $0x8] sm:$0xff pattern:$0x73625140] }
  0xd2   :  { %1732 = vmatpush.msra.mxu0 %v458_v37  ;;  %1751 = vmatpush.msra.mxu1 %v475_v38  ;;  %v1141_v37 = vld.sshfl [vmem:[#allocation1 + $0x18] sm:$0xff pattern:$0x73625140]  ;;  %v523_v38 = vld [vmem:[%s6602_s3 + $0xe70] sm:$0xff] }
  0xd3   :  { %1772 = vmatpush.msra.mxu2 %v490_v39  ;;  %1791 = vmatpush.msra.mxu3 %v507_v40  ;;  %v540_v39 = vld [vmem:[%s6602_s3 + $0xef8] sm:$0xff]  ;;  %v555_v40 = vld [vmem:[%s6602_s3 + $0xf70] sm:$0xff] }
  0xd4   :  { %1733 = vmatpush.msra.mxu0 %v457_v41  ;;  %1752 = vmatpush.msra.mxu1 %v474_v42  ;;  %v572_v41 = vld [vmem:[%s6602_s3 + $0xff8] sm:$0xff]  ;;  %v522_v42 = vld [vmem:[%s6602_s3 + $0xe68] sm:$0xff] }
  0xd5   :  { %1773 = vmatpush.msra.mxu2 %v489_v43  ;;  %1792 = vmatpush.msra.mxu3 %v506_v44  ;;  %v539_v43 = vld [vmem:[%s6602_s3 + $0xef0] sm:$0xff]  ;;  %v554_v44 = vld [vmem:[%s6602_s3 + $0xf68] sm:$0xff] }
  0xd6   :  { %1734 = vmatpush.msra.mxu0 %v456_v45  ;;  %1753 = vmatpush.msra.mxu1 %v473_v46  ;;  %v571_v45 = vld [vmem:[%s6602_s3 + $0xff0] sm:$0xff]  ;;  %v521_v46 = vld [vmem:[%s6602_s3 + $0xe60] sm:$0xff] }
  0xd7   :  { %1774 = vmatpush.msra.mxu2 %v488_v47  ;;  %1793 = vmatpush.msra.mxu3 %v505_v48  ;;  %v538_v47 = vld [vmem:[%s6602_s3 + $0xee8] sm:$0xff]  ;;  %v553_v48 = vld [vmem:[%s6602_s3 + $0xf60] sm:$0xff] }
  0xd8   :  { %1735 = vmatpush.msra.mxu0 %v455_v49  ;;  %1754 = vmatpush.msra.mxu1 %v472_v50  ;;  %v570_v49 = vld [vmem:[%s6602_s3 + $0xfe8] sm:$0xff]  ;;  %v520_v50 = vld [vmem:[%s6602_s3 + $0xe58] sm:$0xff] }
  0xd9   :  { %1775 = vmatpush.msra.mxu2 %v487_v51  ;;  %1794 = vmatpush.msra.mxu3 %v504_v52  ;;  %v537_v51 = vld [vmem:[%s6602_s3 + $0xee0] sm:$0xff]  ;;  %v552_v52 = vld [vmem:[%s6602_s3 + $0xf58] sm:$0xff] }
  0xda   :  { %1736 = vmatpush.msra.mxu0 %v454_v53  ;;  %1755 = vmatpush.msra.mxu1 %v471_v54  ;;  %v569_v53 = vld [vmem:[%s6602_s3 + $0xfe0] sm:$0xff]  ;;  %v519_v54 = vld [vmem:[%s6602_s3 + $0xe50] sm:$0xff] }
  0xdb   :  { %1776 = vmatpush.msra.mxu2 %v486_v55  ;;  %1795 = vmatpush.msra.mxu3 %v503_v56  ;;  %v536_v55 = vld [vmem:[%s6602_s3 + $0xed8] sm:$0xff]  ;;  %v551_v56 = vld [vmem:[%s6602_s3 + $0xf50] sm:$0xff] }
  0xdc   :  { %1737 = vmatpush.msra.mxu0 %v453_v57  ;;  %1756 = vmatpush.msra.mxu1 %v470_v58  ;;  %v568_v57 = vld [vmem:[%s6602_s3 + $0xfd8] sm:$0xff]  ;;  %v518_v58 = vld [vmem:[%s6602_s3 + $0xe48] sm:$0xff] }
  0xdd   :  { %1777 = vmatpush.msra.mxu2 %v485_v59  ;;  %1796 = vmatpush.msra.mxu3 %v502_v60  ;;  %v535_v59 = vld [vmem:[%s6602_s3 + $0xed0] sm:$0xff]  ;;  %v550_v60 = vld [vmem:[%s6602_s3 + $0xf48] sm:$0xff] }
  0xde   :  { %1738 = vmatpush.msra.mxu0 %v452_v61  ;;  %1757 = vmatpush.msra.mxu1 %v469_v62  ;;  %v567_v61 = vld [vmem:[%s6602_s3 + $0xfd0] sm:$0xff]  ;;  %v517_v62 = vld [vmem:[%s6602_s3 + $0xe40] sm:$0xff] }
  0xdf   :  { %1778 = vmatpush.msra.mxu2 %v484_v63  ;;  %1797 = vmatpush.msra.mxu3 %v501_v0  ;;  %v534_v63 = vld [vmem:[%s6602_s3 + $0xec8] sm:$0xff]  ;;  %v549_v0 = vld [vmem:[%s6602_s3 + $0xf40] sm:$0xff] }
  0xe0   :  { %1739 = vmatpush.msra.mxu0 %v451_v1  ;;  %1758 = vmatpush.msra.mxu1 %v468_v2  ;;  %v566_v1 = vld [vmem:[%s6602_s3 + $0xfc8] sm:$0xff]  ;;  %v516_v2 = vld [vmem:[%s6602_s3 + $0xe38] sm:$0xff] }
  0xe1   :  { %1779 = vmatpush.msra.mxu2 %v483_v3  ;;  %1798 = vmatpush.msra.mxu3 %v500_v4  ;;  %v533_v3 = vld [vmem:[%s6602_s3 + $0xec0] sm:$0xff]  ;;  %v548_v4 = vld [vmem:[%s6602_s3 + $0xf38] sm:$0xff] }
  0xe2   :  { %1740 = vmatpush.msra.mxu0 %v450_v5  ;;  %1759 = vmatpush.msra.mxu1 %v467_v6  ;;  %v565_v5 = vld [vmem:[%s6602_s3 + $0xfc0] sm:$0xff]  ;;  %v515_v6 = vld [vmem:[%s6602_s3 + $0xe30] sm:$0xff] }
  0xe3   :  { %1780 = vmatpush.msra.mxu2 %v482_v7  ;;  %1799 = vmatpush.msra.mxu3 %v499_v8  ;;  %v532_v7 = vld [vmem:[%s6602_s3 + $0xeb8] sm:$0xff]  ;;  %v547_v8 = vld [vmem:[%s6602_s3 + $0xf30] sm:$0xff] }
  0xe4   :  { %1741 = vmatpush.msra.mxu0 %v449_v9  ;;  %1760 = vmatpush.msra.mxu1 %v466_v10  ;;  %v564_v9 = vld [vmem:[%s6602_s3 + $0xfb8] sm:$0xff]  ;;  %v514_v10 = vld [vmem:[%s6602_s3 + $0xe28] sm:$0xff] }
  0xe5   :  { %1781 = vmatpush.msra.mxu2 %v481_v11  ;;  %1800 = vmatpush.msra.mxu3 %v498_v12  ;;  %v531_v11 = vld [vmem:[%s6602_s3 + $0xeb0] sm:$0xff]  ;;  %v546_v12 = vld [vmem:[%s6602_s3 + $0xf28] sm:$0xff] }
  0xe6   :  { %1742 = vmatpush.msra.mxu0 %v448_v13  ;;  %1761 = vmatpush.msra.mxu1 %v465_v14  ;;  %v563_v13 = vld [vmem:[%s6602_s3 + $0xfb0] sm:$0xff]  ;;  %v513_v14 = vld [vmem:[%s6602_s3 + $0xe20] sm:$0xff] }
  0xe7   :  { %1782 = vmatpush.msra.mxu2 %v480_v15  ;;  %1801 = vmatpush.msra.mxu3 %v497_v16  ;;  %v530_v15 = vld [vmem:[%s6602_s3 + $0xea8] sm:$0xff]  ;;  %v545_v16 = vld [vmem:[%s6602_s3 + $0xf20] sm:$0xff] }
  0xe8   :  { %1743 = vmatpush.msra.mxu0 %v447_v17  ;;  %1762 = vmatpush.msra.mxu1 %v464_v18  ;;  %v562_v17 = vld [vmem:[%s6602_s3 + $0xfa8] sm:$0xff]  ;;  %v512_v18 = vld [vmem:[%s6602_s3 + $0xe18] sm:$0xff] }
  0xe9   :  { %1783 = vmatpush.msra.mxu2 %v479_v19  ;;  %1802 = vmatpush.msra.mxu3 %v496_v20  ;;  %v529_v19 = vld [vmem:[%s6602_s3 + $0xea0] sm:$0xff]  ;;  %v544_v20 = vld [vmem:[%s6602_s3 + $0xf18] sm:$0xff] }
  0xea   :  { %1744 = vmatpush.msra.mxu0 %v446_v21  ;;  %1763 = vmatpush.msra.mxu1 %v463_v22  ;;  %v561_v21 = vld [vmem:[%s6602_s3 + $0xfa0] sm:$0xff]  ;;  %v511_v22 = vld [vmem:[%s6602_s3 + $0xe10] sm:$0xff] }
  0xeb   :  { %1784 = vmatpush.msra.mxu2 %v478_v24  ;;  %1803 = vmatpush.msra.mxu3 %v495_v25  ;;  %v543_v24 = vld [vmem:[%s6602_s3 + $0xf10] sm:$0xff]  ;;  %v560_v25 = vld [vmem:[%s6602_s3 + $0xf98] sm:$0xff] }
  0xec   :  { %1745 = vmatpush.msra.mxu0 %v445_v26  ;;  %1764 = vmatpush.msra.mxu1 %v462_v27  ;;  %v510_v26 = vld [vmem:[%s6602_s3 + $0xe08] sm:$0xff]  ;;  %v527_v27 = vld [vmem:[%s6602_s3 + $0xe90] sm:$0xff] }
  0xed   :  { %1785 = vmatpush.msra.mxu2 %v477_v29  ;;  %1804 = vmatpush.msra.mxu3 %v494_v30  ;;  %v53_v29 = vld [vmem:[%s6599_s0 + $0x40] sm:$0xff]  ;;  %v542_v30 = vld [vmem:[%s6602_s3 + $0xf08] sm:$0xff] }
  0xee   :  { %1746 = vmatmul.f32.vlgmr.msra.gmra.mxu0 %v1138_v28  ;;  %1786 = vmatmul.f32.vlgmr.msra.gmra.mxu2 %v1140_v32  ;;  %v559_v28 = vld [vmem:[%s6602_s3 + $0xf90] sm:$0xff]  ;;  %1146 = vst [vmem:[#allocation1] ss:$4 sm:$0xff] %v53_v29  ;;  %v509_v32 = vld [vmem:[%s6602_s3 + $0xe00] sm:$0xff]  ;;  %v592_v29 = vld [vmem:[%s6602_s3 + $0x1098] sm:$0xff] }
  0xef   :  { %1810 = vmatpush.msrb.mxu0 %v524_v31  ;;  %1850 = vmatpush.msrb.mxu2 %v556_v33  ;;  %v526_v31 = vld [vmem:[%s6602_s3 + $0xe88] sm:$0xff]  ;;  %v541_v33 = vld [vmem:[%s6602_s3 + $0xf00] sm:$0xff] }
  0xf0   :  { %1765 = vmatpush.msra.mxu1 %v461_v34  ;;  %1805 = vmatpush.msra.mxu3 %v493_v35  ;;  %v558_v34 = vld [vmem:[%s6602_s3 + $0xf88] sm:$0xff]  ;;  %v1142_v35 = vld.sshfl [vmem:[#allocation1 + $0x20] sm:$0xff pattern:$0x73625140] }
  0xf1   :  { %1766 = vmatmul.f32.vlgmr.msra.gmra.mxu1 %v1139_v36  ;;  %1806 = vmatmul.f32.vlgmr.msra.gmra.mxu3 %v1141_v37  ;;  %v1144_v36 = vld.sshfl [vmem:[#allocation1 + $0x30] sm:$0xff pattern:$0x73625140]  ;;  %v588_v37 = vld [vmem:[%s6602_s3 + $0x1078] sm:$0xff] }
  0xf2   :  { %1811 = vmatpush.msrb.mxu0 %v523_v38  ;;  %1830 = vmatpush.msrb.mxu1 %v540_v39  ;;  %v620_v38 = vld [vmem:[%s6602_s3 + $0x1178] sm:$0xff]  ;;  %v525_v39 = vld [vmem:[%s6602_s3 + $0xe80] sm:$0xff] }
  0xf3   :  { %1851 = vmatpush.msrb.mxu2 %v555_v40  ;;  %1870 = vmatpush.msrb.mxu3 %v572_v41  ;;  %v557_v40 = vld [vmem:[%s6602_s3 + $0xf80] sm:$0xff]  ;;  %v1143_v41 = vld.sshfl [vmem:[#allocation1 + $0x28] sm:$0xff pattern:$0x73625140] }
  0xf4   :  { %1812 = vmatpush.msrb.mxu0 %v522_v42  ;;  %1831 = vmatpush.msrb.mxu1 %v539_v43  ;;  %v1145_v42 = vld.sshfl [vmem:[#allocation1 + $0x38] sm:$0xff pattern:$0x73625140]  ;;  %v587_v43 = vld [vmem:[%s6602_s3 + $0x1070] sm:$0xff] }
  0xf5   :  { %1852 = vmatpush.msrb.mxu2 %v554_v44  ;;  %1871 = vmatpush.msrb.mxu3 %v571_v45  ;;  %v604_v44 = vld [vmem:[%s6602_s3 + $0x10f8] sm:$0xff]  ;;  %v619_v45 = vld [vmem:[%s6602_s3 + $0x1170] sm:$0xff] }
  0xf6   :  { %1813 = vmatpush.msrb.mxu0 %v521_v46  ;;  %1832 = vmatpush.msrb.mxu1 %v538_v47  ;;  %v636_v46 = vld [vmem:[%s6602_s3 + $0x11f8] sm:$0xff]  ;;  %v586_v47 = vld [vmem:[%s6602_s3 + $0x1068] sm:$0xff] }
  0xf7   :  { %1853 = vmatpush.msrb.mxu2 %v553_v48  ;;  %1872 = vmatpush.msrb.mxu3 %v570_v49  ;;  %v603_v48 = vld [vmem:[%s6602_s3 + $0x10f0] sm:$0xff]  ;;  %v618_v49 = vld [vmem:[%s6602_s3 + $0x1168] sm:$0xff] }
  0xf8   :  { %1814 = vmatpush.msrb.mxu0 %v520_v50  ;;  %1833 = vmatpush.msrb.mxu1 %v537_v51  ;;  %v635_v50 = vld [vmem:[%s6602_s3 + $0x11f0] sm:$0xff]  ;;  %v585_v51 = vld [vmem:[%s6602_s3 + $0x1060] sm:$0xff] }
  0xf9   :  { %1854 = vmatpush.msrb.mxu2 %v552_v52  ;;  %1873 = vmatpush.msrb.mxu3 %v569_v53  ;;  %v602_v52 = vld [vmem:[%s6602_s3 + $0x10e8] sm:$0xff]  ;;  %v617_v53 = vld [vmem:[%s6602_s3 + $0x1160] sm:$0xff] }
  0xfa   :  { %1815 = vmatpush.msrb.mxu0 %v519_v54  ;;  %1834 = vmatpush.msrb.mxu1 %v536_v55  ;;  %v634_v54 = vld [vmem:[%s6602_s3 + $0x11e8] sm:$0xff]  ;;  %v584_v55 = vld [vmem:[%s6602_s3 + $0x1058] sm:$0xff] }
  0xfb   :  { %1855 = vmatpush.msrb.mxu2 %v551_v56  ;;  %1874 = vmatpush.msrb.mxu3 %v568_v57  ;;  %v601_v56 = vld [vmem:[%s6602_s3 + $0x10e0] sm:$0xff]  ;;  %v616_v57 = vld [vmem:[%s6602_s3 + $0x1158] sm:$0xff] }
  0xfc   :  { %1816 = vmatpush.msrb.mxu0 %v518_v58  ;;  %1835 = vmatpush.msrb.mxu1 %v535_v59  ;;  %v633_v58 = vld [vmem:[%s6602_s3 + $0x11e0] sm:$0xff]  ;;  %v583_v59 = vld [vmem:[%s6602_s3 + $0x1050] sm:$0xff] }
  0xfd   :  { %1856 = vmatpush.msrb.mxu2 %v550_v60  ;;  %1875 = vmatpush.msrb.mxu3 %v567_v61  ;;  %v600_v60 = vld [vmem:[%s6602_s3 + $0x10d8] sm:$0xff]  ;;  %v615_v61 = vld [vmem:[%s6602_s3 + $0x1150] sm:$0xff] }
  0xfe   :  { %1817 = vmatpush.msrb.mxu0 %v517_v62  ;;  %1836 = vmatpush.msrb.mxu1 %v534_v63  ;;  %v632_v62 = vld [vmem:[%s6602_s3 + $0x11d8] sm:$0xff]  ;;  %v582_v63 = vld [vmem:[%s6602_s3 + $0x1048] sm:$0xff] }
  0xff   :  { %1857 = vmatpush.msrb.mxu2 %v549_v0  ;;  %1876 = vmatpush.msrb.mxu3 %v566_v1  ;;  %v599_v0 = vld [vmem:[%s6602_s3 + $0x10d0] sm:$0xff]  ;;  %v614_v1 = vld [vmem:[%s6602_s3 + $0x1148] sm:$0xff] }
 0x100   :  { %1818 = vmatpush.msrb.mxu0 %v516_v2  ;;  %1837 = vmatpush.msrb.mxu1 %v533_v3  ;;  %v631_v2 = vld [vmem:[%s6602_s3 + $0x11d0] sm:$0xff]  ;;  %v581_v3 = vld [vmem:[%s6602_s3 + $0x1040] sm:$0xff] }
 0x101   :  { %1858 = vmatpush.msrb.mxu2 %v548_v4  ;;  %1877 = vmatpush.msrb.mxu3 %v565_v5  ;;  %v598_v4 = vld [vmem:[%s6602_s3 + $0x10c8] sm:$0xff]  ;;  %v613_v5 = vld [vmem:[%s6602_s3 + $0x1140] sm:$0xff] }
 0x102   :  { %1819 = vmatpush.msrb.mxu0 %v515_v6  ;;  %1838 = vmatpush.msrb.mxu1 %v532_v7  ;;  %v630_v6 = vld [vmem:[%s6602_s3 + $0x11c8] sm:$0xff]  ;;  %v580_v7 = vld [vmem:[%s6602_s3 + $0x1038] sm:$0xff] }
 0x103   :  { %1859 = vmatpush.msrb.mxu2 %v547_v8  ;;  %1878 = vmatpush.msrb.mxu3 %v564_v9  ;;  %v597_v8 = vld [vmem:[%s6602_s3 + $0x10c0] sm:$0xff]  ;;  %v612_v9 = vld [vmem:[%s6602_s3 + $0x1138] sm:$0xff] }
 0x104   :  { %1820 = vmatpush.msrb.mxu0 %v514_v10  ;;  %1839 = vmatpush.msrb.mxu1 %v531_v11  ;;  %v629_v10 = vld [vmem:[%s6602_s3 + $0x11c0] sm:$0xff]  ;;  %v579_v11 = vld [vmem:[%s6602_s3 + $0x1030] sm:$0xff] }
 0x105   :  { %1860 = vmatpush.msrb.mxu2 %v546_v12  ;;  %1879 = vmatpush.msrb.mxu3 %v563_v13  ;;  %v596_v12 = vld [vmem:[%s6602_s3 + $0x10b8] sm:$0xff]  ;;  %v611_v13 = vld [vmem:[%s6602_s3 + $0x1130] sm:$0xff] }
 0x106   :  { %1821 = vmatpush.msrb.mxu0 %v513_v14  ;;  %1840 = vmatpush.msrb.mxu1 %v530_v15  ;;  %v628_v14 = vld [vmem:[%s6602_s3 + $0x11b8] sm:$0xff]  ;;  %v578_v15 = vld [vmem:[%s6602_s3 + $0x1028] sm:$0xff] }
 0x107   :  { %1861 = vmatpush.msrb.mxu2 %v545_v16  ;;  %1880 = vmatpush.msrb.mxu3 %v562_v17  ;;  %v595_v16 = vld [vmem:[%s6602_s3 + $0x10b0] sm:$0xff]  ;;  %v610_v17 = vld [vmem:[%s6602_s3 + $0x1128] sm:$0xff] }
 0x108   :  { %1822 = vmatpush.msrb.mxu0 %v512_v18  ;;  %1841 = vmatpush.msrb.mxu1 %v529_v19  ;;  %v627_v18 = vld [vmem:[%s6602_s3 + $0x11b0] sm:$0xff]  ;;  %v577_v19 = vld [vmem:[%s6602_s3 + $0x1020] sm:$0xff] }
 0x109   :  { %1862 = vmatpush.msrb.mxu2 %v544_v20  ;;  %1881 = vmatpush.msrb.mxu3 %v561_v21  ;;  %v594_v20 = vld [vmem:[%s6602_s3 + $0x10a8] sm:$0xff]  ;;  %v609_v21 = vld [vmem:[%s6602_s3 + $0x1120] sm:$0xff] }
 0x10a   :  { %1823 = vmatpush.msrb.mxu0 %v511_v22  ;;  %1842 = vmatpush.msrb.mxu1 %v528_v23  ;;  %v626_v22 = vld [vmem:[%s6602_s3 + $0x11a8] sm:$0xff]  ;;  %v576_v23 = vld [vmem:[%s6602_s3 + $0x1018] sm:$0xff] }
 0x10b   :  { %1863 = vmatpush.msrb.mxu2 %v543_v24  ;;  %1882 = vmatpush.msrb.mxu3 %v560_v25  ;;  %v593_v24 = vld [vmem:[%s6602_s3 + $0x10a0] sm:$0xff]  ;;  %v608_v25 = vld [vmem:[%s6602_s3 + $0x1118] sm:$0xff] }
 0x10c   :  { %1824 = vmatpush.msrb.mxu0 %v510_v26  ;;  %1843 = vmatpush.msrb.mxu1 %v527_v27  ;;  %v625_v26 = vld [vmem:[%s6602_s3 + $0x11a0] sm:$0xff]  ;;  %v575_v27 = vld [vmem:[%s6602_s3 + $0x1010] sm:$0xff] }
 0x10d   :  { %1864 = vmatpush.msrb.mxu2 %v542_v30  ;;  %1883 = vmatpush.msrb.mxu3 %v559_v28  ;;  %v607_v30 = vld [vmem:[%s6602_s3 + $0x1110] sm:$0xff]  ;;  %v624_v28 = vld [vmem:[%s6602_s3 + $0x1198] sm:$0xff] }
 0x10e   :  { %1825 = vmatpush.msrb.mxu0 %v509_v32  ;;  %1844 = vmatpush.msrb.mxu1 %v526_v31  ;;  %v574_v32 = vld [vmem:[%s6602_s3 + $0x1008] sm:$0xff]  ;;  %v591_v31 = vld [vmem:[%s6602_s3 + $0x1090] sm:$0xff] }
 0x10f   :  { %1865 = vmatpush.msrb.mxu2 %v541_v33  ;;  %1884 = vmatpush.msrb.mxu3 %v558_v34  ;;  %v54_v33 = vld [vmem:[%s6599_s0 + $0x48] sm:$0xff] }
 0x110   :  { %1826 = vmatmul.f32.vlgmr.msrb.gmra.mxu0 %v1142_v35  ;;  %1866 = vmatmul.f32.vlgmr.msrb.gmra.mxu2 %v1144_v36  ;;  %v606_v34 = vld [vmem:[%s6602_s3 + $0x1108] sm:$0xff]  ;;  %v623_v35 = vld [vmem:[%s6602_s3 + $0x1190] sm:$0xff]  ;;  %1147 = vst [vmem:[#allocation1 + $0x20] ss:$4 sm:$0xff] %v54_v33  ;;  %v573_v36 = vld [vmem:[%s6602_s3 + $0x1000] sm:$0xff] }
 0x111   :  { %1890 = vmatpush.msra.mxu0 %v588_v37  ;;  %1930 = vmatpush.msra.mxu2 %v620_v38  ;;  %v590_v37 = vld [vmem:[%s6602_s3 + $0x1088] sm:$0xff]  ;;  %v605_v38 = vld [vmem:[%s6602_s3 + $0x1100] sm:$0xff]  ;;  %v656_v33 = vld [vmem:[%s6602_s3 + $0x1298] sm:$0xff] }
 0x112   :  { %1845 = vmatpush.msrb.mxu1 %v525_v39  ;;  %1885 = vmatpush.msrb.mxu3 %v557_v40  ;;  %v622_v39 = vld [vmem:[%s6602_s3 + $0x1188] sm:$0xff]  ;;  %v1148_v40 = vld.sshfl [vmem:[#allocation1] sm:$0xff pattern:$0x73625140] }
 0x113   :  { %1846 = vmatmul.f32.vlgmr.msrb.gmra.mxu1 %v1143_v41  ;;  %1886 = vmatmul.f32.vlgmr.msrb.gmra.mxu3 %v1145_v42  ;;  %v1150_v41 = vld.sshfl [vmem:[#allocation1 + $0x10] sm:$0xff pattern:$0x73625140]  ;;  %v652_v42 = vld [vmem:[%s6602_s3 + $0x1278] sm:$0xff] }
 0x114   :  { %1891 = vmatpush.msra.mxu0 %v587_v43  ;;  %1910 = vmatpush.msra.mxu1 %v604_v44  ;;  %v684_v43 = vld [vmem:[%s6602_s3 + $0x1378] sm:$0xff]  ;;  %v589_v44 = vld [vmem:[%s6602_s3 + $0x1080] sm:$0xff] }
 0x115   :  { %1931 = vmatpush.msra.mxu2 %v619_v45  ;;  %1950 = vmatpush.msra.mxu3 %v636_v46  ;;  %v621_v45 = vld [vmem:[%s6602_s3 + $0x1180] sm:$0xff]  ;;  %v1149_v46 = vld.sshfl [vmem:[#allocation1 + $0x8] sm:$0xff pattern:$0x73625140] }
 0x116   :  { %1892 = vmatpush.msra.mxu0 %v586_v47  ;;  %1911 = vmatpush.msra.mxu1 %v603_v48  ;;  %v1151_v47 = vld.sshfl [vmem:[#allocation1 + $0x18] sm:$0xff pattern:$0x73625140]  ;;  %v651_v48 = vld [vmem:[%s6602_s3 + $0x1270] sm:$0xff] }
 0x117   :  { %1932 = vmatpush.msra.mxu2 %v618_v49  ;;  %1951 = vmatpush.msra.mxu3 %v635_v50  ;;  %v668_v49 = vld [vmem:[%s6602_s3 + $0x12f8] sm:$0xff]  ;;  %v683_v50 = vld [vmem:[%s6602_s3 + $0x1370] sm:$0xff] }
 0x118   :  { %1893 = vmatpush.msra.mxu0 %v585_v51  ;;  %1912 = vmatpush.msra.mxu1 %v602_v52  ;;  %v700_v51 = vld [vmem:[%s6602_s3 + $0x13f8] sm:$0xff]  ;;  %v650_v52 = vld [vmem:[%s6602_s3 + $0x1268] sm:$0xff] }
 0x119   :  { %1933 = vmatpush.msra.mxu2 %v617_v53  ;;  %1952 = vmatpush.msra.mxu3 %v634_v54  ;;  %v667_v53 = vld [vmem:[%s6602_s3 + $0x12f0] sm:$0xff]  ;;  %v682_v54 = vld [vmem:[%s6602_s3 + $0x1368] sm:$0xff] }
 0x11a   :  { %1894 = vmatpush.msra.mxu0 %v584_v55  ;;  %1913 = vmatpush.msra.mxu1 %v601_v56  ;;  %v699_v55 = vld [vmem:[%s6602_s3 + $0x13f0] sm:$0xff]  ;;  %v649_v56 = vld [vmem:[%s6602_s3 + $0x1260] sm:$0xff] }
 0x11b   :  { %1934 = vmatpush.msra.mxu2 %v616_v57  ;;  %1953 = vmatpush.msra.mxu3 %v633_v58  ;;  %v666_v57 = vld [vmem:[%s6602_s3 + $0x12e8] sm:$0xff]  ;;  %v681_v58 = vld [vmem:[%s6602_s3 + $0x1360] sm:$0xff] }
 0x11c   :  { %1895 = vmatpush.msra.mxu0 %v583_v59  ;;  %1914 = vmatpush.msra.mxu1 %v600_v60  ;;  %v698_v59 = vld [vmem:[%s6602_s3 + $0x13e8] sm:$0xff]  ;;  %v648_v60 = vld [vmem:[%s6602_s3 + $0x1258] sm:$0xff] }
 0x11d   :  { %1935 = vmatpush.msra.mxu2 %v615_v61  ;;  %1954 = vmatpush.msra.mxu3 %v632_v62  ;;  %v665_v61 = vld [vmem:[%s6602_s3 + $0x12e0] sm:$0xff]  ;;  %v680_v62 = vld [vmem:[%s6602_s3 + $0x1358] sm:$0xff] }
 0x11e   :  { %1896 = vmatpush.msra.mxu0 %v582_v63  ;;  %1915 = vmatpush.msra.mxu1 %v599_v0  ;;  %v697_v63 = vld [vmem:[%s6602_s3 + $0x13e0] sm:$0xff]  ;;  %v647_v0 = vld [vmem:[%s6602_s3 + $0x1250] sm:$0xff] }
 0x11f   :  { %1936 = vmatpush.msra.mxu2 %v614_v1  ;;  %1955 = vmatpush.msra.mxu3 %v631_v2  ;;  %v664_v1 = vld [vmem:[%s6602_s3 + $0x12d8] sm:$0xff]  ;;  %v679_v2 = vld [vmem:[%s6602_s3 + $0x1350] sm:$0xff] }
 0x120   :  { %1897 = vmatpush.msra.mxu0 %v581_v3  ;;  %1916 = vmatpush.msra.mxu1 %v598_v4  ;;  %v696_v3 = vld [vmem:[%s6602_s3 + $0x13d8] sm:$0xff]  ;;  %v646_v4 = vld [vmem:[%s6602_s3 + $0x1248] sm:$0xff] }
 0x121   :  { %1937 = vmatpush.msra.mxu2 %v613_v5  ;;  %1956 = vmatpush.msra.mxu3 %v630_v6  ;;  %v663_v5 = vld [vmem:[%s6602_s3 + $0x12d0] sm:$0xff]  ;;  %v678_v6 = vld [vmem:[%s6602_s3 + $0x1348] sm:$0xff] }
 0x122   :  { %1898 = vmatpush.msra.mxu0 %v580_v7  ;;  %1917 = vmatpush.msra.mxu1 %v597_v8  ;;  %v695_v7 = vld [vmem:[%s6602_s3 + $0x13d0] sm:$0xff]  ;;  %v645_v8 = vld [vmem:[%s6602_s3 + $0x1240] sm:$0xff] }
 0x123   :  { %1938 = vmatpush.msra.mxu2 %v612_v9  ;;  %1957 = vmatpush.msra.mxu3 %v629_v10  ;;  %v662_v9 = vld [vmem:[%s6602_s3 + $0x12c8] sm:$0xff]  ;;  %v677_v10 = vld [vmem:[%s6602_s3 + $0x1340] sm:$0xff] }
 0x124   :  { %1899 = vmatpush.msra.mxu0 %v579_v11  ;;  %1918 = vmatpush.msra.mxu1 %v596_v12  ;;  %v694_v11 = vld [vmem:[%s6602_s3 + $0x13c8] sm:$0xff]  ;;  %v644_v12 = vld [vmem:[%s6602_s3 + $0x1238] sm:$0xff] }
 0x125   :  { %1939 = vmatpush.msra.mxu2 %v611_v13  ;;  %1958 = vmatpush.msra.mxu3 %v628_v14  ;;  %v661_v13 = vld [vmem:[%s6602_s3 + $0x12c0] sm:$0xff]  ;;  %v676_v14 = vld [vmem:[%s6602_s3 + $0x1338] sm:$0xff] }
 0x126   :  { %1900 = vmatpush.msra.mxu0 %v578_v15  ;;  %1919 = vmatpush.msra.mxu1 %v595_v16  ;;  %v693_v15 = vld [vmem:[%s6602_s3 + $0x13c0] sm:$0xff]  ;;  %v643_v16 = vld [vmem:[%s6602_s3 + $0x1230] sm:$0xff] }
 0x127   :  { %1940 = vmatpush.msra.mxu2 %v610_v17  ;;  %1959 = vmatpush.msra.mxu3 %v627_v18  ;;  %v660_v17 = vld [vmem:[%s6602_s3 + $0x12b8] sm:$0xff]  ;;  %v675_v18 = vld [vmem:[%s6602_s3 + $0x1330] sm:$0xff] }
 0x128   :  { %1901 = vmatpush.msra.mxu0 %v577_v19  ;;  %1920 = vmatpush.msra.mxu1 %v594_v20  ;;  %v692_v19 = vld [vmem:[%s6602_s3 + $0x13b8] sm:$0xff]  ;;  %v642_v20 = vld [vmem:[%s6602_s3 + $0x1228] sm:$0xff] }
 0x129   :  { %1941 = vmatpush.msra.mxu2 %v609_v21  ;;  %1960 = vmatpush.msra.mxu3 %v626_v22  ;;  %v659_v21 = vld [vmem:[%s6602_s3 + $0x12b0] sm:$0xff]  ;;  %v674_v22 = vld [vmem:[%s6602_s3 + $0x1328] sm:$0xff] }
 0x12a   :  { %1902 = vmatpush.msra.mxu0 %v576_v23  ;;  %1921 = vmatpush.msra.mxu1 %v593_v24  ;;  %v691_v23 = vld [vmem:[%s6602_s3 + $0x13b0] sm:$0xff]  ;;  %v641_v24 = vld [vmem:[%s6602_s3 + $0x1220] sm:$0xff] }
 0x12b   :  { %1942 = vmatpush.msra.mxu2 %v608_v25  ;;  %1961 = vmatpush.msra.mxu3 %v625_v26  ;;  %v658_v25 = vld [vmem:[%s6602_s3 + $0x12a8] sm:$0xff]  ;;  %v673_v26 = vld [vmem:[%s6602_s3 + $0x1320] sm:$0xff] }
 0x12c   :  { %1903 = vmatpush.msra.mxu0 %v575_v27  ;;  %1922 = vmatpush.msra.mxu1 %v592_v29  ;;  %v690_v27 = vld [vmem:[%s6602_s3 + $0x13a8] sm:$0xff]  ;;  %v640_v29 = vld [vmem:[%s6602_s3 + $0x1218] sm:$0xff] }
 0x12d   :  { %1943 = vmatpush.msra.mxu2 %v607_v30  ;;  %1962 = vmatpush.msra.mxu3 %v624_v28  ;;  %v657_v30 = vld [vmem:[%s6602_s3 + $0x12a0] sm:$0xff]  ;;  %v672_v28 = vld [vmem:[%s6602_s3 + $0x1318] sm:$0xff] }
 0x12e   :  { %1904 = vmatpush.msra.mxu0 %v574_v32  ;;  %1923 = vmatpush.msra.mxu1 %v591_v31  ;;  %v689_v32 = vld [vmem:[%s6602_s3 + $0x13a0] sm:$0xff]  ;;  %v639_v31 = vld [vmem:[%s6602_s3 + $0x1210] sm:$0xff] }
 0x12f   :  { %1944 = vmatpush.msra.mxu2 %v606_v34  ;;  %1963 = vmatpush.msra.mxu3 %v623_v35  ;;  %v671_v34 = vld [vmem:[%s6602_s3 + $0x1310] sm:$0xff]  ;;  %v688_v35 = vld [vmem:[%s6602_s3 + $0x1398] sm:$0xff] }
 0x130   :  { %1905 = vmatpush.msra.mxu0 %v573_v36  ;;  %1924 = vmatpush.msra.mxu1 %v590_v37  ;;  %v638_v36 = vld [vmem:[%s6602_s3 + $0x1208] sm:$0xff]  ;;  %v655_v37 = vld [vmem:[%s6602_s3 + $0x1290] sm:$0xff] }
 0x131   :  { %1945 = vmatpush.msra.mxu2 %v605_v38  ;;  %1964 = vmatpush.msra.mxu3 %v622_v39  ;;  %v55_v38 = vld [vmem:[%s6599_s0 + $0x50] sm:$0xff]  ;;  %v670_v39 = vld [vmem:[%s6602_s3 + $0x1308] sm:$0xff] }
 0x132   :  { %1906 = vmatmul.f32.vlgmr.msra.gmra.mxu0 %v1148_v40  ;;  %1946 = vmatmul.f32.vlgmr.msra.gmra.mxu2 %v1150_v41  ;;  %v687_v40 = vld [vmem:[%s6602_s3 + $0x1390] sm:$0xff]  ;;  %1156 = vst [vmem:[#allocation1] ss:$4 sm:$0xff] %v55_v38  ;;  %v637_v41 = vld [vmem:[%s6602_s3 + $0x1200] sm:$0xff]  ;;  %v720_v38 = vld [vmem:[%s6602_s3 + $0x1498] sm:$0xff] }
 0x133   :  { %1970 = vmatpush.msrb.mxu0 %v652_v42  ;;  %2010 = vmatpush.msrb.mxu2 %v684_v43  ;;  %v654_v42 = vld [vmem:[%s6602_s3 + $0x1288] sm:$0xff]  ;;  %v669_v43 = vld [vmem:[%s6602_s3 + $0x1300] sm:$0xff] }
 0x134   :  { %1925 = vmatpush.msra.mxu1 %v589_v44  ;;  %1965 = vmatpush.msra.mxu3 %v621_v45  ;;  %v686_v44 = vld [vmem:[%s6602_s3 + $0x1388] sm:$0xff]  ;;  %v1152_v45 = vld.sshfl [vmem:[#allocation1 + $0x20] sm:$0xff pattern:$0x73625140] }
 0x135   :  { %1926 = vmatmul.f32.vlgmr.msra.gmra.mxu1 %v1149_v46  ;;  %1966 = vmatmul.f32.vlgmr.msra.gmra.mxu3 %v1151_v47  ;;  %v1154_v46 = vld.sshfl [vmem:[#allocation1 + $0x30] sm:$0xff pattern:$0x73625140]  ;;  %v716_v47 = vld [vmem:[%s6602_s3 + $0x1478] sm:$0xff] }
 0x136   :  { %1971 = vmatpush.msrb.mxu0 %v651_v48  ;;  %1990 = vmatpush.msrb.mxu1 %v668_v49  ;;  %v748_v48 = vld [vmem:[%s6602_s3 + $0x1578] sm:$0xff]  ;;  %v653_v49 = vld [vmem:[%s6602_s3 + $0x1280] sm:$0xff] }
 0x137   :  { %2011 = vmatpush.msrb.mxu2 %v683_v50  ;;  %2030 = vmatpush.msrb.mxu3 %v700_v51  ;;  %v685_v50 = vld [vmem:[%s6602_s3 + $0x1380] sm:$0xff]  ;;  %v1153_v51 = vld.sshfl [vmem:[#allocation1 + $0x28] sm:$0xff pattern:$0x73625140] }
 0x138   :  { %1972 = vmatpush.msrb.mxu0 %v650_v52  ;;  %1991 = vmatpush.msrb.mxu1 %v667_v53  ;;  %v1155_v52 = vld.sshfl [vmem:[#allocation1 + $0x38] sm:$0xff pattern:$0x73625140]  ;;  %v715_v53 = vld [vmem:[%s6602_s3 + $0x1470] sm:$0xff] }
 0x139   :  { %2012 = vmatpush.msrb.mxu2 %v682_v54  ;;  %2031 = vmatpush.msrb.mxu3 %v699_v55  ;;  %v732_v54 = vld [vmem:[%s6602_s3 + $0x14f8] sm:$0xff]  ;;  %v747_v55 = vld [vmem:[%s6602_s3 + $0x1570] sm:$0xff] }
 0x13a   :  { %1973 = vmatpush.msrb.mxu0 %v649_v56  ;;  %1992 = vmatpush.msrb.mxu1 %v666_v57  ;;  %v764_v56 = vld [vmem:[%s6602_s3 + $0x15f8] sm:$0xff]  ;;  %v714_v57 = vld [vmem:[%s6602_s3 + $0x1468] sm:$0xff] }
 0x13b   :  { %2013 = vmatpush.msrb.mxu2 %v681_v58  ;;  %2032 = vmatpush.msrb.mxu3 %v698_v59  ;;  %v731_v58 = vld [vmem:[%s6602_s3 + $0x14f0] sm:$0xff]  ;;  %v746_v59 = vld [vmem:[%s6602_s3 + $0x1568] sm:$0xff] }
 0x13c   :  { %1974 = vmatpush.msrb.mxu0 %v648_v60  ;;  %1993 = vmatpush.msrb.mxu1 %v665_v61  ;;  %v763_v60 = vld [vmem:[%s6602_s3 + $0x15f0] sm:$0xff]  ;;  %v713_v61 = vld [vmem:[%s6602_s3 + $0x1460] sm:$0xff] }
 0x13d   :  { %2014 = vmatpush.msrb.mxu2 %v680_v62  ;;  %2033 = vmatpush.msrb.mxu3 %v697_v63  ;;  %v730_v62 = vld [vmem:[%s6602_s3 + $0x14e8] sm:$0xff]  ;;  %v745_v63 = vld [vmem:[%s6602_s3 + $0x1560] sm:$0xff] }
 0x13e   :  { %1975 = vmatpush.msrb.mxu0 %v647_v0  ;;  %1994 = vmatpush.msrb.mxu1 %v664_v1  ;;  %v762_v0 = vld [vmem:[%s6602_s3 + $0x15e8] sm:$0xff]  ;;  %v712_v1 = vld [vmem:[%s6602_s3 + $0x1458] sm:$0xff] }
 0x13f   :  { %2015 = vmatpush.msrb.mxu2 %v679_v2  ;;  %2034 = vmatpush.msrb.mxu3 %v696_v3  ;;  %v729_v2 = vld [vmem:[%s6602_s3 + $0x14e0] sm:$0xff]  ;;  %v744_v3 = vld [vmem:[%s6602_s3 + $0x1558] sm:$0xff] }
 0x140   :  { %1976 = vmatpush.msrb.mxu0 %v646_v4  ;;  %1995 = vmatpush.msrb.mxu1 %v663_v5  ;;  %v761_v4 = vld [vmem:[%s6602_s3 + $0x15e0] sm:$0xff]  ;;  %v711_v5 = vld [vmem:[%s6602_s3 + $0x1450] sm:$0xff] }
 0x141   :  { %2016 = vmatpush.msrb.mxu2 %v678_v6  ;;  %2035 = vmatpush.msrb.mxu3 %v695_v7  ;;  %v728_v6 = vld [vmem:[%s6602_s3 + $0x14d8] sm:$0xff]  ;;  %v743_v7 = vld [vmem:[%s6602_s3 + $0x1550] sm:$0xff] }
 0x142   :  { %1977 = vmatpush.msrb.mxu0 %v645_v8  ;;  %1996 = vmatpush.msrb.mxu1 %v662_v9  ;;  %v760_v8 = vld [vmem:[%s6602_s3 + $0x15d8] sm:$0xff]  ;;  %v710_v9 = vld [vmem:[%s6602_s3 + $0x1448] sm:$0xff] }
 0x143   :  { %2017 = vmatpush.msrb.mxu2 %v677_v10  ;;  %2036 = vmatpush.msrb.mxu3 %v694_v11  ;;  %v727_v10 = vld [vmem:[%s6602_s3 + $0x14d0] sm:$0xff]  ;;  %v742_v11 = vld [vmem:[%s6602_s3 + $0x1548] sm:$0xff] }
 0x144   :  { %1978 = vmatpush.msrb.mxu0 %v644_v12  ;;  %1997 = vmatpush.msrb.mxu1 %v661_v13  ;;  %v759_v12 = vld [vmem:[%s6602_s3 + $0x15d0] sm:$0xff]  ;;  %v709_v13 = vld [vmem:[%s6602_s3 + $0x1440] sm:$0xff] }
 0x145   :  { %2018 = vmatpush.msrb.mxu2 %v676_v14  ;;  %2037 = vmatpush.msrb.mxu3 %v693_v15  ;;  %v726_v14 = vld [vmem:[%s6602_s3 + $0x14c8] sm:$0xff]  ;;  %v741_v15 = vld [vmem:[%s6602_s3 + $0x1540] sm:$0xff] }
 0x146   :  { %1979 = vmatpush.msrb.mxu0 %v643_v16  ;;  %1998 = vmatpush.msrb.mxu1 %v660_v17  ;;  %v758_v16 = vld [vmem:[%s6602_s3 + $0x15c8] sm:$0xff]  ;;  %v708_v17 = vld [vmem:[%s6602_s3 + $0x1438] sm:$0xff] }
 0x147   :  { %2019 = vmatpush.msrb.mxu2 %v675_v18  ;;  %2038 = vmatpush.msrb.mxu3 %v692_v19  ;;  %v725_v18 = vld [vmem:[%s6602_s3 + $0x14c0] sm:$0xff]  ;;  %v740_v19 = vld [vmem:[%s6602_s3 + $0x1538] sm:$0xff] }
 0x148   :  { %1980 = vmatpush.msrb.mxu0 %v642_v20  ;;  %1999 = vmatpush.msrb.mxu1 %v659_v21  ;;  %v757_v20 = vld [vmem:[%s6602_s3 + $0x15c0] sm:$0xff]  ;;  %v707_v21 = vld [vmem:[%s6602_s3 + $0x1430] sm:$0xff] }
 0x149   :  { %2020 = vmatpush.msrb.mxu2 %v674_v22  ;;  %2039 = vmatpush.msrb.mxu3 %v691_v23  ;;  %v724_v22 = vld [vmem:[%s6602_s3 + $0x14b8] sm:$0xff]  ;;  %v739_v23 = vld [vmem:[%s6602_s3 + $0x1530] sm:$0xff] }
 0x14a   :  { %1981 = vmatpush.msrb.mxu0 %v641_v24  ;;  %2000 = vmatpush.msrb.mxu1 %v658_v25  ;;  %v756_v24 = vld [vmem:[%s6602_s3 + $0x15b8] sm:$0xff]  ;;  %v706_v25 = vld [vmem:[%s6602_s3 + $0x1428] sm:$0xff] }
 0x14b   :  { %2021 = vmatpush.msrb.mxu2 %v673_v26  ;;  %2040 = vmatpush.msrb.mxu3 %v690_v27  ;;  %v723_v26 = vld [vmem:[%s6602_s3 + $0x14b0] sm:$0xff]  ;;  %v738_v27 = vld [vmem:[%s6602_s3 + $0x1528] sm:$0xff] }
 0x14c   :  { %1982 = vmatpush.msrb.mxu0 %v640_v29  ;;  %2001 = vmatpush.msrb.mxu1 %v657_v30  ;;  %v755_v29 = vld [vmem:[%s6602_s3 + $0x15b0] sm:$0xff]  ;;  %v705_v30 = vld [vmem:[%s6602_s3 + $0x1420] sm:$0xff] }
 0x14d   :  { %2022 = vmatpush.msrb.mxu2 %v672_v28  ;;  %2041 = vmatpush.msrb.mxu3 %v689_v32  ;;  %v722_v28 = vld [vmem:[%s6602_s3 + $0x14a8] sm:$0xff]  ;;  %v737_v32 = vld [vmem:[%s6602_s3 + $0x1520] sm:$0xff] }
 0x14e   :  { %1983 = vmatpush.msrb.mxu0 %v639_v31  ;;  %2002 = vmatpush.msrb.mxu1 %v656_v33  ;;  %v754_v31 = vld [vmem:[%s6602_s3 + $0x15a8] sm:$0xff]  ;;  %v704_v33 = vld [vmem:[%s6602_s3 + $0x1418] sm:$0xff] }
 0x14f   :  { %2023 = vmatpush.msrb.mxu2 %v671_v34  ;;  %2042 = vmatpush.msrb.mxu3 %v688_v35  ;;  %v721_v34 = vld [vmem:[%s6602_s3 + $0x14a0] sm:$0xff]  ;;  %v736_v35 = vld [vmem:[%s6602_s3 + $0x1518] sm:$0xff] }
 0x150   :  { %1984 = vmatpush.msrb.mxu0 %v638_v36  ;;  %2003 = vmatpush.msrb.mxu1 %v655_v37  ;;  %v753_v36 = vld [vmem:[%s6602_s3 + $0x15a0] sm:$0xff]  ;;  %v703_v37 = vld [vmem:[%s6602_s3 + $0x1410] sm:$0xff] }
 0x151   :  { %2024 = vmatpush.msrb.mxu2 %v670_v39  ;;  %2043 = vmatpush.msrb.mxu3 %v687_v40  ;;  %v735_v39 = vld [vmem:[%s6602_s3 + $0x1510] sm:$0xff]  ;;  %v752_v40 = vld [vmem:[%s6602_s3 + $0x1598] sm:$0xff] }
 0x152   :  { %1985 = vmatpush.msrb.mxu0 %v637_v41  ;;  %2004 = vmatpush.msrb.mxu1 %v654_v42  ;;  %v702_v41 = vld [vmem:[%s6602_s3 + $0x1408] sm:$0xff]  ;;  %v719_v42 = vld [vmem:[%s6602_s3 + $0x1490] sm:$0xff] }
 0x153   :  { %2025 = vmatpush.msrb.mxu2 %v669_v43  ;;  %2044 = vmatpush.msrb.mxu3 %v686_v44  ;;  %v56_v43 = vld [vmem:[%s6599_s0 + $0x58] sm:$0xff]  ;;  %v734_v44 = vld [vmem:[%s6602_s3 + $0x1508] sm:$0xff] }
 0x154   :  { %1986 = vmatmul.f32.vlgmr.msrb.gmra.mxu0 %v1152_v45  ;;  %2026 = vmatmul.f32.vlgmr.msrb.gmra.mxu2 %v1154_v46  ;;  %v751_v45 = vld [vmem:[%s6602_s3 + $0x1590] sm:$0xff]  ;;  %1157 = vst [vmem:[#allocation1 + $0x20] ss:$4 sm:$0xff] %v56_v43  ;;  %v701_v46 = vld [vmem:[%s6602_s3 + $0x1400] sm:$0xff]  ;;  %v784_v43 = vld [vmem:[%s6602_s3 + $0x1698] sm:$0xff] }
 0x155   :  { %2050 = vmatpush.msra.mxu0 %v716_v47  ;;  %2090 = vmatpush.msra.mxu2 %v748_v48  ;;  %v718_v47 = vld [vmem:[%s6602_s3 + $0x1488] sm:$0xff]  ;;  %v733_v48 = vld [vmem:[%s6602_s3 + $0x1500] sm:$0xff] }
 0x156   :  { %2005 = vmatpush.msrb.mxu1 %v653_v49  ;;  %2045 = vmatpush.msrb.mxu3 %v685_v50  ;;  %v750_v49 = vld [vmem:[%s6602_s3 + $0x1588] sm:$0xff]  ;;  %v1158_v50 = vld.sshfl [vmem:[#allocation1] sm:$0xff pattern:$0x73625140] }
 0x157   :  { %2006 = vmatmul.f32.vlgmr.msrb.gmra.mxu1 %v1153_v51  ;;  %2046 = vmatmul.f32.vlgmr.msrb.gmra.mxu3 %v1155_v52  ;;  %v1160_v51 = vld.sshfl [vmem:[#allocation1 + $0x10] sm:$0xff pattern:$0x73625140]  ;;  %v780_v52 = vld [vmem:[%s6602_s3 + $0x1678] sm:$0xff] }
 0x158   :  { %2051 = vmatpush.msra.mxu0 %v715_v53  ;;  %2070 = vmatpush.msra.mxu1 %v732_v54  ;;  %v812_v53 = vld [vmem:[%s6602_s3 + $0x1778] sm:$0xff]  ;;  %v717_v54 = vld [vmem:[%s6602_s3 + $0x1480] sm:$0xff] }
 0x159   :  { %2091 = vmatpush.msra.mxu2 %v747_v55  ;;  %2110 = vmatpush.msra.mxu3 %v764_v56  ;;  %v749_v55 = vld [vmem:[%s6602_s3 + $0x1580] sm:$0xff]  ;;  %v1159_v56 = vld.sshfl [vmem:[#allocation1 + $0x8] sm:$0xff pattern:$0x73625140] }
 0x15a   :  { %2052 = vmatpush.msra.mxu0 %v714_v57  ;;  %2071 = vmatpush.msra.mxu1 %v731_v58  ;;  %v1161_v57 = vld.sshfl [vmem:[#allocation1 + $0x18] sm:$0xff pattern:$0x73625140]  ;;  %v779_v58 = vld [vmem:[%s6602_s3 + $0x1670] sm:$0xff] }
 0x15b   :  { %2092 = vmatpush.msra.mxu2 %v746_v59  ;;  %2111 = vmatpush.msra.mxu3 %v763_v60  ;;  %v796_v59 = vld [vmem:[%s6602_s3 + $0x16f8] sm:$0xff]  ;;  %v811_v60 = vld [vmem:[%s6602_s3 + $0x1770] sm:$0xff] }
 0x15c   :  { %2053 = vmatpush.msra.mxu0 %v713_v61  ;;  %2072 = vmatpush.msra.mxu1 %v730_v62  ;;  %v828_v61 = vld [vmem:[%s6602_s3 + $0x17f8] sm:$0xff]  ;;  %v778_v62 = vld [vmem:[%s6602_s3 + $0x1668] sm:$0xff] }
 0x15d   :  { %2093 = vmatpush.msra.mxu2 %v745_v63  ;;  %2112 = vmatpush.msra.mxu3 %v762_v0  ;;  %v795_v63 = vld [vmem:[%s6602_s3 + $0x16f0] sm:$0xff]  ;;  %v810_v0 = vld [vmem:[%s6602_s3 + $0x1768] sm:$0xff] }
 0x15e   :  { %2054 = vmatpush.msra.mxu0 %v712_v1  ;;  %2073 = vmatpush.msra.mxu1 %v729_v2  ;;  %v827_v1 = vld [vmem:[%s6602_s3 + $0x17f0] sm:$0xff]  ;;  %v777_v2 = vld [vmem:[%s6602_s3 + $0x1660] sm:$0xff] }
 0x15f   :  { %2094 = vmatpush.msra.mxu2 %v744_v3  ;;  %2113 = vmatpush.msra.mxu3 %v761_v4  ;;  %v794_v3 = vld [vmem:[%s6602_s3 + $0x16e8] sm:$0xff]  ;;  %v809_v4 = vld [vmem:[%s6602_s3 + $0x1760] sm:$0xff] }
 0x160   :  { %2055 = vmatpush.msra.mxu0 %v711_v5  ;;  %2074 = vmatpush.msra.mxu1 %v728_v6  ;;  %v826_v5 = vld [vmem:[%s6602_s3 + $0x17e8] sm:$0xff]  ;;  %v776_v6 = vld [vmem:[%s6602_s3 + $0x1658] sm:$0xff] }
 0x161   :  { %2095 = vmatpush.msra.mxu2 %v743_v7  ;;  %2114 = vmatpush.msra.mxu3 %v760_v8  ;;  %v793_v7 = vld [vmem:[%s6602_s3 + $0x16e0] sm:$0xff]  ;;  %v808_v8 = vld [vmem:[%s6602_s3 + $0x1758] sm:$0xff] }
 0x162   :  { %2056 = vmatpush.msra.mxu0 %v710_v9  ;;  %2075 = vmatpush.msra.mxu1 %v727_v10  ;;  %v825_v9 = vld [vmem:[%s6602_s3 + $0x17e0] sm:$0xff]  ;;  %v775_v10 = vld [vmem:[%s6602_s3 + $0x1650] sm:$0xff] }
 0x163   :  { %2096 = vmatpush.msra.mxu2 %v742_v11  ;;  %2115 = vmatpush.msra.mxu3 %v759_v12  ;;  %v792_v11 = vld [vmem:[%s6602_s3 + $0x16d8] sm:$0xff]  ;;  %v807_v12 = vld [vmem:[%s6602_s3 + $0x1750] sm:$0xff] }
 0x164   :  { %2057 = vmatpush.msra.mxu0 %v709_v13  ;;  %2076 = vmatpush.msra.mxu1 %v726_v14  ;;  %v824_v13 = vld [vmem:[%s6602_s3 + $0x17d8] sm:$0xff]  ;;  %v774_v14 = vld [vmem:[%s6602_s3 + $0x1648] sm:$0xff] }
 0x165   :  { %2097 = vmatpush.msra.mxu2 %v741_v15  ;;  %2116 = vmatpush.msra.mxu3 %v758_v16  ;;  %v791_v15 = vld [vmem:[%s6602_s3 + $0x16d0] sm:$0xff]  ;;  %v806_v16 = vld [vmem:[%s6602_s3 + $0x1748] sm:$0xff] }
 0x166   :  { %2058 = vmatpush.msra.mxu0 %v708_v17  ;;  %2077 = vmatpush.msra.mxu1 %v725_v18  ;;  %v823_v17 = vld [vmem:[%s6602_s3 + $0x17d0] sm:$0xff]  ;;  %v773_v18 = vld [vmem:[%s6602_s3 + $0x1640] sm:$0xff] }
 0x167   :  { %2098 = vmatpush.msra.mxu2 %v740_v19  ;;  %2117 = vmatpush.msra.mxu3 %v757_v20  ;;  %v790_v19 = vld [vmem:[%s6602_s3 + $0x16c8] sm:$0xff]  ;;  %v805_v20 = vld [vmem:[%s6602_s3 + $0x1740] sm:$0xff] }
 0x168   :  { %2059 = vmatpush.msra.mxu0 %v707_v21  ;;  %2078 = vmatpush.msra.mxu1 %v724_v22  ;;  %v822_v21 = vld [vmem:[%s6602_s3 + $0x17c8] sm:$0xff]  ;;  %v772_v22 = vld [vmem:[%s6602_s3 + $0x1638] sm:$0xff] }
 0x169   :  { %2099 = vmatpush.msra.mxu2 %v739_v23  ;;  %2118 = vmatpush.msra.mxu3 %v756_v24  ;;  %v789_v23 = vld [vmem:[%s6602_s3 + $0x16c0] sm:$0xff]  ;;  %v804_v24 = vld [vmem:[%s6602_s3 + $0x1738] sm:$0xff] }
 0x16a   :  { %2060 = vmatpush.msra.mxu0 %v706_v25  ;;  %2079 = vmatpush.msra.mxu1 %v723_v26  ;;  %v821_v25 = vld [vmem:[%s6602_s3 + $0x17c0] sm:$0xff]  ;;  %v771_v26 = vld [vmem:[%s6602_s3 + $0x1630] sm:$0xff] }
 0x16b   :  { %2100 = vmatpush.msra.mxu2 %v738_v27  ;;  %2119 = vmatpush.msra.mxu3 %v755_v29  ;;  %v788_v27 = vld [vmem:[%s6602_s3 + $0x16b8] sm:$0xff]  ;;  %v803_v29 = vld [vmem:[%s6602_s3 + $0x1730] sm:$0xff] }
 0x16c   :  { %2061 = vmatpush.msra.mxu0 %v705_v30  ;;  %2080 = vmatpush.msra.mxu1 %v722_v28  ;;  %v820_v30 = vld [vmem:[%s6602_s3 + $0x17b8] sm:$0xff]  ;;  %v770_v28 = vld [vmem:[%s6602_s3 + $0x1628] sm:$0xff] }
 0x16d   :  { %2101 = vmatpush.msra.mxu2 %v737_v32  ;;  %2120 = vmatpush.msra.mxu3 %v754_v31  ;;  %v787_v32 = vld [vmem:[%s6602_s3 + $0x16b0] sm:$0xff]  ;;  %v802_v31 = vld [vmem:[%s6602_s3 + $0x1728] sm:$0xff] }
 0x16e   :  { %2062 = vmatpush.msra.mxu0 %v704_v33  ;;  %2081 = vmatpush.msra.mxu1 %v721_v34  ;;  %v819_v33 = vld [vmem:[%s6602_s3 + $0x17b0] sm:$0xff]  ;;  %v769_v34 = vld [vmem:[%s6602_s3 + $0x1620] sm:$0xff] }
 0x16f   :  { %2102 = vmatpush.msra.mxu2 %v736_v35  ;;  %2121 = vmatpush.msra.mxu3 %v753_v36  ;;  %v786_v35 = vld [vmem:[%s6602_s3 + $0x16a8] sm:$0xff]  ;;  %v801_v36 = vld [vmem:[%s6602_s3 + $0x1720] sm:$0xff] }
 0x170   :  { %2063 = vmatpush.msra.mxu0 %v703_v37  ;;  %2082 = vmatpush.msra.mxu1 %v720_v38  ;;  %v818_v37 = vld [vmem:[%s6602_s3 + $0x17a8] sm:$0xff]  ;;  %v768_v38 = vld [vmem:[%s6602_s3 + $0x1618] sm:$0xff] }
 0x171   :  { %2103 = vmatpush.msra.mxu2 %v735_v39  ;;  %2122 = vmatpush.msra.mxu3 %v752_v40  ;;  %v785_v39 = vld [vmem:[%s6602_s3 + $0x16a0] sm:$0xff]  ;;  %v800_v40 = vld [vmem:[%s6602_s3 + $0x1718] sm:$0xff] }
 0x172   :  { %2064 = vmatpush.msra.mxu0 %v702_v41  ;;  %2083 = vmatpush.msra.mxu1 %v719_v42  ;;  %v817_v41 = vld [vmem:[%s6602_s3 + $0x17a0] sm:$0xff]  ;;  %v767_v42 = vld [vmem:[%s6602_s3 + $0x1610] sm:$0xff] }
 0x173   :  { %2104 = vmatpush.msra.mxu2 %v734_v44  ;;  %2123 = vmatpush.msra.mxu3 %v751_v45  ;;  %v799_v44 = vld [vmem:[%s6602_s3 + $0x1710] sm:$0xff]  ;;  %v816_v45 = vld [vmem:[%s6602_s3 + $0x1798] sm:$0xff] }
 0x174   :  { %2065 = vmatpush.msra.mxu0 %v701_v46  ;;  %2084 = vmatpush.msra.mxu1 %v718_v47  ;;  %v766_v46 = vld [vmem:[%s6602_s3 + $0x1608] sm:$0xff]  ;;  %v783_v47 = vld [vmem:[%s6602_s3 + $0x1690] sm:$0xff] }
 0x175   :  { %2105 = vmatpush.msra.mxu2 %v733_v48  ;;  %2124 = vmatpush.msra.mxu3 %v750_v49  ;;  %v57_v48 = vld [vmem:[%s6599_s0 + $0x60] sm:$0xff]  ;;  %v798_v49 = vld [vmem:[%s6602_s3 + $0x1708] sm:$0xff] }
 0x176   :  { %2066 = vmatmul.f32.vlgmr.msra.gmra.mxu0 %v1158_v50  ;;  %2106 = vmatmul.f32.vlgmr.msra.gmra.mxu2 %v1160_v51  ;;  %v815_v50 = vld [vmem:[%s6602_s3 + $0x1790] sm:$0xff]  ;;  %1166 = vst [vmem:[#allocation1] ss:$4 sm:$0xff] %v57_v48  ;;  %v765_v51 = vld [vmem:[%s6602_s3 + $0x1600] sm:$0xff]  ;;  %v848_v48 = vld [vmem:[%s6602_s3 + $0x1898] sm:$0xff] }
 0x177   :  { %2130 = vmatpush.msrb.mxu0 %v780_v52  ;;  %2170 = vmatpush.msrb.mxu2 %v812_v53  ;;  %v782_v52 = vld [vmem:[%s6602_s3 + $0x1688] sm:$0xff]  ;;  %v797_v53 = vld [vmem:[%s6602_s3 + $0x1700] sm:$0xff] }
 0x178   :  { %2085 = vmatpush.msra.mxu1 %v717_v54  ;;  %2125 = vmatpush.msra.mxu3 %v749_v55  ;;  %v814_v54 = vld [vmem:[%s6602_s3 + $0x1788] sm:$0xff]  ;;  %v1162_v55 = vld.sshfl [vmem:[#allocation1 + $0x20] sm:$0xff pattern:$0x73625140] }
 0x179   :  { %2086 = vmatmul.f32.vlgmr.msra.gmra.mxu1 %v1159_v56  ;;  %2126 = vmatmul.f32.vlgmr.msra.gmra.mxu3 %v1161_v57  ;;  %v1164_v56 = vld.sshfl [vmem:[#allocation1 + $0x30] sm:$0xff pattern:$0x73625140]  ;;  %v844_v57 = vld [vmem:[%s6602_s3 + $0x1878] sm:$0xff] }
 0x17a   :  { %2131 = vmatpush.msrb.mxu0 %v779_v58  ;;  %2150 = vmatpush.msrb.mxu1 %v796_v59  ;;  %v876_v58 = vld [vmem:[%s6602_s3 + $0x1978] sm:$0xff]  ;;  %v781_v59 = vld [vmem:[%s6602_s3 + $0x1680] sm:$0xff] }
 0x17b   :  { %2171 = vmatpush.msrb.mxu2 %v811_v60  ;;  %2190 = vmatpush.msrb.mxu3 %v828_v61  ;;  %v813_v60 = vld [vmem:[%s6602_s3 + $0x1780] sm:$0xff]  ;;  %v1163_v61 = vld.sshfl [vmem:[#allocation1 + $0x28] sm:$0xff pattern:$0x73625140] }
 0x17c   :  { %2132 = vmatpush.msrb.mxu0 %v778_v62  ;;  %2151 = vmatpush.msrb.mxu1 %v795_v63  ;;  %v1165_v62 = vld.sshfl [vmem:[#allocation1 + $0x38] sm:$0xff pattern:$0x73625140]  ;;  %v843_v63 = vld [vmem:[%s6602_s3 + $0x1870] sm:$0xff] }
 0x17d   :  { %2172 = vmatpush.msrb.mxu2 %v810_v0  ;;  %2191 = vmatpush.msrb.mxu3 %v827_v1  ;;  %v860_v0 = vld [vmem:[%s6602_s3 + $0x18f8] sm:$0xff]  ;;  %v875_v1 = vld [vmem:[%s6602_s3 + $0x1970] sm:$0xff] }
 0x17e   :  { %2133 = vmatpush.msrb.mxu0 %v777_v2  ;;  %2152 = vmatpush.msrb.mxu1 %v794_v3  ;;  %v892_v2 = vld [vmem:[%s6602_s3 + $0x19f8] sm:$0xff]  ;;  %v842_v3 = vld [vmem:[%s6602_s3 + $0x1868] sm:$0xff] }
 0x17f   :  { %2173 = vmatpush.msrb.mxu2 %v809_v4  ;;  %2192 = vmatpush.msrb.mxu3 %v826_v5  ;;  %v859_v4 = vld [vmem:[%s6602_s3 + $0x18f0] sm:$0xff]  ;;  %v874_v5 = vld [vmem:[%s6602_s3 + $0x1968] sm:$0xff] }
 0x180   :  { %2134 = vmatpush.msrb.mxu0 %v776_v6  ;;  %2153 = vmatpush.msrb.mxu1 %v793_v7  ;;  %v891_v6 = vld [vmem:[%s6602_s3 + $0x19f0] sm:$0xff]  ;;  %v841_v7 = vld [vmem:[%s6602_s3 + $0x1860] sm:$0xff] }
 0x181   :  { %2174 = vmatpush.msrb.mxu2 %v808_v8  ;;  %2193 = vmatpush.msrb.mxu3 %v825_v9  ;;  %v858_v8 = vld [vmem:[%s6602_s3 + $0x18e8] sm:$0xff]  ;;  %v873_v9 = vld [vmem:[%s6602_s3 + $0x1960] sm:$0xff] }
 0x182   :  { %2135 = vmatpush.msrb.mxu0 %v775_v10  ;;  %2154 = vmatpush.msrb.mxu1 %v792_v11  ;;  %v890_v10 = vld [vmem:[%s6602_s3 + $0x19e8] sm:$0xff]  ;;  %v840_v11 = vld [vmem:[%s6602_s3 + $0x1858] sm:$0xff] }
 0x183   :  { %2175 = vmatpush.msrb.mxu2 %v807_v12  ;;  %2194 = vmatpush.msrb.mxu3 %v824_v13  ;;  %v857_v12 = vld [vmem:[%s6602_s3 + $0x18e0] sm:$0xff]  ;;  %v872_v13 = vld [vmem:[%s6602_s3 + $0x1958] sm:$0xff] }
 0x184   :  { %2136 = vmatpush.msrb.mxu0 %v774_v14  ;;  %2155 = vmatpush.msrb.mxu1 %v791_v15  ;;  %v889_v14 = vld [vmem:[%s6602_s3 + $0x19e0] sm:$0xff]  ;;  %v839_v15 = vld [vmem:[%s6602_s3 + $0x1850] sm:$0xff] }
 0x185   :  { %2176 = vmatpush.msrb.mxu2 %v806_v16  ;;  %2195 = vmatpush.msrb.mxu3 %v823_v17  ;;  %v856_v16 = vld [vmem:[%s6602_s3 + $0x18d8] sm:$0xff]  ;;  %v871_v17 = vld [vmem:[%s6602_s3 + $0x1950] sm:$0xff] }
 0x186   :  { %2137 = vmatpush.msrb.mxu0 %v773_v18  ;;  %2156 = vmatpush.msrb.mxu1 %v790_v19  ;;  %v888_v18 = vld [vmem:[%s6602_s3 + $0x19d8] sm:$0xff]  ;;  %v838_v19 = vld [vmem:[%s6602_s3 + $0x1848] sm:$0xff] }
 0x187   :  { %2177 = vmatpush.msrb.mxu2 %v805_v20  ;;  %2196 = vmatpush.msrb.mxu3 %v822_v21  ;;  %v855_v20 = vld [vmem:[%s6602_s3 + $0x18d0] sm:$0xff]  ;;  %v870_v21 = vld [vmem:[%s6602_s3 + $0x1948] sm:$0xff] }
 0x188   :  { %2138 = vmatpush.msrb.mxu0 %v772_v22  ;;  %2157 = vmatpush.msrb.mxu1 %v789_v23  ;;  %v887_v22 = vld [vmem:[%s6602_s3 + $0x19d0] sm:$0xff]  ;;  %v837_v23 = vld [vmem:[%s6602_s3 + $0x1840] sm:$0xff] }
 0x189   :  { %2178 = vmatpush.msrb.mxu2 %v804_v24  ;;  %2197 = vmatpush.msrb.mxu3 %v821_v25  ;;  %v854_v24 = vld [vmem:[%s6602_s3 + $0x18c8] sm:$0xff]  ;;  %v869_v25 = vld [vmem:[%s6602_s3 + $0x1940] sm:$0xff] }
 0x18a   :  { %2139 = vmatpush.msrb.mxu0 %v771_v26  ;;  %2158 = vmatpush.msrb.mxu1 %v788_v27  ;;  %v886_v26 = vld [vmem:[%s6602_s3 + $0x19c8] sm:$0xff]  ;;  %v836_v27 = vld [vmem:[%s6602_s3 + $0x1838] sm:$0xff] }
 0x18b   :  { %2179 = vmatpush.msrb.mxu2 %v803_v29  ;;  %2198 = vmatpush.msrb.mxu3 %v820_v30  ;;  %v853_v29 = vld [vmem:[%s6602_s3 + $0x18c0] sm:$0xff]  ;;  %v868_v30 = vld [vmem:[%s6602_s3 + $0x1938] sm:$0xff] }
 0x18c   :  { %2140 = vmatpush.msrb.mxu0 %v770_v28  ;;  %2159 = vmatpush.msrb.mxu1 %v787_v32  ;;  %v885_v28 = vld [vmem:[%s6602_s3 + $0x19c0] sm:$0xff]  ;;  %v835_v32 = vld [vmem:[%s6602_s3 + $0x1830] sm:$0xff] }
 0x18d   :  { %2180 = vmatpush.msrb.mxu2 %v802_v31  ;;  %2199 = vmatpush.msrb.mxu3 %v819_v33  ;;  %v852_v31 = vld [vmem:[%s6602_s3 + $0x18b8] sm:$0xff]  ;;  %v867_v33 = vld [vmem:[%s6602_s3 + $0x1930] sm:$0xff] }
 0x18e   :  { %2141 = vmatpush.msrb.mxu0 %v769_v34  ;;  %2160 = vmatpush.msrb.mxu1 %v786_v35  ;;  %v884_v34 = vld [vmem:[%s6602_s3 + $0x19b8] sm:$0xff]  ;;  %v834_v35 = vld [vmem:[%s6602_s3 + $0x1828] sm:$0xff] }
 0x18f   :  { %2181 = vmatpush.msrb.mxu2 %v801_v36  ;;  %2200 = vmatpush.msrb.mxu3 %v818_v37  ;;  %v851_v36 = vld [vmem:[%s6602_s3 + $0x18b0] sm:$0xff]  ;;  %v866_v37 = vld [vmem:[%s6602_s3 + $0x1928] sm:$0xff] }
 0x190   :  { %2142 = vmatpush.msrb.mxu0 %v768_v38  ;;  %2161 = vmatpush.msrb.mxu1 %v785_v39  ;;  %v883_v38 = vld [vmem:[%s6602_s3 + $0x19b0] sm:$0xff]  ;;  %v833_v39 = vld [vmem:[%s6602_s3 + $0x1820] sm:$0xff] }
 0x191   :  { %2182 = vmatpush.msrb.mxu2 %v800_v40  ;;  %2201 = vmatpush.msrb.mxu3 %v817_v41  ;;  %v850_v40 = vld [vmem:[%s6602_s3 + $0x18a8] sm:$0xff]  ;;  %v865_v41 = vld [vmem:[%s6602_s3 + $0x1920] sm:$0xff] }
 0x192   :  { %2143 = vmatpush.msrb.mxu0 %v767_v42  ;;  %2162 = vmatpush.msrb.mxu1 %v784_v43  ;;  %v882_v42 = vld [vmem:[%s6602_s3 + $0x19a8] sm:$0xff]  ;;  %v832_v43 = vld [vmem:[%s6602_s3 + $0x1818] sm:$0xff] }
 0x193   :  { %2183 = vmatpush.msrb.mxu2 %v799_v44  ;;  %2202 = vmatpush.msrb.mxu3 %v816_v45  ;;  %v849_v44 = vld [vmem:[%s6602_s3 + $0x18a0] sm:$0xff]  ;;  %v864_v45 = vld [vmem:[%s6602_s3 + $0x1918] sm:$0xff] }
 0x194   :  { %2144 = vmatpush.msrb.mxu0 %v766_v46  ;;  %2163 = vmatpush.msrb.mxu1 %v783_v47  ;;  %v881_v46 = vld [vmem:[%s6602_s3 + $0x19a0] sm:$0xff]  ;;  %v831_v47 = vld [vmem:[%s6602_s3 + $0x1810] sm:$0xff] }
 0x195   :  { %2184 = vmatpush.msrb.mxu2 %v798_v49  ;;  %2203 = vmatpush.msrb.mxu3 %v815_v50  ;;  %v863_v49 = vld [vmem:[%s6602_s3 + $0x1910] sm:$0xff]  ;;  %v880_v50 = vld [vmem:[%s6602_s3 + $0x1998] sm:$0xff] }
 0x196   :  { %2145 = vmatpush.msrb.mxu0 %v765_v51  ;;  %2164 = vmatpush.msrb.mxu1 %v782_v52  ;;  %v830_v51 = vld [vmem:[%s6602_s3 + $0x1808] sm:$0xff]  ;;  %v847_v52 = vld [vmem:[%s6602_s3 + $0x1890] sm:$0xff] }
 0x197   :  { %2185 = vmatpush.msrb.mxu2 %v797_v53  ;;  %2204 = vmatpush.msrb.mxu3 %v814_v54  ;;  %v58_v53 = vld [vmem:[%s6599_s0 + $0x68] sm:$0xff] }
 0x198   :  { %2146 = vmatmul.f32.vlgmr.msrb.gmra.mxu0 %v1162_v55  ;;  %2186 = vmatmul.f32.vlgmr.msrb.gmra.mxu2 %v1164_v56  ;;  %v862_v54 = vld [vmem:[%s6602_s3 + $0x1908] sm:$0xff]  ;;  %v879_v55 = vld [vmem:[%s6602_s3 + $0x1990] sm:$0xff]  ;;  %1167 = vst [vmem:[#allocation1 + $0x20] ss:$4 sm:$0xff] %v58_v53  ;;  %v829_v56 = vld [vmem:[%s6602_s3 + $0x1800] sm:$0xff] }
 0x199   :  { %2210 = vmatpush.msra.mxu0 %v844_v57  ;;  %2250 = vmatpush.msra.mxu2 %v876_v58  ;;  %v846_v57 = vld [vmem:[%s6602_s3 + $0x1888] sm:$0xff]  ;;  %v861_v58 = vld [vmem:[%s6602_s3 + $0x1900] sm:$0xff]  ;;  %v912_v53 = vld [vmem:[%s6602_s3 + $0x1a98] sm:$0xff] }
 0x19a   :  { %2165 = vmatpush.msrb.mxu1 %v781_v59  ;;  %2205 = vmatpush.msrb.mxu3 %v813_v60  ;;  %v878_v59 = vld [vmem:[%s6602_s3 + $0x1988] sm:$0xff]  ;;  %v1168_v60 = vld.sshfl [vmem:[#allocation1] sm:$0xff pattern:$0x73625140] }
 0x19b   :  { %2166 = vmatmul.f32.vlgmr.msrb.gmra.mxu1 %v1163_v61  ;;  %2206 = vmatmul.f32.vlgmr.msrb.gmra.mxu3 %v1165_v62  ;;  %v1170_v61 = vld.sshfl [vmem:[#allocation1 + $0x10] sm:$0xff pattern:$0x73625140]  ;;  %v908_v62 = vld [vmem:[%s6602_s3 + $0x1a78] sm:$0xff] }
 0x19c   :  { %2211 = vmatpush.msra.mxu0 %v843_v63  ;;  %2230 = vmatpush.msra.mxu1 %v860_v0  ;;  %v940_v63 = vld [vmem:[%s6602_s3 + $0x1b78] sm:$0xff]  ;;  %v845_v0 = vld [vmem:[%s6602_s3 + $0x1880] sm:$0xff] }
 0x19d   :  { %2251 = vmatpush.msra.mxu2 %v875_v1  ;;  %2270 = vmatpush.msra.mxu3 %v892_v2  ;;  %v877_v1 = vld [vmem:[%s6602_s3 + $0x1980] sm:$0xff]  ;;  %v1169_v2 = vld.sshfl [vmem:[#allocation1 + $0x8] sm:$0xff pattern:$0x73625140] }
 0x19e   :  { %2212 = vmatpush.msra.mxu0 %v842_v3  ;;  %2231 = vmatpush.msra.mxu1 %v859_v4  ;;  %v1171_v3 = vld.sshfl [vmem:[#allocation1 + $0x18] sm:$0xff pattern:$0x73625140]  ;;  %v907_v4 = vld [vmem:[%s6602_s3 + $0x1a70] sm:$0xff] }
 0x19f   :  { %2252 = vmatpush.msra.mxu2 %v874_v5  ;;  %2271 = vmatpush.msra.mxu3 %v891_v6  ;;  %v924_v5 = vld [vmem:[%s6602_s3 + $0x1af8] sm:$0xff]  ;;  %v939_v6 = vld [vmem:[%s6602_s3 + $0x1b70] sm:$0xff] }
 0x1a0   :  { %2213 = vmatpush.msra.mxu0 %v841_v7  ;;  %2232 = vmatpush.msra.mxu1 %v858_v8  ;;  %v956_v7 = vld [vmem:[%s6602_s3 + $0x1bf8] sm:$0xff]  ;;  %v906_v8 = vld [vmem:[%s6602_s3 + $0x1a68] sm:$0xff] }
 0x1a1   :  { %2253 = vmatpush.msra.mxu2 %v873_v9  ;;  %2272 = vmatpush.msra.mxu3 %v890_v10  ;;  %v923_v9 = vld [vmem:[%s6602_s3 + $0x1af0] sm:$0xff]  ;;  %v938_v10 = vld [vmem:[%s6602_s3 + $0x1b68] sm:$0xff] }
 0x1a2   :  { %2214 = vmatpush.msra.mxu0 %v840_v11  ;;  %2233 = vmatpush.msra.mxu1 %v857_v12  ;;  %v955_v11 = vld [vmem:[%s6602_s3 + $0x1bf0] sm:$0xff]  ;;  %v905_v12 = vld [vmem:[%s6602_s3 + $0x1a60] sm:$0xff] }
 0x1a3   :  { %2254 = vmatpush.msra.mxu2 %v872_v13  ;;  %2273 = vmatpush.msra.mxu3 %v889_v14  ;;  %v922_v13 = vld [vmem:[%s6602_s3 + $0x1ae8] sm:$0xff]  ;;  %v937_v14 = vld [vmem:[%s6602_s3 + $0x1b60] sm:$0xff] }
 0x1a4   :  { %2215 = vmatpush.msra.mxu0 %v839_v15  ;;  %2234 = vmatpush.msra.mxu1 %v856_v16  ;;  %v954_v15 = vld [vmem:[%s6602_s3 + $0x1be8] sm:$0xff]  ;;  %v904_v16 = vld [vmem:[%s6602_s3 + $0x1a58] sm:$0xff] }
 0x1a5   :  { %2255 = vmatpush.msra.mxu2 %v871_v17  ;;  %2274 = vmatpush.msra.mxu3 %v888_v18  ;;  %v921_v17 = vld [vmem:[%s6602_s3 + $0x1ae0] sm:$0xff]  ;;  %v936_v18 = vld [vmem:[%s6602_s3 + $0x1b58] sm:$0xff] }
 0x1a6   :  { %2216 = vmatpush.msra.mxu0 %v838_v19  ;;  %2235 = vmatpush.msra.mxu1 %v855_v20  ;;  %v953_v19 = vld [vmem:[%s6602_s3 + $0x1be0] sm:$0xff]  ;;  %v903_v20 = vld [vmem:[%s6602_s3 + $0x1a50] sm:$0xff] }
 0x1a7   :  { %2256 = vmatpush.msra.mxu2 %v870_v21  ;;  %2275 = vmatpush.msra.mxu3 %v887_v22  ;;  %v920_v21 = vld [vmem:[%s6602_s3 + $0x1ad8] sm:$0xff]  ;;  %v935_v22 = vld [vmem:[%s6602_s3 + $0x1b50] sm:$0xff] }
 0x1a8   :  { %2217 = vmatpush.msra.mxu0 %v837_v23  ;;  %2236 = vmatpush.msra.mxu1 %v854_v24  ;;  %v952_v23 = vld [vmem:[%s6602_s3 + $0x1bd8] sm:$0xff]  ;;  %v902_v24 = vld [vmem:[%s6602_s3 + $0x1a48] sm:$0xff] }
 0x1a9   :  { %2257 = vmatpush.msra.mxu2 %v869_v25  ;;  %2276 = vmatpush.msra.mxu3 %v886_v26  ;;  %v919_v25 = vld [vmem:[%s6602_s3 + $0x1ad0] sm:$0xff]  ;;  %v934_v26 = vld [vmem:[%s6602_s3 + $0x1b48] sm:$0xff] }
 0x1aa   :  { %2218 = vmatpush.msra.mxu0 %v836_v27  ;;  %2237 = vmatpush.msra.mxu1 %v853_v29  ;;  %v951_v27 = vld [vmem:[%s6602_s3 + $0x1bd0] sm:$0xff]  ;;  %v901_v29 = vld [vmem:[%s6602_s3 + $0x1a40] sm:$0xff] }
 0x1ab   :  { %2258 = vmatpush.msra.mxu2 %v868_v30  ;;  %2277 = vmatpush.msra.mxu3 %v885_v28  ;;  %v918_v30 = vld [vmem:[%s6602_s3 + $0x1ac8] sm:$0xff]  ;;  %v933_v28 = vld [vmem:[%s6602_s3 + $0x1b40] sm:$0xff] }
 0x1ac   :  { %2219 = vmatpush.msra.mxu0 %v835_v32  ;;  %2238 = vmatpush.msra.mxu1 %v852_v31  ;;  %v950_v32 = vld [vmem:[%s6602_s3 + $0x1bc8] sm:$0xff]  ;;  %v900_v31 = vld [vmem:[%s6602_s3 + $0x1a38] sm:$0xff] }
 0x1ad   :  { %2259 = vmatpush.msra.mxu2 %v867_v33  ;;  %2278 = vmatpush.msra.mxu3 %v884_v34  ;;  %v917_v33 = vld [vmem:[%s6602_s3 + $0x1ac0] sm:$0xff]  ;;  %v932_v34 = vld [vmem:[%s6602_s3 + $0x1b38] sm:$0xff] }
 0x1ae   :  { %2220 = vmatpush.msra.mxu0 %v834_v35  ;;  %2239 = vmatpush.msra.mxu1 %v851_v36  ;;  %v949_v35 = vld [vmem:[%s6602_s3 + $0x1bc0] sm:$0xff]  ;;  %v899_v36 = vld [vmem:[%s6602_s3 + $0x1a30] sm:$0xff] }
 0x1af   :  { %2260 = vmatpush.msra.mxu2 %v866_v37  ;;  %2279 = vmatpush.msra.mxu3 %v883_v38  ;;  %v916_v37 = vld [vmem:[%s6602_s3 + $0x1ab8] sm:$0xff]  ;;  %v931_v38 = vld [vmem:[%s6602_s3 + $0x1b30] sm:$0xff] }
 0x1b0   :  { %2221 = vmatpush.msra.mxu0 %v833_v39  ;;  %2240 = vmatpush.msra.mxu1 %v850_v40  ;;  %v948_v39 = vld [vmem:[%s6602_s3 + $0x1bb8] sm:$0xff]  ;;  %v898_v40 = vld [vmem:[%s6602_s3 + $0x1a28] sm:$0xff] }
 0x1b1   :  { %2261 = vmatpush.msra.mxu2 %v865_v41  ;;  %2280 = vmatpush.msra.mxu3 %v882_v42  ;;  %v915_v41 = vld [vmem:[%s6602_s3 + $0x1ab0] sm:$0xff]  ;;  %v930_v42 = vld [vmem:[%s6602_s3 + $0x1b28] sm:$0xff] }
 0x1b2   :  { %2222 = vmatpush.msra.mxu0 %v832_v43  ;;  %2241 = vmatpush.msra.mxu1 %v849_v44  ;;  %v947_v43 = vld [vmem:[%s6602_s3 + $0x1bb0] sm:$0xff]  ;;  %v897_v44 = vld [vmem:[%s6602_s3 + $0x1a20] sm:$0xff] }
 0x1b3   :  { %2262 = vmatpush.msra.mxu2 %v864_v45  ;;  %2281 = vmatpush.msra.mxu3 %v881_v46  ;;  %v914_v45 = vld [vmem:[%s6602_s3 + $0x1aa8] sm:$0xff]  ;;  %v929_v46 = vld [vmem:[%s6602_s3 + $0x1b20] sm:$0xff] }
 0x1b4   :  { %2223 = vmatpush.msra.mxu0 %v831_v47  ;;  %2242 = vmatpush.msra.mxu1 %v848_v48  ;;  %v946_v47 = vld [vmem:[%s6602_s3 + $0x1ba8] sm:$0xff]  ;;  %v896_v48 = vld [vmem:[%s6602_s3 + $0x1a18] sm:$0xff] }
 0x1b5   :  { %2263 = vmatpush.msra.mxu2 %v863_v49  ;;  %2282 = vmatpush.msra.mxu3 %v880_v50  ;;  %v913_v49 = vld [vmem:[%s6602_s3 + $0x1aa0] sm:$0xff]  ;;  %v928_v50 = vld [vmem:[%s6602_s3 + $0x1b18] sm:$0xff] }
 0x1b6   :  { %2224 = vmatpush.msra.mxu0 %v830_v51  ;;  %2243 = vmatpush.msra.mxu1 %v847_v52  ;;  %v945_v51 = vld [vmem:[%s6602_s3 + $0x1ba0] sm:$0xff]  ;;  %v895_v52 = vld [vmem:[%s6602_s3 + $0x1a10] sm:$0xff] }
 0x1b7   :  { %2264 = vmatpush.msra.mxu2 %v862_v54  ;;  %2283 = vmatpush.msra.mxu3 %v879_v55  ;;  %v927_v54 = vld [vmem:[%s6602_s3 + $0x1b10] sm:$0xff]  ;;  %v944_v55 = vld [vmem:[%s6602_s3 + $0x1b98] sm:$0xff] }
 0x1b8   :  { %2225 = vmatpush.msra.mxu0 %v829_v56  ;;  %2244 = vmatpush.msra.mxu1 %v846_v57  ;;  %v894_v56 = vld [vmem:[%s6602_s3 + $0x1a08] sm:$0xff]  ;;  %v911_v57 = vld [vmem:[%s6602_s3 + $0x1a90] sm:$0xff] }
 0x1b9   :  { %2265 = vmatpush.msra.mxu2 %v861_v58  ;;  %2284 = vmatpush.msra.mxu3 %v878_v59  ;;  %v59_v58 = vld [vmem:[%s6599_s0 + $0x70] sm:$0xff]  ;;  %v926_v59 = vld [vmem:[%s6602_s3 + $0x1b08] sm:$0xff] }
 0x1ba   :  { %2226 = vmatmul.f32.vlgmr.msra.gmra.mxu0 %v1168_v60  ;;  %2266 = vmatmul.f32.vlgmr.msra.gmra.mxu2 %v1170_v61  ;;  %v943_v60 = vld [vmem:[%s6602_s3 + $0x1b90] sm:$0xff]  ;;  %1176 = vst [vmem:[#allocation1] ss:$4 sm:$0xff] %v59_v58  ;;  %v893_v61 = vld [vmem:[%s6602_s3 + $0x1a00] sm:$0xff] }
 0x1bb   :  { %2290 = vmatpush.msrb.mxu0 %v908_v62  ;;  %2330 = vmatpush.msrb.mxu2 %v940_v63  ;;  %v910_v62 = vld [vmem:[%s6602_s3 + $0x1a88] sm:$0xff]  ;;  %v925_v63 = vld [vmem:[%s6602_s3 + $0x1b00] sm:$0xff] }
 0x1bc   :  { %2245 = vmatpush.msra.mxu1 %v845_v0  ;;  %2285 = vmatpush.msra.mxu3 %v877_v1  ;;  %v942_v0 = vld [vmem:[%s6602_s3 + $0x1b88] sm:$0xff]  ;;  %v1172_v1 = vld.sshfl [vmem:[#allocation1 + $0x20] sm:$0xff pattern:$0x73625140] }
 0x1bd   :  { %2246 = vmatmul.f32.vlgmr.msra.gmra.mxu1 %v1169_v2  ;;  %2286 = vmatmul.f32.vlgmr.msra.gmra.mxu3 %v1171_v3  ;;  %v1174_v2 = vld.sshfl [vmem:[#allocation1 + $0x30] sm:$0xff pattern:$0x73625140]  ;;  %v972_v3 = vld [vmem:[%s6602_s3 + $0x1c78] sm:$0xff] }
 0x1be   :  { %2291 = vmatpush.msrb.mxu0 %v907_v4  ;;  %2310 = vmatpush.msrb.mxu1 %v924_v5  ;;  %v1004_v4 = vld [vmem:[%s6602_s3 + $0x1d78] sm:$0xff]  ;;  %v909_v5 = vld [vmem:[%s6602_s3 + $0x1a80] sm:$0xff] }
 0x1bf   :  { %2331 = vmatpush.msrb.mxu2 %v939_v6  ;;  %2350 = vmatpush.msrb.mxu3 %v956_v7  ;;  %v941_v6 = vld [vmem:[%s6602_s3 + $0x1b80] sm:$0xff]  ;;  %v1173_v7 = vld.sshfl [vmem:[#allocation1 + $0x28] sm:$0xff pattern:$0x73625140] }
 0x1c0   :  { %2292 = vmatpush.msrb.mxu0 %v906_v8  ;;  %2311 = vmatpush.msrb.mxu1 %v923_v9  ;;  %v1175_v8 = vld.sshfl [vmem:[#allocation1 + $0x38] sm:$0xff pattern:$0x73625140]  ;;  %v971_v9 = vld [vmem:[%s6602_s3 + $0x1c70] sm:$0xff] }
 0x1c1   :  { %2332 = vmatpush.msrb.mxu2 %v938_v10  ;;  %2351 = vmatpush.msrb.mxu3 %v955_v11  ;;  %v988_v10 = vld [vmem:[%s6602_s3 + $0x1cf8] sm:$0xff]  ;;  %v1003_v11 = vld [vmem:[%s6602_s3 + $0x1d70] sm:$0xff] }
 0x1c2   :  { %2293 = vmatpush.msrb.mxu0 %v905_v12  ;;  %2312 = vmatpush.msrb.mxu1 %v922_v13  ;;  %v1020_v12 = vld [vmem:[%s6602_s3 + $0x1df8] sm:$0xff]  ;;  %v970_v13 = vld [vmem:[%s6602_s3 + $0x1c68] sm:$0xff] }
 0x1c3   :  { %2333 = vmatpush.msrb.mxu2 %v937_v14  ;;  %2352 = vmatpush.msrb.mxu3 %v954_v15  ;;  %v987_v14 = vld [vmem:[%s6602_s3 + $0x1cf0] sm:$0xff]  ;;  %v2953_v15 = vld [vmem:[%s6603_s4] ss:$0 sm:$0xff] }
 0x1c4   :  { %2294 = vmatpush.msrb.mxu0 %v904_v16  ;;  %2313 = vmatpush.msrb.mxu1 %v921_v17  ;;  %v1002_v16 = vld [vmem:[%s6602_s3 + $0x1d68] sm:$0xff]  ;;  %v1019_v17 = vld [vmem:[%s6602_s3 + $0x1df0] sm:$0xff] }
 0x1c5   :  { %2334 = vmatpush.msrb.mxu2 %v936_v18  ;;  %2353 = vmatpush.msrb.mxu3 %v953_v19  ;;  %v1267_v18 = vpop.f32.mrf.mxu0  ;;  %v969_v19 = vld [vmem:[%s6602_s3 + $0x1c60] sm:$0xff] }
 0x1c6   :  { %2295 = vmatpush.msrb.mxu0 %v903_v20  ;;  %2314 = vmatpush.msrb.mxu1 %v920_v21  ;;  %v986_v20 = vld [vmem:[%s6602_s3 + $0x1ce8] sm:$0xff]  ;;  %v1001_v21 = vld [vmem:[%s6602_s3 + $0x1d60] sm:$0xff] }
 0x1c7   :  { %2335 = vmatpush.msrb.mxu2 %v935_v22  ;;  %2354 = vmatpush.msrb.mxu3 %v952_v23  ;;  %v1018_v22 = vld [vmem:[%s6602_s3 + $0x1de8] sm:$0xff]  ;;  %v968_v23 = vld [vmem:[%s6602_s3 + $0x1c58] sm:$0xff] }
 0x1c8   :  { %2296 = vmatpush.msrb.mxu0 %v902_v24  ;;  %2315 = vmatpush.msrb.mxu1 %v919_v25  ;;  %v985_v24 = vld [vmem:[%s6602_s3 + $0x1ce0] sm:$0xff]  ;;  %v1268_v25 = vadd.f32 %v2953_v15, %v1267_v18 }
 0x1c9   :  { %2336 = vmatpush.msrb.mxu2 %v934_v26  ;;  %2355 = vmatpush.msrb.mxu3 %v951_v27  ;;  %v1000_v26 = vld [vmem:[%s6602_s3 + $0x1d58] sm:$0xff]  ;;  %v1017_v27 = vld [vmem:[%s6602_s3 + $0x1de0] sm:$0xff] }
 0x1ca   :  { %2297 = vmatpush.msrb.mxu0 %v901_v29  ;;  %2316 = vmatpush.msrb.mxu1 %v918_v30  ;;  %v1287_v29 = vpop.f32.mrf.mxu1  ;;  %v967_v30 = vld [vmem:[%s6602_s3 + $0x1c50] sm:$0xff]  ;;  %v989_v18 = vld [vmem:[%s6602_s3 + $0x1d00] sm:$0xff] }
 0x1cb   :  { %2337 = vmatpush.msrb.mxu2 %v933_v28  ;;  %2356 = vmatpush.msrb.mxu3 %v950_v32  ;;  %v984_v28 = vld [vmem:[%s6602_s3 + $0x1cd8] sm:$0xff]  ;;  %v999_v32 = vld [vmem:[%s6602_s3 + $0x1d50] sm:$0xff] }
 0x1cc   :  { %2298 = vmatpush.msrb.mxu0 %v900_v31  ;;  %2317 = vmatpush.msrb.mxu1 %v917_v33  ;;  %v1016_v31 = vld [vmem:[%s6602_s3 + $0x1dd8] sm:$0xff]  ;;  %v966_v33 = vld [vmem:[%s6602_s3 + $0x1c48] sm:$0xff] }
 0x1cd   :  { %2338 = vmatpush.msrb.mxu2 %v932_v34  ;;  %2357 = vmatpush.msrb.mxu3 %v949_v35  ;;  %v983_v34 = vld [vmem:[%s6602_s3 + $0x1cd0] sm:$0xff]  ;;  %v1288_v35 = vadd.f32 %v1287_v29, %v1268_v25  ;;  %v1347_v58 = vpop.f32.mrf.mxu0  ;;  %v1179_v29 = vld.sshfl [vmem:[#allocation1 + $0x8] sm:$0xff pattern:$0x73625140] }
 0x1ce   :  { %2299 = vmatpush.msrb.mxu0 %v899_v36  ;;  %2318 = vmatpush.msrb.mxu1 %v916_v37  ;;  %v998_v36 = vld [vmem:[%s6602_s3 + $0x1d48] sm:$0xff]  ;;  %v1015_v37 = vld [vmem:[%s6602_s3 + $0x1dd0] sm:$0xff] }
 0x1cf   :  { %2339 = vmatpush.msrb.mxu2 %v931_v38  ;;  %2358 = vmatpush.msrb.mxu3 %v948_v39  ;;  %v1307_v38 = vpop.f32.mrf.mxu2  ;;  %v965_v39 = vld [vmem:[%s6602_s3 + $0x1c40] sm:$0xff] }
 0x1d0   :  { %2300 = vmatpush.msrb.mxu0 %v898_v40  ;;  %2319 = vmatpush.msrb.mxu1 %v915_v41  ;;  %v982_v40 = vld [vmem:[%s6602_s3 + $0x1cc8] sm:$0xff]  ;;  %v997_v41 = vld [vmem:[%s6602_s3 + $0x1d40] sm:$0xff] }
 0x1d1   :  { %2340 = vmatpush.msrb.mxu2 %v930_v42  ;;  %2359 = vmatpush.msrb.mxu3 %v947_v43  ;;  %v1014_v42 = vld [vmem:[%s6602_s3 + $0x1dc8] sm:$0xff]  ;;  %v964_v43 = vld [vmem:[%s6602_s3 + $0x1c38] sm:$0xff] }
 0x1d2   :  { %2301 = vmatpush.msrb.mxu0 %v897_v44  ;;  %2320 = vmatpush.msrb.mxu1 %v914_v45  ;;  %v981_v44 = vld [vmem:[%s6602_s3 + $0x1cc0] sm:$0xff]  ;;  %v1308_v45 = vadd.f32 %v1307_v38, %v1288_v35  ;;  %v1084_v35 = vld [vmem:[%s6602_s3 + $0x1ff8] sm:$0xff] }
 0x1d3   :  { %2341 = vmatpush.msrb.mxu2 %v929_v46  ;;  %2360 = vmatpush.msrb.mxu3 %v946_v47  ;;  %v996_v46 = vld [vmem:[%s6602_s3 + $0x1d38] sm:$0xff]  ;;  %v1013_v47 = vld [vmem:[%s6602_s3 + $0x1dc0] sm:$0xff] }
 0x1d4   :  { %2302 = vmatpush.msrb.mxu0 %v896_v48  ;;  %2321 = vmatpush.msrb.mxu1 %v913_v49  ;;  %v1327_v48 = vpop.f32.mrf.mxu3  ;;  %v963_v49 = vld [vmem:[%s6602_s3 + $0x1c30] sm:$0xff] }
 0x1d5   :  { %2342 = vmatpush.msrb.mxu2 %v928_v50  ;;  %2361 = vmatpush.msrb.mxu3 %v945_v51  ;;  %v980_v50 = vld [vmem:[%s6602_s3 + $0x1cb8] sm:$0xff]  ;;  %v995_v51 = vld [vmem:[%s6602_s3 + $0x1d30] sm:$0xff] }
 0x1d6   :  { %2303 = vmatpush.msrb.mxu0 %v895_v52  ;;  %2322 = vmatpush.msrb.mxu1 %v912_v53  ;;  %v1012_v52 = vld [vmem:[%s6602_s3 + $0x1db8] sm:$0xff]  ;;  %v962_v53 = vld [vmem:[%s6602_s3 + $0x1c28] sm:$0xff] }
 0x1d7   :  { %2343 = vmatpush.msrb.mxu2 %v927_v54  ;;  %2362 = vmatpush.msrb.mxu3 %v944_v55  ;;  %v979_v54 = vld [vmem:[%s6602_s3 + $0x1cb0] sm:$0xff]  ;;  %v1328_v55 = vadd.f32 %v1327_v48, %v1308_v45  ;;  %v1387_v15 = vpop.f32.mrf.mxu2  ;;  %v1082_v45 = vld [vmem:[%s6602_s3 + $0x1fe8] sm:$0xff]  ;;  %v1049_v48 = vld [vmem:[%s6602_s3 + $0x1ee0] sm:$0xff] }
 0x1d8   :  { %2304 = vmatpush.msrb.mxu0 %v894_v56  ;;  %2323 = vmatpush.msrb.mxu1 %v911_v57  ;;  %v994_v56 = vld [vmem:[%s6602_s3 + $0x1d28] sm:$0xff]  ;;  %v1011_v57 = vld [vmem:[%s6602_s3 + $0x1db0] sm:$0xff] }
 0x1d9   :  { %2344 = vmatpush.msrb.mxu2 %v926_v59  ;;  %2363 = vmatpush.msrb.mxu3 %v943_v60  ;;  %v961_v59 = vld [vmem:[%s6602_s3 + $0x1c20] sm:$0xff]  ;;  %v978_v60 = vld [vmem:[%s6602_s3 + $0x1ca8] sm:$0xff] }
 0x1da   :  { %2305 = vmatpush.msrb.mxu0 %v893_v61  ;;  %2324 = vmatpush.msrb.mxu1 %v910_v62  ;;  %v993_v61 = vld [vmem:[%s6602_s3 + $0x1d20] sm:$0xff]  ;;  %v1010_v62 = vld [vmem:[%s6602_s3 + $0x1da8] sm:$0xff] }
 0x1db   :  { %2345 = vmatpush.msrb.mxu2 %v925_v63  ;;  %2364 = vmatpush.msrb.mxu3 %v942_v0  ;;  %v960_v63 = vld [vmem:[%s6602_s3 + $0x1c18] sm:$0xff]  ;;  %v977_v0 = vld [vmem:[%s6602_s3 + $0x1ca0] sm:$0xff] }
 0x1dc   :  { %2306 = vmatmul.f32.vlgmr.msrb.gmra.mxu0 %v1172_v1  ;;  %2346 = vmatmul.f32.vlgmr.msrb.gmra.mxu2 %v1174_v2  ;;  %v1348_v1 = vadd.f32 %v1347_v58, %v1328_v55  ;;  %v992_v2 = vld [vmem:[%s6602_s3 + $0x1d18] sm:$0xff]  ;;  %v1407_v25 = vpop.f32.mrf.mxu3  ;;  %v1063_v55 = vld [vmem:[%s6602_s3 + $0x1f50] sm:$0xff]  ;;  %v1030_v58 = vld [vmem:[%s6602_s3 + $0x1e48] sm:$0xff] }
 0x1dd   :  { %2370 = vmatpush.msra.mxu0 %v972_v3  ;;  %2410 = vmatpush.msra.mxu2 %v1004_v4  ;;  %v1009_v3 = vld [vmem:[%s6602_s3 + $0x1da0] sm:$0xff]  ;;  %v1367_v4 = vpop.f32.mrf.mxu1 }
 0x1de   :  { %2325 = vmatpush.msrb.mxu1 %v909_v5  ;;  %2365 = vmatpush.msrb.mxu3 %v941_v6  ;;  %v959_v5 = vld [vmem:[%s6602_s3 + $0x1c10] sm:$0xff]  ;;  %v976_v6 = vld [vmem:[%s6602_s3 + $0x1c98] sm:$0xff] }
 0x1df   :  { %2326 = vmatmul.f32.vlgmr.msrb.gmra.mxu1 %v1173_v7  ;;  %2366 = vmatmul.f32.vlgmr.msrb.gmra.mxu3 %v1175_v8  ;;  %v991_v7 = vld [vmem:[%s6602_s3 + $0x1d10] sm:$0xff]  ;;  %v1008_v8 = vld [vmem:[%s6602_s3 + $0x1d98] sm:$0xff] }
 0x1e0   :  { %2371 = vmatpush.msra.mxu0 %v971_v9  ;;  %2390 = vmatpush.msra.mxu1 %v988_v10  ;;  %v958_v9 = vld [vmem:[%s6602_s3 + $0x1c08] sm:$0xff]  ;;  %v975_v10 = vld [vmem:[%s6602_s3 + $0x1c90] sm:$0xff] }
 0x1e1   :  { %2411 = vmatpush.msra.mxu2 %v1003_v11  ;;  %2430 = vmatpush.msra.mxu3 %v1020_v12  ;;  %v60_v11 = vld [vmem:[%s6599_s0 + $0x78] sm:$0xff]  ;;  %v1368_v12 = vadd.f32 %v1367_v4, %v1348_v1 }
 0x1e2   :  { %2372 = vmatpush.msra.mxu0 %v970_v13  ;;  %2391 = vmatpush.msra.mxu1 %v987_v14  ;;  %v990_v13 = vld [vmem:[%s6602_s3 + $0x1d08] sm:$0xff]  ;;  %v1007_v14 = vld [vmem:[%s6602_s3 + $0x1d90] sm:$0xff]  ;;  %1177 = vst [vmem:[#allocation1 + $0x20] ss:$4 sm:$0xff] %v60_v11  ;;  %v1028_v4 = vld [vmem:[%s6602_s3 + $0x1e38] sm:$0xff] }
 0x1e3   :  { %2412 = vmatpush.msra.mxu2 %v1002_v16  ;;  %2431 = vmatpush.msra.mxu3 %v1019_v17  ;;  %v957_v16 = vld [vmem:[%s6602_s3 + $0x1c00] sm:$0xff]  ;;  %v974_v17 = vld [vmem:[%s6602_s3 + $0x1c88] sm:$0xff]  ;;  %v1044_v11 = vld [vmem:[%s6602_s3 + $0x1eb8] sm:$0xff] }
 0x1e4   :  { %2373 = vmatpush.msra.mxu0 %v969_v19  ;;  %2392 = vmatpush.msra.mxu1 %v986_v20  ;;  %v1006_v19 = vld [vmem:[%s6602_s3 + $0x1d88] sm:$0xff]  ;;  %v1178_v20 = vld.sshfl [vmem:[#allocation1] sm:$0xff pattern:$0x73625140] }
 0x1e5   :  { %2413 = vmatpush.msra.mxu2 %v1001_v21  ;;  %2432 = vmatpush.msra.mxu3 %v1018_v22  ;;  %v1180_v21 = vld.sshfl [vmem:[#allocation1 + $0x10] sm:$0xff pattern:$0x73625140]  ;;  %v1388_v22 = vadd.f32 %v1387_v15, %v1368_v12  ;;  %v1026_v15 = vld [vmem:[%s6602_s3 + $0x1e28] sm:$0xff] }
 0x1e6   :  { %2374 = vmatpush.msra.mxu0 %v968_v23  ;;  %2393 = vmatpush.msra.mxu1 %v985_v24  ;;  %v1036_v23 = vld [vmem:[%s6602_s3 + $0x1e78] sm:$0xff]  ;;  %v1059_v12 = vld [vmem:[%s6602_s3 + $0x1f30] sm:$0xff] }
 0x1e7   :  { %2414 = vmatpush.msra.mxu2 %v1000_v26  ;;  %2433 = vmatpush.msra.mxu3 %v1017_v27  ;;  %v1068_v24 = vld [vmem:[%s6602_s3 + $0x1f78] sm:$0xff]  ;;  %v973_v26 = vld [vmem:[%s6602_s3 + $0x1c80] sm:$0xff] }
 0x1e8   :  { %2375 = vmatpush.msra.mxu0 %v967_v30  ;;  %2394 = vmatpush.msra.mxu1 %v984_v28  ;;  %v1005_v27 = vld [vmem:[%s6602_s3 + $0x1d80] sm:$0xff]  ;;  %v1181_v30 = vld.sshfl [vmem:[#allocation1 + $0x18] sm:$0xff pattern:$0x73625140]  ;;  %v1427_v28 = vpop.f32.mrf.mxu0 }
 0x1e9   :  { %2415 = vmatpush.msra.mxu2 %v999_v32  ;;  %2434 = vmatpush.msra.mxu3 %v1016_v31  ;;  %v1035_v32 = vld [vmem:[%s6602_s3 + $0x1e70] sm:$0xff]  ;;  %v1052_v31 = vld [vmem:[%s6602_s3 + $0x1ef8] sm:$0xff] }
 0x1ea   :  { %2376 = vmatpush.msra.mxu0 %v966_v33  ;;  %2395 = vmatpush.msra.mxu1 %v983_v34  ;;  %v1408_v33 = vadd.f32 %v1407_v25, %v1388_v22  ;;  %v1067_v34 = vld [vmem:[%s6602_s3 + $0x1f70] sm:$0xff] }
 0x1eb   :  { %2416 = vmatpush.msra.mxu2 %v998_v36  ;;  %2435 = vmatpush.msra.mxu3 %v1015_v37  ;;  %v1034_v36 = vld [vmem:[%s6602_s3 + $0x1e68] sm:$0xff]  ;;  %v1051_v37 = vld [vmem:[%s6602_s3 + $0x1ef0] sm:$0xff] }
 0x1ec   :  { %2377 = vmatpush.msra.mxu0 %v965_v39  ;;  %2396 = vmatpush.msra.mxu1 %v982_v40  ;;  %v1428_v38 = vadd.f32 %v1427_v28, %v1408_v33  ;;  %v1066_v39 = vld [vmem:[%s6602_s3 + $0x1f68] sm:$0xff]  ;;  %v1083_v40 = vld [vmem:[%s6602_s3 + $0x1ff0] sm:$0xff] }
 0x1ed   :  { %2417 = vmatpush.msra.mxu2 %v997_v41  ;;  %2436 = vmatpush.msra.mxu3 %v1014_v42  ;;  %v1447_v41 = vpop.f32.mrf.mxu1  ;;  %v1033_v42 = vld [vmem:[%s6602_s3 + $0x1e60] sm:$0xff] }
 0x1ee   :  { %2378 = vmatpush.msra.mxu0 %v964_v43  ;;  %2397 = vmatpush.msra.mxu1 %v981_v44  ;;  %v1050_v43 = vld [vmem:[%s6602_s3 + $0x1ee8] sm:$0xff]  ;;  %v1065_v44 = vld [vmem:[%s6602_s3 + $0x1f60] sm:$0xff] }
 0x1ef   :  { %2418 = vmatpush.msra.mxu2 %v996_v46  ;;  %2437 = vmatpush.msra.mxu3 %v1013_v47  ;;  %v1467_v46 = vpop.f32.mrf.mxu2  ;;  %v1032_v47 = vld [vmem:[%s6602_s3 + $0x1e58] sm:$0xff] }
 0x1f0   :  { %2379 = vmatpush.msra.mxu0 %v963_v49  ;;  %2398 = vmatpush.msra.mxu1 %v980_v50  ;;  %v1448_v49 = vadd.f32 %v1447_v41, %v1428_v38  ;;  %v1064_v50 = vld [vmem:[%s6602_s3 + $0x1f58] sm:$0xff] }
 0x1f1   :  { %2419 = vmatpush.msra.mxu2 %v995_v51  ;;  %2438 = vmatpush.msra.mxu3 %v1012_v52  ;;  %v1081_v51 = vld [vmem:[%s6602_s3 + $0x1fe0] sm:$0xff]  ;;  %v1031_v52 = vld [vmem:[%s6602_s3 + $0x1e50] sm:$0xff] }
 0x1f2   :  { %2380 = vmatpush.msra.mxu0 %v962_v53  ;;  %2399 = vmatpush.msra.mxu1 %v979_v54  ;;  %v1048_v53 = vld [vmem:[%s6602_s3 + $0x1ed8] sm:$0xff]  ;;  %v1468_v54 = vadd.f32 %v1467_v46, %v1448_v49 }
 0x1f3   :  { %2420 = vmatpush.msra.mxu2 %v994_v56  ;;  %2439 = vmatpush.msra.mxu3 %v1011_v57  ;;  %v1080_v56 = vld [vmem:[%s6602_s3 + $0x1fd8] sm:$0xff]  ;;  %v1487_v57 = vpop.f32.mrf.mxu3 }
 0x1f4   :  { %2381 = vmatpush.msra.mxu0 %v961_v59  ;;  %2400 = vmatpush.msra.mxu1 %v978_v60  ;;  %v1047_v59 = vld [vmem:[%s6602_s3 + $0x1ed0] sm:$0xff]  ;;  %v1062_v60 = vld [vmem:[%s6602_s3 + $0x1f48] sm:$0xff]  ;;  %v1488_v1 = vadd.f32 %v1487_v57, %v1468_v54 }
 0x1f5   :  { %2421 = vmatpush.msra.mxu2 %v993_v61  ;;  %2440 = vmatpush.msra.mxu3 %v1010_v62  ;;  %v1079_v61 = vld [vmem:[%s6602_s3 + $0x1fd0] sm:$0xff]  ;;  %v1507_v62 = vpop.f32.mrf.mxu0 }
 0x1f6   :  { %2382 = vmatpush.msra.mxu0 %v960_v63  ;;  %2401 = vmatpush.msra.mxu1 %v977_v0  ;;  %v1029_v63 = vld [vmem:[%s6602_s3 + $0x1e40] sm:$0xff]  ;;  %v1046_v0 = vld [vmem:[%s6602_s3 + $0x1ec8] sm:$0xff] }
 0x1f7   :  { %2422 = vmatpush.msra.mxu2 %v992_v2  ;;  %2441 = vmatpush.msra.mxu3 %v1009_v3  ;;  %v1061_v2 = vld [vmem:[%s6602_s3 + $0x1f40] sm:$0xff]  ;;  %v1078_v3 = vld [vmem:[%s6602_s3 + $0x1fc8] sm:$0xff] }
 0x1f8   :  { %2383 = vmatpush.msra.mxu0 %v959_v5  ;;  %2402 = vmatpush.msra.mxu1 %v976_v6  ;;  %v1045_v5 = vld [vmem:[%s6602_s3 + $0x1ec0] sm:$0xff]  ;;  %v1508_v6 = vadd.f32 %v1507_v62, %v1488_v1 }
 0x1f9   :  { %2423 = vmatpush.msra.mxu2 %v991_v7  ;;  %2442 = vmatpush.msra.mxu3 %v1008_v8  ;;  %v1060_v7 = vld [vmem:[%s6602_s3 + $0x1f38] sm:$0xff]  ;;  %v1077_v8 = vld [vmem:[%s6602_s3 + $0x1fc0] sm:$0xff] }
 0x1fa   :  { %2384 = vmatpush.msra.mxu0 %v958_v9  ;;  %2403 = vmatpush.msra.mxu1 %v975_v10  ;;  %v1527_v9 = vpop.f32.mrf.mxu1  ;;  %v1027_v10 = vld [vmem:[%s6602_s3 + $0x1e30] sm:$0xff] }
 0x1fb   :  { %2424 = vmatpush.msra.mxu2 %v990_v13  ;;  %2443 = vmatpush.msra.mxu3 %v1007_v14  ;;  %v1076_v13 = vld [vmem:[%s6602_s3 + $0x1fb8] sm:$0xff]  ;;  %v1547_v14 = vpop.f32.mrf.mxu2  ;;  %v1567_v25 = vpop.f32.mrf.mxu3 }
 0x1fc   :  { %2385 = vmatpush.msra.mxu0 %v957_v16  ;;  %2404 = vmatpush.msra.mxu1 %v974_v17  ;;  %v1043_v16 = vld [vmem:[%s6602_s3 + $0x1eb0] sm:$0xff]  ;;  %v1528_v17 = vadd.f32 %v1527_v9, %v1508_v6 }
 0x1fd   :  { %2425 = vmatpush.msra.mxu2 %v989_v18  ;;  %2444 = vmatpush.msra.mxu3 %v1006_v19  ;;  %v1058_v18 = vld [vmem:[%s6602_s3 + $0x1f28] sm:$0xff]  ;;  %v1075_v19 = vld [vmem:[%s6602_s3 + $0x1fb0] sm:$0xff]  ;;  %v1587_v28 = vpop.f32.mrf.mxu0 }
 0x1fe   :  { %2386 = vmatmul.f32.vlgmr.msra.gmra.mxu0 %v1178_v20  ;;  %2426 = vmatmul.f32.vlgmr.msra.gmra.mxu2 %v1180_v21  ;;  %v1025_v20 = vld [vmem:[%s6602_s3 + $0x1e20] sm:$0xff]  ;;  %v1042_v21 = vld [vmem:[%s6602_s3 + $0x1ea8] sm:$0xff]  ;;  %v1548_v22 = vadd.f32 %v1547_v14, %v1528_v17 }
 0x1ff   :  { %2450 = vmatpush.msrb.mxu0 %v1036_v23  ;;  %2490 = vmatpush.msrb.mxu2 %v1068_v24  ;;  %v1057_v23 = vld [vmem:[%s6602_s3 + $0x1f20] sm:$0xff]  ;;  %v1074_v24 = vld [vmem:[%s6602_s3 + $0x1fa8] sm:$0xff] }
 0x200   :  { %2405 = vmatpush.msra.mxu1 %v973_v26  ;;  %2445 = vmatpush.msra.mxu3 %v1005_v27  ;;  %v1024_v26 = vld [vmem:[%s6602_s3 + $0x1e18] sm:$0xff]  ;;  %v1041_v27 = vld [vmem:[%s6602_s3 + $0x1ea0] sm:$0xff]  ;;  %v1568_v33 = vadd.f32 %v1567_v25, %v1548_v22 }
 0x201   :  { %2406 = vmatmul.f32.vlgmr.msra.gmra.mxu1 %v1179_v29  ;;  %2446 = vmatmul.f32.vlgmr.msra.gmra.mxu3 %v1181_v30  ;;  %v1056_v29 = vld [vmem:[%s6602_s3 + $0x1f18] sm:$0xff]  ;;  %v1073_v30 = vld [vmem:[%s6602_s3 + $0x1fa0] sm:$0xff] }
 0x202   :  { %2451 = vmatpush.msrb.mxu0 %v1035_v32  ;;  %2470 = vmatpush.msrb.mxu1 %v1052_v31  ;;  %v1023_v32 = vld [vmem:[%s6602_s3 + $0x1e10] sm:$0xff]  ;;  %v1040_v31 = vld [vmem:[%s6602_s3 + $0x1e98] sm:$0xff]  ;;  %v1588_v38 = vadd.f32 %v1587_v28, %v1568_v33  ;;  %v1607_v41 = vpop.f32.mrf.mxu1 }
 0x203   :  { %2491 = vmatpush.msrb.mxu2 %v1067_v34  ;;  %2510 = vmatpush.msrb.mxu3 %v1084_v35  ;;  %v1055_v34 = vld [vmem:[%s6602_s3 + $0x1f10] sm:$0xff]  ;;  %v1072_v35 = vld [vmem:[%s6602_s3 + $0x1f98] sm:$0xff]  ;;  %v1627_v46 = vpop.f32.mrf.mxu2 }
 0x204   :  { %2452 = vmatpush.msrb.mxu0 %v1034_v36  ;;  %2471 = vmatpush.msrb.mxu1 %v1051_v37  ;;  %v1022_v36 = vld [vmem:[%s6602_s3 + $0x1e08] sm:$0xff]  ;;  %v1039_v37 = vld [vmem:[%s6602_s3 + $0x1e90] sm:$0xff]  ;;  %v1608_v49 = vadd.f32 %v1607_v41, %v1588_v38  ;;  %v2551_v38 = vld [vmem:[%s6605_s6 + $0x78] sm:$0xff] }
 0x205   :  { %2492 = vmatpush.msrb.mxu2 %v1066_v39  ;;  %2511 = vmatpush.msrb.mxu3 %v1083_v40  ;;  %v1054_v39 = vld [vmem:[%s6602_s3 + $0x1f08] sm:$0xff]  ;;  %v1071_v40 = vld [vmem:[%s6602_s3 + $0x1f90] sm:$0xff] }
 0x206   :  { %2453 = vmatpush.msrb.mxu0 %v1033_v42  ;;  %2472 = vmatpush.msrb.mxu1 %v1050_v43  ;;  %v1021_v42 = vld [vmem:[%s6602_s3 + $0x1e00] sm:$0xff]  ;;  %v1038_v43 = vld [vmem:[%s6602_s3 + $0x1e88] sm:$0xff]  ;;  %v1628_v54 = vadd.f32 %v1627_v46, %v1608_v49 }
 0x207   :  { %2493 = vmatpush.msrb.mxu2 %v1065_v44  ;;  %2512 = vmatpush.msrb.mxu3 %v1082_v45  ;;  %v1053_v44 = vld [vmem:[%s6602_s3 + $0x1f00] sm:$0xff]  ;;  %v1070_v45 = vld [vmem:[%s6602_s3 + $0x1f88] sm:$0xff] }
 0x208   :  { %2454 = vmatpush.msrb.mxu0 %v1032_v47  ;;  %2473 = vmatpush.msrb.mxu1 %v1049_v48  ;;  %v1182_v47 = vld.sshfl [vmem:[#allocation1 + $0x20] sm:$0xff pattern:$0x73625140]  ;;  %v1184_v48 = vld.sshfl [vmem:[#allocation1 + $0x30] sm:$0xff pattern:$0x73625140] }
 0x209   :  { %2494 = vmatpush.msrb.mxu2 %v1064_v50  ;;  %2513 = vmatpush.msrb.mxu3 %v1081_v51  ;;  %v1037_v50 = vld [vmem:[%s6602_s3 + $0x1e80] sm:$0xff] }
 0x20a   :  { %2455 = vmatpush.msrb.mxu0 %v1031_v52  ;;  %2474 = vmatpush.msrb.mxu1 %v1048_v53  ;;  %v1069_v51 = vld [vmem:[%s6602_s3 + $0x1f80] sm:$0xff]  ;;  %v1183_v52 = vld.sshfl [vmem:[#allocation1 + $0x28] sm:$0xff pattern:$0x73625140] }
 0x20b   :  { %2495 = vmatpush.msrb.mxu2 %v1063_v55  ;;  %2514 = vmatpush.msrb.mxu3 %v1080_v56  ;;  %v1185_v53 = vld.sshfl [vmem:[#allocation1 + $0x38] sm:$0xff pattern:$0x73625140]  ;;  %v1647_v55 = vpop.f32.mrf.mxu3  ;;  %v1667_v56 = vpop.f32.mrf.mxu0 }
 0x20c   :  { %2456 = vmatpush.msrb.mxu0 %v1030_v58  ;;  %2475 = vmatpush.msrb.mxu1 %v1047_v59  ;;  %v1648_v57 = vadd.f32 %v1647_v55, %v1628_v54  ;;  %v1687_v59 = vpop.f32.mrf.mxu1  ;;  %v2548_v54 = vld [vmem:[%s6605_s6 + $0x60] sm:$0xff]  ;;  %v2549_v55 = vld [vmem:[%s6605_s6 + $0x68] sm:$0xff] }
 0x20d   :  { %2496 = vmatpush.msrb.mxu2 %v1062_v60  ;;  %2515 = vmatpush.msrb.mxu3 %v1079_v61  ;;  %v1707_v60 = vpop.f32.mrf.mxu2 }
 0x20e   :  { %2457 = vmatpush.msrb.mxu0 %v1029_v63  ;;  %2476 = vmatpush.msrb.mxu1 %v1046_v0  ;;  %v1668_v58 = vadd.f32 %v1667_v56, %v1648_v57 }
 0x20f   :  { %2497 = vmatpush.msrb.mxu2 %v1061_v2  ;;  %2516 = vmatpush.msrb.mxu3 %v1078_v3 }
 0x210   :  { %2458 = vmatpush.msrb.mxu0 %v1028_v4  ;;  %2477 = vmatpush.msrb.mxu1 %v1045_v5  ;;  %v1688_v61 = vadd.f32 %v1687_v59, %v1668_v58  ;;  %v2546_v58 = vld [vmem:[%s6605_s6 + $0x50] sm:$0xff]  ;;  %v2547_v59 = vld [vmem:[%s6605_s6 + $0x58] sm:$0xff] }
 0x211   :  { %2498 = vmatpush.msrb.mxu2 %v1060_v7  ;;  %2517 = vmatpush.msrb.mxu3 %v1077_v8 }
 0x212   :  { %2459 = vmatpush.msrb.mxu0 %v1027_v10  ;;  %2478 = vmatpush.msrb.mxu1 %v1044_v11  ;;  %v1708_v62 = vadd.f32 %v1707_v60, %v1688_v61  ;;  %v2544_v61 = vld [vmem:[%s6605_s6 + $0x40] sm:$0xff] }
 0x213   :  { %2499 = vmatpush.msrb.mxu2 %v1059_v12  ;;  %2518 = vmatpush.msrb.mxu3 %v1076_v13  ;;  %v1727_v63 = vpop.f32.mrf.mxu3  ;;  %v1747_v0 = vpop.f32.mrf.mxu0 }
 0x214   :  { %2460 = vmatpush.msrb.mxu0 %v1026_v15  ;;  %2479 = vmatpush.msrb.mxu1 %v1043_v16  ;;  %v1728_v1 = vadd.f32 %v1727_v63, %v1708_v62  ;;  %v1767_v3 = vpop.f32.mrf.mxu1  ;;  %v2545_v62 = vld [vmem:[%s6605_s6 + $0x48] sm:$0xff] }
 0x215   :  { %2500 = vmatpush.msrb.mxu2 %v1058_v18  ;;  %2519 = vmatpush.msrb.mxu3 %v1075_v19  ;;  %v1787_v4 = vpop.f32.mrf.mxu2 }
 0x216   :  { %2461 = vmatpush.msrb.mxu0 %v1025_v20  ;;  %2480 = vmatpush.msrb.mxu1 %v1042_v21  ;;  %v1748_v2 = vadd.f32 %v1747_v0, %v1728_v1  ;;  %v2542_v0 = vld [vmem:[%s6605_s6 + $0x30] sm:$0xff]  ;;  %v2543_v1 = vld [vmem:[%s6605_s6 + $0x38] sm:$0xff] }
 0x217   :  { %2501 = vmatpush.msrb.mxu2 %v1057_v23  ;;  %2520 = vmatpush.msrb.mxu3 %v1074_v24 }
 0x218   :  { %2462 = vmatpush.msrb.mxu0 %v1024_v26  ;;  %2481 = vmatpush.msrb.mxu1 %v1041_v27  ;;  %v1768_v5 = vadd.f32 %v1767_v3, %v1748_v2 }
 0x219   :  { %2502 = vmatpush.msrb.mxu2 %v1056_v29  ;;  %2521 = vmatpush.msrb.mxu3 %v1073_v30 }
 0x21a   :  { %2463 = vmatpush.msrb.mxu0 %v1023_v32  ;;  %2482 = vmatpush.msrb.mxu1 %v1040_v31  ;;  %v1788_v6 = vadd.f32 %v1787_v4, %v1768_v5  ;;  %v2540_v4 = vld [vmem:[%s6605_s6 + $0x20] sm:$0xff]  ;;  %v2541_v5 = vld [vmem:[%s6605_s6 + $0x28] sm:$0xff] }
 0x21b   :  { %2503 = vmatpush.msrb.mxu2 %v1055_v34  ;;  %2522 = vmatpush.msrb.mxu3 %v1072_v35  ;;  %v1807_v7 = vpop.f32.mrf.mxu3  ;;  %v1827_v8 = vpop.f32.mrf.mxu0 }
 0x21c   :  { %2464 = vmatpush.msrb.mxu0 %v1022_v36  ;;  %2483 = vmatpush.msrb.mxu1 %v1039_v37  ;;  %v1808_v9 = vadd.f32 %v1807_v7, %v1788_v6  ;;  %v1847_v11 = vpop.f32.mrf.mxu1  ;;  %v2550_v37 = vld [vmem:[%s6605_s6 + $0x70] sm:$0xff] }
 0x21d   :  { %2504 = vmatpush.msrb.mxu2 %v1054_v39  ;;  %2523 = vmatpush.msrb.mxu3 %v1071_v40  ;;  %v1867_v12 = vpop.f32.mrf.mxu2  ;;  %v2538_v7 = vld [vmem:[%s6605_s6 + $0x10] sm:$0xff] }
 0x21e   :  { %2465 = vmatpush.msrb.mxu0 %v1021_v42  ;;  %2484 = vmatpush.msrb.mxu1 %v1038_v43  ;;  %v1828_v10 = vadd.f32 %v1827_v8, %v1808_v9  ;;  %v2539_v8 = vld [vmem:[%s6605_s6 + $0x18] sm:$0xff] }
 0x21f   :  { %2505 = vmatpush.msrb.mxu2 %v1053_v44  ;;  %2524 = vmatpush.msrb.mxu3 %v1070_v45 }
 0x220   :  { %2466 = vmatmul.f32.vlgmr.msrb.gmra.mxu0 %v1182_v47  ;;  %2506 = vmatmul.f32.vlgmr.msrb.gmra.mxu2 %v1184_v48  ;;  %v1848_v13 = vadd.f32 %v1847_v11, %v1828_v10  ;;  %v2536_v10 = vld [vmem:[%s6605_s6] sm:$0xff]  ;;  %v2537_v11 = vld [vmem:[%s6605_s6 + $0x8] sm:$0xff] }
 0x221   :  { %2485 = vmatpush.msrb.mxu1 %v1037_v50  ;;  %2525 = vmatpush.msrb.mxu3 %v1069_v51 }
 0x222   :  { %2486 = vmatmul.f32.vlgmr.msrb.gmra.mxu1 %v1183_v52  ;;  %2526 = vmatmul.f32.vlgmr.msrb.gmra.mxu3 %v1185_v53  ;;  %v1868_v14 = vadd.f32 %v1867_v12, %v1848_v13 }
 0x223   :  { %v1887_v15 = vpop.f32.mrf.mxu3  ;;  %v1907_v16 = vpop.f32.mrf.mxu0  ;;  %2564 = vmatpush.msra.mxu2 %v2550_v37  ;;  %2584 = vmatpush.msra.mxu3 %v2551_v38  ;;  %v2724_v37 = vld [vmem:[%s6608_s9 + $0xc0] sm:$0xff] }
 0x224   :  { %v1888_v17 = vadd.f32 %v1887_v15, %v1868_v14  ;;  %v1927_v19 = vpop.f32.mrf.mxu1  ;;  %v2534_v14 = vld [vmem:[%s6604_s5 + $0x10] sm:$0xff]  ;;  %v2535_v15 = vld [vmem:[%s6604_s5 + $0x18] sm:$0xff]  ;;  %v2756_v38 = vld [vmem:[%s6608_s9 + $0x1c0] sm:$0xff] }
 0x225   :  { %v1947_v20 = vpop.f32.mrf.mxu2  ;;  %2565 = vmatpush.msra.mxu2 %v2548_v54  ;;  %2585 = vmatpush.msra.mxu3 %v2549_v55  ;;  %v2761_v54 = vld [vmem:[%s6608_s9 + $0x1e8] sm:$0xff]  ;;  %v2727_v55 = vld [vmem:[%s6608_s9 + $0xd8] sm:$0xff] }
 0x226   :  { %v1908_v18 = vadd.f32 %v1907_v16, %v1888_v17  ;;  %v2532_v16 = vld [vmem:[%s6604_s5] sm:$0xff]  ;;  %v2533_v17 = vld [vmem:[%s6604_s5 + $0x8] sm:$0xff] }
 0x227   :  { %2566 = vmatpush.msra.mxu2 %v2546_v58  ;;  %2586 = vmatpush.msra.mxu3 %v2547_v59  ;;  %v2757_v58 = vld [vmem:[%s6608_s9 + $0x1c8] sm:$0xff]  ;;  %v2640_v59 = vld [vmem:[%s6601_s2] sm:$0x3] }
 0x228   :  { %v1928_v21 = vadd.f32 %v1927_v19, %v1908_v18 }
 0x229   :  { %2567 = vmatpush.msra.mxu2 %v2544_v61  ;;  %2587 = vmatpush.msra.mxu3 %v2545_v62  ;;  %v2754_v61 = vld [vmem:[%s6608_s9 + $0x1b0] sm:$0xff]  ;;  %v2723_v62 = vld [vmem:[%s6608_s9 + $0xb8] sm:$0xff] }
 0x22a   :  { %v1948_v22 = vadd.f32 %v1947_v20, %v1928_v21 }
 0x22b   :  { %v1967_v23 = vpop.f32.mrf.mxu3  ;;  %v1987_v24 = vpop.f32.mrf.mxu0  ;;  %2568 = vmatpush.msra.mxu2 %v2542_v0  ;;  %2588 = vmatpush.msra.mxu3 %v2543_v1  ;;  %v2720_v0 = vld [vmem:[%s6608_s9 + $0xa0] sm:$0xff] }
 0x22c   :  { %v1968_v25 = vadd.f32 %v1967_v23, %v1948_v22  ;;  %v2007_v27 = vpop.f32.mrf.mxu1  ;;  %v2752_v1 = vld [vmem:[%s6608_s9 + $0x1a0] sm:$0xff] }
 0x22d   :  { %v2027_v29 = vpop.f32.mrf.mxu2  ;;  %2569 = vmatpush.msra.mxu2 %v2540_v4  ;;  %2589 = vmatpush.msra.mxu3 %v2541_v5  ;;  %v2718_v4 = vld [vmem:[%s6608_s9 + $0x90] sm:$0xff] }
 0x22e   :  { %v1988_v26 = vadd.f32 %v1987_v24, %v1968_v25  ;;  %v2750_v5 = vld [vmem:[%s6608_s9 + $0x190] sm:$0xff] }
 0x22f   :  { %2570 = vmatpush.msra.mxu2 %v2538_v7  ;;  %2590 = vmatpush.msra.mxu3 %v2539_v8  ;;  %v2751_v7 = vld [vmem:[%s6608_s9 + $0x198] sm:$0xff]  ;;  %v2716_v8 = vld [vmem:[%s6608_s9 + $0x80] sm:$0xff] }
 0x230   :  { %v2008_v30 = vadd.f32 %v2007_v27, %v1988_v26 }
 0x231   :  { %2571 = vmatpush.msra.mxu2 %v2536_v10  ;;  %2591 = vmatpush.msra.mxu3 %v2537_v11  ;;  %v2717_v10 = vld [vmem:[%s6608_s9 + $0x88] sm:$0xff] }
 0x232   :  { %v2028_v28 = vadd.f32 %v2027_v29, %v2008_v30  ;;  %v2730_v29 = vld [vmem:[%s6608_s9 + $0xf0] sm:$0xff]  ;;  %v2749_v11 = vld [vmem:[%s6608_s9 + $0x188] sm:$0xff] }
 0x233   :  { %v2047_v32 = vpop.f32.mrf.mxu3  ;;  %v2067_v31 = vpop.f32.mrf.mxu0  ;;  %2614 = vmatpush.msrb.mxu2 %v2534_v14  ;;  %2634 = vmatpush.msrb.mxu3 %v2535_v15  ;;  %v2762_v30 = vld [vmem:[%s6608_s9 + $0x1f0] sm:$0xff]  ;;  %v2715_v14 = vld [vmem:[%s6608_s9 + $0x78] sm:$0xff] }
 0x234   :  { %v2048_v33 = vadd.f32 %v2047_v32, %v2028_v28  ;;  %v2087_v35 = vpop.f32.mrf.mxu1  ;;  %2770 = vmatpush.msra.mxu0 %v2730_v29  ;;  %2790 = vmatpush.msra.mxu1 %v2762_v30  ;;  %v2728_v28 = vld [vmem:[%s6608_s9 + $0xe0] sm:$0xff]  ;;  %v2747_v15 = vld [vmem:[%s6608_s9 + $0x178] sm:$0xff]  ;;  %v2706_v29 = vld [vmem:[%s6608_s9 + $0x30] sm:$0xff] }
 0x235   :  { %v2107_v36 = vpop.f32.mrf.mxu2  ;;  %2615 = vmatpush.msrb.mxu2 %v2532_v16  ;;  %2635 = vmatpush.msrb.mxu3 %v2533_v17  ;;  %v2760_v32 = vld [vmem:[%s6608_s9 + $0x1e0] sm:$0xff]  ;;  %v2738_v30 = vld [vmem:[%s6608_s9 + $0x130] sm:$0xff] }
 0x236   :  { %v2068_v34 = vadd.f32 %v2067_v31, %v2048_v33  ;;  %v2726_v33 = vld [vmem:[%s6608_s9 + $0xd0] sm:$0xff]  ;;  %2771 = vmatpush.msra.mxu0 %v2728_v28  ;;  %2791 = vmatpush.msra.mxu1 %v2760_v32  ;;  %v2712_v16 = vld [vmem:[%s6608_s9 + $0x60] sm:$0xff]  ;;  %v2707_v28 = vld [vmem:[%s6608_s9 + $0x38] sm:$0xff] }
 0x237   :  { %v2744_v17 = vld [vmem:[%s6608_s9 + $0x160] sm:$0xff]  ;;  %v2739_v32 = vld [vmem:[%s6608_s9 + $0x138] sm:$0xff] }
 0x238   :  { %v2088_v39 = vadd.f32 %v2087_v35, %v2068_v34  ;;  %v2758_v35 = vld [vmem:[%s6608_s9 + $0x1d0] sm:$0xff]  ;;  %2772 = vmatpush.msra.mxu0 %v2726_v33  ;;  %v2736_v33 = vld [vmem:[%s6608_s9 + $0x120] sm:$0xff] }
 0x239   :  { %2792 = vmatpush.msra.mxu1 %v2758_v35  ;;  %v2737_v35 = vld [vmem:[%s6608_s9 + $0x128] sm:$0xff] }
 0x23a   :  { %v2108_v40 = vadd.f32 %v2107_v36, %v2088_v39  ;;  %2773 = vmatpush.msra.mxu0 %v2724_v37  ;;  %v2734_v37 = vld [vmem:[%s6608_s9 + $0x110] sm:$0xff] }
 0x23b   :  { %v2127_v41 = vpop.f32.mrf.mxu3  ;;  %v2147_v42 = vpop.f32.mrf.mxu0  ;;  %2793 = vmatpush.msra.mxu1 %v2756_v38  ;;  %v2703_v38 = vld [vmem:[%s6608_s9 + $0x18] sm:$0xff] }
 0x23c   :  { %v2128_v43 = vadd.f32 %v2127_v41, %v2108_v40  ;;  %v2167_v45 = vpop.f32.mrf.mxu1 }
 0x23d   :  { %v2187_v46 = vpop.f32.mrf.mxu2  ;;  %2794 = vmatpush.msra.mxu1 %v2754_v61  ;;  %v2876_v61 = vld [vmem:[%s6610_s11 + $0xc0] sm:$0xff] }
 0x23e   :  { %v2148_v44 = vadd.f32 %v2147_v42, %v2128_v43 }
 0x23f   :  { %2795 = vmatpush.msra.mxu1 %v2752_v1 }
 0x240   :  { %v2168_v47 = vadd.f32 %v2167_v45, %v2148_v44 }
 0x241   :  { %2796 = vmatpush.msra.mxu1 %v2750_v5  ;;  %v2856_v5 = vld [vmem:[%s6610_s11 + $0x20] sm:$0xff] }
 0x242   :  { %v2188_v48 = vadd.f32 %v2187_v46, %v2168_v47  ;;  %v2643_v46 = vld [vmem:[%s6606_s7 + $0x10] sm:$0xff]  ;;  %v2644_v47 = vld [vmem:[%s6606_s7 + $0x18] sm:$0xff] }
 0x243   :  { %v2207_v49 = vpop.f32.mrf.mxu3  ;;  %v2227_v50 = vpop.f32.mrf.mxu0 }
 0x244   :  { %v2208_v51 = vadd.f32 %v2207_v49, %v2188_v48  ;;  %v2247_v53 = vpop.f32.mrf.mxu1  ;;  %v2641_v48 = vld [vmem:[%s6606_s7] sm:$0xff]  ;;  %v2642_v49 = vld [vmem:[%s6606_s7 + $0x8] sm:$0xff] }
 0x245   :  { %v2267_v56 = vpop.f32.mrf.mxu2 }
 0x246   :  { %v2228_v52 = vadd.f32 %v2227_v50, %v2208_v51  ;;  %v2531_v50 = vld [vmem:[%s6600_s1] sm:$0x3]  ;;  %v2731_v51 = vld [vmem:[%s6608_s9 + $0xf8] sm:$0xff] }
 0x248   :  { %v2248_v57 = vadd.f32 %v2247_v53, %v2228_v52  ;;  %v2763_v52 = vld [vmem:[%s6608_s9 + $0x1f8] sm:$0xff]  ;;  %v2729_v53 = vld [vmem:[%s6608_s9 + $0xe8] sm:$0xff] }
 0x24a   :  { %v2268_v60 = vadd.f32 %v2267_v56, %v2248_v57  ;;  %v2759_v56 = vld [vmem:[%s6608_s9 + $0x1d8] sm:$0xff]  ;;  %v2725_v57 = vld [vmem:[%s6608_s9 + $0xc8] sm:$0xff] }
 0x24b   :  { %v2287_v63 = vpop.f32.mrf.mxu3 }
 0x24c   :  { %v2288_v3 = vadd.f32 %v2287_v63, %v2268_v60  ;;  %v2722_v60 = vld [vmem:[%s6608_s9 + $0xb0] sm:$0xff]  ;;  %v2755_v63 = vld [vmem:[%s6608_s9 + $0x1b8] sm:$0xff] }
 0x24d   :  { %2774 = vmatpush.msra.mxu0 %v2722_v60  ;;  %v2860_v60 = vld [vmem:[%s6610_s11 + $0x40] sm:$0xff] }
 0x24f   :  { %2775 = vmatpush.msra.mxu0 %v2720_v0 }
 0x251   :  { %2776 = vmatpush.msra.mxu0 %v2718_v4  ;;  %v2690_v4 = vld [vmem:[%s6607_s8] sm:$0x3] }
 0x253   :  { %2777 = vmatpush.msra.mxu0 %v2716_v8  ;;  %v2692_v8 = vperm.slane %v2690_v4, 0 }
 0x259   :  { %v2307_v2 = vpop.f32.mrf.mxu0 }
 0x25a   :  { %v2308_v6 = vadd.f32 %v2307_v2, %v2288_v3  ;;  %v2721_v2 = vld [vmem:[%s6608_s9 + $0xa8] sm:$0xff] }
 0x25b   :  { %v2753_v3 = vld [vmem:[%s6608_s9 + $0x1a8] sm:$0xff] }
 0x25c   :  { %v2327_v9 = vpop.f32.mrf.mxu1 }
 0x25d   :  { %v2328_v13 = vadd.f32 %v2327_v9, %v2308_v6  ;;  %v2719_v6 = vld [vmem:[%s6608_s9 + $0x98] sm:$0xff]  ;;  %v2748_v9 = vld [vmem:[%s6608_s9 + $0x180] sm:$0xff] }
 0x25e   :  { %2797 = vmatpush.msra.mxu1 %v2748_v9  ;;  %v2693_v9 = vperm.slane %v2690_v4, 1 }
 0x25f   :  { %v2347_v12 = vpop.f32.mrf.mxu2 }
 0x260   :  { %v2348_v18 = vadd.f32 %v2347_v12, %v2328_v13  ;;  %v2714_v12 = vld [vmem:[%s6608_s9 + $0x70] sm:$0xff] }
 0x261   :  { %v2746_v13 = vld [vmem:[%s6608_s9 + $0x170] sm:$0xff]  ;;  %2778 = vmatpush.msra.mxu0 %v2714_v12 }
 0x262   :  { %v2367_v19 = vpop.f32.mrf.mxu3  ;;  %2798 = vmatpush.msra.mxu1 %v2746_v13 }
 0x263   :  { %v2368_v21 = vadd.f32 %v2367_v19, %v2348_v18  ;;  %v2713_v18 = vld [vmem:[%s6608_s9 + $0x68] sm:$0xff]  ;;  %2779 = vmatpush.msra.mxu0 %v2712_v16 }
 0x264   :  { %2799 = vmatpush.msra.mxu1 %v2744_v17  ;;  %v2745_v19 = vld [vmem:[%s6608_s9 + $0x168] sm:$0xff] }
 0x27b   :  { %v2387_v20 = vpop.f32.mrf.mxu0 }
 0x27c   :  { %v2388_v22 = vadd.f32 %v2387_v20, %v2368_v21  ;;  %v2710_v20 = vld [vmem:[%s6608_s9 + $0x50] sm:$0xff] }
 0x27d   :  { %v2742_v21 = vld [vmem:[%s6608_s9 + $0x150] sm:$0xff]  ;;  %2780 = vmatpush.msra.mxu0 %v2710_v20 }
 0x27e   :  { %v2407_v23 = vpop.f32.mrf.mxu1  ;;  %2800 = vmatpush.msra.mxu1 %v2742_v21  ;;  %v2854_v20 = vld [vmem:[%s6610_s11 + $0x10] sm:$0xff]  ;;  %v2873_v21 = vld [vmem:[%s6610_s11 + $0xa8] sm:$0xff] }
 0x27f   :  { %v2408_v25 = vadd.f32 %v2407_v23, %v2388_v22  ;;  %v2711_v22 = vld [vmem:[%s6608_s9 + $0x58] sm:$0xff] }
 0x280   :  { %v2743_v23 = vld [vmem:[%s6608_s9 + $0x158] sm:$0xff] }
 0x281   :  { %v2427_v24 = vpop.f32.mrf.mxu2 }
 0x282   :  { %v2428_v26 = vadd.f32 %v2427_v24, %v2408_v25  ;;  %v2708_v24 = vld [vmem:[%s6608_s9 + $0x40] sm:$0xff] }
 0x283   :  { %v2740_v25 = vld [vmem:[%s6608_s9 + $0x140] sm:$0xff]  ;;  %2781 = vmatpush.msra.mxu0 %v2708_v24 }
 0x284   :  { %v2447_v27 = vpop.f32.mrf.mxu3  ;;  %2801 = vmatpush.msra.mxu1 %v2740_v25  ;;  %v2852_v24 = vld [vmem:[%s6610_s11] sm:$0xff]  ;;  %v2871_v25 = vld [vmem:[%s6610_s11 + $0x98] sm:$0xff] }
 0x285   :  { %v2448_v31 = vadd.f32 %v2447_v27, %v2428_v26  ;;  %v2709_v26 = vld [vmem:[%s6608_s9 + $0x48] sm:$0xff]  ;;  %2782 = vmatpush.msra.mxu0 %v2706_v29  ;;  %v2868_v29 = vld [vmem:[%s6610_s11 + $0x80] sm:$0xff] }
 0x286   :  { %v2741_v27 = vld [vmem:[%s6608_s9 + $0x148] sm:$0xff]  ;;  %2802 = vmatpush.msra.mxu1 %v2738_v30  ;;  %v2764_v30 = vld [vmem:[%s6609_s10] sm:$0x3]  ;;  %s2981_s10 = smov [#allocation2]  }
 0x287   :  { %s2935_s7 = sshll.u32 %s2981_s10, 4  ;;  %s2936_s7 = int_to_ptr.vmem [resolvable:$true] %s2935_s7 }
 0x288   :  { %2803 = vmatpush.msra.mxu1 %v2736_v33 }
 0x28a   :  { %2804 = vmatpush.msra.mxu1 %v2734_v37 }
 0x29d   :  { %v2467_v34 = vpop.f32.mrf.mxu0 }
 0x29e   :  { %v2468_v36 = vadd.f32 %v2467_v34, %v2448_v31  ;;  %v2704_v31 = vld [vmem:[%s6608_s9 + $0x20] sm:$0xff]  ;;  %v2705_v34 = vld [vmem:[%s6608_s9 + $0x28] sm:$0xff] }
 0x29f   :  { %v2487_v39 = vpop.f32.mrf.mxu1  ;;  %2783 = vmatpush.msra.mxu0 %v2704_v31 }
 0x2a0   :  { %v2488_v40 = vadd.f32 %v2487_v39, %v2468_v36  ;;  %v2702_v36 = vld [vmem:[%s6608_s9 + $0x10] sm:$0xff]  ;;  %v2735_v39 = vld [vmem:[%s6608_s9 + $0x118] sm:$0xff] }
 0x2a1   :  { %2784 = vmatpush.msra.mxu0 %v2702_v36 }
 0x2a3   :  { %v2507_v41 = vpop.f32.mrf.mxu2 }
 0x2a4   :  { %v2508_v42 = vadd.f32 %v2507_v41, %v2488_v40  ;;  %v2700_v40 = vld [vmem:[%s6608_s9] sm:$0xff] }
 0x2a5   :  { %v2527_v43 = vpop.f32.mrf.mxu3  ;;  %v2732_v41 = vld [vmem:[%s6608_s9 + $0x100] sm:$0xff]  ;;  %2785 = vmatpush.msra.mxu0 %v2700_v40 }
 0x2a6   :  { %v2528_v44 = vadd.f32 %v2527_v43, %v2508_v42  ;;  %v2701_v42 = vld [vmem:[%s6608_s9 + $0x8] sm:$0xff]  ;;  %2805 = vmatpush.msra.mxu1 %v2732_v41 }
 0x2a7   :  { %v2733_v43 = vld [vmem:[%s6608_s9 + $0x108] sm:$0xff] }
 0x2a8   :  { %v2530_v45 = vmax.f32 %v2528_v44, 0.0  ;;  %v2867_v44 = vld [vmem:[%s6610_s11 + $0x78] sm:$0xff] }
 0x2a9   :  { %2888 = vmatpush.msrb.mxu0 %v2867_v44 }
 0x2aa   :  { %2946 = vmatmul.msk.f32.vlgmr.msra.gmra.mxu2 %vm2552_vm0, %v2530_v45  ;;  %2947 = vmatmul.msk.f32.vlgmr.msra.gmra.mxu3 %vm2552_vm0, %v2530_v45  ;;  %v2866_v45 = vld [vmem:[%s6610_s11 + $0x70] sm:$0xff] }
 0x2ab   :  { %2662 = vmatpush.msra.mxu2 %v2643_v46  ;;  %2682 = vmatpush.msra.mxu3 %v2644_v47  ;;  %v2883_v46 = vld [vmem:[%s6610_s11 + $0xf8] sm:$0xff]  ;;  %v2865_v47 = vld [vmem:[%s6610_s11 + $0x68] sm:$0xff] }
 0x2ac   :  { %2908 = vmatpush.msrb.mxu1 %v2883_v46  ;;  %2889 = vmatpush.msrb.mxu0 %v2866_v45 }
 0x2ad   :  { %2663 = vmatpush.msra.mxu2 %v2641_v48  ;;  %2683 = vmatpush.msra.mxu3 %v2642_v49  ;;  %v2882_v48 = vld [vmem:[%s6610_s11 + $0xf0] sm:$0xff]  ;;  %v2881_v49 = vld [vmem:[%s6610_s11 + $0xe8] sm:$0xff] }
 0x2ae   :  { %2909 = vmatpush.msrb.mxu1 %v2882_v48  ;;  %2890 = vmatpush.msrb.mxu0 %v2865_v47 }
 0x2b0   :  { %2910 = vmatpush.msrb.mxu1 %v2881_v49 }
 0x2b2   :  { %2948 = vmatmul.msk.f32.vlgmr.msrb.gmra.mxu2 %vm2596_vm1, %v2531_v50  ;;  %2949 = vmatmul.msk.f32.vlgmr.msrb.gmra.mxu3 %vm2596_vm1, %v2531_v50  ;;  %v2864_v50 = vld [vmem:[%s6610_s11 + $0x60] sm:$0xff] }
 0x2b3   :  { %2810 = vmatpush.msrb.mxu2 %v2731_v51  ;;  %2830 = vmatpush.msrb.mxu3 %v2763_v52  ;;  %v2880_v51 = vld [vmem:[%s6610_s11 + $0xe0] sm:$0xff]  ;;  %v2863_v52 = vld [vmem:[%s6610_s11 + $0x58] sm:$0xff] }
 0x2b4   :  { %2891 = vmatpush.msrb.mxu0 %v2864_v50  ;;  %2911 = vmatpush.msrb.mxu1 %v2880_v51 }
 0x2b5   :  { %2811 = vmatpush.msrb.mxu2 %v2729_v53  ;;  %2831 = vmatpush.msrb.mxu3 %v2761_v54  ;;  %v2879_v53 = vld [vmem:[%s6610_s11 + $0xd8] sm:$0xff] }
 0x2b6   :  { %2892 = vmatpush.msrb.mxu0 %v2863_v52  ;;  %2912 = vmatpush.msrb.mxu1 %v2879_v53 }
 0x2b7   :  { %2812 = vmatpush.msrb.mxu2 %v2727_v55  ;;  %2832 = vmatpush.msrb.mxu3 %v2759_v56  ;;  %v2862_v56 = vld [vmem:[%s6610_s11 + $0x50] sm:$0xff] }
 0x2b8   :  { %2893 = vmatpush.msrb.mxu0 %v2862_v56 }
 0x2b9   :  { %2813 = vmatpush.msrb.mxu2 %v2725_v57  ;;  %2833 = vmatpush.msrb.mxu3 %v2757_v58  ;;  %v2878_v57 = vld [vmem:[%s6610_s11 + $0xd0] sm:$0xff]  ;;  %v2861_v58 = vld [vmem:[%s6610_s11 + $0x48] sm:$0xff] }
 0x2ba   :  { %2950 = vmatmul.msk.f32.vlgmr.msra.gmra.mxu2 %vm2596_vm1, %v2640_v59  ;;  %2951 = vmatmul.msk.f32.vlgmr.msra.gmra.mxu3 %vm2596_vm1, %v2640_v59  ;;  %v2877_v59 = vld [vmem:[%s6610_s11 + $0xc8] sm:$0xff] }
 0x2bb   :  { %2814 = vmatpush.msrb.mxu2 %v2723_v62  ;;  %2834 = vmatpush.msrb.mxu3 %v2755_v63  ;;  %v2859_v62 = vld [vmem:[%s6610_s11 + $0x38] sm:$0xff] }
 0x2bc   :  { %2913 = vmatpush.msrb.mxu1 %v2878_v57  ;;  %2894 = vmatpush.msrb.mxu0 %v2861_v58  ;;  %v2875_v63 = vld [vmem:[%s6610_s11 + $0xb8] sm:$0xff] }
 0x2bd   :  { %2815 = vmatpush.msrb.mxu2 %v2721_v2  ;;  %2835 = vmatpush.msrb.mxu3 %v2753_v3  ;;  %v2858_v2 = vld [vmem:[%s6610_s11 + $0x30] sm:$0xff]  ;;  %v2857_v3 = vld [vmem:[%s6610_s11 + $0x28] sm:$0xff] }
 0x2be   :  { %2914 = vmatpush.msrb.mxu1 %v2877_v59  ;;  %2895 = vmatpush.msrb.mxu0 %v2860_v60 }
 0x2bf   :  { %2816 = vmatpush.msrb.mxu2 %v2719_v6  ;;  %2836 = vmatpush.msrb.mxu3 %v2751_v7 }
 0x2c0   :  { %2915 = vmatpush.msrb.mxu1 %v2876_v61  ;;  %2896 = vmatpush.msrb.mxu0 %v2859_v62 }
 0x2c1   :  { %2817 = vmatpush.msrb.mxu2 %v2717_v10  ;;  %2837 = vmatpush.msrb.mxu3 %v2749_v11 }
 0x2c2   :  { %2916 = vmatpush.msrb.mxu1 %v2875_v63  ;;  %2897 = vmatpush.msrb.mxu0 %v2858_v2 }
 0x2c3   :  { %2818 = vmatpush.msrb.mxu2 %v2715_v14  ;;  %2838 = vmatpush.msrb.mxu3 %v2747_v15 }
 0x2c4   :  { %2898 = vmatpush.msrb.mxu0 %v2857_v3 }
 0x2c5   :  { %2819 = vmatpush.msrb.mxu2 %v2713_v18  ;;  %2839 = vmatpush.msrb.mxu3 %v2745_v19  ;;  %v2855_v18 = vld [vmem:[%s6610_s11 + $0x18] sm:$0xff]  ;;  %v2874_v19 = vld [vmem:[%s6610_s11 + $0xb0] sm:$0xff] }
 0x2c6   :  { %2899 = vmatpush.msrb.mxu0 %v2856_v5  ;;  %2917 = vmatpush.msrb.mxu1 %v2874_v19 }
 0x2c7   :  { %2820 = vmatpush.msrb.mxu2 %v2711_v22  ;;  %2840 = vmatpush.msrb.mxu3 %v2743_v23  ;;  %v2853_v22 = vld [vmem:[%s6610_s11 + $0x8] sm:$0xff]  ;;  %v2872_v23 = vld [vmem:[%s6610_s11 + $0xa0] sm:$0xff] }
 0x2c8   :  { %2900 = vmatpush.msrb.mxu0 %v2855_v18  ;;  %2918 = vmatpush.msrb.mxu1 %v2873_v21 }
 0x2c9   :  { %2821 = vmatpush.msrb.mxu2 %v2709_v26  ;;  %2841 = vmatpush.msrb.mxu3 %v2741_v27  ;;  %v2870_v26 = vld [vmem:[%s6610_s11 + $0x90] sm:$0xff]  ;;  %v2869_v27 = vld [vmem:[%s6610_s11 + $0x88] sm:$0xff] }
 0x2ca   :  { %2901 = vmatpush.msrb.mxu0 %v2854_v20  ;;  %2919 = vmatpush.msrb.mxu1 %v2872_v23 }
 0x2cb   :  { %2822 = vmatpush.msrb.mxu2 %v2707_v28  ;;  %2842 = vmatpush.msrb.mxu3 %v2739_v32  ;;  %v2766_v28 = vperm.slane %v2764_v30, 0 }
 0x2cc   :  { %2902 = vmatpush.msrb.mxu0 %v2853_v22  ;;  %2920 = vmatpush.msrb.mxu1 %v2871_v25 }
 0x2cd   :  { %2823 = vmatpush.msrb.mxu2 %v2705_v34  ;;  %2843 = vmatpush.msrb.mxu3 %v2737_v35  ;;  %v2767_v35 = vperm.slane %v2764_v30, 1 }
 0x2ce   :  { %2903 = vmatpush.msrb.mxu0 %v2852_v24  ;;  %2921 = vmatpush.msrb.mxu1 %v2870_v26 }
 0x2cf   :  { %2824 = vmatpush.msrb.mxu2 %v2703_v38  ;;  %2844 = vmatpush.msrb.mxu3 %v2735_v39 }
 0x2d0   :  { %2922 = vmatpush.msrb.mxu1 %v2869_v27 }
 0x2d1   :  { %2825 = vmatpush.msrb.mxu2 %v2701_v42  ;;  %2845 = vmatpush.msrb.mxu3 %v2733_v43  ;;  %v2954_v42 = vld [vmem:[%s6611_s12] ss:$0 sm:$0xff] }
 0x2d2   :  { %2923 = vmatpush.msrb.mxu1 %v2868_v29 }
 0x32d   :  { %v2573_v54 = vpop.f32.mrf.mxu2  ;;  %v2593_v55 = vpop.f32.mrf.mxu3 }
 0x335   :  { %v2617_v0 = vpop.f32.mrf.mxu2  ;;  %v2637_v1 = vpop.f32.mrf.mxu3 }
 0x336   :  { %v2618_v6 = vadd.f32 %v2617_v0, %v2573_v54  ;;  %v2638_v7 = vadd.f32 %v2637_v1, %v2593_v55 }
 0x33d   :  { %v2665_v10 = vpop.f32.mrf.mxu2  ;;  %v2685_v11 = vpop.f32.mrf.mxu3 }
 0x33e   :  { %v2688_v12 = vadd.f32 %v2665_v10, %v2618_v6  ;;  %v2689_v13 = vadd.f32 %v2685_v11, %v2638_v7 }
 0x340   :  { %v2696_v14 = vadd.f32 %v2692_v8, %v2688_v12  ;;  %v2697_v15 = vadd.f32 %v2693_v9, %v2689_v13 }
 0x342   :  { %v2698_v16 = vmax.f32 %v2696_v14, 0.0  ;;  %v2699_v17 = vmax.f32 %v2697_v15, 0.0 }
 0x344   :  { %2786 = vmatmul.f32.vlgmr.msra.gmra.mxu0 %v2698_v16  ;;  %2806 = vmatmul.f32.vlgmr.msra.gmra.mxu1 %v2699_v17 }
 0x345   :  { %2826 = vmatmul.f32.vlgmr.msrb.gmra.mxu2 %v2698_v16  ;;  %2846 = vmatmul.f32.vlgmr.msrb.gmra.mxu3 %v2699_v17 }
 0x3c1   :  { %v2787_v32 = vpop.f32.mrf.mxu0  ;;  %v2807_v33 = vpop.f32.mrf.mxu1 }
 0x3c2   :  { %v2788_v31 = vadd.f32 %v2787_v32, %v2766_v28 }
 0x3c4   :  { %v2808_v34 = vadd.f32 %v2807_v33, %v2788_v31 }
 0x3c6   :  { %v2850_v36 = vmax.f32 %v2808_v34, 0.0 }
 0x3c8   :  { %v2827_v37 = vpop.f32.mrf.mxu2  ;;  %2904 = vmatmul.f32.vlgmr.msrb.gmra.mxu0 %v2850_v36  ;;  %v2847_v39 = vpop.f32.mrf.mxu3 }
 0x3c9   :  { %v2828_v38 = vadd.f32 %v2827_v37, %v2767_v35 }
 0x3cb   :  { %v2848_v40 = vadd.f32 %v2847_v39, %v2828_v38 }
 0x3cd   :  { %v2851_v41 = vmax.f32 %v2848_v40, 0.0 }
 0x3cf   :  { %2924 = vmatmul.f32.vlgmr.msrb.gmra.mxu1 %v2851_v41 }
 0x445   :  { %v2905_v43 = vpop.f32.mrf.mxu0 }
 0x446   :  { %v2906_v44 = vadd.f32 %v2954_v42, %v2905_v43 }
 0x44c   :  { %v2925_v45 = vpop.f32.mrf.mxu1 }
 0x44d   :  { %v2926_v46 = vadd.f32 %v2925_v45, %v2906_v44 }
 0x44f   :  { %2929 = vst.msk [vmem:[#allocation2] sm:$0x3] %vm2928_vm2, %v2926_v46 }
 0x450   :  { %2940 = dma.vmem_to_hbm [thread:$0]  %s2936_s7, 32, %s2938_s18, [#allocation3]  }
 0x451   :  { %2979 = dma.done.wait [#allocation3], 32  }
 0x452   :  { %2980 = vsyncadd [#allocation3], 4294967264 }
 0x453   :  { %2945 = vsyncpa [#allocation3], 1 }

// kernel: pair_filtering_forward.4
= control target key start
LH: loop header
LB: loop body
LE: loop exit
PB: predicated region body
PF: predicated region fallthrough
CT: control target
= control target key end

     0   :  { %vm74_vm0 = vcmask 785408   ;;  %s8799_s1 = inlined_call_operand.vmem [shape: f32[25,96,128], index: 1, kind: input, shape index: {}]   ;;  %s8800_s0 = inlined_call_operand.vmem [shape: f32[2,40,10,96], index: 0, kind: input, shape index: {}]   ;;  %s8801_s2 = inlined_call_operand.vmem [shape: f32[1,128], index: 2, kind: input, shape index: {}]   ;;  %s8802_s3 = inlined_call_operand.vmem [shape: f32[2,64,128], index: 3, kind: output, shape index: {}]  }
   0x1   :  { %v73_v0 = vld [vmem:[%s8799_s1 + $0x58] sm:$0xff]  ;;  %v72_v1 = vld [vmem:[%s8799_s1 + $0x50] sm:$0xff]  ;;  %v71_v2 = vld [vmem:[%s8799_s1 + $0x48] sm:$0xff] }
   0x2   :  { %5885 = vmatpush.msra.mxu1 %v73_v0  ;;  %5886 = vmatpush.msra.mxu2 %v73_v0  ;;  %v70_v3 = vld [vmem:[%s8799_s1 + $0x40] sm:$0xff]  ;;  %v69_v4 = vld [vmem:[%s8799_s1 + $0x38] sm:$0xff]  ;;  %v68_v5 = vld [vmem:[%s8799_s1 + $0x30] sm:$0xff] }
   0x3   :  { %5887 = vmatpush.msra.mxu3 %v73_v0  ;;  %127 = vmatpush.msra.mxu0 %v73_v0  ;;  %v67_v6 = vld [vmem:[%s8799_s1 + $0x28] sm:$0xff]  ;;  %v66_v7 = vld [vmem:[%s8799_s1 + $0x20] sm:$0xff]  ;;  %v65_v8 = vld [vmem:[%s8799_s1 + $0x18] sm:$0xff] }
   0x4   :  { %5888 = vmatpush.msra.mxu1 %v72_v1  ;;  %5889 = vmatpush.msra.mxu2 %v72_v1  ;;  %v64_v9 = vld [vmem:[%s8799_s1 + $0x10] sm:$0xff]  ;;  %v63_v10 = vld [vmem:[%s8799_s1 + $0x8] sm:$0xff]  ;;  %v62_v11 = vld [vmem:[%s8799_s1] sm:$0xff] }
   0x5   :  { %5890 = vmatpush.msra.mxu3 %v72_v1  ;;  %128 = vmatpush.msra.mxu0 %v72_v1  ;;  %v34_v12 = vld [vmem:[%s8800_s0 + $0x40] sm:$0xff]  ;;  %v4916_v14 = vld [vmem:[%s8799_s1 + $0x118] sm:$0xff]  ;;  %v4915_v18 = vld [vmem:[%s8799_s1 + $0x110] sm:$0xff] }
   0x6   :  { %5891 = vmatpush.msra.mxu1 %v71_v2  ;;  %5892 = vmatpush.msra.mxu2 %v71_v2  ;;  %v38_v13 = vld [vmem:[%s8800_s0 + $0x280] sm:$0xff]  ;;  %v4888_v16 = vld [vmem:[%s8799_s1 + $0xb8] sm:$0xff]  ;;  %v4887_v19 = vld [vmem:[%s8799_s1 + $0xb0] sm:$0xff] }
   0x7   :  { %5893 = vmatpush.msra.mxu3 %v71_v2  ;;  %129 = vmatpush.msra.mxu0 %v71_v2  ;;  %v42_v15 = vld [vmem:[%s8800_s0 + $0x2c0] sm:$0xff]  ;;  %v4960_v17 = vld [vmem:[%s8799_s1 + $0x178] sm:$0xff]  ;;  %v4959_v20 = vld [vmem:[%s8799_s1 + $0x170] sm:$0xff] }
   0x8   :  { %5894 = vmatpush.msra.mxu1 %v70_v3  ;;  %5895 = vmatpush.msra.mxu2 %v70_v3  ;;  %v4914_v21 = vld [vmem:[%s8799_s1 + $0x108] sm:$0xff]  ;;  %v30_v22 = vld [vmem:[%s8800_s0] sm:$0xff]  ;;  %v35_v26 = vld [vmem:[%s8800_s0 + $0x50] sm:$0xff] }
   0x9   :  { %5896 = vmatpush.msra.mxu3 %v70_v3  ;;  %130 = vmatpush.msra.mxu0 %v70_v3  ;;  %v4886_v23 = vld [vmem:[%s8799_s1 + $0xa8] sm:$0xff]  ;;  %v4913_v24 = vld [vmem:[%s8799_s1 + $0x100] sm:$0xff]  ;;  %v39_v27 = vld [vmem:[%s8800_s0 + $0x290] sm:$0xff] }
   0xa   :  { %5897 = vmatpush.msra.mxu1 %v69_v4  ;;  %5898 = vmatpush.msra.mxu2 %v69_v4  ;;  %v4958_v25 = vld [vmem:[%s8799_s1 + $0x168] sm:$0xff]  ;;  %v4957_v28 = vld [vmem:[%s8799_s1 + $0x160] sm:$0xff]  ;;  %v4988_v29 = vld [vmem:[%s8799_s1 + $0x1d8] sm:$0xff] }
   0xb   :  { %5899 = vmatpush.msra.mxu3 %v69_v4  ;;  %131 = vmatpush.msra.mxu0 %v69_v4  ;;  %v43_v30 = vld [vmem:[%s8800_s0 + $0x2d0] sm:$0xff]  ;;  %v4912_v31 = vld [vmem:[%s8799_s1 + $0xf8] sm:$0xff]  ;;  %v4885_v32 = vld [vmem:[%s8799_s1 + $0xa0] sm:$0xff] }
   0xc   :  { %5900 = vmatpush.msra.mxu1 %v68_v5  ;;  %5901 = vmatpush.msra.mxu2 %v68_v5  ;;  %v4956_v33 = vld [vmem:[%s8799_s1 + $0x158] sm:$0xff]  ;;  %v4987_v34 = vld [vmem:[%s8799_s1 + $0x1d0] sm:$0xff]  ;;  %v4910_v38 = vld [vmem:[%s8799_s1 + $0xe8] sm:$0xff] }
   0xd   :  { %5902 = vmatpush.msra.mxu3 %v68_v5  ;;  %132 = vmatpush.msra.mxu0 %v68_v5  ;;  %v4911_v35 = vld [vmem:[%s8799_s1 + $0xf0] sm:$0xff]  ;;  %v4884_v36 = vld [vmem:[%s8799_s1 + $0x98] sm:$0xff]  ;;  %v4986_v39 = vld [vmem:[%s8799_s1 + $0x1c8] sm:$0xff] }
   0xe   :  { %5903 = vmatpush.msra.mxu1 %v67_v6  ;;  %5904 = vmatpush.msra.mxu2 %v67_v6  ;;  %v4955_v37 = vld [vmem:[%s8799_s1 + $0x150] sm:$0xff]  ;;  %v36_v42 = vld [vmem:[%s8800_s0 + $0x60] sm:$0xff]  ;;  %v4954_v44 = vld [vmem:[%s8799_s1 + $0x148] sm:$0xff] }
   0xf   :  { %5905 = vmatpush.msra.mxu3 %v67_v6  ;;  %133 = vmatpush.msra.mxu0 %v67_v6  ;;  %v31_v40 = vld [vmem:[%s8800_s0 + $0x10] sm:$0xff]  ;;  %v40_v43 = vld [vmem:[%s8800_s0 + $0x2a0] sm:$0xff]  ;;  %v4882_v48 = vld [vmem:[%s8799_s1 + $0x88] sm:$0xff] }
  0x10   :  { %5906 = vmatpush.msra.mxu1 %v66_v7  ;;  %5907 = vmatpush.msra.mxu2 %v66_v7  ;;  %v4883_v41 = vld [vmem:[%s8799_s1 + $0x90] sm:$0xff]  ;;  %v4985_v45 = vld [vmem:[%s8799_s1 + $0x1c0] sm:$0xff]  ;;  %v4984_v50 = vld [vmem:[%s8799_s1 + $0x1b8] sm:$0xff] }
  0x11   :  { %5908 = vmatpush.msra.mxu3 %v66_v7  ;;  %134 = vmatpush.msra.mxu0 %v66_v7  ;;  %v44_v46 = vld [vmem:[%s8800_s0 + $0x2e0] sm:$0xff]  ;;  %v4908_v51 = vld [vmem:[%s8799_s1 + $0xd8] sm:$0xff]  ;;  %v4907_v54 = vld [vmem:[%s8799_s1 + $0xd0] sm:$0xff] }
  0x12   :  { %5909 = vmatpush.msra.mxu1 %v65_v8  ;;  %5910 = vmatpush.msra.mxu2 %v65_v8  ;;  %v4909_v47 = vld [vmem:[%s8799_s1 + $0xe0] sm:$0xff]  ;;  %v4952_v53 = vld [vmem:[%s8799_s1 + $0x138] sm:$0xff]  ;;  %v4983_v55 = vld [vmem:[%s8799_s1 + $0x1b0] sm:$0xff] }
  0x13   :  { %5911 = vmatpush.msra.mxu3 %v65_v8  ;;  %135 = vmatpush.msra.mxu0 %v65_v8  ;;  %v4953_v49 = vld [vmem:[%s8799_s1 + $0x140] sm:$0xff]  ;;  %v4880_v56 = vld [vmem:[%s8799_s1 + $0x78] sm:$0xff]  ;;  %v37_v58 = vld [vmem:[%s8800_s0 + $0x70] sm:$0xff] }
  0x14   :  { %5912 = vmatpush.msra.mxu1 %v64_v9  ;;  %5913 = vmatpush.msra.mxu2 %v64_v9  ;;  %v4881_v52 = vld [vmem:[%s8799_s1 + $0x80] sm:$0xff]  ;;  %v41_v59 = vld [vmem:[%s8800_s0 + $0x2b0] sm:$0xff]  ;;  %v4982_v61 = vld [vmem:[%s8799_s1 + $0x1a8] sm:$0xff] }
  0x15   :  { %5914 = vmatpush.msra.mxu3 %v64_v9  ;;  %136 = vmatpush.msra.mxu0 %v64_v9  ;;  %v32_v57 = vld [vmem:[%s8800_s0 + $0x20] sm:$0xff]  ;;  %v4951_v60 = vld [vmem:[%s8799_s1 + $0x130] sm:$0xff]  ;;  %v4906_v0 = vld [vmem:[%s8799_s1 + $0xc8] sm:$0xff] }
  0x16   :  { %5915 = vmatpush.msra.mxu1 %v63_v10  ;;  %5916 = vmatpush.msra.mxu2 %v63_v10  ;;  %v45_v62 = vld [vmem:[%s8800_s0 + $0x2f0] sm:$0xff]  ;;  %v4950_v1 = vld [vmem:[%s8799_s1 + $0x128] sm:$0xff]  ;;  %v4981_v3 = vld [vmem:[%s8799_s1 + $0x1a0] sm:$0xff] }
  0x17   :  { %5917 = vmatpush.msra.mxu3 %v63_v10  ;;  %137 = vmatpush.msra.mxu0 %v63_v10  ;;  %v4879_v63 = vld [vmem:[%s8799_s1 + $0x70] sm:$0xff]  ;;  %v4878_v2 = vld [vmem:[%s8799_s1 + $0x68] sm:$0xff]  ;;  %v4905_v4 = vld [vmem:[%s8799_s1 + $0xc0] sm:$0xff] }
  0x18   :  { %5918 = vmatpush.msra.mxu1 %v62_v11  ;;  %5919 = vmatpush.msra.mxu2 %v62_v11  ;;  %v4949_v5 = vld [vmem:[%s8799_s1 + $0x120] sm:$0xff]  ;;  %v4980_v7 = vld [vmem:[%s8799_s1 + $0x198] sm:$0xff]  ;;  %v33_v9 = vld [vmem:[%s8800_s0 + $0x30] sm:$0xff] }
  0x19   :  { %4849 = vmatmul.msk.f32.vlgmr.msra.gmra.mxu1 %vm74_vm0, %v34_v12  ;;  %4853 = vmatmul.msk.f32.vlgmr.msra.gmra.mxu2 %vm74_vm0, %v38_v13  ;;  %v4877_v6 = vld [vmem:[%s8799_s1 + $0x60] sm:$0xff]  ;;  %v5076_v8 = vld [vmem:[%s8799_s1 + $0x298] sm:$0xff]  ;;  %v4979_v12 = vld [vmem:[%s8799_s1 + $0x190] sm:$0xff] }
  0x1a   :  { %508 = vmatpush.msrb.mxu2 %v4916_v14  ;;  %5920 = vmatpush.msra.mxu3 %v62_v11  ;;  %v4861_v10 = vld [vmem:[%s8800_s0 + $0xa0] sm:$0xff]  ;;  %v5120_v13 = vld [vmem:[%s8799_s1 + $0x2f8] sm:$0xff] }
  0x1b   :  { %4857 = vmatmul.msk.f32.vlgmr.msra.gmra.mxu3 %vm74_vm0, %v42_v15  ;;  %318 = vmatpush.msrb.mxu1 %v4888_v16  ;;  %v4933_v14 = vld [vmem:[%s8800_s0 + $0xa1] sm:$0xff]  ;;  %v5032_v15 = vld [vmem:[%s8799_s1 + $0x238] sm:$0xff] }
  0x1c   :  { %698 = vmatpush.msrb.mxu3 %v4960_v17  ;;  %509 = vmatpush.msrb.mxu2 %v4915_v18  ;;  %v4978_v16 = vld [vmem:[%s8799_s1 + $0x188] sm:$0xff]  ;;  %v5075_v17 = vld [vmem:[%s8799_s1 + $0x290] sm:$0xff] }
  0x1d   :  { %319 = vmatpush.msrb.mxu1 %v4887_v19  ;;  %138 = vmatpush.msra.mxu0 %v62_v11  ;;  %v411_v11 = vld [vmem:[%s8800_s0 + $0x1] sm:$0xff]  ;;  %v5119_v18 = vld [vmem:[%s8799_s1 + $0x2f0] sm:$0xff] }
  0x1e   :  { %699 = vmatpush.msrb.mxu3 %v4959_v20  ;;  %510 = vmatpush.msrb.mxu2 %v4914_v21  ;;  %v5031_v19 = vld [vmem:[%s8799_s1 + $0x230] sm:$0xff]  ;;  %v4977_v20 = vld [vmem:[%s8799_s1 + $0x180] sm:$0xff]  ;;  %v5074_v21 = vld [vmem:[%s8799_s1 + $0x288] sm:$0xff] }
  0x1f   :  { %4845 = vmatmul.msk.f32.vlgmr.msra.gmra.mxu0 %vm74_vm0, %v30_v22  ;;  %320 = vmatpush.msrb.mxu1 %v4886_v23  ;;  %v5164_v22 = vld [vmem:[%s8799_s1 + $0x358] sm:$0xff]  ;;  %v5118_v23 = vld [vmem:[%s8799_s1 + $0x2e8] sm:$0xff] }
  0x20   :  { %511 = vmatpush.msrb.mxu2 %v4913_v24  ;;  %700 = vmatpush.msrb.mxu3 %v4958_v25  ;;  %v791_v24 = vld [vmem:[%s8800_s0 + $0x2] sm:$0xff] }
  0x21   :  { %4850 = vmatmul.msk.f32.gmra.mxu1 %vm74_vm0, %v35_v26  ;;  %4854 = vmatmul.msk.f32.gmra.mxu2 %vm74_vm0, %v39_v27  ;;  %v5030_v25 = vld [vmem:[%s8799_s1 + $0x228] sm:$0xff]  ;;  %v4862_v26 = vld [vmem:[%s8800_s0 + $0xb0] sm:$0xff] }
  0x22   :  { %701 = vmatpush.msrb.mxu3 %v4957_v28  ;;  %888 = vmatpush.msrb.mxu0 %v4988_v29  ;;  %v412_v27 = vld [vmem:[%s8800_s0 + $0x11] sm:$0xff]  ;;  %v5073_v29 = vld [vmem:[%s8799_s1 + $0x280] sm:$0xff] }
  0x23   :  { %4858 = vmatmul.msk.f32.gmra.mxu3 %vm74_vm0, %v43_v30  ;;  %512 = vmatpush.msrb.mxu2 %v4912_v31  ;;  %v5163_v28 = vld [vmem:[%s8799_s1 + $0x350] sm:$0xff]  ;;  %v5029_v31 = vld [vmem:[%s8799_s1 + $0x220] sm:$0xff] }
  0x24   :  { %321 = vmatpush.msrb.mxu1 %v4885_v32  ;;  %702 = vmatpush.msrb.mxu3 %v4956_v33  ;;  %v4934_v30 = vld [vmem:[%s8800_s0 + $0xb1] sm:$0xff]  ;;  %v5162_v32 = vld [vmem:[%s8799_s1 + $0x348] sm:$0xff]  ;;  %v5117_v33 = vld [vmem:[%s8799_s1 + $0x2e0] sm:$0xff] }
  0x25   :  { %889 = vmatpush.msrb.mxu0 %v4987_v34  ;;  %513 = vmatpush.msrb.mxu2 %v4911_v35  ;;  %v5161_v34 = vld [vmem:[%s8799_s1 + $0x340] sm:$0xff]  ;;  %v5072_v35 = vld [vmem:[%s8799_s1 + $0x278] sm:$0xff] }
  0x26   :  { %322 = vmatpush.msrb.mxu1 %v4884_v36  ;;  %703 = vmatpush.msrb.mxu3 %v4955_v37  ;;  %v5116_v36 = vld [vmem:[%s8799_s1 + $0x2d8] sm:$0xff] }
  0x27   :  { %514 = vmatpush.msrb.mxu2 %v4910_v38  ;;  %890 = vmatpush.msrb.mxu0 %v4986_v39  ;;  %v5028_v37 = vld [vmem:[%s8799_s1 + $0x218] sm:$0xff]  ;;  %v4863_v39 = vld [vmem:[%s8800_s0 + $0xc0] sm:$0xff] }
  0x28   :  { %4846 = vmatmul.msk.f32.gmra.mxu0 %vm74_vm0, %v31_v40  ;;  %323 = vmatpush.msrb.mxu1 %v4883_v41  ;;  %v792_v38 = vld [vmem:[%s8800_s0 + $0x12] sm:$0xff]  ;;  %v413_v40 = vld [vmem:[%s8800_s0 + $0x21] sm:$0xff] }
  0x29   :  { %4851 = vmatmul.msk.f32.gmra.mxu1 %vm74_vm0, %v36_v42  ;;  %4855 = vmatmul.msk.f32.gmra.mxu2 %vm74_vm0, %v40_v43  ;;  %v4935_v41 = vld [vmem:[%s8800_s0 + $0xc1] sm:$0xff]  ;;  %v5160_v42 = vld [vmem:[%s8799_s1 + $0x338] sm:$0xff]  ;;  %v5071_v43 = vld [vmem:[%s8799_s1 + $0x270] sm:$0xff] }
  0x2a   :  { %704 = vmatpush.msrb.mxu3 %v4954_v44  ;;  %891 = vmatpush.msrb.mxu0 %v4985_v45  ;;  %v793_v44 = vld [vmem:[%s8800_s0 + $0x22] sm:$0xff]  ;;  %v4864_v45 = vld [vmem:[%s8800_s0 + $0xd0] sm:$0xff] }
  0x2b   :  { %4859 = vmatmul.msk.f32.gmra.mxu3 %vm74_vm0, %v44_v46  ;;  %515 = vmatpush.msrb.mxu2 %v4909_v47  ;;  %v414_v46 = vld [vmem:[%s8800_s0 + $0x31] sm:$0xff] }
  0x2c   :  { %324 = vmatpush.msrb.mxu1 %v4882_v48  ;;  %705 = vmatpush.msrb.mxu3 %v4953_v49  ;;  %v4936_v47 = vld [vmem:[%s8800_s0 + $0xd1] sm:$0xff] }
  0x2d   :  { %892 = vmatpush.msrb.mxu0 %v4984_v50  ;;  %516 = vmatpush.msrb.mxu2 %v4908_v51  ;;  %v5115_v48 = vld [vmem:[%s8799_s1 + $0x2d0] sm:$0xff]  ;;  %v4865_v51 = vld [vmem:[%s8800_s0 + $0xe0] sm:$0xff] }
  0x2e   :  { %325 = vmatpush.msrb.mxu1 %v4881_v52  ;;  %706 = vmatpush.msrb.mxu3 %v4952_v53  ;;  %v5027_v49 = vld [vmem:[%s8799_s1 + $0x210] sm:$0xff]  ;;  %v415_v52 = vld [vmem:[%s8800_s0 + $0x41] sm:$0xff] }
  0x2f   :  { %517 = vmatpush.msrb.mxu2 %v4907_v54  ;;  %893 = vmatpush.msrb.mxu0 %v4983_v55  ;;  %v794_v50 = vld [vmem:[%s8800_s0 + $0x32] sm:$0xff]  ;;  %v4937_v53 = vld [vmem:[%s8800_s0 + $0xe1] sm:$0xff] }
  0x30   :  { %326 = vmatpush.msrb.mxu1 %v4880_v56  ;;  %4847 = vmatmul.msk.f32.gmra.mxu0 %vm74_vm0, %v32_v57  ;;  %v5070_v54 = vld [vmem:[%s8799_s1 + $0x268] sm:$0xff]  ;;  %v5159_v55 = vld [vmem:[%s8799_s1 + $0x330] sm:$0xff] }
  0x31   :  { %4852 = vmatmul.msk.f32.gmra.mxu1 %vm74_vm0, %v37_v58  ;;  %4856 = vmatmul.msk.f32.gmra.mxu2 %vm74_vm0, %v41_v59  ;;  %v5114_v56 = vld [vmem:[%s8799_s1 + $0x2c8] sm:$0xff]  ;;  %v4866_v59 = vld [vmem:[%s8800_s0 + $0xf0] sm:$0xff] }
  0x32   :  { %707 = vmatpush.msrb.mxu3 %v4951_v60  ;;  %894 = vmatpush.msrb.mxu0 %v4982_v61  ;;  %v5026_v57 = vld [vmem:[%s8799_s1 + $0x208] sm:$0xff]  ;;  %v416_v60 = vld [vmem:[%s8800_s0 + $0x51] sm:$0xff] }
  0x33   :  { %4860 = vmatmul.msk.f32.gmra.mxu3 %vm74_vm0, %v45_v62  ;;  %327 = vmatpush.msrb.mxu1 %v4879_v63  ;;  %v795_v58 = vld [vmem:[%s8800_s0 + $0x42] sm:$0xff]  ;;  %v4938_v61 = vld [vmem:[%s8800_s0 + $0xf1] sm:$0xff] }
  0x34   :  { %518 = vmatpush.msrb.mxu2 %v4906_v0  ;;  %708 = vmatpush.msrb.mxu3 %v4950_v1  ;;  %v5158_v62 = vld [vmem:[%s8799_s1 + $0x328] sm:$0xff]  ;;  %v5069_v63 = vld [vmem:[%s8799_s1 + $0x260] sm:$0xff] }
  0x35   :  { %328 = vmatpush.msrb.mxu1 %v4878_v2  ;;  %895 = vmatpush.msrb.mxu0 %v4981_v3  ;;  %v5113_v0 = vld [vmem:[%s8799_s1 + $0x2c0] sm:$0xff]  ;;  %v796_v2 = vld [vmem:[%s8800_s0 + $0x52] sm:$0xff] }
  0x36   :  { %519 = vmatpush.msrb.mxu2 %v4905_v4  ;;  %709 = vmatpush.msrb.mxu3 %v4949_v5  ;;  %v5025_v1 = vld [vmem:[%s8799_s1 + $0x200] sm:$0xff] }
  0x37   :  { %329 = vmatpush.msrb.mxu1 %v4877_v6  ;;  %896 = vmatpush.msrb.mxu0 %v4980_v7  ;;  %v4867_v3 = vld [vmem:[%s8800_s0 + $0x100] sm:$0xff]  ;;  %v5068_v7 = vld [vmem:[%s8799_s1 + $0x258] sm:$0xff] }
  0x38   :  { %1270 = vmatpush.msra.mxu2 %v5076_v8  ;;  %4848 = vmatmul.msk.f32.gmra.mxu0 %vm74_vm0, %v33_v9  ;;  %v417_v4 = vld [vmem:[%s8800_s0 + $0x61] sm:$0xff]  ;;  %v4868_v9 = vld [vmem:[%s8800_s0 + $0x110] sm:$0xff] }
  0x39   :  { %4889 = vmatmul.msk.f32.vlgmr.msrb.gmra.mxu1 %vm74_vm0, %v4861_v10  ;;  %4917 = vmatmul.msk.f32.vlgmr.msrb.gmra.mxu2 %vm74_vm0, %v411_v11  ;;  %v4939_v5 = vld [vmem:[%s8800_s0 + $0x101] sm:$0xff]  ;;  %v418_v10 = vld [vmem:[%s8800_s0 + $0x71] sm:$0xff] }
  0x3a   :  { %897 = vmatpush.msrb.mxu0 %v4979_v12  ;;  %1460 = vmatpush.msra.mxu3 %v5120_v13  ;;  %v5157_v6 = vld [vmem:[%s8799_s1 + $0x320] sm:$0xff]  ;;  %v4940_v11 = vld [vmem:[%s8800_s0 + $0x111] sm:$0xff] }
  0x3b   :  { %4961 = vmatmul.msk.f32.vlgmr.msrb.gmra.mxu3 %vm74_vm0, %v4933_v14  ;;  %1079 = vmatpush.msra.mxu1 %v5032_v15  ;;  %v797_v8 = vld [vmem:[%s8800_s0 + $0x62] sm:$0xff]  ;;  %v5112_v12 = vld [vmem:[%s8799_s1 + $0x2b8] sm:$0xff] }
  0x3c   :  { %898 = vmatpush.msrb.mxu0 %v4978_v16  ;;  %1271 = vmatpush.msra.mxu2 %v5075_v17  ;;  %v5024_v13 = vld [vmem:[%s8799_s1 + $0x1f8] sm:$0xff]  ;;  %v4869_v15 = vld [vmem:[%s8800_s0 + $0x320] sm:$0xff] }
  0x3d   :  { %1461 = vmatpush.msra.mxu3 %v5119_v18  ;;  %1080 = vmatpush.msra.mxu1 %v5031_v19  ;;  %v798_v14 = vld [vmem:[%s8800_s0 + $0x72] sm:$0xff]  ;;  %v419_v16 = vld [vmem:[%s8800_s0 + $0x281] sm:$0xff] }
  0x3e   :  { %899 = vmatpush.msrb.mxu0 %v4977_v20  ;;  %1272 = vmatpush.msra.mxu2 %v5074_v21  ;;  %v4941_v17 = vld [vmem:[%s8800_s0 + $0x321] sm:$0xff]  ;;  %v5067_v18 = vld [vmem:[%s8799_s1 + $0x250] sm:$0xff]  ;;  %v5156_v19 = vld [vmem:[%s8799_s1 + $0x318] sm:$0xff] }
  0x3f   :  { %1462 = vmatpush.msra.mxu3 %v5118_v23  ;;  %1081 = vmatpush.msra.mxu1 %v5030_v25  ;;  %v5111_v20 = vld [vmem:[%s8799_s1 + $0x2b0] sm:$0xff] }
  0x40   :  { %1650 = vmatpush.msra.mxu0 %v5164_v22  ;;  %1273 = vmatpush.msra.mxu2 %v5073_v29  ;;  %v5023_v21 = vld [vmem:[%s8799_s1 + $0x1f0] sm:$0xff]  ;;  %v799_v22 = vld [vmem:[%s8800_s0 + $0x282] sm:$0xff] }
  0x41   :  { %4989 = vmatmul.msk.f32.vlgmr.msrb.gmra.mxu0 %vm74_vm0, %v791_v24  ;;  %4890 = vmatmul.msk.f32.gmra.mxu1 %vm74_vm0, %v4862_v26  ;;  %v4870_v23 = vld [vmem:[%s8800_s0 + $0x330] sm:$0xff] }
  0x42   :  { %4918 = vmatmul.msk.f32.gmra.mxu2 %vm74_vm0, %v412_v27  ;;  %1651 = vmatpush.msra.mxu0 %v5163_v28  ;;  %v420_v24 = vld [vmem:[%s8800_s0 + $0x291] sm:$0xff]  ;;  %v5066_v27 = vld [vmem:[%s8799_s1 + $0x248] sm:$0xff]  ;;  %v4871_v28 = vld [vmem:[%s8800_s0 + $0x340] sm:$0xff] }
  0x43   :  { %4962 = vmatmul.msk.f32.gmra.mxu3 %vm74_vm0, %v4934_v30  ;;  %1082 = vmatpush.msra.mxu1 %v5029_v31  ;;  %v4942_v25 = vld [vmem:[%s8800_s0 + $0x331] sm:$0xff]  ;;  %v421_v30 = vld [vmem:[%s8800_s0 + $0x2a1] sm:$0xff] }
  0x44   :  { %1652 = vmatpush.msra.mxu0 %v5162_v32  ;;  %1463 = vmatpush.msra.mxu3 %v5117_v33  ;;  %v5155_v26 = vld [vmem:[%s8799_s1 + $0x310] sm:$0xff]  ;;  %v5110_v31 = vld [vmem:[%s8799_s1 + $0x2a8] sm:$0xff] }
  0x45   :  { %1274 = vmatpush.msra.mxu2 %v5072_v35  ;;  %1083 = vmatpush.msra.mxu1 %v5028_v37  ;;  %v800_v29 = vld [vmem:[%s8800_s0 + $0x292] sm:$0xff]  ;;  %v5022_v32 = vld [vmem:[%s8799_s1 + $0x1e8] sm:$0xff] }
  0x46   :  { %1653 = vmatpush.msra.mxu0 %v5161_v34  ;;  %1464 = vmatpush.msra.mxu3 %v5116_v36  ;;  %v4943_v33 = vld [vmem:[%s8800_s0 + $0x341] sm:$0xff]  ;;  %v4872_v34 = vld [vmem:[%s8800_s0 + $0x350] sm:$0xff] }
  0x47   :  { %1275 = vmatpush.msra.mxu2 %v5071_v43  ;;  %1084 = vmatpush.msra.mxu1 %v5027_v49  ;;  %v801_v35 = vld [vmem:[%s8800_s0 + $0x2a2] sm:$0xff]  ;;  %v422_v36 = vld [vmem:[%s8800_s0 + $0x2b1] sm:$0xff] }
  0x48   :  { %1654 = vmatpush.msra.mxu0 %v5160_v42  ;;  %1465 = vmatpush.msra.mxu3 %v5115_v48  ;;  %v5154_v37 = vld [vmem:[%s8799_s1 + $0x308] sm:$0xff]  ;;  %v802_v42 = vld [vmem:[%s8800_s0 + $0x2b2] sm:$0xff] }
  0x49   :  { %4990 = vmatmul.msk.f32.gmra.mxu0 %vm74_vm0, %v792_v38  ;;  %4891 = vmatmul.msk.f32.gmra.mxu1 %vm74_vm0, %v4863_v39  ;;  %v5065_v38 = vld [vmem:[%s8799_s1 + $0x240] sm:$0xff]  ;;  %v4944_v39 = vld [vmem:[%s8800_s0 + $0x351] sm:$0xff] }
  0x4a   :  { %4919 = vmatmul.msk.f32.gmra.mxu2 %vm74_vm0, %v413_v40  ;;  %1655 = vmatpush.msra.mxu0 %v5159_v55  ;;  %v5109_v40 = vld [vmem:[%s8799_s1 + $0x2a0] sm:$0xff]  ;;  %v5252_v48 = vld [vmem:[%s8799_s1 + $0x418] sm:$0xff] }
  0x4b   :  { %4963 = vmatmul.msk.f32.gmra.mxu3 %vm74_vm0, %v4935_v41  ;;  %1276 = vmatpush.msra.mxu2 %v5070_v54  ;;  %v5021_v41 = vld [vmem:[%s8799_s1 + $0x1e0] sm:$0xff]  ;;  %v5296_v49 = vld [vmem:[%s8799_s1 + $0x478] sm:$0xff] }
  0x4c   :  { %1466 = vmatpush.msra.mxu3 %v5114_v56  ;;  %1085 = vmatpush.msra.mxu1 %v5026_v57  ;;  %v4874_v56 = vld [vmem:[%s8800_s0 + $0x370] sm:$0xff] }
  0x4d   :  { %1656 = vmatpush.msra.mxu0 %v5158_v62  ;;  %1277 = vmatpush.msra.mxu2 %v5069_v63  ;;  %v424_v57 = vld [vmem:[%s8800_s0 + $0x2d1] sm:$0xff] }
  0x4e   :  { %1467 = vmatpush.msra.mxu3 %v5113_v0  ;;  %1086 = vmatpush.msra.mxu1 %v5025_v1  ;;  %v804_v62 = vld [vmem:[%s8800_s0 + $0x2d2] sm:$0xff] }
  0x4f   :  { %1657 = vmatpush.msra.mxu0 %v5157_v6  ;;  %1278 = vmatpush.msra.mxu2 %v5068_v7  ;;  %v5251_v63 = vld [vmem:[%s8799_s1 + $0x410] sm:$0xff] }
  0x50   :  { %1468 = vmatpush.msra.mxu3 %v5112_v12  ;;  %1087 = vmatpush.msra.mxu1 %v5024_v13  ;;  %v5207_v6 = vld [vmem:[%s8799_s1 + $0x3b0] sm:$0xff] }
  0x51   :  { %4991 = vmatmul.msk.f32.gmra.mxu0 %vm74_vm0, %v793_v44  ;;  %4892 = vmatmul.msk.f32.gmra.mxu1 %vm74_vm0, %v4864_v45  ;;  %v4873_v44 = vld [vmem:[%s8800_s0 + $0x360] sm:$0xff]  ;;  %v4876_v12 = vld [vmem:[%s8800_s0 + $0x390] sm:$0xff] }
  0x52   :  { %4920 = vmatmul.msk.f32.gmra.mxu2 %vm74_vm0, %v414_v46  ;;  %1658 = vmatpush.msra.mxu0 %v5156_v19  ;;  %v423_v45 = vld [vmem:[%s8800_s0 + $0x2c1] sm:$0xff]  ;;  %v426_v13 = vld [vmem:[%s8800_s0 + $0x2f1] sm:$0xff] }
  0x53   :  { %4964 = vmatmul.msk.f32.gmra.mxu3 %vm74_vm0, %v4936_v47  ;;  %1279 = vmatpush.msra.mxu2 %v5067_v18  ;;  %v4945_v46 = vld [vmem:[%s8800_s0 + $0x361] sm:$0xff] }
  0x54   :  { %1469 = vmatpush.msra.mxu3 %v5111_v20  ;;  %1088 = vmatpush.msra.mxu1 %v5023_v21  ;;  %v5153_v47 = vld [vmem:[%s8799_s1 + $0x300] sm:$0xff]  ;;  %v5206_v18 = vld [vmem:[%s8799_s1 + $0x3a8] sm:$0xff]  ;;  %v806_v21 = vld [vmem:[%s8800_s0 + $0x2f2] sm:$0xff] }
  0x55   :  { %1659 = vmatpush.msra.mxu0 %v5155_v26  ;;  %1280 = vmatpush.msra.mxu2 %v5066_v27  ;;  %v5093_v26 = vld [vmem:[%s8800_s0 + $0x141] sm:$0xff] }
  0x56   :  { %1470 = vmatpush.msra.mxu3 %v5110_v31  ;;  %1089 = vmatpush.msra.mxu1 %v5022_v32  ;;  %v5249_v27 = vld [vmem:[%s8799_s1 + $0x400] sm:$0xff] }
  0x57   :  { %1660 = vmatpush.msra.mxu0 %v5154_v37  ;;  %1281 = vmatpush.msra.mxu2 %v5065_v38  ;;  %v5006_v38 = vld [vmem:[%s8800_s0 + $0x150] sm:$0xff] }
  0x58   :  { %1471 = vmatpush.msra.mxu3 %v5109_v40  ;;  %1090 = vmatpush.msra.mxu1 %v5021_v41  ;;  %v5094_v41 = vld [vmem:[%s8800_s0 + $0x151] sm:$0xff] }
  0x59   :  { %4992 = vmatmul.msk.f32.gmra.mxu0 %vm74_vm0, %v794_v50  ;;  %4893 = vmatmul.msk.f32.gmra.mxu1 %vm74_vm0, %v4865_v51 }
  0x5a   :  { %4921 = vmatmul.msk.f32.gmra.mxu2 %vm74_vm0, %v415_v52  ;;  %1661 = vmatpush.msra.mxu0 %v5153_v47  ;;  %v803_v52 = vld [vmem:[%s8800_s0 + $0x2c2] sm:$0xff] }
  0x5b   :  { %4965 = vmatmul.msk.f32.gmra.mxu3 %vm74_vm0, %v4937_v53  ;;  %2031 = vmatpush.msrb.mxu2 %v5252_v48  ;;  %v5208_v53 = vld [vmem:[%s8799_s1 + $0x3b8] sm:$0xff] }
  0x5c   :  { %2222 = vmatpush.msrb.mxu3 %v5296_v49  ;;  %1840 = vmatpush.msrb.mxu1 %v5208_v53  ;;  %v5138_v49 = vld [vmem:[%s8800_s0 + $0x1f1] sm:$0xff] }
  0x5d   :  { %2032 = vmatpush.msrb.mxu2 %v5251_v63  ;;  %v5204_v63 = vld [vmem:[%s8799_s1 + $0x398] sm:$0xff] }
  0x5e   :  { %1841 = vmatpush.msrb.mxu1 %v5207_v6  ;;  %v5139_v6 = vld [vmem:[%s8800_s0 + $0x201] sm:$0xff] }
  0x60   :  { %1842 = vmatpush.msrb.mxu1 %v5206_v18 }
  0x61   :  { %4993 = vmatmul.msk.f32.gmra.mxu0 %vm74_vm0, %v795_v58  ;;  %4894 = vmatmul.msk.f32.gmra.mxu1 %vm74_vm0, %v4866_v59  ;;  %v4946_v58 = vld [vmem:[%s8800_s0 + $0x371] sm:$0xff] }
  0x62   :  { %4922 = vmatmul.msk.f32.gmra.mxu2 %vm74_vm0, %v416_v60  ;;  %v5340_v59 = vld [vmem:[%s8799_s1 + $0x4d8] sm:$0xff] }
  0x63   :  { %4966 = vmatmul.msk.f32.gmra.mxu3 %vm74_vm0, %v4938_v61  ;;  %2412 = vmatpush.msrb.mxu0 %v5340_v59  ;;  %v5292_v59 = vld [vmem:[%s8799_s1 + $0x458] sm:$0xff] }
  0x69   :  { %4994 = vmatmul.msk.f32.gmra.mxu0 %vm74_vm0, %v796_v2  ;;  %4895 = vmatmul.msk.f32.gmra.mxu1 %vm74_vm0, %v4867_v3  ;;  %v4875_v2 = vld [vmem:[%s8800_s0 + $0x380] sm:$0xff] }
  0x6a   :  { %4923 = vmatmul.msk.f32.gmra.mxu2 %vm74_vm0, %v417_v4  ;;  %v425_v3 = vld [vmem:[%s8800_s0 + $0x2e1] sm:$0xff]  ;;  %v5295_v4 = vld [vmem:[%s8799_s1 + $0x470] sm:$0xff] }
  0x6b   :  { %4967 = vmatmul.msk.f32.gmra.mxu3 %vm74_vm0, %v4939_v5  ;;  %v4947_v5 = vld [vmem:[%s8800_s0 + $0x381] sm:$0xff] }
  0x6c   :  { %2223 = vmatpush.msrb.mxu3 %v5295_v4 }
  0x71   :  { %4995 = vmatmul.msk.f32.gmra.mxu0 %vm74_vm0, %v797_v8  ;;  %4896 = vmatmul.msk.f32.gmra.mxu1 %vm74_vm0, %v4868_v9  ;;  %v805_v9 = vld [vmem:[%s8800_s0 + $0x2e2] sm:$0xff] }
  0x72   :  { %4924 = vmatmul.msk.f32.gmra.mxu2 %vm74_vm0, %v418_v10 }
  0x73   :  { %4968 = vmatmul.msk.f32.gmra.mxu3 %vm74_vm0, %v4940_v11 }
  0x79   :  { %4996 = vmatmul.msk.f32.gmra.mxu0 %vm74_vm0, %v798_v14  ;;  %4897 = vmatmul.msk.f32.gmra.mxu1 %vm74_vm0, %v4869_v15  ;;  %v5339_v14 = vld [vmem:[%s8799_s1 + $0x4d0] sm:$0xff]  ;;  %v5250_v15 = vld [vmem:[%s8799_s1 + $0x408] sm:$0xff] }
  0x7a   :  { %4925 = vmatmul.msk.f32.gmra.mxu2 %vm74_vm0, %v419_v16  ;;  %v4948_v16 = vld [vmem:[%s8800_s0 + $0x391] sm:$0xff]  ;;  %2413 = vmatpush.msrb.mxu0 %v5339_v14 }
  0x7b   :  { %4969 = vmatmul.msk.f32.gmra.mxu3 %vm74_vm0, %v4941_v17  ;;  %2033 = vmatpush.msrb.mxu2 %v5250_v15  ;;  %v5294_v17 = vld [vmem:[%s8799_s1 + $0x468] sm:$0xff]  ;;  %v5052_v14 = vld [vmem:[%s8800_s0 + $0x210] sm:$0xff]  ;;  %v5336_v15 = vld [vmem:[%s8799_s1 + $0x4b8] sm:$0xff] }
  0x7c   :  { %2224 = vmatpush.msrb.mxu3 %v5294_v17  ;;  %v5096_v17 = vld [vmem:[%s8800_s0 + $0x171] sm:$0xff] }
  0x7d   :  { %2034 = vmatpush.msrb.mxu2 %v5249_v27 }
  0x81   :  { %4997 = vmatmul.msk.f32.gmra.mxu0 %vm74_vm0, %v799_v22  ;;  %4898 = vmatmul.msk.f32.gmra.mxu1 %vm74_vm0, %v4870_v23 }
  0x82   :  { %4926 = vmatmul.msk.f32.gmra.mxu2 %vm74_vm0, %v420_v24  ;;  %v5005_v24 = vld [vmem:[%s8800_s0 + $0x140] sm:$0xff] }
  0x83   :  { %4970 = vmatmul.msk.f32.gmra.mxu3 %vm74_vm0, %v4942_v25  ;;  %v5049_v25 = vld [vmem:[%s8800_s0 + $0x1e0] sm:$0xff] }
  0x89   :  { %4998 = vmatmul.msk.f32.gmra.mxu0 %vm74_vm0, %v800_v29  ;;  %4899 = vmatmul.msk.f32.gmra.mxu1 %vm74_vm0, %v4871_v28  ;;  %v5338_v28 = vld [vmem:[%s8799_s1 + $0x4c8] sm:$0xff] }
  0x8a   :  { %4927 = vmatmul.msk.f32.gmra.mxu2 %vm74_vm0, %v421_v30  ;;  %2414 = vmatpush.msrb.mxu0 %v5338_v28  ;;  %v5293_v30 = vld [vmem:[%s8799_s1 + $0x460] sm:$0xff]  ;;  %v5140_v28 = vld [vmem:[%s8800_s0 + $0x211] sm:$0xff] }
  0x8b   :  { %4971 = vmatmul.msk.f32.gmra.mxu3 %vm74_vm0, %v4943_v33 }
  0x8c   :  { %2225 = vmatpush.msrb.mxu3 %v5293_v30 }
  0x8e   :  { %2226 = vmatpush.msrb.mxu3 %v5292_v59 }
  0x91   :  { %4999 = vmatmul.msk.f32.gmra.mxu0 %vm74_vm0, %v801_v35  ;;  %4900 = vmatmul.msk.f32.gmra.mxu1 %vm74_vm0, %v4872_v34  ;;  %v5137_v34 = vld [vmem:[%s8800_s0 + $0x1e1] sm:$0xff] }
  0x92   :  { %4928 = vmatmul.msk.f32.gmra.mxu2 %vm74_vm0, %v422_v36  ;;  %v5205_v35 = vld [vmem:[%s8799_s1 + $0x3a0] sm:$0xff] }
  0x93   :  { %4972 = vmatmul.msk.f32.gmra.mxu3 %vm74_vm0, %v4944_v39  ;;  %v5050_v39 = vld [vmem:[%s8800_s0 + $0x1f0] sm:$0xff]  ;;  %1843 = vmatpush.msrb.mxu1 %v5205_v35  ;;  %v5246_v35 = vld [vmem:[%s8799_s1 + $0x3e8] sm:$0xff] }
  0x95   :  { %1844 = vmatpush.msrb.mxu1 %v5204_v63  ;;  %v5245_v63 = vld [vmem:[%s8799_s1 + $0x3e0] sm:$0xff] }
  0x96   :  { %v6518_v43 = vpop.f32.mrf.mxu1 }
  0x99   :  { %5000 = vmatmul.msk.f32.gmra.mxu0 %vm74_vm0, %v802_v42  ;;  %4901 = vmatmul.msk.f32.gmra.mxu1 %vm74_vm0, %v4873_v44 }
  0x9a   :  { %4929 = vmatmul.msk.f32.gmra.mxu2 %vm74_vm0, %v423_v45  ;;  %v5337_v45 = vld [vmem:[%s8799_s1 + $0x4c0] sm:$0xff] }
  0x9b   :  { %4973 = vmatmul.msk.f32.gmra.mxu3 %vm74_vm0, %v4945_v46  ;;  %2415 = vmatpush.msrb.mxu0 %v5337_v45  ;;  %v5202_v45 = vld [vmem:[%s8799_s1 + $0x388] sm:$0xff] }
  0x9c   :  { %v6542_v50 = vpop.f32.mrf.mxu2  ;;  %v6544_v51 = vpop.f32.mrf.mxu0 }
  0x9d   :  { %2416 = vmatpush.msrb.mxu0 %v5336_v15 }
  0x9e   :  { %v6552_v54 = vpop.f32.mrf.mxu1  ;;  %v6554_v55 = vpop.f32.mrf.mxu3 }
  0xa1   :  { %5001 = vmatmul.msk.f32.gmra.mxu0 %vm74_vm0, %v803_v52  ;;  %4902 = vmatmul.msk.f32.gmra.mxu1 %vm74_vm0, %v4874_v56  ;;  %v5007_v56 = vld [vmem:[%s8800_s0 + $0x160] sm:$0xff] }
  0xa2   :  { %4930 = vmatmul.msk.f32.gmra.mxu2 %vm74_vm0, %v424_v57  ;;  %v5051_v57 = vld [vmem:[%s8800_s0 + $0x200] sm:$0xff] }
  0xa3   :  { %4974 = vmatmul.msk.f32.gmra.mxu3 %vm74_vm0, %v4946_v58 }
  0xa4   :  { %v6572_v60 = vpop.f32.mrf.mxu2 }
  0xa5   :  { %v6574_v61 = vpop.f32.mrf.mxu0 }
  0xa6   :  { %v6582_v0 = vpop.f32.mrf.mxu1  ;;  %v6584_v1 = vpop.f32.mrf.mxu3 }
  0xa9   :  { %5002 = vmatmul.msk.f32.gmra.mxu0 %vm74_vm0, %v804_v62  ;;  %4903 = vmatmul.msk.f32.gmra.mxu1 %vm74_vm0, %v4875_v2 }
  0xaa   :  { %4931 = vmatmul.msk.f32.gmra.mxu2 %vm74_vm0, %v425_v3 }
  0xab   :  { %4975 = vmatmul.msk.f32.gmra.mxu3 %vm74_vm0, %v4947_v5 }
  0xac   :  { %v6605_v7 = vpop.f32.mrf.mxu2 }
  0xad   :  { %v6607_v8 = vpop.f32.mrf.mxu0 }
  0xae   :  { %v6612_v10 = vpop.f32.mrf.mxu1  ;;  %v6614_v11 = vpop.f32.mrf.mxu3 }
  0xb1   :  { %5003 = vmatmul.msk.f32.gmra.mxu0 %vm74_vm0, %v805_v9  ;;  %4904 = vmatmul.msk.f32.gmra.mxu1 %vm74_vm0, %v4876_v12 }
  0xb2   :  { %4932 = vmatmul.msk.f32.gmra.mxu2 %vm74_vm0, %v426_v13  ;;  %v5008_v13 = vld [vmem:[%s8800_s0 + $0x170] sm:$0xff] }
  0xb3   :  { %4976 = vmatmul.msk.f32.gmra.mxu3 %vm74_vm0, %v4948_v16  ;;  %v5247_v16 = vld [vmem:[%s8799_s1 + $0x3f0] sm:$0xff] }
  0xb4   :  { %v6641_v19 = vpop.f32.mrf.mxu2 }
  0xb5   :  { %v6643_v20 = vpop.f32.mrf.mxu0 }
  0xb6   :  { %v6648_v22 = vpop.f32.mrf.mxu3  ;;  %v331_v23 = vpop.f32.mrf.mxu1 }
  0xb7   :  { %v379_v29 = vadd.f32 %v331_v23, %v6544_v51  ;;  %v5248_v51 = vld [vmem:[%s8799_s1 + $0x3f8] sm:$0xff] }
  0xb8   :  { %2035 = vmatpush.msrb.mxu2 %v5248_v51  ;;  %v5098_v51 = vld [vmem:[%s8800_s0 + $0x191] sm:$0xff] }
  0xb9   :  { %5004 = vmatmul.msk.f32.gmra.mxu0 %vm74_vm0, %v806_v21  ;;  %5033 = vmatmul.msk.f32.vlgmr.msra.gmra.mxu1 %vm74_vm0, %v5005_v24  ;;  %v5291_v21 = vld [vmem:[%s8799_s1 + $0x450] sm:$0xff] }
  0xba   :  { %5077 = vmatmul.msk.f32.vlgmr.msra.gmra.mxu2 %vm74_vm0, %v5049_v25  ;;  %2227 = vmatpush.msrb.mxu3 %v5291_v21  ;;  %v5203_v24 = vld [vmem:[%s8799_s1 + $0x390] sm:$0xff] }
  0xbb   :  { %5121 = vmatmul.msk.f32.vlgmr.msra.gmra.mxu3 %vm74_vm0, %v5093_v26  ;;  %2036 = vmatpush.msrb.mxu2 %v5247_v16 }
  0xbc   :  { %v521_v31 = vpop.f32.mrf.mxu2  ;;  %1845 = vmatpush.msrb.mxu1 %v5203_v24  ;;  %v5012_v24 = vld [vmem:[%s8800_s0 + $0x1b0] sm:$0xff] }
  0xbd   :  { %v569_v32 = vadd.f32 %v521_v31, %v379_v29  ;;  %v5053_v31 = vld [vmem:[%s8800_s0 + $0x220] sm:$0xff]  ;;  %2037 = vmatpush.msrb.mxu2 %v5246_v35 }
  0xbe   :  { %v901_v33 = vpop.f32.mrf.mxu0  ;;  %v334_v36 = vpop.f32.mrf.mxu1  ;;  %1846 = vmatpush.msrb.mxu1 %v5202_v45  ;;  %v5243_v45 = vld [vmem:[%s8799_s1 + $0x3d0] sm:$0xff] }
  0xbf   :  { %v711_v37 = vpop.f32.mrf.mxu3  ;;  %v380_v44 = vadd.f32 %v334_v36, %v6574_v61  ;;  %v5095_v61 = vld [vmem:[%s8800_s0 + $0x161] sm:$0xff]  ;;  %v5335_v36 = vld [vmem:[%s8799_s1 + $0x4b0] sm:$0xff]  ;;  %2038 = vmatpush.msrb.mxu2 %v5245_v63 }
  0xc0   :  { %v759_v40 = vadd.f32 %v711_v37, %v569_v32  ;;  %2417 = vmatpush.msrb.mxu0 %v5335_v36  ;;  %v5144_v36 = vld [vmem:[%s8800_s0 + $0x251] sm:$0xff] }
  0xc1   :  { %5165 = vmatmul.msk.f32.vlgmr.msra.gmra.mxu0 %vm74_vm0, %v5137_v34  ;;  %5034 = vmatmul.msk.f32.gmra.mxu1 %vm74_vm0, %v5006_v38  ;;  %v5290_v38 = vld [vmem:[%s8799_s1 + $0x448] sm:$0xff]  ;;  %v5102_v63 = vld [vmem:[%s8800_s0 + $0x3d1] sm:$0xff] }
  0xc2   :  { %v6689_v42 = vadd.f32 %v901_v33, %v759_v40  ;;  %5078 = vmatmul.msk.f32.gmra.mxu2 %vm74_vm0, %v5050_v39  ;;  %v5097_v33 = vld [vmem:[%s8800_s0 + $0x181] sm:$0xff]  ;;  %2228 = vmatpush.msrb.mxu3 %v5290_v38 }
  0xc3   :  { %5122 = vmatmul.msk.f32.gmra.mxu3 %vm74_vm0, %v5094_v41 }
  0xc5   :  { %v524_v46 = vpop.f32.mrf.mxu2 }
  0xc6   :  { %v570_v47 = vadd.f32 %v524_v46, %v380_v44  ;;  %v904_v48 = vpop.f32.mrf.mxu0  ;;  %v337_v52 = vpop.f32.mrf.mxu1  ;;  %v5141_v44 = vld [vmem:[%s8800_s0 + $0x221] sm:$0xff] }
  0xc7   :  { %v714_v53 = vpop.f32.mrf.mxu3  ;;  %v381_v2 = vadd.f32 %v337_v52, %v6607_v8 }
  0xc8   :  { %v760_v58 = vadd.f32 %v714_v53, %v570_v47  ;;  %v5010_v47 = vld [vmem:[%s8800_s0 + $0x190] sm:$0xff] }
  0xc9   :  { %5166 = vmatmul.msk.f32.gmra.mxu0 %vm74_vm0, %v5138_v49  ;;  %5035 = vmatmul.msk.f32.gmra.mxu1 %vm74_vm0, %v5007_v56  ;;  %v5334_v56 = vld [vmem:[%s8799_s1 + $0x4a8] sm:$0xff] }
  0xca   :  { %v6717_v62 = vadd.f32 %v904_v48, %v760_v58  ;;  %5079 = vmatmul.msk.f32.gmra.mxu2 %vm74_vm0, %v5051_v57  ;;  %v5054_v48 = vld [vmem:[%s8800_s0 + $0x230] sm:$0xff]  ;;  %2418 = vmatpush.msrb.mxu0 %v5334_v56 }
  0xcb   :  { %5123 = vmatmul.msk.f32.gmra.mxu3 %vm74_vm0, %v5095_v61  ;;  %v5142_v61 = vld [vmem:[%s8800_s0 + $0x231] sm:$0xff] }
  0xcc   :  { %v5199_v56 = vld [vmem:[%s8799_s1 + $0x370] sm:$0xff] }
  0xcd   :  { %v527_v3 = vpop.f32.mrf.mxu2 }
  0xce   :  { %v571_v4 = vadd.f32 %v527_v3, %v381_v2  ;;  %v907_v5 = vpop.f32.mrf.mxu0  ;;  %v340_v9 = vpop.f32.mrf.mxu1  ;;  %v5011_v3 = vld [vmem:[%s8800_s0 + $0x1a0] sm:$0xff] }
  0xcf   :  { %v717_v12 = vpop.f32.mrf.mxu3  ;;  %v382_v23 = vadd.f32 %v340_v9, %v6643_v20  ;;  %v5009_v20 = vld [vmem:[%s8800_s0 + $0x180] sm:$0xff] }
  0xd0   :  { %v761_v8 = vadd.f32 %v717_v12, %v571_v4  ;;  %v5055_v4 = vld [vmem:[%s8800_s0 + $0x240] sm:$0xff] }
  0xd1   :  { %5167 = vmatmul.msk.f32.gmra.mxu0 %vm74_vm0, %v5139_v6  ;;  %5036 = vmatmul.msk.f32.gmra.mxu1 %vm74_vm0, %v5008_v13  ;;  %v5289_v6 = vld [vmem:[%s8799_s1 + $0x440] sm:$0xff] }
  0xd2   :  { %v6745_v18 = vadd.f32 %v907_v5, %v761_v8  ;;  %5080 = vmatmul.msk.f32.gmra.mxu2 %vm74_vm0, %v5052_v14  ;;  %v5099_v9 = vld [vmem:[%s8800_s0 + $0x1a1] sm:$0xff]  ;;  %2229 = vmatpush.msrb.mxu3 %v5289_v6 }
  0xd3   :  { %5124 = vmatmul.msk.f32.gmra.mxu3 %vm74_vm0, %v5096_v17  ;;  %v5201_v13 = vld [vmem:[%s8799_s1 + $0x380] sm:$0xff] }
  0xd4   :  { %1847 = vmatpush.msrb.mxu1 %v5201_v13  ;;  %v5143_v17 = vld [vmem:[%s8800_s0 + $0x241] sm:$0xff] }
  0xd5   :  { %v530_v25 = vpop.f32.mrf.mxu2  ;;  %v5242_v13 = vld [vmem:[%s8799_s1 + $0x3c8] sm:$0xff] }
  0xd6   :  { %v572_v26 = vadd.f32 %v530_v25, %v382_v23  ;;  %v910_v27 = vpop.f32.mrf.mxu0  ;;  %v343_v29 = vpop.f32.mrf.mxu1  ;;  %v5056_v25 = vld [vmem:[%s8800_s0 + $0x250] sm:$0xff] }
  0xd7   :  { %v720_v30 = vpop.f32.mrf.mxu3  ;;  %v383_v37 = vadd.f32 %v343_v29, %v6518_v43 }
  0xd8   :  { %v762_v32 = vadd.f32 %v720_v30, %v572_v26  ;;  %v5333_v26 = vld [vmem:[%s8799_s1 + $0x4a0] sm:$0xff]  ;;  %v5288_v30 = vld [vmem:[%s8799_s1 + $0x438] sm:$0xff] }
  0xd9   :  { %5168 = vmatmul.msk.f32.gmra.mxu0 %vm74_vm0, %v5140_v28  ;;  %5037 = vmatmul.msk.f32.gmra.mxu1 %vm74_vm0, %v5009_v20  ;;  %v5100_v28 = vld [vmem:[%s8800_s0 + $0x1b1] sm:$0xff] }
  0xda   :  { %v6770_v34 = vadd.f32 %v910_v27, %v762_v32  ;;  %5081 = vmatmul.msk.f32.gmra.mxu2 %vm74_vm0, %v5053_v31  ;;  %v5244_v27 = vld [vmem:[%s8799_s1 + $0x3d8] sm:$0xff]  ;;  %2419 = vmatpush.msrb.mxu0 %v5333_v26 }
  0xdb   :  { %5125 = vmatmul.msk.f32.gmra.mxu3 %vm74_vm0, %v5097_v33  ;;  %2039 = vmatpush.msrb.mxu2 %v5244_v27  ;;  %v5200_v31 = vld [vmem:[%s8799_s1 + $0x378] sm:$0xff] }
  0xdc   :  { %2230 = vmatpush.msrb.mxu3 %v5288_v30  ;;  %1848 = vmatpush.msrb.mxu1 %v5200_v31  ;;  %v5016_v31 = vld [vmem:[%s8800_s0 + $0x3f0] sm:$0xff] }
  0xdd   :  { %v533_v39 = vpop.f32.mrf.mxu2  ;;  %2040 = vmatpush.msrb.mxu2 %v5243_v45 }
  0xde   :  { %v573_v40 = vadd.f32 %v533_v39, %v383_v37  ;;  %v913_v41 = vpop.f32.mrf.mxu0  ;;  %v346_v46 = vpop.f32.mrf.mxu1  ;;  %v5057_v39 = vld [vmem:[%s8800_s0 + $0x460] sm:$0xff]  ;;  %1849 = vmatpush.msrb.mxu1 %v5199_v56 }
  0xdf   :  { %v723_v43 = vpop.f32.mrf.mxu3  ;;  %v384_v53 = vadd.f32 %v346_v46, %v6552_v54  ;;  %v5332_v46 = vld [vmem:[%s8799_s1 + $0x498] sm:$0xff]  ;;  %2041 = vmatpush.msrb.mxu2 %v5242_v13  ;;  %v5329_v56 = vld [vmem:[%s8799_s1 + $0x480] sm:$0xff] }
  0xe0   :  { %v763_v49 = vadd.f32 %v723_v43, %v573_v40  ;;  %2420 = vmatpush.msrb.mxu0 %v5332_v46  ;;  %v5148_v46 = vld [vmem:[%s8800_s0 + $0x491] sm:$0xff] }
  0xe1   :  { %5169 = vmatmul.msk.f32.gmra.mxu0 %vm74_vm0, %v5141_v44  ;;  %5038 = vmatmul.msk.f32.gmra.mxu1 %vm74_vm0, %v5010_v47  ;;  %v5287_v47 = vld [vmem:[%s8799_s1 + $0x430] sm:$0xff] }
  0xe2   :  { %v6801_v52 = vadd.f32 %v913_v41, %v763_v49  ;;  %5082 = vmatmul.msk.f32.gmra.mxu2 %vm74_vm0, %v5054_v48  ;;  %v5101_v41 = vld [vmem:[%s8800_s0 + $0x3c1] sm:$0xff]  ;;  %2231 = vmatpush.msrb.mxu3 %v5287_v47  ;;  %v5106_v13 = vld [vmem:[%s8800_s0 + $0x411] sm:$0xff] }
  0xe3   :  { %5126 = vmatmul.msk.f32.gmra.mxu3 %vm74_vm0, %v5098_v51 }
  0xe5   :  { %v536_v57 = vpop.f32.mrf.mxu2 }
  0xe6   :  { %v574_v58 = vadd.f32 %v536_v57, %v384_v53  ;;  %v916_v59 = vpop.f32.mrf.mxu0  ;;  %v349_v2 = vpop.f32.mrf.mxu1  ;;  %v5145_v53 = vld [vmem:[%s8800_s0 + $0x461] sm:$0xff] }
  0xe7   :  { %v726_v54 = vpop.f32.mrf.mxu3  ;;  %v385_v14 = vadd.f32 %v349_v2, %v6582_v0 }
  0xe8   :  { %v764_v5 = vadd.f32 %v726_v54, %v574_v58  ;;  %v5014_v58 = vld [vmem:[%s8800_s0 + $0x3d0] sm:$0xff] }
  0xe9   :  { %5170 = vmatmul.msk.f32.gmra.mxu0 %vm74_vm0, %v5142_v61  ;;  %5039 = vmatmul.msk.f32.gmra.mxu1 %vm74_vm0, %v5011_v3  ;;  %v5331_v3 = vld [vmem:[%s8799_s1 + $0x490] sm:$0xff] }
  0xea   :  { %v6829_v12 = vadd.f32 %v916_v59, %v764_v5  ;;  %5083 = vmatmul.msk.f32.gmra.mxu2 %vm74_vm0, %v5055_v4  ;;  %v5058_v59 = vld [vmem:[%s8800_s0 + $0x470] sm:$0xff]  ;;  %2421 = vmatpush.msrb.mxu0 %v5331_v3  ;;  %v5384_v3 = vld [vmem:[%s8799_s1 + $0x538] sm:$0xff] }
  0xeb   :  { %5127 = vmatmul.msk.f32.gmra.mxu3 %vm74_vm0, %v5099_v9  ;;  %v5146_v9 = vld [vmem:[%s8800_s0 + $0x471] sm:$0xff] }
  0xed   :  { %v539_v8 = vpop.f32.mrf.mxu2 }
  0xee   :  { %v575_v15 = vadd.f32 %v539_v8, %v385_v14  ;;  %v919_v16 = vpop.f32.mrf.mxu0  ;;  %v352_v21 = vpop.f32.mrf.mxu1  ;;  %v5015_v8 = vld [vmem:[%s8800_s0 + $0x3e0] sm:$0xff] }
  0xef   :  { %v729_v23 = vpop.f32.mrf.mxu3  ;;  %v386_v20 = vadd.f32 %v352_v21, %v6612_v10  ;;  %v5013_v10 = vld [vmem:[%s8800_s0 + $0x3c0] sm:$0xff] }
  0xf0   :  { %v765_v0 = vadd.f32 %v729_v23, %v575_v15  ;;  %v5059_v15 = vld [vmem:[%s8800_s0 + $0x480] sm:$0xff] }
  0xf1   :  { %5171 = vmatmul.msk.f32.gmra.mxu0 %vm74_vm0, %v5143_v17  ;;  %5040 = vmatmul.msk.f32.gmra.mxu1 %vm74_vm0, %v5012_v24  ;;  %v5286_v17 = vld [vmem:[%s8799_s1 + $0x428] sm:$0xff] }
  0xf2   :  { %v6857_v29 = vadd.f32 %v919_v16, %v765_v0  ;;  %5084 = vmatmul.msk.f32.gmra.mxu2 %vm74_vm0, %v5056_v25  ;;  %v5103_v21 = vld [vmem:[%s8800_s0 + $0x3e1] sm:$0xff]  ;;  %2232 = vmatpush.msrb.mxu3 %v5286_v17 }
  0xf3   :  { %5128 = vmatmul.msk.f32.gmra.mxu3 %vm74_vm0, %v5100_v28  ;;  %v5198_v24 = vld [vmem:[%s8799_s1 + $0x368] sm:$0xff] }
  0xf4   :  { %1850 = vmatpush.msrb.mxu1 %v5198_v24  ;;  %v5147_v28 = vld [vmem:[%s8800_s0 + $0x481] sm:$0xff]  ;;  %v5427_v24 = vld [vmem:[%s8799_s1 + $0x590] sm:$0xff] }
  0xf5   :  { %v542_v32 = vpop.f32.mrf.mxu2 }
  0xf6   :  { %v576_v33 = vadd.f32 %v542_v32, %v386_v20  ;;  %v922_v35 = vpop.f32.mrf.mxu0  ;;  %v355_v37 = vpop.f32.mrf.mxu1  ;;  %v5060_v32 = vld [vmem:[%s8800_s0 + $0x490] sm:$0xff] }
  0xf7   :  { %v732_v38 = vpop.f32.mrf.mxu3  ;;  %v387_v43 = vadd.f32 %v355_v37, %v6542_v50 }
  0xf8   :  { %v766_v40 = vadd.f32 %v732_v38, %v576_v33  ;;  %v5330_v33 = vld [vmem:[%s8799_s1 + $0x488] sm:$0xff]  ;;  %v5285_v38 = vld [vmem:[%s8799_s1 + $0x420] sm:$0xff] }
  0xf9   :  { %5172 = vmatmul.msk.f32.gmra.mxu0 %vm74_vm0, %v5144_v36  ;;  %5041 = vmatmul.msk.f32.gmra.mxu1 %vm74_vm0, %v5013_v10  ;;  %v5104_v36 = vld [vmem:[%s8800_s0 + $0x3f1] sm:$0xff] }
  0xfa   :  { %v6882_v44 = vadd.f32 %v922_v35, %v766_v40  ;;  %5085 = vmatmul.msk.f32.gmra.mxu2 %vm74_vm0, %v5057_v39  ;;  %v5241_v35 = vld [vmem:[%s8799_s1 + $0x3c0] sm:$0xff]  ;;  %2422 = vmatpush.msrb.mxu0 %v5330_v33 }
  0xfb   :  { %5129 = vmatmul.msk.f32.gmra.mxu3 %vm74_vm0, %v5101_v41  ;;  %2042 = vmatpush.msrb.mxu2 %v5241_v35  ;;  %v5197_v39 = vld [vmem:[%s8799_s1 + $0x360] sm:$0xff] }
  0xfc   :  { %2233 = vmatpush.msrb.mxu3 %v5285_v38  ;;  %1851 = vmatpush.msrb.mxu1 %v5197_v39  ;;  %v5020_v39 = vld [vmem:[%s8800_s0 + $0x430] sm:$0xff] }
  0xfd   :  { %v545_v48 = vpop.f32.mrf.mxu2  ;;  %2423 = vmatpush.msrb.mxu0 %v5329_v56 }
  0xfe   :  { %v577_v49 = vadd.f32 %v545_v48, %v387_v43  ;;  %v925_v51 = vpop.f32.mrf.mxu0  ;;  %v358_v57 = vpop.f32.mrf.mxu1  ;;  %v5061_v48 = vld [vmem:[%s8800_s0 + $0x4a0] sm:$0xff]  ;;  %2602 = vmatpush.msra.mxu1 %v5384_v3 }
  0xff   :  { %v735_v50 = vpop.f32.mrf.mxu3  ;;  %v388_v54 = vadd.f32 %v358_v57, %v6572_v60  ;;  %v5428_v57 = vld [vmem:[%s8799_s1 + $0x598] sm:$0xff]  ;;  %v5425_v3 = vld [vmem:[%s8799_s1 + $0x580] sm:$0xff] }
 0x100   :  { %v767_v61 = vadd.f32 %v735_v50, %v577_v49  ;;  %2792 = vmatpush.msra.mxu2 %v5428_v57  ;;  %v5152_v57 = vld [vmem:[%s8800_s0 + $0x4d1] sm:$0xff] }
 0x101   :  { %5173 = vmatmul.msk.f32.gmra.mxu0 %vm74_vm0, %v5145_v53  ;;  %5042 = vmatmul.msk.f32.gmra.mxu1 %vm74_vm0, %v5014_v58  ;;  %v5472_v58 = vld [vmem:[%s8799_s1 + $0x5f8] sm:$0xff] }
 0x102   :  { %v6913_v2 = vadd.f32 %v925_v51, %v767_v61  ;;  %5086 = vmatmul.msk.f32.gmra.mxu2 %vm74_vm0, %v5058_v59  ;;  %v5105_v51 = vld [vmem:[%s8800_s0 + $0x401] sm:$0xff]  ;;  %2983 = vmatpush.msra.mxu3 %v5472_v58 }
 0x103   :  { %5130 = vmatmul.msk.f32.gmra.mxu3 %vm74_vm0, %v5102_v63  ;;  %2793 = vmatpush.msra.mxu2 %v5427_v24  ;;  %v5270_v24 = vld [vmem:[%s8800_s0 + $0xc0] sm:$0xff] }
 0x105   :  { %v548_v4 = vpop.f32.mrf.mxu2 }
 0x106   :  { %v578_v5 = vadd.f32 %v548_v4, %v388_v54  ;;  %v928_v6 = vpop.f32.mrf.mxu0  ;;  %v361_v14 = vpop.f32.mrf.mxu1  ;;  %v5149_v54 = vld [vmem:[%s8800_s0 + $0x4a1] sm:$0xff] }
 0x107   :  { %v738_v60 = vpop.f32.mrf.mxu3  ;;  %v389_v25 = vadd.f32 %v361_v14, %v6605_v7 }
 0x108   :  { %v768_v16 = vadd.f32 %v738_v60, %v578_v5  ;;  %v5018_v5 = vld [vmem:[%s8800_s0 + $0x410] sm:$0xff] }
 0x109   :  { %5174 = vmatmul.msk.f32.gmra.mxu0 %vm74_vm0, %v5146_v9  ;;  %5043 = vmatmul.msk.f32.gmra.mxu1 %vm74_vm0, %v5015_v8  ;;  %v5516_v8 = vld [vmem:[%s8799_s1 + $0x658] sm:$0xff] }
 0x10a   :  { %v6941_v23 = vadd.f32 %v928_v6, %v768_v16  ;;  %5087 = vmatmul.msk.f32.gmra.mxu2 %vm74_vm0, %v5059_v15  ;;  %v5062_v6 = vld [vmem:[%s8800_s0 + $0x4b0] sm:$0xff]  ;;  %3174 = vmatpush.msra.mxu0 %v5516_v8  ;;  %v5381_v8 = vld [vmem:[%s8799_s1 + $0x520] sm:$0xff] }
 0x10b   :  { %5131 = vmatmul.msk.f32.gmra.mxu3 %vm74_vm0, %v5103_v21  ;;  %v5150_v21 = vld [vmem:[%s8800_s0 + $0x4b1] sm:$0xff] }
 0x10d   :  { %v551_v0 = vpop.f32.mrf.mxu2 }
 0x10e   :  { %v579_v26 = vadd.f32 %v551_v0, %v389_v25  ;;  %v931_v27 = vpop.f32.mrf.mxu0  ;;  %v364_v30 = vpop.f32.mrf.mxu1  ;;  %v5019_v0 = vld [vmem:[%s8800_s0 + $0x420] sm:$0xff] }
 0x10f   :  { %v741_v20 = vpop.f32.mrf.mxu3  ;;  %v390_v10 = vadd.f32 %v364_v30, %v6641_v19  ;;  %v5017_v19 = vld [vmem:[%s8800_s0 + $0x400] sm:$0xff] }
 0x110   :  { %v769_v7 = vadd.f32 %v741_v20, %v579_v26  ;;  %v5063_v26 = vld [vmem:[%s8800_s0 + $0x4c0] sm:$0xff] }
 0x111   :  { %5175 = vmatmul.msk.f32.gmra.mxu0 %vm74_vm0, %v5147_v28  ;;  %5044 = vmatmul.msk.f32.gmra.mxu1 %vm74_vm0, %v5016_v31  ;;  %v5471_v28 = vld [vmem:[%s8799_s1 + $0x5f0] sm:$0xff]  ;;  %v5107_v30 = vld [vmem:[%s8800_s0 + $0x421] sm:$0xff] }
 0x112   :  { %v6969_v37 = vadd.f32 %v931_v27, %v769_v7  ;;  %5088 = vmatmul.msk.f32.gmra.mxu2 %vm74_vm0, %v5060_v32  ;;  %2984 = vmatpush.msra.mxu3 %v5471_v28  ;;  %v5383_v31 = vld [vmem:[%s8799_s1 + $0x530] sm:$0xff] }
 0x113   :  { %5132 = vmatmul.msk.f32.gmra.mxu3 %vm74_vm0, %v5104_v36  ;;  %2603 = vmatpush.msra.mxu1 %v5383_v31  ;;  %v5151_v36 = vld [vmem:[%s8800_s0 + $0x4c1] sm:$0xff]  ;;  %v5424_v31 = vld [vmem:[%s8799_s1 + $0x578] sm:$0xff] }
 0x115   :  { %v554_v40 = vpop.f32.mrf.mxu2 }
 0x116   :  { %v580_v41 = vadd.f32 %v554_v40, %v390_v10  ;;  %v934_v45 = vpop.f32.mrf.mxu0  ;;  %v367_v43 = vpop.f32.mrf.mxu1  ;;  %v5064_v40 = vld [vmem:[%s8800_s0 + $0x4d0] sm:$0xff] }
 0x117   :  { %v744_v47 = vpop.f32.mrf.mxu3  ;;  %v391_v50 = vadd.f32 %v367_v43, %v6554_v55 }
 0x118   :  { %v770_v49 = vadd.f32 %v744_v47, %v580_v41  ;;  %v5515_v41 = vld [vmem:[%s8799_s1 + $0x650] sm:$0xff]  ;;  %v5470_v47 = vld [vmem:[%s8799_s1 + $0x5e8] sm:$0xff] }
 0x119   :  { %5176 = vmatmul.msk.f32.gmra.mxu0 %vm74_vm0, %v5148_v46  ;;  %5045 = vmatmul.msk.f32.gmra.mxu1 %vm74_vm0, %v5017_v19  ;;  %v5108_v46 = vld [vmem:[%s8800_s0 + $0x431] sm:$0xff] }
 0x11a   :  { %v6994_v53 = vadd.f32 %v934_v45, %v770_v49  ;;  %5089 = vmatmul.msk.f32.gmra.mxu2 %vm74_vm0, %v5061_v48  ;;  %v5426_v45 = vld [vmem:[%s8799_s1 + $0x588] sm:$0xff]  ;;  %3175 = vmatpush.msra.mxu0 %v5515_v41 }
 0x11b   :  { %5133 = vmatmul.msk.f32.gmra.mxu3 %vm74_vm0, %v5105_v51  ;;  %2794 = vmatpush.msra.mxu2 %v5426_v45  ;;  %v5382_v48 = vld [vmem:[%s8799_s1 + $0x528] sm:$0xff] }
 0x11c   :  { %2985 = vmatpush.msra.mxu3 %v5470_v47  ;;  %2604 = vmatpush.msra.mxu1 %v5382_v48  ;;  %v5184_v48 = vld [vmem:[%s8800_s0 + $0x172] sm:$0xff] }
 0x11d   :  { %v557_v59 = vpop.f32.mrf.mxu2  ;;  %2795 = vmatpush.msra.mxu2 %v5425_v3 }
 0x11e   :  { %v581_v61 = vadd.f32 %v557_v59, %v391_v50  ;;  %v937_v63 = vpop.f32.mrf.mxu0  ;;  %v370_v4 = vpop.f32.mrf.mxu1  ;;  %v5225_v59 = vld [vmem:[%s8800_s0 + $0x10] sm:$0xff]  ;;  %2605 = vmatpush.msra.mxu1 %v5381_v8  ;;  %v5422_v8 = vld [vmem:[%s8799_s1 + $0x568] sm:$0xff] }
 0x11f   :  { %v747_v55 = vpop.f32.mrf.mxu3  ;;  %v392_v60 = vadd.f32 %v370_v4, %v6584_v1  ;;  %v5514_v4 = vld [vmem:[%s8799_s1 + $0x648] sm:$0xff]  ;;  %2796 = vmatpush.msra.mxu2 %v5424_v31  ;;  %v5274_v31 = vld [vmem:[%s8800_s0 + $0x100] sm:$0xff] }
 0x120   :  { %v771_v9 = vadd.f32 %v747_v55, %v581_v61  ;;  %3176 = vmatpush.msra.mxu0 %v5514_v4  ;;  %v5316_v4 = vld [vmem:[%s8800_s0 + $0x41] sm:$0xff] }
 0x121   :  { %5177 = vmatmul.msk.f32.gmra.mxu0 %vm74_vm0, %v5149_v54  ;;  %5046 = vmatmul.msk.f32.gmra.mxu1 %vm74_vm0, %v5018_v5  ;;  %v5469_v5 = vld [vmem:[%s8799_s1 + $0x5e0] sm:$0xff] }
 0x122   :  { %v7025_v14 = vadd.f32 %v937_v63, %v771_v9  ;;  %5090 = vmatmul.msk.f32.gmra.mxu2 %vm74_vm0, %v5062_v6  ;;  %v5269_v63 = vld [vmem:[%s8800_s0 + $0xb0] sm:$0xff]  ;;  %2986 = vmatpush.msra.mxu3 %v5469_v5 }
 0x123   :  { %5134 = vmatmul.msk.f32.gmra.mxu3 %vm74_vm0, %v5106_v13 }
 0x125   :  { %v560_v15 = vpop.f32.mrf.mxu2 }
 0x126   :  { %v582_v16 = vadd.f32 %v560_v15, %v392_v60  ;;  %v940_v17 = vpop.f32.mrf.mxu0  ;;  %v373_v25 = vpop.f32.mrf.mxu1  ;;  %v5313_v60 = vld [vmem:[%s8800_s0 + $0x11] sm:$0xff] }
 0x127   :  { %v750_v1 = vpop.f32.mrf.mxu3  ;;  %v393_v32 = vadd.f32 %v373_v25, %v6614_v11 }
 0x128   :  { %v772_v27 = vadd.f32 %v750_v1, %v582_v16  ;;  %v5182_v16 = vld [vmem:[%s8800_s0 + $0x152] sm:$0xff] }
 0x129   :  { %5178 = vmatmul.msk.f32.gmra.mxu0 %vm74_vm0, %v5150_v21  ;;  %5047 = vmatmul.msk.f32.gmra.mxu1 %vm74_vm0, %v5019_v0  ;;  %v5513_v0 = vld [vmem:[%s8799_s1 + $0x640] sm:$0xff] }
 0x12a   :  { %v7053_v20 = vadd.f32 %v940_v17, %v772_v27  ;;  %5091 = vmatmul.msk.f32.gmra.mxu2 %vm74_vm0, %v5063_v26  ;;  %v5226_v17 = vld [vmem:[%s8800_s0 + $0x20] sm:$0xff]  ;;  %3177 = vmatpush.msra.mxu0 %v5513_v0  ;;  %v5378_v0 = vld [vmem:[%s8799_s1 + $0x508] sm:$0xff] }
 0x12b   :  { %5135 = vmatmul.msk.f32.gmra.mxu3 %vm74_vm0, %v5107_v30  ;;  %v5314_v30 = vld [vmem:[%s8800_s0 + $0x21] sm:$0xff] }
 0x12d   :  { %v563_v7 = vpop.f32.mrf.mxu2 }
 0x12e   :  { %v583_v33 = vadd.f32 %v563_v7, %v393_v32  ;;  %v943_v35 = vpop.f32.mrf.mxu0  ;;  %v376_v38 = vpop.f32.mrf.mxu1  ;;  %v5183_v7 = vld [vmem:[%s8800_s0 + $0x162] sm:$0xff] }
 0x12f   :  { %v753_v10 = vpop.f32.mrf.mxu3  ;;  %v394_v19 = vadd.f32 %v376_v38, %v6648_v22  ;;  %v5181_v22 = vld [vmem:[%s8800_s0 + $0x142] sm:$0xff]  ;;  %v5271_v38 = vld [vmem:[%s8800_s0 + $0xd0] sm:$0xff] }
 0x130   :  { %v773_v11 = vadd.f32 %v753_v10, %v583_v33  ;;  %v5227_v33 = vld [vmem:[%s8800_s0 + $0x30] sm:$0xff] }
 0x131   :  { %5179 = vmatmul.msk.f32.gmra.mxu0 %vm74_vm0, %v5151_v36  ;;  %5048 = vmatmul.msk.f32.gmra.mxu1 %vm74_vm0, %v5020_v39  ;;  %v5468_v36 = vld [vmem:[%s8799_s1 + $0x5d8] sm:$0xff] }
 0x132   :  { %v7081_v43 = vadd.f32 %v943_v35, %v773_v11  ;;  %5092 = vmatmul.msk.f32.gmra.mxu2 %vm74_vm0, %v5064_v40  ;;  %2987 = vmatpush.msra.mxu3 %v5468_v36  ;;  %v5380_v39 = vld [vmem:[%s8799_s1 + $0x518] sm:$0xff] }
 0x133   :  { %5136 = vmatmul.msk.f32.gmra.mxu3 %vm74_vm0, %v5108_v46  ;;  %2606 = vmatpush.msra.mxu1 %v5380_v39  ;;  %v5315_v46 = vld [vmem:[%s8800_s0 + $0x31] sm:$0xff]  ;;  %v5421_v39 = vld [vmem:[%s8799_s1 + $0x560] sm:$0xff] }
 0x135   :  { %v566_v49 = vpop.f32.mrf.mxu2 }
 0x136   :  { %v584_v51 = vadd.f32 %v566_v49, %v394_v19  ;;  %v946_v56 = vpop.f32.mrf.mxu0  ;;  %v1092_v58 = vpop.f32.mrf.mxu1  ;;  %v5228_v49 = vld [vmem:[%s8800_s0 + $0x40] sm:$0xff] }
 0x137   :  { %v756_v50 = vpop.f32.mrf.mxu3  ;;  %v1140_v55 = vadd.f32 %v1092_v58, %v6689_v42  ;;  %v5467_v58 = vld [vmem:[%s8799_s1 + $0x5d0] sm:$0xff] }
 0x138   :  { %v774_v61 = vadd.f32 %v756_v50, %v584_v51  ;;  %v5512_v51 = vld [vmem:[%s8799_s1 + $0x638] sm:$0xff]  ;;  %2988 = vmatpush.msra.mxu3 %v5467_v58 }
 0x139   :  { %5180 = vmatmul.msk.f32.gmra.mxu0 %vm74_vm0, %v5152_v57  ;;  %5209 = vmatmul.msk.f32.vlgmr.msrb.gmra.mxu1 %vm74_vm0, %v5181_v22  ;;  %v5272_v57 = vld [vmem:[%s8800_s0 + $0xe0] sm:$0xff] }
 0x13a   :  { %v7106_v54 = vadd.f32 %v946_v56, %v774_v61  ;;  %5253 = vmatmul.msk.f32.vlgmr.msrb.gmra.mxu2 %vm74_vm0, %v5225_v59  ;;  %v5423_v56 = vld [vmem:[%s8799_s1 + $0x570] sm:$0xff]  ;;  %3178 = vmatpush.msra.mxu0 %v5512_v51 }
 0x13b   :  { %5297 = vmatmul.msk.f32.vlgmr.msrb.gmra.mxu3 %vm74_vm0, %v5269_v63  ;;  %2797 = vmatpush.msra.mxu2 %v5423_v56  ;;  %v5379_v59 = vld [vmem:[%s8799_s1 + $0x510] sm:$0xff] }
 0x13c   :  { %2607 = vmatpush.msra.mxu1 %v5379_v59  ;;  %v5188_v59 = vld [vmem:[%s8800_s0 + $0x1b2] sm:$0xff] }
 0x13d   :  { %v1283_v6 = vpop.f32.mrf.mxu2  ;;  %2798 = vmatpush.msra.mxu2 %v5422_v8 }
 0x13e   :  { %v1331_v9 = vadd.f32 %v1283_v6, %v1140_v55  ;;  %v1663_v13 = vpop.f32.mrf.mxu0  ;;  %v1095_v15 = vpop.f32.mrf.mxu1  ;;  %v5229_v6 = vld [vmem:[%s8800_s0 + $0x50] sm:$0xff]  ;;  %2608 = vmatpush.msra.mxu1 %v5378_v0 }
 0x13f   :  { %v1473_v42 = vpop.f32.mrf.mxu3  ;;  %v1141_v1 = vadd.f32 %v1095_v15, %v6717_v62  ;;  %v5511_v15 = vld [vmem:[%s8799_s1 + $0x630] sm:$0xff]  ;;  %2799 = vmatpush.msra.mxu2 %v5421_v39  ;;  %v5278_v39 = vld [vmem:[%s8800_s0 + $0x340] sm:$0xff] }
 0x140   :  { %v1521_v21 = vadd.f32 %v1473_v42, %v1331_v9  ;;  %3179 = vmatpush.msra.mxu0 %v5511_v15  ;;  %v5320_v15 = vld [vmem:[%s8800_s0 + $0x81] sm:$0xff]  ;;  %v5419_v0 = vld [vmem:[%s8799_s1 + $0x550] sm:$0xff] }
 0x141   :  { %5341 = vmatmul.msk.f32.vlgmr.msrb.gmra.mxu0 %vm74_vm0, %v5313_v60  ;;  %5210 = vmatmul.msk.f32.gmra.mxu1 %vm74_vm0, %v5182_v16  ;;  %v5466_v16 = vld [vmem:[%s8799_s1 + $0x5c8] sm:$0xff] }
 0x142   :  { %v7137_v25 = vadd.f32 %v1663_v13, %v1521_v21  ;;  %5254 = vmatmul.msk.f32.gmra.mxu2 %vm74_vm0, %v5226_v17  ;;  %v5273_v13 = vld [vmem:[%s8800_s0 + $0xf0] sm:$0xff]  ;;  %2989 = vmatpush.msra.mxu3 %v5466_v16 }
 0x143   :  { %5298 = vmatmul.msk.f32.gmra.mxu3 %vm74_vm0, %v5270_v24 }
 0x145   :  { %v1286_v26 = vpop.f32.mrf.mxu2 }
 0x146   :  { %v1332_v27 = vadd.f32 %v1286_v26, %v1141_v1  ;;  %v1666_v28 = vpop.f32.mrf.mxu0  ;;  %v1098_v32 = vpop.f32.mrf.mxu1  ;;  %v5317_v1 = vld [vmem:[%s8800_s0 + $0x51] sm:$0xff] }
 0x147   :  { %v1476_v62 = vpop.f32.mrf.mxu3  ;;  %v1142_v40 = vadd.f32 %v1098_v32, %v6745_v18 }
 0x148   :  { %v1522_v35 = vadd.f32 %v1476_v62, %v1332_v27  ;;  %v5186_v27 = vld [vmem:[%s8800_s0 + $0x192] sm:$0xff] }
 0x149   :  { %5342 = vmatmul.msk.f32.gmra.mxu0 %vm74_vm0, %v5314_v30  ;;  %5211 = vmatmul.msk.f32.gmra.mxu1 %vm74_vm0, %v5183_v7  ;;  %v5510_v7 = vld [vmem:[%s8799_s1 + $0x628] sm:$0xff] }
 0x14a   :  { %v7165_v10 = vadd.f32 %v1666_v28, %v1522_v35  ;;  %5255 = vmatmul.msk.f32.gmra.mxu2 %vm74_vm0, %v5227_v33  ;;  %v5230_v28 = vld [vmem:[%s8800_s0 + $0x60] sm:$0xff]  ;;  %3180 = vmatpush.msra.mxu0 %v5510_v7  ;;  %v5375_v7 = vld [vmem:[%s8799_s1 + $0x4f0] sm:$0xff] }
 0x14b   :  { %5299 = vmatmul.msk.f32.gmra.mxu3 %vm74_vm0, %v5271_v38  ;;  %v5318_v38 = vld [vmem:[%s8800_s0 + $0x61] sm:$0xff] }
 0x14d   :  { %v1289_v11 = vpop.f32.mrf.mxu2 }
 0x14e   :  { %v1333_v41 = vadd.f32 %v1289_v11, %v1142_v40  ;;  %v1669_v45 = vpop.f32.mrf.mxu0  ;;  %v1101_v47 = vpop.f32.mrf.mxu1  ;;  %v5187_v11 = vld [vmem:[%s8800_s0 + $0x1a2] sm:$0xff] }
 0x14f   :  { %v1479_v19 = vpop.f32.mrf.mxu3  ;;  %v1143_v22 = vadd.f32 %v1101_v47, %v6770_v34  ;;  %v5185_v34 = vld [vmem:[%s8800_s0 + $0x182] sm:$0xff]  ;;  %v5275_v47 = vld [vmem:[%s8800_s0 + $0x110] sm:$0xff] }
 0x150   :  { %v1523_v18 = vadd.f32 %v1479_v19, %v1333_v41  ;;  %v5231_v41 = vld [vmem:[%s8800_s0 + $0x70] sm:$0xff] }
 0x151   :  { %5343 = vmatmul.msk.f32.gmra.mxu0 %vm74_vm0, %v5315_v46  ;;  %5212 = vmatmul.msk.f32.gmra.mxu1 %vm74_vm0, %v5184_v48  ;;  %v5465_v46 = vld [vmem:[%s8799_s1 + $0x5c0] sm:$0xff] }
 0x152   :  { %v7193_v50 = vadd.f32 %v1669_v45, %v1523_v18  ;;  %5256 = vmatmul.msk.f32.gmra.mxu2 %vm74_vm0, %v5228_v49  ;;  %2990 = vmatpush.msra.mxu3 %v5465_v46  ;;  %v5377_v48 = vld [vmem:[%s8799_s1 + $0x500] sm:$0xff] }
 0x153   :  { %5300 = vmatmul.msk.f32.gmra.mxu3 %vm74_vm0, %v5272_v57  ;;  %2609 = vmatpush.msra.mxu1 %v5377_v48  ;;  %v5319_v57 = vld [vmem:[%s8800_s0 + $0x71] sm:$0xff]  ;;  %v5418_v48 = vld [vmem:[%s8799_s1 + $0x548] sm:$0xff] }
 0x155   :  { %v1292_v61 = vpop.f32.mrf.mxu2 }
 0x156   :  { %v1334_v63 = vadd.f32 %v1292_v61, %v1143_v22  ;;  %v1672_v3 = vpop.f32.mrf.mxu0  ;;  %v1104_v55 = vpop.f32.mrf.mxu1  ;;  %v5232_v61 = vld [vmem:[%s8800_s0 + $0x80] sm:$0xff] }
 0x157   :  { %v1482_v5 = vpop.f32.mrf.mxu3  ;;  %v1144_v42 = vadd.f32 %v1104_v55, %v6801_v52 }
 0x158   :  { %v1524_v9 = vadd.f32 %v1482_v5, %v1334_v63  ;;  %v5509_v63 = vld [vmem:[%s8799_s1 + $0x620] sm:$0xff]  ;;  %v5464_v5 = vld [vmem:[%s8799_s1 + $0x5b8] sm:$0xff] }
 0x159   :  { %5344 = vmatmul.msk.f32.gmra.mxu0 %vm74_vm0, %v5316_v4  ;;  %5213 = vmatmul.msk.f32.gmra.mxu1 %vm74_vm0, %v5185_v34  ;;  %v5276_v4 = vld [vmem:[%s8800_s0 + $0x120] sm:$0xff] }
 0x15a   :  { %v7218_v60 = vadd.f32 %v1672_v3, %v1524_v9  ;;  %5257 = vmatmul.msk.f32.gmra.mxu2 %vm74_vm0, %v5229_v6  ;;  %v5420_v3 = vld [vmem:[%s8799_s1 + $0x558] sm:$0xff]  ;;  %3181 = vmatpush.msra.mxu0 %v5509_v63 }
 0x15b   :  { %5301 = vmatmul.msk.f32.gmra.mxu3 %vm74_vm0, %v5273_v13  ;;  %2800 = vmatpush.msra.mxu2 %v5420_v3  ;;  %v5376_v6 = vld [vmem:[%s8799_s1 + $0x4f8] sm:$0xff] }
 0x15c   :  { %2991 = vmatpush.msra.mxu3 %v5464_v5  ;;  %2610 = vmatpush.msra.mxu1 %v5376_v6  ;;  %v5192_v6 = vld [vmem:[%s8800_s0 + $0x3f2] sm:$0xff] }
 0x15d   :  { %v1295_v17 = vpop.f32.mrf.mxu2  ;;  %2801 = vmatpush.msra.mxu2 %v5419_v0 }
 0x15e   :  { %v1335_v21 = vadd.f32 %v1295_v17, %v1144_v42  ;;  %v1675_v24 = vpop.f32.mrf.mxu0  ;;  %v1107_v26 = vpop.f32.mrf.mxu1  ;;  %v5233_v17 = vld [vmem:[%s8800_s0 + $0x290] sm:$0xff]  ;;  %2611 = vmatpush.msra.mxu1 %v5375_v7  ;;  %v5505_v7 = vld [vmem:[%s8799_s1 + $0x600] sm:$0xff] }
 0x15f   :  { %v1485_v52 = vpop.f32.mrf.mxu3  ;;  %v1145_v62 = vadd.f32 %v1107_v26, %v6829_v12  ;;  %v5508_v26 = vld [vmem:[%s8799_s1 + $0x618] sm:$0xff]  ;;  %2802 = vmatpush.msra.mxu2 %v5418_v48  ;;  %v5282_v48 = vld [vmem:[%s8800_s0 + $0x380] sm:$0xff] }
 0x160   :  { %v1525_v30 = vadd.f32 %v1485_v52, %v1335_v21  ;;  %3182 = vmatpush.msra.mxu0 %v5508_v26  ;;  %v5324_v26 = vld [vmem:[%s8800_s0 + $0x2c1] sm:$0xff] }
 0x161   :  { %5345 = vmatmul.msk.f32.gmra.mxu0 %vm74_vm0, %v5317_v1  ;;  %5214 = vmatmul.msk.f32.gmra.mxu1 %vm74_vm0, %v5186_v27  ;;  %v5463_v27 = vld [vmem:[%s8799_s1 + $0x5b0] sm:$0xff] }
 0x162   :  { %v7249_v32 = vadd.f32 %v1675_v24, %v1525_v30  ;;  %5258 = vmatmul.msk.f32.gmra.mxu2 %vm74_vm0, %v5230_v28  ;;  %v5277_v24 = vld [vmem:[%s8800_s0 + $0x330] sm:$0xff]  ;;  %2992 = vmatpush.msra.mxu3 %v5463_v27 }
 0x163   :  { %5302 = vmatmul.msk.f32.gmra.mxu3 %vm74_vm0, %v5274_v31 }
 0x165   :  { %v1298_v33 = vpop.f32.mrf.mxu2 }
 0x166   :  { %v1336_v35 = vadd.f32 %v1298_v33, %v1145_v62  ;;  %v1678_v36 = vpop.f32.mrf.mxu0  ;;  %v1110_v40 = vpop.f32.mrf.mxu1  ;;  %v5321_v62 = vld [vmem:[%s8800_s0 + $0x291] sm:$0xff] }
 0x167   :  { %v1488_v12 = vpop.f32.mrf.mxu3  ;;  %v1146_v49 = vadd.f32 %v1110_v40, %v6857_v29 }
 0x168   :  { %v1526_v45 = vadd.f32 %v1488_v12, %v1336_v35  ;;  %v5190_v35 = vld [vmem:[%s8800_s0 + $0x3d2] sm:$0xff] }
 0x169   :  { %5346 = vmatmul.msk.f32.gmra.mxu0 %vm74_vm0, %v5318_v38  ;;  %5215 = vmatmul.msk.f32.gmra.mxu1 %vm74_vm0, %v5187_v11  ;;  %v5507_v11 = vld [vmem:[%s8799_s1 + $0x610] sm:$0xff] }
 0x16a   :  { %v7277_v19 = vadd.f32 %v1678_v36, %v1526_v45  ;;  %5259 = vmatmul.msk.f32.gmra.mxu2 %vm74_vm0, %v5231_v41  ;;  %v5234_v36 = vld [vmem:[%s8800_s0 + $0x2a0] sm:$0xff]  ;;  %3183 = vmatpush.msra.mxu0 %v5507_v11  ;;  %v5560_v11 = vld [vmem:[%s8799_s1 + $0x6b8] sm:$0xff] }
 0x16b   :  { %5303 = vmatmul.msk.f32.gmra.mxu3 %vm74_vm0, %v5275_v47  ;;  %v5322_v47 = vld [vmem:[%s8800_s0 + $0x2a1] sm:$0xff] }
 0x16d   :  { %v1301_v18 = vpop.f32.mrf.mxu2 }
 0x16e   :  { %v1337_v51 = vadd.f32 %v1301_v18, %v1146_v49  ;;  %v1681_v56 = vpop.f32.mrf.mxu0  ;;  %v1113_v58 = vpop.f32.mrf.mxu1  ;;  %v5191_v18 = vld [vmem:[%s8800_s0 + $0x3e2] sm:$0xff] }
 0x16f   :  { %v1491_v22 = vpop.f32.mrf.mxu3  ;;  %v1147_v34 = vadd.f32 %v1113_v58, %v6882_v44  ;;  %v5189_v44 = vld [vmem:[%s8800_s0 + $0x3c2] sm:$0xff]  ;;  %v5279_v58 = vld [vmem:[%s8800_s0 + $0x350] sm:$0xff] }
 0x170   :  { %v1527_v29 = vadd.f32 %v1491_v22, %v1337_v51  ;;  %v5235_v51 = vld [vmem:[%s8800_s0 + $0x2b0] sm:$0xff] }
 0x171   :  { %5347 = vmatmul.msk.f32.gmra.mxu0 %vm74_vm0, %v5319_v57  ;;  %5216 = vmatmul.msk.f32.gmra.mxu1 %vm74_vm0, %v5188_v59  ;;  %v5462_v57 = vld [vmem:[%s8799_s1 + $0x5a8] sm:$0xff] }
 0x172   :  { %v7305_v55 = vadd.f32 %v1681_v56, %v1527_v29  ;;  %5260 = vmatmul.msk.f32.gmra.mxu2 %vm74_vm0, %v5232_v61  ;;  %2993 = vmatpush.msra.mxu3 %v5462_v57  ;;  %v5374_v59 = vld [vmem:[%s8799_s1 + $0x4e8] sm:$0xff] }
 0x173   :  { %5304 = vmatmul.msk.f32.gmra.mxu3 %vm74_vm0, %v5276_v4  ;;  %2612 = vmatpush.msra.mxu1 %v5374_v59  ;;  %v5323_v4 = vld [vmem:[%s8800_s0 + $0x2b1] sm:$0xff] }
 0x174   :  { %v5603_v59 = vld [vmem:[%s8799_s1 + $0x710] sm:$0xff] }
 0x175   :  { %v1304_v9 = vpop.f32.mrf.mxu2 }
 0x176   :  { %v1338_v13 = vadd.f32 %v1304_v9, %v1147_v34  ;;  %v1684_v8 = vpop.f32.mrf.mxu0  ;;  %v1116_v42 = vpop.f32.mrf.mxu1  ;;  %v5236_v9 = vld [vmem:[%s8800_s0 + $0x2c0] sm:$0xff] }
 0x177   :  { %v1494_v16 = vpop.f32.mrf.mxu3  ;;  %v1148_v52 = vadd.f32 %v1116_v42, %v6913_v2 }
 0x178   :  { %v1528_v21 = vadd.f32 %v1494_v16, %v1338_v13  ;;  %v5506_v13 = vld [vmem:[%s8799_s1 + $0x608] sm:$0xff]  ;;  %v5461_v16 = vld [vmem:[%s8799_s1 + $0x5a0] sm:$0xff] }
 0x179   :  { %5348 = vmatmul.msk.f32.gmra.mxu0 %vm74_vm0, %v5320_v15  ;;  %5217 = vmatmul.msk.f32.gmra.mxu1 %vm74_vm0, %v5189_v44  ;;  %v5280_v15 = vld [vmem:[%s8800_s0 + $0x360] sm:$0xff] }
 0x17a   :  { %v7330_v1 = vadd.f32 %v1684_v8, %v1528_v21  ;;  %5261 = vmatmul.msk.f32.gmra.mxu2 %vm74_vm0, %v5233_v17  ;;  %v5417_v8 = vld [vmem:[%s8799_s1 + $0x540] sm:$0xff]  ;;  %3184 = vmatpush.msra.mxu0 %v5506_v13 }
 0x17b   :  { %5305 = vmatmul.msk.f32.gmra.mxu3 %vm74_vm0, %v5277_v24  ;;  %2803 = vmatpush.msra.mxu2 %v5417_v8  ;;  %v5373_v17 = vld [vmem:[%s8799_s1 + $0x4e0] sm:$0xff] }
 0x17c   :  { %2994 = vmatpush.msra.mxu3 %v5461_v16  ;;  %2613 = vmatpush.msra.mxu1 %v5373_v17  ;;  %v5196_v17 = vld [vmem:[%s8800_s0 + $0x432] sm:$0xff] }
 0x17d   :  { %v1307_v28 = vpop.f32.mrf.mxu2  ;;  %3185 = vmatpush.msra.mxu0 %v5505_v7 }
 0x17e   :  { %v1339_v30 = vadd.f32 %v1307_v28, %v1148_v52  ;;  %v1687_v31 = vpop.f32.mrf.mxu0  ;;  %v1119_v33 = vpop.f32.mrf.mxu1  ;;  %v5237_v28 = vld [vmem:[%s8800_s0 + $0x2d0] sm:$0xff]  ;;  %3364 = vmatpush.msrb.mxu1 %v5560_v11  ;;  %v5601_v11 = vld [vmem:[%s8799_s1 + $0x700] sm:$0xff] }
 0x17f   :  { %v1497_v2 = vpop.f32.mrf.mxu3  ;;  %v1149_v12 = vadd.f32 %v1119_v33, %v6941_v23  ;;  %v5604_v33 = vld [vmem:[%s8799_s1 + $0x718] sm:$0xff] }
 0x180   :  { %v1529_v38 = vadd.f32 %v1497_v2, %v1339_v30  ;;  %3554 = vmatpush.msrb.mxu2 %v5604_v33  ;;  %v5328_v33 = vld [vmem:[%s8800_s0 + $0x301] sm:$0xff] }
 0x181   :  { %5349 = vmatmul.msk.f32.gmra.mxu0 %vm74_vm0, %v5321_v62  ;;  %5218 = vmatmul.msk.f32.gmra.mxu1 %vm74_vm0, %v5190_v35  ;;  %v5648_v35 = vld [vmem:[%s8799_s1 + $0x778] sm:$0xff] }
 0x182   :  { %v7361_v40 = vadd.f32 %v1687_v31, %v1529_v38  ;;  %5262 = vmatmul.msk.f32.gmra.mxu2 %vm74_vm0, %v5234_v36  ;;  %v5281_v31 = vld [vmem:[%s8800_s0 + $0x370] sm:$0xff]  ;;  %3744 = vmatpush.msrb.mxu3 %v5648_v35 }
 0x183   :  { %5306 = vmatmul.msk.f32.gmra.mxu3 %vm74_vm0, %v5278_v39  ;;  %3555 = vmatpush.msrb.mxu2 %v5603_v59  ;;  %v5446_v59 = vld [vmem:[%s8800_s0 + $0x160] sm:$0xff] }
 0x185   :  { %v1310_v41 = vpop.f32.mrf.mxu2 }
 0x186   :  { %v1340_v45 = vadd.f32 %v1310_v41, %v1149_v12  ;;  %v1690_v46 = vpop.f32.mrf.mxu0  ;;  %v1122_v49 = vpop.f32.mrf.mxu1  ;;  %v5325_v12 = vld [vmem:[%s8800_s0 + $0x2d1] sm:$0xff] }
 0x187   :  { %v1500_v23 = vpop.f32.mrf.mxu3  ;;  %v1150_v61 = vadd.f32 %v1122_v49, %v6969_v37 }
 0x188   :  { %v1530_v56 = vadd.f32 %v1500_v23, %v1340_v45  ;;  %v5194_v45 = vld [vmem:[%s8800_s0 + $0x412] sm:$0xff] }
 0x189   :  { %5350 = vmatmul.msk.f32.gmra.mxu0 %vm74_vm0, %v5322_v47  ;;  %5219 = vmatmul.msk.f32.gmra.mxu1 %vm74_vm0, %v5191_v18  ;;  %v5692_v18 = vld [vmem:[%s8799_s1 + $0x7d8] sm:$0xff] }
 0x18a   :  { %v7389_v22 = vadd.f32 %v1690_v46, %v1530_v56  ;;  %5263 = vmatmul.msk.f32.gmra.mxu2 %vm74_vm0, %v5235_v51  ;;  %v5238_v46 = vld [vmem:[%s8800_s0 + $0x2e0] sm:$0xff]  ;;  %3935 = vmatpush.msrb.mxu0 %v5692_v18 }
 0x18b   :  { %5307 = vmatmul.msk.f32.gmra.mxu3 %vm74_vm0, %v5279_v58  ;;  %v5326_v58 = vld [vmem:[%s8800_s0 + $0x2e1] sm:$0xff] }
 0x18c   :  { %v5557_v18 = vld [vmem:[%s8799_s1 + $0x6a0] sm:$0xff] }
 0x18d   :  { %v1313_v29 = vpop.f32.mrf.mxu2 }
 0x18e   :  { %v1341_v63 = vadd.f32 %v1313_v29, %v1150_v61  ;;  %v1693_v3 = vpop.f32.mrf.mxu0  ;;  %v1125_v5 = vpop.f32.mrf.mxu1  ;;  %v5195_v29 = vld [vmem:[%s8800_s0 + $0x422] sm:$0xff] }
 0x18f   :  { %v1503_v34 = vpop.f32.mrf.mxu3  ;;  %v1151_v44 = vadd.f32 %v1125_v5, %v6994_v53  ;;  %v5193_v53 = vld [vmem:[%s8800_s0 + $0x402] sm:$0xff]  ;;  %v5283_v5 = vld [vmem:[%s8800_s0 + $0x390] sm:$0xff] }
 0x190   :  { %v1531_v37 = vadd.f32 %v1503_v34, %v1341_v63  ;;  %v5239_v63 = vld [vmem:[%s8800_s0 + $0x2f0] sm:$0xff] }
 0x191   :  { %5351 = vmatmul.msk.f32.gmra.mxu0 %vm74_vm0, %v5323_v4  ;;  %5220 = vmatmul.msk.f32.gmra.mxu1 %vm74_vm0, %v5192_v6  ;;  %v5647_v4 = vld [vmem:[%s8799_s1 + $0x770] sm:$0xff] }
 0x192   :  { %v7417_v42 = vadd.f32 %v1693_v3, %v1531_v37  ;;  %5264 = vmatmul.msk.f32.gmra.mxu2 %vm74_vm0, %v5236_v9  ;;  %3745 = vmatpush.msrb.mxu3 %v5647_v4  ;;  %v5559_v6 = vld [vmem:[%s8799_s1 + $0x6b0] sm:$0xff] }
 0x193   :  { %5308 = vmatmul.msk.f32.gmra.mxu3 %vm74_vm0, %v5280_v15  ;;  %3365 = vmatpush.msrb.mxu1 %v5559_v6  ;;  %v5327_v15 = vld [vmem:[%s8800_s0 + $0x2f1] sm:$0xff] }
 0x194   :  { %v5600_v6 = vld [vmem:[%s8799_s1 + $0x6f8] sm:$0xff] }
 0x195   :  { %v1316_v21 = vpop.f32.mrf.mxu2 }
 0x196   :  { %v1342_v24 = vadd.f32 %v1316_v21, %v1151_v44  ;;  %v1696_v0 = vpop.f32.mrf.mxu0  ;;  %v1128_v52 = vpop.f32.mrf.mxu1  ;;  %v5240_v21 = vld [vmem:[%s8800_s0 + $0x300] sm:$0xff] }
 0x197   :  { %v1506_v27 = vpop.f32.mrf.mxu3  ;;  %v1152_v2 = vadd.f32 %v1128_v52, %v7025_v14 }
 0x198   :  { %v1532_v30 = vadd.f32 %v1506_v27, %v1342_v24  ;;  %v5691_v24 = vld [vmem:[%s8799_s1 + $0x7d0] sm:$0xff]  ;;  %v5646_v27 = vld [vmem:[%s8799_s1 + $0x768] sm:$0xff] }
 0x199   :  { %5352 = vmatmul.msk.f32.gmra.mxu0 %vm74_vm0, %v5324_v26  ;;  %5221 = vmatmul.msk.f32.gmra.mxu1 %vm74_vm0, %v5193_v53  ;;  %v5284_v26 = vld [vmem:[%s8800_s0 + $0x3a0] sm:$0xff] }
 0x19a   :  { %v7442_v62 = vadd.f32 %v1696_v0, %v1532_v30  ;;  %5265 = vmatmul.msk.f32.gmra.mxu2 %vm74_vm0, %v5237_v28  ;;  %v5602_v0 = vld [vmem:[%s8799_s1 + $0x708] sm:$0xff]  ;;  %3936 = vmatpush.msrb.mxu0 %v5691_v24 }
 0x19b   :  { %5309 = vmatmul.msk.f32.gmra.mxu3 %vm74_vm0, %v5281_v31  ;;  %3556 = vmatpush.msrb.mxu2 %v5602_v0  ;;  %v5558_v28 = vld [vmem:[%s8799_s1 + $0x6a8] sm:$0xff] }
 0x19c   :  { %3746 = vmatpush.msrb.mxu3 %v5646_v27  ;;  %3366 = vmatpush.msrb.mxu1 %v5558_v28  ;;  %v5360_v28 = vld [vmem:[%s8800_s0 + $0xe1] sm:$0xff] }
 0x19d   :  { %v1319_v36 = vpop.f32.mrf.mxu2  ;;  %3557 = vmatpush.msrb.mxu2 %v5601_v11 }
 0x19e   :  { %v1343_v38 = vadd.f32 %v1319_v36, %v1152_v2  ;;  %v1699_v39 = vpop.f32.mrf.mxu0  ;;  %v1131_v41 = vpop.f32.mrf.mxu1  ;;  %v5401_v36 = vld [vmem:[%s8800_s0 + $0x12] sm:$0xff]  ;;  %3367 = vmatpush.msrb.mxu1 %v5557_v18  ;;  %v5598_v18 = vld [vmem:[%s8799_s1 + $0x6e8] sm:$0xff] }
 0x19f   :  { %v1509_v14 = vpop.f32.mrf.mxu3  ;;  %v1153_v23 = vadd.f32 %v1131_v41, %v7053_v20  ;;  %v5690_v41 = vld [vmem:[%s8799_s1 + $0x7c8] sm:$0xff]  ;;  %3558 = vmatpush.msrb.mxu2 %v5600_v6  ;;  %v5450_v6 = vld [vmem:[%s8800_s0 + $0x1a0] sm:$0xff] }
 0x1a0   :  { %v1533_v47 = vadd.f32 %v1509_v14, %v1343_v38  ;;  %3937 = vmatpush.msrb.mxu0 %v5690_v41  ;;  %v5492_v41 = vld [vmem:[%s8800_s0 + $0x220] sm:$0xff] }
 0x1a1   :  { %5353 = vmatmul.msk.f32.gmra.mxu0 %vm74_vm0, %v5325_v12  ;;  %5222 = vmatmul.msk.f32.gmra.mxu1 %vm74_vm0, %v5194_v45  ;;  %v5645_v45 = vld [vmem:[%s8799_s1 + $0x760] sm:$0xff] }
 0x1a2   :  { %v7473_v49 = vadd.f32 %v1699_v39, %v1533_v47  ;;  %5266 = vmatmul.msk.f32.gmra.mxu2 %vm74_vm0, %v5238_v46  ;;  %v5445_v39 = vld [vmem:[%s8800_s0 + $0x150] sm:$0xff]  ;;  %3747 = vmatpush.msrb.mxu3 %v5645_v45 }
 0x1a3   :  { %5310 = vmatmul.msk.f32.gmra.mxu3 %vm74_vm0, %v5282_v48 }
 0x1a5   :  { %v1322_v51 = vpop.f32.mrf.mxu2 }
 0x1a6   :  { %v1344_v56 = vadd.f32 %v1322_v51, %v1153_v23  ;;  %v1702_v57 = vpop.f32.mrf.mxu0  ;;  %v1134_v61 = vpop.f32.mrf.mxu1  ;;  %v5489_v23 = vld [vmem:[%s8800_s0 + $0x1f0] sm:$0xff] }
 0x1a7   :  { %v1512_v20 = vpop.f32.mrf.mxu3  ;;  %v1154_v9 = vadd.f32 %v1134_v61, %v7081_v43 }
 0x1a8   :  { %v1534_v3 = vadd.f32 %v1512_v20, %v1344_v56  ;;  %v5358_v56 = vld [vmem:[%s8800_s0 + $0xc1] sm:$0xff] }
 0x1a9   :  { %5354 = vmatmul.msk.f32.gmra.mxu0 %vm74_vm0, %v5326_v58  ;;  %5223 = vmatmul.msk.f32.gmra.mxu1 %vm74_vm0, %v5195_v29  ;;  %v5689_v29 = vld [vmem:[%s8799_s1 + $0x7c0] sm:$0xff] }
 0x1aa   :  { %v7501_v34 = vadd.f32 %v1702_v57, %v1534_v3  ;;  %5267 = vmatmul.msk.f32.gmra.mxu2 %vm74_vm0, %v5239_v63  ;;  %v5402_v57 = vld [vmem:[%s8800_s0 + $0x22] sm:$0xff]  ;;  %3938 = vmatpush.msrb.mxu0 %v5689_v29 }
 0x1ab   :  { %5311 = vmatmul.msk.f32.gmra.mxu3 %vm74_vm0, %v5283_v5  ;;  %v5490_v5 = vld [vmem:[%s8800_s0 + $0x200] sm:$0xff]  ;;  %v5554_v29 = vld [vmem:[%s8799_s1 + $0x688] sm:$0xff] }
 0x1ad   :  { %v1325_v37 = vpop.f32.mrf.mxu2 }
 0x1ae   :  { %v1345_v13 = vadd.f32 %v1325_v37, %v1154_v9  ;;  %v1705_v8 = vpop.f32.mrf.mxu0  ;;  %v1137_v16 = vpop.f32.mrf.mxu1  ;;  %v5359_v37 = vld [vmem:[%s8800_s0 + $0xd1] sm:$0xff] }
 0x1af   :  { %v1515_v44 = vpop.f32.mrf.mxu3  ;;  %v1155_v53 = vadd.f32 %v1137_v16, %v7106_v54  ;;  %v5357_v54 = vld [vmem:[%s8800_s0 + $0xb1] sm:$0xff] }
 0x1b0   :  { %v1535_v43 = vadd.f32 %v1515_v44, %v1345_v13  ;;  %v5403_v13 = vld [vmem:[%s8800_s0 + $0x32] sm:$0xff] }
 0x1b1   :  { %5355 = vmatmul.msk.f32.gmra.mxu0 %vm74_vm0, %v5327_v15  ;;  %5224 = vmatmul.msk.f32.gmra.mxu1 %vm74_vm0, %v5196_v17  ;;  %v5644_v15 = vld [vmem:[%s8799_s1 + $0x758] sm:$0xff]  ;;  %v5447_v16 = vld [vmem:[%s8800_s0 + $0x170] sm:$0xff] }
 0x1b2   :  { %v7529_v52 = vadd.f32 %v1705_v8, %v1535_v43  ;;  %5268 = vmatmul.msk.f32.gmra.mxu2 %vm74_vm0, %v5240_v21  ;;  %3748 = vmatpush.msrb.mxu3 %v5644_v15  ;;  %v5556_v17 = vld [vmem:[%s8799_s1 + $0x698] sm:$0xff] }
 0x1b3   :  { %5312 = vmatmul.msk.f32.gmra.mxu3 %vm74_vm0, %v5284_v26  ;;  %3368 = vmatpush.msrb.mxu1 %v5556_v17  ;;  %v5491_v26 = vld [vmem:[%s8800_s0 + $0x210] sm:$0xff]  ;;  %v5597_v17 = vld [vmem:[%s8799_s1 + $0x6e0] sm:$0xff] }
 0x1b5   :  { %v1328_v30 = vpop.f32.mrf.mxu2 }
 0x1b6   :  { %v1346_v31 = vadd.f32 %v1328_v30, %v1155_v53  ;;  %v1708_v7 = vpop.f32.mrf.mxu0  ;;  %v1853_v35 = vpop.f32.mrf.mxu1  ;;  %v5404_v30 = vld [vmem:[%s8800_s0 + $0x42] sm:$0xff] }
 0x1b7   :  { %v1518_v2 = vpop.f32.mrf.mxu3  ;;  %v1901_v14 = vadd.f32 %v1853_v35, %v7137_v25  ;;  %v5643_v35 = vld [vmem:[%s8799_s1 + $0x750] sm:$0xff] }
 0x1b8   :  { %v1536_v38 = vadd.f32 %v1518_v2, %v1346_v31  ;;  %v5688_v31 = vld [vmem:[%s8799_s1 + $0x7b8] sm:$0xff]  ;;  %3749 = vmatpush.msrb.mxu3 %v5643_v35 }
 0x1b9   :  { %5356 = vmatmul.msk.f32.gmra.mxu0 %vm74_vm0, %v5328_v33  ;;  %5385 = vmatmul.msk.f32.vlgmr.msra.gmra.mxu1 %vm74_vm0, %v5357_v54  ;;  %v5448_v33 = vld [vmem:[%s8800_s0 + $0x180] sm:$0xff] }
 0x1ba   :  { %v7554_v12 = vadd.f32 %v1708_v7, %v1536_v38  ;;  %5429 = vmatmul.msk.f32.vlgmr.msra.gmra.mxu2 %vm74_vm0, %v5401_v36  ;;  %v5599_v7 = vld [vmem:[%s8799_s1 + $0x6f0] sm:$0xff]  ;;  %3939 = vmatpush.msrb.mxu0 %v5688_v31 }
 0x1bb   :  { %5473 = vmatmul.msk.f32.vlgmr.msra.gmra.mxu3 %vm74_vm0, %v5445_v39  ;;  %3559 = vmatpush.msrb.mxu2 %v5599_v7  ;;  %v5555_v36 = vld [vmem:[%s8799_s1 + $0x690] sm:$0xff] }
 0x1bc   :  { %3369 = vmatpush.msrb.mxu1 %v5555_v36  ;;  %v5364_v36 = vld [vmem:[%s8800_s0 + $0x121] sm:$0xff] }
 0x1bd   :  { %v2044_v46 = vpop.f32.mrf.mxu2  ;;  %3560 = vmatpush.msrb.mxu2 %v5598_v18 }
 0x1be   :  { %v2092_v47 = vadd.f32 %v2044_v46, %v1901_v14  ;;  %v2425_v48 = vpop.f32.mrf.mxu0  ;;  %v1856_v51 = vpop.f32.mrf.mxu1  ;;  %v5405_v46 = vld [vmem:[%s8800_s0 + $0x52] sm:$0xff]  ;;  %3370 = vmatpush.msrb.mxu1 %v5554_v29 }
 0x1bf   :  { %v2235_v25 = vpop.f32.mrf.mxu3  ;;  %v1902_v20 = vadd.f32 %v1856_v51, %v7165_v10  ;;  %v5687_v51 = vld [vmem:[%s8799_s1 + $0x7b0] sm:$0xff]  ;;  %3561 = vmatpush.msrb.mxu2 %v5597_v17  ;;  %v5454_v17 = vld [vmem:[%s8800_s0 + $0x3e0] sm:$0xff] }
 0x1c0   :  { %v2283_v58 = vadd.f32 %v2235_v25, %v2092_v47  ;;  %3940 = vmatpush.msrb.mxu0 %v5687_v51  ;;  %v5496_v51 = vld [vmem:[%s8800_s0 + $0x260] sm:$0xff]  ;;  %v5595_v29 = vld [vmem:[%s8799_s1 + $0x6d0] sm:$0xff] }
 0x1c1   :  { %5517 = vmatmul.msk.f32.vlgmr.msra.gmra.mxu0 %vm74_vm0, %v5489_v23  ;;  %5386 = vmatmul.msk.f32.gmra.mxu1 %vm74_vm0, %v5358_v56  ;;  %v5642_v56 = vld [vmem:[%s8799_s1 + $0x748] sm:$0xff] }
 0x1c2   :  { %v7585_v61 = vadd.f32 %v2425_v48, %v2283_v58  ;;  %5430 = vmatmul.msk.f32.gmra.mxu2 %vm74_vm0, %v5402_v57  ;;  %v5449_v48 = vld [vmem:[%s8800_s0 + $0x190] sm:$0xff]  ;;  %3750 = vmatpush.msrb.mxu3 %v5642_v56 }
 0x1c3   :  { %5474 = vmatmul.msk.f32.gmra.mxu3 %vm74_vm0, %v5446_v59 }
 0x1c5   :  { %v2047_v63 = vpop.f32.mrf.mxu2 }
 0x1c6   :  { %v2093_v3 = vadd.f32 %v2047_v63, %v1902_v20  ;;  %v2428_v4 = vpop.f32.mrf.mxu0  ;;  %v1859_v9 = vpop.f32.mrf.mxu1  ;;  %v5493_v20 = vld [vmem:[%s8800_s0 + $0x230] sm:$0xff] }
 0x1c7   :  { %v2238_v10 = vpop.f32.mrf.mxu3  ;;  %v1903_v21 = vadd.f32 %v1859_v9, %v7193_v50 }
 0x1c8   :  { %v2284_v8 = vadd.f32 %v2238_v10, %v2093_v3  ;;  %v5362_v3 = vld [vmem:[%s8800_s0 + $0x101] sm:$0xff] }
 0x1c9   :  { %5518 = vmatmul.msk.f32.gmra.mxu0 %vm74_vm0, %v5490_v5  ;;  %5387 = vmatmul.msk.f32.gmra.mxu1 %vm74_vm0, %v5359_v37  ;;  %v5686_v37 = vld [vmem:[%s8799_s1 + $0x7a8] sm:$0xff] }
 0x1ca   :  { %v7613_v44 = vadd.f32 %v2428_v4, %v2284_v8  ;;  %5431 = vmatmul.msk.f32.gmra.mxu2 %vm74_vm0, %v5403_v13  ;;  %v5406_v4 = vld [vmem:[%s8800_s0 + $0x62] sm:$0xff]  ;;  %3941 = vmatpush.msrb.mxu0 %v5686_v37  ;;  %v5551_v37 = vld [vmem:[%s8799_s1 + $0x670] sm:$0xff] }
 0x1cb   :  { %5475 = vmatmul.msk.f32.gmra.mxu3 %vm74_vm0, %v5447_v16  ;;  %v5494_v16 = vld [vmem:[%s8800_s0 + $0x240] sm:$0xff] }
 0x1cd   :  { %v2050_v43 = vpop.f32.mrf.mxu2 }
 0x1ce   :  { %v2094_v24 = vadd.f32 %v2050_v43, %v1903_v21  ;;  %v2431_v0 = vpop.f32.mrf.mxu0  ;;  %v1862_v27 = vpop.f32.mrf.mxu1  ;;  %v5363_v43 = vld [vmem:[%s8800_s0 + $0x111] sm:$0xff] }
 0x1cf   :  { %v2241_v53 = vpop.f32.mrf.mxu3  ;;  %v1904_v54 = vadd.f32 %v1862_v27, %v7218_v60  ;;  %v5361_v60 = vld [vmem:[%s8800_s0 + $0xf1] sm:$0xff] }
 0x1d0   :  { %v2285_v50 = vadd.f32 %v2241_v53, %v2094_v24  ;;  %v5407_v24 = vld [vmem:[%s8800_s0 + $0x72] sm:$0xff] }
 0x1d1   :  { %5519 = vmatmul.msk.f32.gmra.mxu0 %vm74_vm0, %v5491_v26  ;;  %5388 = vmatmul.msk.f32.gmra.mxu1 %vm74_vm0, %v5360_v28  ;;  %v5641_v26 = vld [vmem:[%s8799_s1 + $0x740] sm:$0xff]  ;;  %v5451_v27 = vld [vmem:[%s8800_s0 + $0x1b0] sm:$0xff] }
 0x1d2   :  { %v7641_v2 = vadd.f32 %v2431_v0, %v2285_v50  ;;  %5432 = vmatmul.msk.f32.gmra.mxu2 %vm74_vm0, %v5404_v30  ;;  %3751 = vmatpush.msrb.mxu3 %v5641_v26  ;;  %v5553_v28 = vld [vmem:[%s8799_s1 + $0x680] sm:$0xff] }
 0x1d3   :  { %5476 = vmatmul.msk.f32.gmra.mxu3 %vm74_vm0, %v5448_v33  ;;  %3371 = vmatpush.msrb.mxu1 %v5553_v28  ;;  %v5495_v33 = vld [vmem:[%s8800_s0 + $0x250] sm:$0xff]  ;;  %v5594_v28 = vld [vmem:[%s8799_s1 + $0x6c8] sm:$0xff] }
 0x1d5   :  { %v2053_v38 = vpop.f32.mrf.mxu2 }
 0x1d6   :  { %v2095_v39 = vadd.f32 %v2053_v38, %v1904_v54  ;;  %v2434_v11 = vpop.f32.mrf.mxu0  ;;  %v1865_v14 = vpop.f32.mrf.mxu1  ;;  %v5408_v38 = vld [vmem:[%s8800_s0 + $0x82] sm:$0xff] }
 0x1d7   :  { %v2244_v45 = vpop.f32.mrf.mxu3  ;;  %v1905_v25 = vadd.f32 %v1865_v14, %v7249_v32 }
 0x1d8   :  { %v2286_v47 = vadd.f32 %v2244_v45, %v2095_v39  ;;  %v5685_v39 = vld [vmem:[%s8799_s1 + $0x7a0] sm:$0xff]  ;;  %v5640_v45 = vld [vmem:[%s8799_s1 + $0x738] sm:$0xff] }
 0x1d9   :  { %5520 = vmatmul.msk.f32.gmra.mxu0 %vm74_vm0, %v5492_v41  ;;  %5389 = vmatmul.msk.f32.gmra.mxu1 %vm74_vm0, %v5361_v60  ;;  %v5452_v41 = vld [vmem:[%s8800_s0 + $0x1c0] sm:$0xff] }
 0x1da   :  { %v7666_v23 = vadd.f32 %v2434_v11, %v2286_v47  ;;  %5433 = vmatmul.msk.f32.gmra.mxu2 %vm74_vm0, %v5405_v46  ;;  %v5596_v11 = vld [vmem:[%s8799_s1 + $0x6d8] sm:$0xff]  ;;  %3942 = vmatpush.msrb.mxu0 %v5685_v39 }
 0x1db   :  { %5477 = vmatmul.msk.f32.gmra.mxu3 %vm74_vm0, %v5449_v48  ;;  %3562 = vmatpush.msrb.mxu2 %v5596_v11  ;;  %v5552_v46 = vld [vmem:[%s8799_s1 + $0x678] sm:$0xff] }
 0x1dc   :  { %3752 = vmatpush.msrb.mxu3 %v5640_v45  ;;  %3372 = vmatpush.msrb.mxu1 %v5552_v46  ;;  %v5368_v46 = vld [vmem:[%s8800_s0 + $0x361] sm:$0xff] }
 0x1dd   :  { %v2056_v57 = vpop.f32.mrf.mxu2  ;;  %3563 = vmatpush.msrb.mxu2 %v5595_v29 }
 0x1de   :  { %v2096_v58 = vadd.f32 %v2056_v57, %v1905_v25  ;;  %v2437_v59 = vpop.f32.mrf.mxu0  ;;  %v1868_v63 = vpop.f32.mrf.mxu1  ;;  %v5409_v57 = vld [vmem:[%s8800_s0 + $0x292] sm:$0xff]  ;;  %3373 = vmatpush.msrb.mxu1 %v5551_v37  ;;  %v5681_v37 = vld [vmem:[%s8799_s1 + $0x780] sm:$0xff] }
 0x1df   :  { %v2247_v32 = vpop.f32.mrf.mxu3  ;;  %v1906_v10 = vadd.f32 %v1868_v63, %v7277_v19  ;;  %v5684_v63 = vld [vmem:[%s8799_s1 + $0x798] sm:$0xff]  ;;  %3564 = vmatpush.msrb.mxu2 %v5594_v28  ;;  %v5458_v28 = vld [vmem:[%s8800_s0 + $0x420] sm:$0xff] }
 0x1e0   :  { %v2287_v5 = vadd.f32 %v2247_v32, %v2096_v58  ;;  %3943 = vmatpush.msrb.mxu0 %v5684_v63  ;;  %v5500_v63 = vld [vmem:[%s8800_s0 + $0x4a0] sm:$0xff] }
 0x1e1   :  { %5521 = vmatmul.msk.f32.gmra.mxu0 %vm74_vm0, %v5493_v20  ;;  %5390 = vmatmul.msk.f32.gmra.mxu1 %vm74_vm0, %v5362_v3  ;;  %v5639_v3 = vld [vmem:[%s8799_s1 + $0x730] sm:$0xff] }
 0x1e2   :  { %v7697_v9 = vadd.f32 %v2437_v59, %v2287_v5  ;;  %5434 = vmatmul.msk.f32.gmra.mxu2 %vm74_vm0, %v5406_v4  ;;  %v5453_v59 = vld [vmem:[%s8800_s0 + $0x3d0] sm:$0xff]  ;;  %3753 = vmatpush.msrb.mxu3 %v5639_v3 }
 0x1e3   :  { %5478 = vmatmul.msk.f32.gmra.mxu3 %vm74_vm0, %v5450_v6 }
 0x1e5   :  { %v2059_v13 = vpop.f32.mrf.mxu2 }
 0x1e6   :  { %v2097_v8 = vadd.f32 %v2059_v13, %v1906_v10  ;;  %v2440_v15 = vpop.f32.mrf.mxu0  ;;  %v1871_v21 = vpop.f32.mrf.mxu1  ;;  %v5497_v10 = vld [vmem:[%s8800_s0 + $0x470] sm:$0xff] }
 0x1e7   :  { %v2250_v19 = vpop.f32.mrf.mxu3  ;;  %v1907_v30 = vadd.f32 %v1871_v21, %v7305_v55 }
 0x1e8   :  { %v2288_v0 = vadd.f32 %v2250_v19, %v2097_v8  ;;  %v5366_v8 = vld [vmem:[%s8800_s0 + $0x341] sm:$0xff] }
 0x1e9   :  { %5522 = vmatmul.msk.f32.gmra.mxu0 %vm74_vm0, %v5494_v16  ;;  %5391 = vmatmul.msk.f32.gmra.mxu1 %vm74_vm0, %v5363_v43  ;;  %v5683_v43 = vld [vmem:[%s8799_s1 + $0x790] sm:$0xff] }
 0x1ea   :  { %v7725_v53 = vadd.f32 %v2440_v15, %v2288_v0  ;;  %5435 = vmatmul.msk.f32.gmra.mxu2 %vm74_vm0, %v5407_v24  ;;  %v5410_v15 = vld [vmem:[%s8800_s0 + $0x2a2] sm:$0xff]  ;;  %3944 = vmatpush.msrb.mxu0 %v5683_v43  ;;  %v5736_v43 = vld [vmem:[%s8799_s1 + $0x838] sm:$0xff] }
 0x1eb   :  { %5479 = vmatmul.msk.f32.gmra.mxu3 %vm74_vm0, %v5451_v27  ;;  %v5498_v27 = vld [vmem:[%s8800_s0 + $0x480] sm:$0xff] }
 0x1ed   :  { %v2062_v50 = vpop.f32.mrf.mxu2 }
 0x1ee   :  { %v2098_v31 = vadd.f32 %v2062_v50, %v1907_v30  ;;  %v2443_v7 = vpop.f32.mrf.mxu0  ;;  %v1874_v35 = vpop.f32.mrf.mxu1  ;;  %v5367_v50 = vld [vmem:[%s8800_s0 + $0x351] sm:$0xff] }
 0x1ef   :  { %v2253_v54 = vpop.f32.mrf.mxu3  ;;  %v1908_v60 = vadd.f32 %v1874_v35, %v7330_v1  ;;  %v5365_v1 = vld [vmem:[%s8800_s0 + $0x331] sm:$0xff] }
 0x1f0   :  { %v2289_v55 = vadd.f32 %v2253_v54, %v2098_v31  ;;  %v5411_v31 = vld [vmem:[%s8800_s0 + $0x2b2] sm:$0xff] }
 0x1f1   :  { %5523 = vmatmul.msk.f32.gmra.mxu0 %vm74_vm0, %v5495_v33  ;;  %5392 = vmatmul.msk.f32.gmra.mxu1 %vm74_vm0, %v5364_v36  ;;  %v5638_v33 = vld [vmem:[%s8799_s1 + $0x728] sm:$0xff]  ;;  %v5455_v35 = vld [vmem:[%s8800_s0 + $0x3f0] sm:$0xff] }
 0x1f2   :  { %v7753_v14 = vadd.f32 %v2443_v7, %v2289_v55  ;;  %5436 = vmatmul.msk.f32.gmra.mxu2 %vm74_vm0, %v5408_v38  ;;  %3754 = vmatpush.msrb.mxu3 %v5638_v33  ;;  %v5550_v36 = vld [vmem:[%s8799_s1 + $0x668] sm:$0xff] }
 0x1f3   :  { %5480 = vmatmul.msk.f32.gmra.mxu3 %vm74_vm0, %v5452_v41  ;;  %3374 = vmatpush.msrb.mxu1 %v5550_v36  ;;  %v5499_v41 = vld [vmem:[%s8800_s0 + $0x490] sm:$0xff] }
 0x1f4   :  { %v5779_v36 = vld [vmem:[%s8799_s1 + $0x890] sm:$0xff] }
 0x1f5   :  { %v2065_v47 = vpop.f32.mrf.mxu2 }
 0x1f6   :  { %v2099_v48 = vadd.f32 %v2065_v47, %v1908_v60  ;;  %v2446_v18 = vpop.f32.mrf.mxu0  ;;  %v1877_v25 = vpop.f32.mrf.mxu1  ;;  %v5412_v47 = vld [vmem:[%s8800_s0 + $0x2c2] sm:$0xff] }
 0x1f7   :  { %v2256_v56 = vpop.f32.mrf.mxu3  ;;  %v1909_v32 = vadd.f32 %v1877_v25, %v7361_v40 }
 0x1f8   :  { %v2290_v58 = vadd.f32 %v2256_v56, %v2099_v48  ;;  %v5682_v48 = vld [vmem:[%s8799_s1 + $0x788] sm:$0xff]  ;;  %v5637_v56 = vld [vmem:[%s8799_s1 + $0x720] sm:$0xff] }
 0x1f9   :  { %5524 = vmatmul.msk.f32.gmra.mxu0 %vm74_vm0, %v5496_v51  ;;  %5393 = vmatmul.msk.f32.gmra.mxu1 %vm74_vm0, %v5365_v1  ;;  %v5456_v51 = vld [vmem:[%s8800_s0 + $0x400] sm:$0xff] }
 0x1fa   :  { %v7778_v20 = vadd.f32 %v2446_v18, %v2290_v58  ;;  %5437 = vmatmul.msk.f32.gmra.mxu2 %vm74_vm0, %v5409_v57  ;;  %v5593_v18 = vld [vmem:[%s8799_s1 + $0x6c0] sm:$0xff]  ;;  %3945 = vmatpush.msrb.mxu0 %v5682_v48 }
 0x1fb   :  { %5481 = vmatmul.msk.f32.gmra.mxu3 %vm74_vm0, %v5453_v59  ;;  %3565 = vmatpush.msrb.mxu2 %v5593_v18  ;;  %v5549_v57 = vld [vmem:[%s8799_s1 + $0x660] sm:$0xff] }
 0x1fc   :  { %3755 = vmatpush.msrb.mxu3 %v5637_v56  ;;  %3375 = vmatpush.msrb.mxu1 %v5549_v57  ;;  %v5372_v57 = vld [vmem:[%s8800_s0 + $0x3a1] sm:$0xff] }
 0x1fd   :  { %v2068_v4 = vpop.f32.mrf.mxu2  ;;  %3946 = vmatpush.msrb.mxu0 %v5681_v37 }
 0x1fe   :  { %v2100_v5 = vadd.f32 %v2068_v4, %v1909_v32  ;;  %v2449_v6 = vpop.f32.mrf.mxu0  ;;  %v1880_v13 = vpop.f32.mrf.mxu1  ;;  %v5413_v4 = vld [vmem:[%s8800_s0 + $0x2d2] sm:$0xff]  ;;  %4126 = vmatpush.msra.mxu1 %v5736_v43  ;;  %v5777_v43 = vld [vmem:[%s8799_s1 + $0x880] sm:$0xff] }
 0x1ff   :  { %v2259_v40 = vpop.f32.mrf.mxu3  ;;  %v1910_v19 = vadd.f32 %v1880_v13, %v7389_v22  ;;  %v5780_v13 = vld [vmem:[%s8799_s1 + $0x898] sm:$0xff] }
 0x200   :  { %v2291_v16 = vadd.f32 %v2259_v40, %v2100_v5  ;;  %4316 = vmatpush.msra.mxu2 %v5780_v13  ;;  %v5504_v13 = vld [vmem:[%s8800_s0 + $0x4e0] sm:$0xff] }
 0x201   :  { %5525 = vmatmul.msk.f32.gmra.mxu0 %vm74_vm0, %v5497_v10  ;;  %5394 = vmatmul.msk.f32.gmra.mxu1 %vm74_vm0, %v5366_v8  ;;  %v5824_v8 = vld [vmem:[%s8799_s1 + $0x8f8] sm:$0xff] }
 0x202   :  { %v7809_v21 = vadd.f32 %v2449_v6, %v2291_v16  ;;  %5438 = vmatmul.msk.f32.gmra.mxu2 %vm74_vm0, %v5410_v15  ;;  %v5457_v6 = vld [vmem:[%s8800_s0 + $0x410] sm:$0xff]  ;;  %4506 = vmatpush.msra.mxu3 %v5824_v8 }
 0x203   :  { %5482 = vmatmul.msk.f32.gmra.mxu3 %vm74_vm0, %v5454_v17  ;;  %4317 = vmatpush.msra.mxu2 %v5779_v36  ;;  %v5622_v36 = vld [vmem:[%s8800_s0 + $0x162] sm:$0xff] }
 0x205   :  { %v2071_v24 = vpop.f32.mrf.mxu2 }
 0x206   :  { %v2101_v0 = vadd.f32 %v2071_v24, %v1910_v19  ;;  %v2452_v26 = vpop.f32.mrf.mxu0  ;;  %v1883_v30 = vpop.f32.mrf.mxu1  ;;  %v5501_v19 = vld [vmem:[%s8800_s0 + $0x4b0] sm:$0xff] }
 0x207   :  { %v2262_v22 = vpop.f32.mrf.mxu3  ;;  %v1911_v38 = vadd.f32 %v1883_v30, %v7417_v42 }
 0x208   :  { %v2292_v7 = vadd.f32 %v2262_v22, %v2101_v0  ;;  %v5370_v0 = vld [vmem:[%s8800_s0 + $0x381] sm:$0xff] }
 0x209   :  { %5526 = vmatmul.msk.f32.gmra.mxu0 %vm74_vm0, %v5498_v27  ;;  %5395 = vmatmul.msk.f32.gmra.mxu1 %vm74_vm0, %v5367_v50  ;;  %v5868_v50 = vld [vmem:[%s8799_s1 + $0x958] sm:$0xff] }
 0x20a   :  { %v7837_v54 = vadd.f32 %v2452_v26, %v2292_v7  ;;  %5439 = vmatmul.msk.f32.gmra.mxu2 %vm74_vm0, %v5411_v31  ;;  %v5414_v26 = vld [vmem:[%s8800_s0 + $0x2e2] sm:$0xff]  ;;  %4696 = vmatpush.msra.mxu0 %v5868_v50 }
 0x20b   :  { %5483 = vmatmul.msk.f32.gmra.mxu3 %vm74_vm0, %v5455_v35  ;;  %v5502_v35 = vld [vmem:[%s8800_s0 + $0x4c0] sm:$0xff] }
 0x20c   :  { %v5733_v50 = vld [vmem:[%s8799_s1 + $0x820] sm:$0xff] }
 0x20d   :  { %v2074_v55 = vpop.f32.mrf.mxu2 }
 0x20e   :  { %v2102_v39 = vadd.f32 %v2074_v55, %v1911_v38  ;;  %v2455_v11 = vpop.f32.mrf.mxu0  ;;  %v1886_v45 = vpop.f32.mrf.mxu1  ;;  %v5371_v55 = vld [vmem:[%s8800_s0 + $0x391] sm:$0xff] }
 0x20f   :  { %v2265_v60 = vpop.f32.mrf.mxu3  ;;  %v1912_v1 = vadd.f32 %v1886_v45, %v7442_v62  ;;  %v5369_v62 = vld [vmem:[%s8800_s0 + $0x371] sm:$0xff] }
 0x210   :  { %v2293_v42 = vadd.f32 %v2265_v60, %v2102_v39  ;;  %v5415_v39 = vld [vmem:[%s8800_s0 + $0x2f2] sm:$0xff] }
 0x211   :  { %5527 = vmatmul.msk.f32.gmra.mxu0 %vm74_vm0, %v5499_v41  ;;  %5396 = vmatmul.msk.f32.gmra.mxu1 %vm74_vm0, %v5368_v46  ;;  %v5823_v41 = vld [vmem:[%s8799_s1 + $0x8f0] sm:$0xff] }
 0x212   :  { %v7865_v25 = vadd.f32 %v2455_v11, %v2293_v42  ;;  %5440 = vmatmul.msk.f32.gmra.mxu2 %vm74_vm0, %v5412_v47  ;;  %v5459_v45 = vld [vmem:[%s8800_s0 + $0x430] sm:$0xff]  ;;  %4507 = vmatpush.msra.mxu3 %v5823_v41 }
 0x213   :  { %5484 = vmatmul.msk.f32.gmra.mxu3 %vm74_vm0, %v5456_v51  ;;  %v5735_v46 = vld [vmem:[%s8799_s1 + $0x830] sm:$0xff] }
 0x214   :  { %4127 = vmatpush.msra.mxu1 %v5735_v46  ;;  %v5503_v51 = vld [vmem:[%s8800_s0 + $0x4d0] sm:$0xff]  ;;  %v5776_v46 = vld [vmem:[%s8799_s1 + $0x878] sm:$0xff] }
 0x215   :  { %v2077_v58 = vpop.f32.mrf.mxu2 }
 0x216   :  { %v2103_v59 = vadd.f32 %v2077_v58, %v1912_v1  ;;  %v2458_v29 = vpop.f32.mrf.mxu0  ;;  %v1889_v32 = vpop.f32.mrf.mxu1  ;;  %v5416_v58 = vld [vmem:[%s8800_s0 + $0x302] sm:$0xff] }
 0x217   :  { %v2268_v3 = vpop.f32.mrf.mxu3  ;;  %v1913_v40 = vadd.f32 %v1889_v32, %v7473_v49 }
 0x218   :  { %v2294_v5 = vadd.f32 %v2268_v3, %v2103_v59  ;;  %v5867_v59 = vld [vmem:[%s8799_s1 + $0x950] sm:$0xff]  ;;  %v5822_v3 = vld [vmem:[%s8799_s1 + $0x8e8] sm:$0xff] }
 0x219   :  { %5528 = vmatmul.msk.f32.gmra.mxu0 %vm74_vm0, %v5500_v63  ;;  %5397 = vmatmul.msk.f32.gmra.mxu1 %vm74_vm0, %v5369_v62  ;;  %v5460_v63 = vld [vmem:[%s8800_s0 + $0x440] sm:$0xff] }
 0x21a   :  { %v7890_v10 = vadd.f32 %v2458_v29, %v2294_v5  ;;  %5441 = vmatmul.msk.f32.gmra.mxu2 %vm74_vm0, %v5413_v4  ;;  %v5778_v29 = vld [vmem:[%s8799_s1 + $0x888] sm:$0xff]  ;;  %4697 = vmatpush.msra.mxu0 %v5867_v59 }
 0x21b   :  { %5485 = vmatmul.msk.f32.gmra.mxu3 %vm74_vm0, %v5457_v6  ;;  %4318 = vmatpush.msra.mxu2 %v5778_v29  ;;  %v5734_v4 = vld [vmem:[%s8799_s1 + $0x828] sm:$0xff] }
 0x21c   :  { %4508 = vmatpush.msra.mxu3 %v5822_v3  ;;  %4128 = vmatpush.msra.mxu1 %v5734_v4  ;;  %v5536_v4 = vld [vmem:[%s8800_s0 + $0x181] sm:$0xff] }
 0x21d   :  { %v2080_v15 = vpop.f32.mrf.mxu2  ;;  %4319 = vmatpush.msra.mxu2 %v5777_v43 }
 0x21e   :  { %v2104_v16 = vadd.f32 %v2080_v15, %v1913_v40  ;;  %v2461_v17 = vpop.f32.mrf.mxu0  ;;  %v1892_v24 = vpop.f32.mrf.mxu1  ;;  %v5577_v15 = vld [vmem:[%s8800_s0 + $0x1f1] sm:$0xff]  ;;  %4129 = vmatpush.msra.mxu1 %v5733_v50  ;;  %v5774_v50 = vld [vmem:[%s8799_s1 + $0x868] sm:$0xff] }
 0x21f   :  { %v2271_v49 = vpop.f32.mrf.mxu3  ;;  %v1914_v22 = vadd.f32 %v1892_v24, %v7501_v34  ;;  %v5866_v24 = vld [vmem:[%s8799_s1 + $0x948] sm:$0xff]  ;;  %4320 = vmatpush.msra.mxu2 %v5776_v46 }
 0x220   :  { %v2295_v27 = vadd.f32 %v2271_v49, %v2104_v16  ;;  %4698 = vmatpush.msra.mxu0 %v5866_v24  ;;  %v5668_v24 = vld [vmem:[%s8800_s0 + $0x50] sm:$0xff]  ;;  %v5626_v46 = vld [vmem:[%s8800_s0 + $0x1a2] sm:$0xff] }
 0x221   :  { %5529 = vmatmul.msk.f32.gmra.mxu0 %vm74_vm0, %v5501_v19  ;;  %5398 = vmatmul.msk.f32.gmra.mxu1 %vm74_vm0, %v5370_v0  ;;  %v5821_v0 = vld [vmem:[%s8799_s1 + $0x8e0] sm:$0xff] }
 0x222   :  { %v7921_v30 = vadd.f32 %v2461_v17, %v2295_v27  ;;  %5442 = vmatmul.msk.f32.gmra.mxu2 %vm74_vm0, %v5414_v26  ;;  %v5621_v17 = vld [vmem:[%s8800_s0 + $0x152] sm:$0xff]  ;;  %4509 = vmatpush.msra.mxu3 %v5821_v0 }
 0x223   :  { %5486 = vmatmul.msk.f32.gmra.mxu3 %vm74_vm0, %v5458_v28 }
 0x225   :  { %v2083_v31 = vpop.f32.mrf.mxu2 }
 0x226   :  { %v2105_v7 = vadd.f32 %v2083_v31, %v1914_v22  ;;  %v2464_v33 = vpop.f32.mrf.mxu0  ;;  %v1895_v38 = vpop.f32.mrf.mxu1  ;;  %v5665_v22 = vld [vmem:[%s8800_s0 + $0x20] sm:$0xff] }
 0x227   :  { %v2274_v34 = vpop.f32.mrf.mxu3  ;;  %v1915_v47 = vadd.f32 %v1895_v38, %v7529_v52 }
 0x228   :  { %v2296_v11 = vadd.f32 %v2274_v34, %v2105_v7  ;;  %v5534_v7 = vld [vmem:[%s8800_s0 + $0x161] sm:$0xff] }
 0x229   :  { %5530 = vmatmul.msk.f32.gmra.mxu0 %vm74_vm0, %v5502_v35  ;;  %5399 = vmatmul.msk.f32.gmra.mxu1 %vm74_vm0, %v5371_v55  ;;  %v5865_v55 = vld [vmem:[%s8799_s1 + $0x940] sm:$0xff] }
 0x22a   :  { %v7949_v60 = vadd.f32 %v2464_v33, %v2296_v11  ;;  %5443 = vmatmul.msk.f32.gmra.mxu2 %vm74_vm0, %v5415_v39  ;;  %v5578_v33 = vld [vmem:[%s8800_s0 + $0x201] sm:$0xff]  ;;  %4699 = vmatpush.msra.mxu0 %v5865_v55 }
 0x22b   :  { %5487 = vmatmul.msk.f32.gmra.mxu3 %vm74_vm0, %v5459_v45  ;;  %v5666_v45 = vld [vmem:[%s8800_s0 + $0x30] sm:$0xff]  ;;  %v5730_v55 = vld [vmem:[%s8799_s1 + $0x808] sm:$0xff] }
 0x22d   :  { %v2086_v42 = vpop.f32.mrf.mxu2 }
 0x22e   :  { %v2106_v48 = vadd.f32 %v2086_v42, %v1915_v47  ;;  %v2467_v18 = vpop.f32.mrf.mxu0  ;;  %v1898_v56 = vpop.f32.mrf.mxu1  ;;  %v5535_v42 = vld [vmem:[%s8800_s0 + $0x171] sm:$0xff] }
 0x22f   :  { %v2277_v1 = vpop.f32.mrf.mxu3  ;;  %v1916_v62 = vadd.f32 %v1898_v56, %v7554_v12  ;;  %v5533_v12 = vld [vmem:[%s8800_s0 + $0x151] sm:$0xff] }
 0x230   :  { %v2297_v52 = vadd.f32 %v2277_v1, %v2106_v48  ;;  %v5579_v48 = vld [vmem:[%s8800_s0 + $0x211] sm:$0xff] }
 0x231   :  { %5531 = vmatmul.msk.f32.gmra.mxu0 %vm74_vm0, %v5503_v51  ;;  %5400 = vmatmul.msk.f32.gmra.mxu1 %vm74_vm0, %v5372_v57  ;;  %v5820_v51 = vld [vmem:[%s8799_s1 + $0x8d8] sm:$0xff] }
 0x232   :  { %v7977_v32 = vadd.f32 %v2467_v18, %v2297_v52  ;;  %5444 = vmatmul.msk.f32.gmra.mxu2 %vm74_vm0, %v5416_v58  ;;  %v5623_v56 = vld [vmem:[%s8800_s0 + $0x172] sm:$0xff]  ;;  %4510 = vmatpush.msra.mxu3 %v5820_v51 }
 0x233   :  { %5488 = vmatmul.msk.f32.gmra.mxu3 %vm74_vm0, %v5460_v63  ;;  %v5732_v57 = vld [vmem:[%s8799_s1 + $0x818] sm:$0xff]  ;;  %v5667_v63 = vld [vmem:[%s8800_s0 + $0x40] sm:$0xff] }
 0x234   :  { %4130 = vmatpush.msra.mxu1 %v5732_v57  ;;  %v5773_v57 = vld [vmem:[%s8799_s1 + $0x860] sm:$0xff] }
 0x235   :  { %v2089_v5 = vpop.f32.mrf.mxu2 }
 0x236   :  { %v2107_v6 = vadd.f32 %v2089_v5, %v1916_v62  ;;  %v2470_v37 = vpop.f32.mrf.mxu0  ;;  %v2615_v8 = vpop.f32.mrf.mxu1  ;;  %v5580_v5 = vld [vmem:[%s8800_s0 + $0x221] sm:$0xff] }
 0x237   :  { %v2280_v40 = vpop.f32.mrf.mxu3  ;;  %v2663_v49 = vadd.f32 %v2615_v8, %v7585_v61  ;;  %v5819_v8 = vld [vmem:[%s8799_s1 + $0x8d0] sm:$0xff] }
 0x238   :  { %v2298_v16 = vadd.f32 %v2280_v40, %v2107_v6  ;;  %v5864_v6 = vld [vmem:[%s8799_s1 + $0x938] sm:$0xff]  ;;  %4511 = vmatpush.msra.mxu3 %v5819_v8 }
 0x239   :  { %5532 = vmatmul.msk.f32.gmra.mxu0 %vm74_vm0, %v5504_v13  ;;  %5561 = vmatmul.msk.f32.vlgmr.msrb.gmra.mxu1 %vm74_vm0, %v5533_v12  ;;  %v5624_v13 = vld [vmem:[%s8800_s0 + $0x182] sm:$0xff] }
 0x23a   :  { %v8002_v19 = vadd.f32 %v2470_v37, %v2298_v16  ;;  %5605 = vmatmul.msk.f32.vlgmr.msrb.gmra.mxu2 %vm74_vm0, %v5577_v15  ;;  %v5775_v37 = vld [vmem:[%s8799_s1 + $0x870] sm:$0xff]  ;;  %4700 = vmatpush.msra.mxu0 %v5864_v6 }
 0x23b   :  { %5649 = vmatmul.msk.f32.vlgmr.msrb.gmra.mxu3 %vm74_vm0, %v5621_v17  ;;  %4321 = vmatpush.msra.mxu2 %v5775_v37  ;;  %v5731_v15 = vld [vmem:[%s8799_s1 + $0x810] sm:$0xff] }
 0x23c   :  { %4131 = vmatpush.msra.mxu1 %v5731_v15  ;;  %v5540_v15 = vld [vmem:[%s8800_s0 + $0x1c1] sm:$0xff] }
 0x23d   :  { %v2805_v26 = vpop.f32.mrf.mxu2  ;;  %4322 = vmatpush.msra.mxu2 %v5774_v50 }
 0x23e   :  { %v2853_v27 = vadd.f32 %v2805_v26, %v2663_v49  ;;  %v3187_v28 = vpop.f32.mrf.mxu0  ;;  %v2618_v31 = vpop.f32.mrf.mxu1  ;;  %v5581_v26 = vld [vmem:[%s8800_s0 + $0x231] sm:$0xff]  ;;  %4132 = vmatpush.msra.mxu1 %v5730_v55 }
 0x23f   :  { %v2996_v61 = vpop.f32.mrf.mxu3  ;;  %v2664_v34 = vadd.f32 %v2618_v31, %v7613_v44  ;;  %v5863_v31 = vld [vmem:[%s8799_s1 + $0x930] sm:$0xff]  ;;  %4323 = vmatpush.msra.mxu2 %v5773_v57  ;;  %v5630_v57 = vld [vmem:[%s8800_s0 + $0x3e2] sm:$0xff] }
 0x240   :  { %v3044_v35 = vadd.f32 %v2996_v61, %v2853_v27  ;;  %4701 = vmatpush.msra.mxu0 %v5863_v31  ;;  %v5672_v31 = vld [vmem:[%s8800_s0 + $0x90] sm:$0xff] }
 0x241   :  { %5693 = vmatmul.msk.f32.vlgmr.msrb.gmra.mxu0 %vm74_vm0, %v5665_v22  ;;  %5562 = vmatmul.msk.f32.gmra.mxu1 %vm74_vm0, %v5534_v7  ;;  %v5818_v7 = vld [vmem:[%s8799_s1 + $0x8c8] sm:$0xff]  ;;  %v5771_v55 = vld [vmem:[%s8799_s1 + $0x850] sm:$0xff] }
 0x242   :  { %v8033_v38 = vadd.f32 %v3187_v28, %v3044_v35  ;;  %5606 = vmatmul.msk.f32.gmra.mxu2 %vm74_vm0, %v5578_v33  ;;  %v5625_v28 = vld [vmem:[%s8800_s0 + $0x192] sm:$0xff]  ;;  %4512 = vmatpush.msra.mxu3 %v5818_v7 }
 0x243   :  { %5650 = vmatmul.msk.f32.gmra.mxu3 %vm74_vm0, %v5622_v36 }
 0x245   :  { %v2808_v39 = vpop.f32.mrf.mxu2 }
 0x246   :  { %v2854_v11 = vadd.f32 %v2808_v39, %v2664_v34  ;;  %v3190_v41 = vpop.f32.mrf.mxu0  ;;  %v2621_v47 = vpop.f32.mrf.mxu1  ;;  %v5669_v34 = vld [vmem:[%s8800_s0 + $0x60] sm:$0xff] }
 0x247   :  { %v2999_v44 = vpop.f32.mrf.mxu3  ;;  %v2665_v58 = vadd.f32 %v2621_v47, %v7641_v2 }
 0x248   :  { %v3045_v18 = vadd.f32 %v2999_v44, %v2854_v11  ;;  %v5538_v11 = vld [vmem:[%s8800_s0 + $0x1a1] sm:$0xff] }
 0x249   :  { %5694 = vmatmul.msk.f32.gmra.mxu0 %vm74_vm0, %v5666_v45  ;;  %5563 = vmatmul.msk.f32.gmra.mxu1 %vm74_vm0, %v5535_v42  ;;  %v5862_v42 = vld [vmem:[%s8799_s1 + $0x928] sm:$0xff] }
 0x24a   :  { %v8061_v1 = vadd.f32 %v3190_v41, %v3045_v18  ;;  %5607 = vmatmul.msk.f32.gmra.mxu2 %vm74_vm0, %v5579_v48  ;;  %v5582_v41 = vld [vmem:[%s8800_s0 + $0x241] sm:$0xff]  ;;  %4702 = vmatpush.msra.mxu0 %v5862_v42  ;;  %v5727_v42 = vld [vmem:[%s8799_s1 + $0x7f0] sm:$0xff] }
 0x24b   :  { %5651 = vmatmul.msk.f32.gmra.mxu3 %vm74_vm0, %v5623_v56  ;;  %v5670_v56 = vld [vmem:[%s8800_s0 + $0x70] sm:$0xff] }
 0x24d   :  { %v2811_v52 = vpop.f32.mrf.mxu2 }
 0x24e   :  { %v2855_v59 = vadd.f32 %v2811_v52, %v2665_v58  ;;  %v3193_v29 = vpop.f32.mrf.mxu0  ;;  %v2624_v3 = vpop.f32.mrf.mxu1  ;;  %v5539_v52 = vld [vmem:[%s8800_s0 + $0x1b1] sm:$0xff] }
 0x24f   :  { %v3002_v62 = vpop.f32.mrf.mxu3  ;;  %v2666_v12 = vadd.f32 %v2624_v3, %v7666_v23  ;;  %v5537_v23 = vld [vmem:[%s8800_s0 + $0x191] sm:$0xff] }
 0x250   :  { %v3046_v2 = vadd.f32 %v3002_v62, %v2855_v59  ;;  %v5583_v59 = vld [vmem:[%s8800_s0 + $0x251] sm:$0xff] }
 0x251   :  { %5695 = vmatmul.msk.f32.gmra.mxu0 %vm74_vm0, %v5667_v63  ;;  %5564 = vmatmul.msk.f32.gmra.mxu1 %vm74_vm0, %v5536_v4  ;;  %v5817_v63 = vld [vmem:[%s8799_s1 + $0x8c0] sm:$0xff]  ;;  %v5627_v3 = vld [vmem:[%s8800_s0 + $0x1b2] sm:$0xff] }
 0x252   :  { %v8089_v40 = vadd.f32 %v3193_v29, %v3046_v2  ;;  %5608 = vmatmul.msk.f32.gmra.mxu2 %vm74_vm0, %v5580_v5  ;;  %4513 = vmatpush.msra.mxu3 %v5817_v63  ;;  %v5729_v4 = vld [vmem:[%s8799_s1 + $0x800] sm:$0xff] }
 0x253   :  { %5652 = vmatmul.msk.f32.gmra.mxu3 %vm74_vm0, %v5624_v13  ;;  %4133 = vmatpush.msra.mxu1 %v5729_v4  ;;  %v5671_v13 = vld [vmem:[%s8800_s0 + $0x80] sm:$0xff]  ;;  %v5770_v4 = vld [vmem:[%s8799_s1 + $0x848] sm:$0xff] }
 0x255   :  { %v2814_v16 = vpop.f32.mrf.mxu2 }
 0x256   :  { %v2856_v17 = vadd.f32 %v2814_v16, %v2666_v12  ;;  %v3196_v43 = vpop.f32.mrf.mxu0  ;;  %v2627_v49 = vpop.f32.mrf.mxu1  ;;  %v5584_v16 = vld [vmem:[%s8800_s0 + $0x261] sm:$0xff] }
 0x257   :  { %v3005_v0 = vpop.f32.mrf.mxu3  ;;  %v2667_v61 = vadd.f32 %v2627_v49, %v7697_v9 }
 0x258   :  { %v3047_v27 = vadd.f32 %v3005_v0, %v2856_v17  ;;  %v5861_v17 = vld [vmem:[%s8799_s1 + $0x920] sm:$0xff]  ;;  %v5816_v0 = vld [vmem:[%s8799_s1 + $0x8b8] sm:$0xff] }
 0x259   :  { %5696 = vmatmul.msk.f32.gmra.mxu0 %vm74_vm0, %v5668_v24  ;;  %5565 = vmatmul.msk.f32.gmra.mxu1 %vm74_vm0, %v5537_v23  ;;  %v5628_v24 = vld [vmem:[%s8800_s0 + $0x1c2] sm:$0xff] }
 0x25a   :  { %v8114_v22 = vadd.f32 %v3196_v43, %v3047_v27  ;;  %5609 = vmatmul.msk.f32.gmra.mxu2 %vm74_vm0, %v5581_v26  ;;  %v5772_v43 = vld [vmem:[%s8799_s1 + $0x858] sm:$0xff]  ;;  %4703 = vmatpush.msra.mxu0 %v5861_v17 }
 0x25b   :  { %5653 = vmatmul.msk.f32.gmra.mxu3 %vm74_vm0, %v5625_v28  ;;  %4324 = vmatpush.msra.mxu2 %v5772_v43  ;;  %v5728_v26 = vld [vmem:[%s8799_s1 + $0x7f8] sm:$0xff] }
 0x25c   :  { %4514 = vmatpush.msra.mxu3 %v5816_v0  ;;  %4134 = vmatpush.msra.mxu1 %v5728_v26  ;;  %v5544_v26 = vld [vmem:[%s8800_s0 + $0x401] sm:$0xff] }
 0x25d   :  { %v2817_v33 = vpop.f32.mrf.mxu2  ;;  %4325 = vmatpush.msra.mxu2 %v5771_v55 }
 0x25e   :  { %v2857_v35 = vadd.f32 %v2817_v33, %v2667_v61  ;;  %v3199_v36 = vpop.f32.mrf.mxu0  ;;  %v2630_v39 = vpop.f32.mrf.mxu1  ;;  %v5585_v33 = vld [vmem:[%s8800_s0 + $0x471] sm:$0xff]  ;;  %4135 = vmatpush.msra.mxu1 %v5727_v42  ;;  %v5857_v42 = vld [vmem:[%s8799_s1 + $0x900] sm:$0xff] }
 0x25f   :  { %v3008_v9 = vpop.f32.mrf.mxu3  ;;  %v2668_v44 = vadd.f32 %v2630_v39, %v7725_v53  ;;  %v5860_v39 = vld [vmem:[%s8799_s1 + $0x918] sm:$0xff]  ;;  %4326 = vmatpush.msra.mxu2 %v5770_v4 }
 0x260   :  { %v3048_v45 = vadd.f32 %v3008_v9, %v2857_v35  ;;  %4704 = vmatpush.msra.mxu0 %v5860_v39  ;;  %v5676_v39 = vld [vmem:[%s8800_s0 + $0x2d0] sm:$0xff] }
 0x261   :  { %5697 = vmatmul.msk.f32.gmra.mxu0 %vm74_vm0, %v5669_v34  ;;  %5566 = vmatmul.msk.f32.gmra.mxu1 %vm74_vm0, %v5538_v11  ;;  %v5815_v11 = vld [vmem:[%s8799_s1 + $0x8b0] sm:$0xff] }
 0x262   :  { %v8145_v47 = vadd.f32 %v3199_v36, %v3048_v45  ;;  %5610 = vmatmul.msk.f32.gmra.mxu2 %vm74_vm0, %v5582_v41  ;;  %v5629_v36 = vld [vmem:[%s8800_s0 + $0x3d2] sm:$0xff]  ;;  %4515 = vmatpush.msra.mxu3 %v5815_v11 }
 0x263   :  { %5654 = vmatmul.msk.f32.gmra.mxu3 %vm74_vm0, %v5626_v46 }
 0x265   :  { %v2820_v48 = vpop.f32.mrf.mxu2 }
 0x266   :  { %v2858_v18 = vadd.f32 %v2820_v48, %v2668_v44  ;;  %v3202_v51 = vpop.f32.mrf.mxu0  ;;  %v2633_v58 = vpop.f32.mrf.mxu1  ;;  %v5673_v44 = vld [vmem:[%s8800_s0 + $0x2a0] sm:$0xff] }
 0x267   :  { %v3011_v53 = vpop.f32.mrf.mxu3  ;;  %v2669_v5 = vadd.f32 %v2633_v58, %v7753_v14 }
 0x268   :  { %v3049_v29 = vadd.f32 %v3011_v53, %v2858_v18  ;;  %v5542_v18 = vld [vmem:[%s8800_s0 + $0x3e1] sm:$0xff] }
 0x269   :  { %5698 = vmatmul.msk.f32.gmra.mxu0 %vm74_vm0, %v5670_v56  ;;  %5567 = vmatmul.msk.f32.gmra.mxu1 %vm74_vm0, %v5539_v52  ;;  %v5859_v52 = vld [vmem:[%s8799_s1 + $0x910] sm:$0xff] }
 0x26a   :  { %v8173_v62 = vadd.f32 %v3202_v51, %v3049_v29  ;;  %5611 = vmatmul.msk.f32.gmra.mxu2 %vm74_vm0, %v5583_v59  ;;  %v5586_v51 = vld [vmem:[%s8800_s0 + $0x481] sm:$0xff]  ;;  %4705 = vmatpush.msra.mxu0 %v5859_v52 }
 0x26b   :  { %5655 = vmatmul.msk.f32.gmra.mxu3 %vm74_vm0, %v5627_v3  ;;  %v5674_v3 = vld [vmem:[%s8800_s0 + $0x2b0] sm:$0xff]  ;;  %v5546_v52 = vld [vmem:[%s8800_s0 + $0x421] sm:$0xff] }
 0x26d   :  { %v2823_v2 = vpop.f32.mrf.mxu2 }
 0x26e   :  { %v2859_v6 = vadd.f32 %v2823_v2, %v2669_v5  ;;  %v3205_v37 = vpop.f32.mrf.mxu0  ;;  %v2636_v8 = vpop.f32.mrf.mxu1  ;;  %v5543_v2 = vld [vmem:[%s8800_s0 + $0x3f1] sm:$0xff] }
 0x26f   :  { %v3014_v12 = vpop.f32.mrf.mxu3  ;;  %v2670_v23 = vadd.f32 %v2636_v8, %v7778_v20  ;;  %v5541_v20 = vld [vmem:[%s8800_s0 + $0x3d1] sm:$0xff] }
 0x270   :  { %v3050_v14 = vadd.f32 %v3014_v12, %v2859_v6  ;;  %v5587_v6 = vld [vmem:[%s8800_s0 + $0x491] sm:$0xff] }
 0x271   :  { %5699 = vmatmul.msk.f32.gmra.mxu0 %vm74_vm0, %v5671_v13  ;;  %5568 = vmatmul.msk.f32.gmra.mxu1 %vm74_vm0, %v5540_v15  ;;  %v5814_v13 = vld [vmem:[%s8799_s1 + $0x8a8] sm:$0xff]  ;;  %v5631_v8 = vld [vmem:[%s8800_s0 + $0x3f2] sm:$0xff] }
 0x272   :  { %v8201_v49 = vadd.f32 %v3205_v37, %v3050_v14  ;;  %5612 = vmatmul.msk.f32.gmra.mxu2 %vm74_vm0, %v5584_v16  ;;  %4516 = vmatpush.msra.mxu3 %v5814_v13  ;;  %v5726_v15 = vld [vmem:[%s8799_s1 + $0x7e8] sm:$0xff]  ;;  %v5547_v13 = vld [vmem:[%s8800_s0 + $0x431] sm:$0xff] }
 0x273   :  { %5656 = vmatmul.msk.f32.gmra.mxu3 %vm74_vm0, %v5628_v24  ;;  %4136 = vmatpush.msra.mxu1 %v5726_v15  ;;  %v5675_v24 = vld [vmem:[%s8800_s0 + $0x2c0] sm:$0xff]  ;;  %v5635_v15 = vld [vmem:[%s8800_s0 + $0x432] sm:$0xff] }
 0x275   :  { %v2826_v27 = vpop.f32.mrf.mxu2 }
 0x276   :  { %v2860_v28 = vadd.f32 %v2826_v27, %v2670_v23  ;;  %v3208_v50 = vpop.f32.mrf.mxu0  ;;  %v2639_v61 = vpop.f32.mrf.mxu1  ;;  %v5588_v27 = vld [vmem:[%s8800_s0 + $0x4a1] sm:$0xff] }
 0x277   :  { %v3017_v7 = vpop.f32.mrf.mxu3  ;;  %v2671_v9 = vadd.f32 %v2639_v61, %v7809_v21 }
 0x278   :  { %v3051_v35 = vadd.f32 %v3017_v7, %v2860_v28  ;;  %v5858_v28 = vld [vmem:[%s8799_s1 + $0x908] sm:$0xff]  ;;  %v5813_v7 = vld [vmem:[%s8799_s1 + $0x8a0] sm:$0xff] }
 0x279   :  { %5700 = vmatmul.msk.f32.gmra.mxu0 %vm74_vm0, %v5672_v31  ;;  %5569 = vmatmul.msk.f32.gmra.mxu1 %vm74_vm0, %v5541_v20  ;;  %v5632_v31 = vld [vmem:[%s8800_s0 + $0x402] sm:$0xff] }
 0x27a   :  { %v8226_v34 = vadd.f32 %v3208_v50, %v3051_v35  ;;  %5613 = vmatmul.msk.f32.gmra.mxu2 %vm74_vm0, %v5585_v33  ;;  %v5769_v50 = vld [vmem:[%s8799_s1 + $0x840] sm:$0xff]  ;;  %4706 = vmatpush.msra.mxu0 %v5858_v28 }
 0x27b   :  { %5657 = vmatmul.msk.f32.gmra.mxu3 %vm74_vm0, %v5629_v36  ;;  %4327 = vmatpush.msra.mxu2 %v5769_v50  ;;  %v5725_v33 = vld [vmem:[%s8799_s1 + $0x7e0] sm:$0xff] }
 0x27c   :  { %4517 = vmatpush.msra.mxu3 %v5813_v7  ;;  %4137 = vmatpush.msra.mxu1 %v5725_v33  ;;  %v5636_v28 = vld [vmem:[%s8800_s0 + $0x442] sm:$0xff] }
 0x27d   :  { %v2829_v41 = vpop.f32.mrf.mxu2  ;;  %4707 = vmatpush.msra.mxu0 %v5857_v42 }
 0x27e   :  { %v2861_v45 = vadd.f32 %v2829_v41, %v2671_v9  ;;  %v3211_v46 = vpop.f32.mrf.mxu0  ;;  %v2642_v48 = vpop.f32.mrf.mxu1  ;;  %v5589_v41 = vld [vmem:[%s8800_s0 + $0x4b1] sm:$0xff] }
 0x27f   :  { %v3020_v21 = vpop.f32.mrf.mxu3  ;;  %v2672_v53 = vadd.f32 %v2642_v48, %v7837_v54 }
 0x280   :  { %v3052_v56 = vadd.f32 %v3020_v21, %v2861_v45 }
 0x281   :  { %5701 = vmatmul.msk.f32.gmra.mxu0 %vm74_vm0, %v5673_v44  ;;  %5570 = vmatmul.msk.f32.gmra.mxu1 %vm74_vm0, %v5542_v18 }
 0x282   :  { %v8257_v58 = vadd.f32 %v3211_v46, %v3052_v56  ;;  %5614 = vmatmul.msk.f32.gmra.mxu2 %vm74_vm0, %v5586_v51  ;;  %v5633_v46 = vld [vmem:[%s8800_s0 + $0x412] sm:$0xff]  ;;  %v5677_v56 = vld [vmem:[%s8800_s0 + $0x2e0] sm:$0xff] }
 0x283   :  { %5658 = vmatmul.msk.f32.gmra.mxu3 %vm74_vm0, %v5630_v57 }
 0x285   :  { %v2832_v59 = vpop.f32.mrf.mxu2 }
 0x286   :  { %v2862_v29 = vadd.f32 %v2832_v59, %v2672_v53  ;;  %v3214_v63 = vpop.f32.mrf.mxu0  ;;  %v2645_v5 = vpop.f32.mrf.mxu1  ;;  %v5590_v59 = vld [vmem:[%s8800_s0 + $0x4c1] sm:$0xff] }
 0x287   :  { %v3023_v54 = vpop.f32.mrf.mxu3  ;;  %v2673_v16 = vadd.f32 %v2645_v5, %v7865_v25 }
 0x288   :  { %v3053_v37 = vadd.f32 %v3023_v54, %v2862_v29  ;;  %v5634_v29 = vld [vmem:[%s8800_s0 + $0x422] sm:$0xff] }
 0x289   :  { %5702 = vmatmul.msk.f32.gmra.mxu0 %vm74_vm0, %v5674_v3  ;;  %5571 = vmatmul.msk.f32.gmra.mxu1 %vm74_vm0, %v5543_v2  ;;  %v5678_v2 = vld [vmem:[%s8800_s0 + $0x2f0] sm:$0xff] }
 0x28a   :  { %v8285_v12 = vadd.f32 %v3214_v63, %v3053_v37  ;;  %5615 = vmatmul.msk.f32.gmra.mxu2 %vm74_vm0, %v5587_v6 }
 0x28b   :  { %5659 = vmatmul.msk.f32.gmra.mxu3 %vm74_vm0, %v5631_v8  ;;  %v5591_v8 = vld [vmem:[%s8800_s0 + $0x4d1] sm:$0xff] }
 0x28d   :  { %v2835_v14 = vpop.f32.mrf.mxu2 }
 0x28e   :  { %v2863_v17 = vadd.f32 %v2835_v14, %v2673_v16  ;;  %v3217_v43 = vpop.f32.mrf.mxu0  ;;  %v2648_v0 = vpop.f32.mrf.mxu1 }
 0x28f   :  { %v3026_v23 = vpop.f32.mrf.mxu3  ;;  %v2674_v20 = vadd.f32 %v2648_v0, %v7890_v10  ;;  %v5545_v10 = vld [vmem:[%s8800_s0 + $0x411] sm:$0xff]  ;;  %v5679_v0 = vld [vmem:[%s8800_s0 + $0x300] sm:$0xff] }
 0x290   :  { %v3054_v25 = vadd.f32 %v3026_v23, %v2863_v17 }
 0x291   :  { %5703 = vmatmul.msk.f32.gmra.mxu0 %vm74_vm0, %v5675_v24  ;;  %5572 = vmatmul.msk.f32.gmra.mxu1 %vm74_vm0, %v5544_v26 }
 0x292   :  { %v8313_v61 = vadd.f32 %v3217_v43, %v3054_v25  ;;  %5616 = vmatmul.msk.f32.gmra.mxu2 %vm74_vm0, %v5588_v27  ;;  %v5548_v27 = vld [vmem:[%s8800_s0 + $0x441] sm:$0xff] }
 0x293   :  { %5660 = vmatmul.msk.f32.gmra.mxu3 %vm74_vm0, %v5632_v31  ;;  %v5592_v25 = vld [vmem:[%s8800_s0 + $0x4e1] sm:$0xff] }
 0x295   :  { %v2838_v35 = vpop.f32.mrf.mxu2 }
 0x296   :  { %v2864_v36 = vadd.f32 %v2838_v35, %v2674_v20  ;;  %v3220_v55 = vpop.f32.mrf.mxu0  ;;  %v2651_v9 = vpop.f32.mrf.mxu1  ;;  %v5680_v35 = vld [vmem:[%s8800_s0 + $0x310] sm:$0xff] }
 0x297   :  { %v3029_v11 = vpop.f32.mrf.mxu3  ;;  %v2675_v48 = vadd.f32 %v2651_v9, %v7921_v30  ;;  %v5753_v9 = vld [vmem:[%s8800_s0 + $0x21] sm:$0xff] }
 0x298   :  { %v3055_v45 = vadd.f32 %v3029_v11, %v2864_v36  ;;  %v5797_v11 = vld [vmem:[%s8800_s0 + $0xc1] sm:$0xff] }
 0x299   :  { %5704 = vmatmul.msk.f32.gmra.mxu0 %vm74_vm0, %v5676_v39  ;;  %5573 = vmatmul.msk.f32.gmra.mxu1 %vm74_vm0, %v5545_v10  ;;  %v5709_v39 = vld [vmem:[%s8800_s0 + $0xc0] sm:$0xff] }
 0x29a   :  { %v8338_v44 = vadd.f32 %v3220_v55, %v3055_v45  ;;  %5617 = vmatmul.msk.f32.gmra.mxu2 %vm74_vm0, %v5589_v41 }
 0x29b   :  { %5661 = vmatmul.msk.f32.gmra.mxu3 %vm74_vm0, %v5633_v46 }
 0x29d   :  { %v2841_v21 = vpop.f32.mrf.mxu2 }
 0x29e   :  { %v2865_v18 = vadd.f32 %v2841_v21, %v2675_v48  ;;  %v3223_v51 = vpop.f32.mrf.mxu0  ;;  %v2654_v57 = vpop.f32.mrf.mxu1  ;;  %v5841_v48 = vld [vmem:[%s8800_s0 + $0x22] sm:$0xff] }
 0x29f   :  { %v3032_v53 = vpop.f32.mrf.mxu3  ;;  %v2676_v3 = vadd.f32 %v2654_v57, %v7949_v60  ;;  %v5798_v57 = vld [vmem:[%s8800_s0 + $0xd1] sm:$0xff] }
 0x2a0   :  { %v3056_v30 = vadd.f32 %v3032_v53, %v2865_v18 }
 0x2a1   :  { %5705 = vmatmul.msk.f32.gmra.mxu0 %vm74_vm0, %v5677_v56  ;;  %5574 = vmatmul.msk.f32.gmra.mxu1 %vm74_vm0, %v5546_v52  ;;  %v5754_v56 = vld [vmem:[%s8800_s0 + $0x31] sm:$0xff] }
 0x2a2   :  { %v8360_v63 = vadd.f32 %v3223_v51, %v3056_v30  ;;  %5618 = vmatmul.msk.f32.gmra.mxu2 %vm74_vm0, %v5590_v59  ;;  %v5710_v51 = vld [vmem:[%s8800_s0 + $0xd0] sm:$0xff] }
 0x2a3   :  { %5662 = vmatmul.msk.f32.gmra.mxu3 %vm74_vm0, %v5634_v29 }
 0x2a5   :  { %v2844_v4 = vpop.f32.mrf.mxu2 }
 0x2a6   :  { %v2866_v5 = vadd.f32 %v2844_v4, %v2676_v3  ;;  %v3226_v54 = vpop.f32.mrf.mxu0  ;;  %v2657_v6 = vpop.f32.mrf.mxu1  ;;  %v5842_v3 = vld [vmem:[%s8800_s0 + $0x32] sm:$0xff] }
 0x2a7   :  { %v3035_v37 = vpop.f32.mrf.mxu3  ;;  %v2677_v14 = vadd.f32 %v2657_v6, %v7977_v32  ;;  %v5799_v6 = vld [vmem:[%s8800_s0 + $0xe1] sm:$0xff] }
 0x2a8   :  { %v3057_v60 = vadd.f32 %v3035_v37, %v2866_v5 }
 0x2a9   :  { %5706 = vmatmul.msk.f32.gmra.mxu0 %vm74_vm0, %v5678_v2  ;;  %5575 = vmatmul.msk.f32.gmra.mxu1 %vm74_vm0, %v5547_v13  ;;  %v5755_v2 = vld [vmem:[%s8800_s0 + $0x41] sm:$0xff] }
 0x2aa   :  { %v8379_v16 = vadd.f32 %v3226_v54, %v3057_v60  ;;  %5619 = vmatmul.msk.f32.gmra.mxu2 %vm74_vm0, %v5591_v8  ;;  %v5711_v54 = vld [vmem:[%s8800_s0 + $0xe0] sm:$0xff] }
 0x2ab   :  { %5663 = vmatmul.msk.f32.gmra.mxu3 %vm74_vm0, %v5635_v15 }
 0x2ad   :  { %v2847_v17 = vpop.f32.mrf.mxu2 }
 0x2ae   :  { %v2867_v43 = vadd.f32 %v2847_v17, %v2677_v14  ;;  %v3229_v24 = vpop.f32.mrf.mxu0  ;;  %v2660_v23 = vpop.f32.mrf.mxu1  ;;  %v5843_v14 = vld [vmem:[%s8800_s0 + $0x42] sm:$0xff] }
 0x2af   :  { %v3038_v26 = vpop.f32.mrf.mxu3  ;;  %v2678_v31 = vadd.f32 %v2660_v23, %v8002_v19  ;;  %v5800_v23 = vld [vmem:[%s8800_s0 + $0xf1] sm:$0xff] }
 0x2b0   :  { %v3058_v32 = vadd.f32 %v3038_v26, %v2867_v43 }
 0x2b1   :  { %5707 = vmatmul.msk.f32.gmra.mxu0 %vm74_vm0, %v5679_v0  ;;  %5576 = vmatmul.msk.f32.gmra.mxu1 %vm74_vm0, %v5548_v27  ;;  %v5756_v0 = vld [vmem:[%s8800_s0 + $0x51] sm:$0xff] }
 0x2b2   :  { %v8398_v50 = vadd.f32 %v3229_v24, %v3058_v32  ;;  %5620 = vmatmul.msk.f32.gmra.mxu2 %vm74_vm0, %v5592_v25  ;;  %v5712_v24 = vld [vmem:[%s8800_s0 + $0xf0] sm:$0xff] }
 0x2b3   :  { %5664 = vmatmul.msk.f32.gmra.mxu3 %vm74_vm0, %v5636_v28 }
 0x2b5   :  { %v2850_v7 = vpop.f32.mrf.mxu2 }
 0x2b6   :  { %v2868_v20 = vadd.f32 %v2850_v7, %v2678_v31  ;;  %v3232_v33 = vpop.f32.mrf.mxu0  ;;  %v3377_v55 = vpop.f32.mrf.mxu1  ;;  %v5844_v31 = vld [vmem:[%s8800_s0 + $0x52] sm:$0xff] }
 0x2b7   :  { %v3041_v36 = vpop.f32.mrf.mxu3  ;;  %v3425_v41 = vadd.f32 %v3377_v55, %v8033_v38 }
 0x2b8   :  { %v3059_v19 = vadd.f32 %v3041_v36, %v2868_v20  ;;  %v5801_v36 = vld [vmem:[%s8800_s0 + $0x101] sm:$0xff] }
 0x2b9   :  { %5708 = vmatmul.msk.f32.gmra.mxu0 %vm74_vm0, %v5680_v35  ;;  %5737 = vmatmul.msk.f32.vlgmr.msra.gmra.mxu1 %vm74_vm0, %v5709_v39  ;;  %v5757_v35 = vld [vmem:[%s8800_s0 + $0x61] sm:$0xff] }
 0x2ba   :  { %v8417_v10 = vadd.f32 %v3232_v33, %v3059_v19  ;;  %5781 = vmatmul.msk.f32.vlgmr.msra.gmra.mxu2 %vm74_vm0, %v5753_v9  ;;  %v5713_v33 = vld [vmem:[%s8800_s0 + $0x100] sm:$0xff] }
 0x2bb   :  { %5825 = vmatmul.msk.f32.vlgmr.msra.gmra.mxu3 %vm74_vm0, %v5797_v11 }
 0x2bd   :  { %v3567_v45 = vpop.f32.mrf.mxu2 }
 0x2be   :  { %v3615_v46 = vadd.f32 %v3567_v45, %v3425_v41  ;;  %v3948_v42 = vpop.f32.mrf.mxu0  ;;  %v3380_v21 = vpop.f32.mrf.mxu1  ;;  %v5845_v41 = vld [vmem:[%s8800_s0 + $0x62] sm:$0xff] }
 0x2bf   :  { %v3757_v18 = vpop.f32.mrf.mxu3  ;;  %v3426_v52 = vadd.f32 %v3380_v21, %v8061_v1  ;;  %v5802_v21 = vld [vmem:[%s8800_s0 + $0x111] sm:$0xff] }
 0x2c0   :  { %v3805_v38 = vadd.f32 %v3757_v18, %v3615_v46 }
 0x2c1   :  { %5869 = vmatmul.msk.f32.vlgmr.msra.gmra.mxu0 %vm74_vm0, %v5841_v48  ;;  %5738 = vmatmul.msk.f32.gmra.mxu1 %vm74_vm0, %v5710_v51  ;;  %v5758_v48 = vld [vmem:[%s8800_s0 + $0x71] sm:$0xff] }
 0x2c2   :  { %v8436_v53 = vadd.f32 %v3948_v42, %v3805_v38  ;;  %5782 = vmatmul.msk.f32.gmra.mxu2 %vm74_vm0, %v5754_v56  ;;  %v5714_v42 = vld [vmem:[%s8800_s0 + $0x110] sm:$0xff] }
 0x2c3   :  { %5826 = vmatmul.msk.f32.gmra.mxu3 %vm74_vm0, %v5798_v57 }
 0x2c5   :  { %v3570_v59 = vpop.f32.mrf.mxu2 }
 0x2c6   :  { %v3616_v30 = vadd.f32 %v3570_v59, %v3426_v52  ;;  %v3951_v29 = vpop.f32.mrf.mxu0  ;;  %v3383_v4 = vpop.f32.mrf.mxu1  ;;  %v5846_v52 = vld [vmem:[%s8800_s0 + $0x72] sm:$0xff] }
 0x2c7   :  { %v3760_v5 = vpop.f32.mrf.mxu3  ;;  %v3427_v13 = vadd.f32 %v3383_v4, %v8089_v40  ;;  %v5803_v4 = vld [vmem:[%s8800_s0 + $0x121] sm:$0xff] }
 0x2c8   :  { %v3806_v1 = vadd.f32 %v3760_v5, %v3616_v30 }
 0x2c9   :  { %5870 = vmatmul.msk.f32.gmra.mxu0 %vm74_vm0, %v5842_v3  ;;  %5739 = vmatmul.msk.f32.gmra.mxu1 %vm74_vm0, %v5711_v54  ;;  %v5759_v3 = vld [vmem:[%s8800_s0 + $0x81] sm:$0xff] }
 0x2ca   :  { %v8455_v37 = vadd.f32 %v3951_v29, %v3806_v1  ;;  %5783 = vmatmul.msk.f32.gmra.mxu2 %vm74_vm0, %v5755_v2  ;;  %v5715_v29 = vld [vmem:[%s8800_s0 + $0x120] sm:$0xff] }
 0x2cb   :  { %5827 = vmatmul.msk.f32.gmra.mxu3 %vm74_vm0, %v5799_v6 }
 0x2cd   :  { %v3573_v8 = vpop.f32.mrf.mxu2 }
 0x2ce   :  { %v3617_v60 = vadd.f32 %v3573_v8, %v3427_v13  ;;  %v3954_v15 = vpop.f32.mrf.mxu0  ;;  %v3386_v17 = vpop.f32.mrf.mxu1  ;;  %v5847_v13 = vld [vmem:[%s8800_s0 + $0x82] sm:$0xff] }
 0x2cf   :  { %v3763_v43 = vpop.f32.mrf.mxu3  ;;  %v3428_v27 = vadd.f32 %v3386_v17, %v8114_v22  ;;  %v5804_v17 = vld [vmem:[%s8800_s0 + $0x131] sm:$0xff] }
 0x2d0   :  { %v3807_v40 = vadd.f32 %v3763_v43, %v3617_v60 }
 0x2d1   :  { %5871 = vmatmul.msk.f32.gmra.mxu0 %vm74_vm0, %v5843_v14  ;;  %5740 = vmatmul.msk.f32.gmra.mxu1 %vm74_vm0, %v5712_v24  ;;  %v5760_v14 = vld [vmem:[%s8800_s0 + $0x91] sm:$0xff] }
 0x2d2   :  { %v8474_v26 = vadd.f32 %v3954_v15, %v3807_v40  ;;  %5784 = vmatmul.msk.f32.gmra.mxu2 %vm74_vm0, %v5756_v0  ;;  %v5716_v15 = vld [vmem:[%s8800_s0 + $0x130] sm:$0xff] }
 0x2d3   :  { %5828 = vmatmul.msk.f32.gmra.mxu3 %vm74_vm0, %v5800_v23 }
 0x2d5   :  { %v3576_v25 = vpop.f32.mrf.mxu2 }
 0x2d6   :  { %v3618_v32 = vadd.f32 %v3576_v25, %v3428_v27  ;;  %v3957_v28 = vpop.f32.mrf.mxu0  ;;  %v3389_v7 = vpop.f32.mrf.mxu1  ;;  %v5848_v27 = vld [vmem:[%s8800_s0 + $0x92] sm:$0xff] }
 0x2d7   :  { %v3766_v20 = vpop.f32.mrf.mxu3  ;;  %v3429_v39 = vadd.f32 %v3389_v7, %v8145_v47 }
 0x2d8   :  { %v3808_v22 = vadd.f32 %v3766_v20, %v3618_v32  ;;  %v5805_v20 = vld [vmem:[%s8800_s0 + $0x341] sm:$0xff] }
 0x2d9   :  { %5872 = vmatmul.msk.f32.gmra.mxu0 %vm74_vm0, %v5844_v31  ;;  %5741 = vmatmul.msk.f32.gmra.mxu1 %vm74_vm0, %v5713_v33  ;;  %v5761_v31 = vld [vmem:[%s8800_s0 + $0x2a1] sm:$0xff] }
 0x2da   :  { %v8493_v55 = vadd.f32 %v3957_v28, %v3808_v22  ;;  %5785 = vmatmul.msk.f32.gmra.mxu2 %vm74_vm0, %v5757_v35  ;;  %v5717_v28 = vld [vmem:[%s8800_s0 + $0x340] sm:$0xff] }
 0x2db   :  { %5829 = vmatmul.msk.f32.gmra.mxu3 %vm74_vm0, %v5801_v36 }
 0x2dd   :  { %v3579_v9 = vpop.f32.mrf.mxu2 }
 0x2de   :  { %v3619_v19 = vadd.f32 %v3579_v9, %v3429_v39  ;;  %v3960_v11 = vpop.f32.mrf.mxu0  ;;  %v3392_v45 = vpop.f32.mrf.mxu1 }
 0x2df   :  { %v3769_v46 = vpop.f32.mrf.mxu3  ;;  %v3430_v51 = vadd.f32 %v3392_v45, %v8173_v62 }
 0x2e0   :  { %v3809_v47 = vadd.f32 %v3769_v46, %v3619_v19  ;;  %v5718_v19 = vld [vmem:[%s8800_s0 + $0x350] sm:$0xff] }
 0x2e1   :  { %5873 = vmatmul.msk.f32.gmra.mxu0 %vm74_vm0, %v5845_v41  ;;  %5742 = vmatmul.msk.f32.gmra.mxu1 %vm74_vm0, %v5714_v42  ;;  %v5806_v46 = vld [vmem:[%s8800_s0 + $0x351] sm:$0xff] }
 0x2e2   :  { %v8512_v18 = vadd.f32 %v3960_v11, %v3809_v47  ;;  %5786 = vmatmul.msk.f32.gmra.mxu2 %vm74_vm0, %v5758_v48  ;;  %v5762_v11 = vld [vmem:[%s8800_s0 + $0x2b1] sm:$0xff] }
 0x2e3   :  { %5830 = vmatmul.msk.f32.gmra.mxu3 %vm74_vm0, %v5802_v21 }
 0x2e5   :  { %v3582_v56 = vpop.f32.mrf.mxu2 }
 0x2e6   :  { %v3620_v38 = vadd.f32 %v3582_v56, %v3430_v51  ;;  %v3963_v57 = vpop.f32.mrf.mxu0  ;;  %v3395_v59 = vpop.f32.mrf.mxu1 }
 0x2e7   :  { %v3772_v30 = vpop.f32.mrf.mxu3  ;;  %v3431_v54 = vadd.f32 %v3395_v59, %v8201_v49 }
 0x2e8   :  { %v3810_v62 = vadd.f32 %v3772_v30, %v3620_v38  ;;  %v5719_v38 = vld [vmem:[%s8800_s0 + $0x360] sm:$0xff] }
 0x2e9   :  { %5874 = vmatmul.msk.f32.gmra.mxu0 %vm74_vm0, %v5846_v52  ;;  %5743 = vmatmul.msk.f32.gmra.mxu1 %vm74_vm0, %v5715_v29  ;;  %v5807_v30 = vld [vmem:[%s8800_s0 + $0x361] sm:$0xff] }
 0x2ea   :  { %v8531_v5 = vadd.f32 %v3963_v57, %v3810_v62  ;;  %5787 = vmatmul.msk.f32.gmra.mxu2 %vm74_vm0, %v5759_v3  ;;  %v5763_v57 = vld [vmem:[%s8800_s0 + $0x2c1] sm:$0xff] }
 0x2eb   :  { %5831 = vmatmul.msk.f32.gmra.mxu3 %vm74_vm0, %v5803_v4 }
 0x2ed   :  { %v3585_v2 = vpop.f32.mrf.mxu2 }
 0x2ee   :  { %v3621_v1 = vadd.f32 %v3585_v2, %v3431_v54  ;;  %v3966_v6 = vpop.f32.mrf.mxu0  ;;  %v3398_v8 = vpop.f32.mrf.mxu1 }
 0x2ef   :  { %v3775_v60 = vpop.f32.mrf.mxu3  ;;  %v3432_v24 = vadd.f32 %v3398_v8, %v8226_v34 }
 0x2f0   :  { %v3811_v49 = vadd.f32 %v3775_v60, %v3621_v1  ;;  %v5720_v1 = vld [vmem:[%s8800_s0 + $0x370] sm:$0xff] }
 0x2f1   :  { %5875 = vmatmul.msk.f32.gmra.mxu0 %vm74_vm0, %v5847_v13  ;;  %5744 = vmatmul.msk.f32.gmra.mxu1 %vm74_vm0, %v5716_v15  ;;  %v5808_v60 = vld [vmem:[%s8800_s0 + $0x371] sm:$0xff] }
 0x2f2   :  { %v8550_v43 = vadd.f32 %v3966_v6, %v3811_v49  ;;  %5788 = vmatmul.msk.f32.gmra.mxu2 %vm74_vm0, %v5760_v14  ;;  %v5764_v6 = vld [vmem:[%s8800_s0 + $0x2d1] sm:$0xff] }
 0x2f3   :  { %5832 = vmatmul.msk.f32.gmra.mxu3 %vm74_vm0, %v5804_v17 }
 0x2f5   :  { %v3588_v0 = vpop.f32.mrf.mxu2 }
 0x2f6   :  { %v3622_v40 = vadd.f32 %v3588_v0, %v3432_v24  ;;  %v3969_v23 = vpop.f32.mrf.mxu0  ;;  %v3401_v25 = vpop.f32.mrf.mxu1 }
 0x2f7   :  { %v3778_v32 = vpop.f32.mrf.mxu3  ;;  %v3433_v34 = vadd.f32 %v3401_v25, %v8257_v58  ;;  %v5849_v58 = vld [vmem:[%s8800_s0 + $0x2a2] sm:$0xff] }
 0x2f8   :  { %v3812_v7 = vadd.f32 %v3778_v32, %v3622_v40  ;;  %v5721_v40 = vld [vmem:[%s8800_s0 + $0x380] sm:$0xff] }
 0x2f9   :  { %5876 = vmatmul.msk.f32.gmra.mxu0 %vm74_vm0, %v5848_v27  ;;  %5745 = vmatmul.msk.f32.gmra.mxu1 %vm74_vm0, %v5717_v28  ;;  %v5809_v32 = vld [vmem:[%s8800_s0 + $0x381] sm:$0xff] }
 0x2fa   :  { %v8570_v33 = vadd.f32 %v3969_v23, %v3812_v7  ;;  %5789 = vmatmul.msk.f32.gmra.mxu2 %vm74_vm0, %v5761_v31  ;;  %v5765_v23 = vld [vmem:[%s8800_s0 + $0x2e1] sm:$0xff] }
 0x2fb   :  { %5833 = vmatmul.msk.f32.gmra.mxu3 %vm74_vm0, %v5805_v20 }
 0x2fd   :  { %v3591_v35 = vpop.f32.mrf.mxu2 }
 0x2fe   :  { %v3623_v22 = vadd.f32 %v3591_v35, %v3433_v34  ;;  %v3972_v36 = vpop.f32.mrf.mxu0  ;;  %v3404_v39 = vpop.f32.mrf.mxu1 }
 0x2ff   :  { %v3781_v9 = vpop.f32.mrf.mxu3  ;;  %v3434_v41 = vadd.f32 %v3404_v39, %v8285_v12  ;;  %v5850_v12 = vld [vmem:[%s8800_s0 + $0x2b2] sm:$0xff] }
 0x300   :  { %v3813_v45 = vadd.f32 %v3781_v9, %v3623_v22  ;;  %v5722_v22 = vld [vmem:[%s8800_s0 + $0x390] sm:$0xff] }
 0x301   :  { %5877 = vmatmul.msk.f32.gmra.mxu0 %vm74_vm0, %v5849_v58  ;;  %5746 = vmatmul.msk.f32.gmra.mxu1 %vm74_vm0, %v5718_v19  ;;  %v5810_v9 = vld [vmem:[%s8800_s0 + $0x391] sm:$0xff] }
 0x302   :  { %v8589_v42 = vadd.f32 %v3972_v36, %v3813_v45  ;;  %5790 = vmatmul.msk.f32.gmra.mxu2 %vm74_vm0, %v5762_v11  ;;  %v5766_v36 = vld [vmem:[%s8800_s0 + $0x2f1] sm:$0xff] }
 0x303   :  { %5834 = vmatmul.msk.f32.gmra.mxu3 %vm74_vm0, %v5806_v46 }
 0x305   :  { %v3594_v48 = vpop.f32.mrf.mxu2 }
 0x306   :  { %v3624_v47 = vadd.f32 %v3594_v48, %v3434_v41  ;;  %v3975_v21 = vpop.f32.mrf.mxu0  ;;  %v3407_v51 = vpop.f32.mrf.mxu1 }
 0x307   :  { %v3784_v56 = vpop.f32.mrf.mxu3  ;;  %v3435_v52 = vadd.f32 %v3407_v51, %v8313_v61  ;;  %v5851_v61 = vld [vmem:[%s8800_s0 + $0x2c2] sm:$0xff] }
 0x308   :  { %v3814_v59 = vadd.f32 %v3784_v56, %v3624_v47  ;;  %v5723_v47 = vld [vmem:[%s8800_s0 + $0x3a0] sm:$0xff] }
 0x309   :  { %5878 = vmatmul.msk.f32.gmra.mxu0 %vm74_vm0, %v5850_v12  ;;  %5747 = vmatmul.msk.f32.gmra.mxu1 %vm74_vm0, %v5719_v38  ;;  %v5811_v56 = vld [vmem:[%s8800_s0 + $0x3a1] sm:$0xff] }
 0x30a   :  { %v8608_v29 = vadd.f32 %v3975_v21, %v3814_v59  ;;  %5791 = vmatmul.msk.f32.gmra.mxu2 %vm74_vm0, %v5763_v57  ;;  %v5767_v21 = vld [vmem:[%s8800_s0 + $0x301] sm:$0xff] }
 0x30b   :  { %5835 = vmatmul.msk.f32.gmra.mxu3 %vm74_vm0, %v5807_v30 }
 0x30d   :  { %v3597_v3 = vpop.f32.mrf.mxu2 }
 0x30e   :  { %v3625_v62 = vadd.f32 %v3597_v3, %v3435_v52  ;;  %v3978_v4 = vpop.f32.mrf.mxu0  ;;  %v3410_v54 = vpop.f32.mrf.mxu1 }
 0x30f   :  { %v3787_v2 = vpop.f32.mrf.mxu3  ;;  %v3436_v13 = vadd.f32 %v3410_v54, %v8338_v44  ;;  %v5852_v44 = vld [vmem:[%s8800_s0 + $0x2d2] sm:$0xff] }
 0x310   :  { %v3815_v8 = vadd.f32 %v3787_v2, %v3625_v62  ;;  %v5724_v62 = vld [vmem:[%s8800_s0 + $0x3b0] sm:$0xff] }
 0x311   :  { %5879 = vmatmul.msk.f32.gmra.mxu0 %vm74_vm0, %v5851_v61  ;;  %5748 = vmatmul.msk.f32.gmra.mxu1 %vm74_vm0, %v5720_v1  ;;  %v5812_v2 = vld [vmem:[%s8800_s0 + $0x3b1] sm:$0xff] }
 0x312   :  { %v8627_v15 = vadd.f32 %v3978_v4, %v3815_v8  ;;  %5792 = vmatmul.msk.f32.gmra.mxu2 %vm74_vm0, %v5764_v6  ;;  %v5768_v4 = vld [vmem:[%s8800_s0 + $0x311] sm:$0xff] }
 0x313   :  { %5836 = vmatmul.msk.f32.gmra.mxu3 %vm74_vm0, %v5808_v60 }
 0x315   :  { %v3600_v14 = vpop.f32.mrf.mxu2 }
 0x316   :  { %v3626_v49 = vadd.f32 %v3600_v14, %v3436_v13  ;;  %v3981_v17 = vpop.f32.mrf.mxu0  ;;  %v3413_v24 = vpop.f32.mrf.mxu1 }
 0x317   :  { %v3790_v0 = vpop.f32.mrf.mxu3  ;;  %v3437_v27 = vadd.f32 %v3413_v24, %v8360_v63  ;;  %v5853_v63 = vld [vmem:[%s8800_s0 + $0x2e2] sm:$0xff] }
 0x318   :  { %v3816_v25 = vadd.f32 %v3790_v0, %v3626_v49 }
 0x319   :  { %5880 = vmatmul.msk.f32.gmra.mxu0 %vm74_vm0, %v5852_v44  ;;  %5749 = vmatmul.msk.f32.gmra.mxu1 %vm74_vm0, %v5721_v40 }
 0x31a   :  { %v8646_v28 = vadd.f32 %v3981_v17, %v3816_v25  ;;  %5793 = vmatmul.msk.f32.gmra.mxu2 %vm74_vm0, %v5765_v23 }
 0x31b   :  { %5837 = vmatmul.msk.f32.gmra.mxu3 %vm74_vm0, %v5809_v32  ;;  %v8718_v32 = vld [vmem:[%s8801_s2] ss:$0 sm:$0xff] }
 0x31d   :  { %v3603_v31 = vpop.f32.mrf.mxu2 }
 0x31e   :  { %v3627_v34 = vadd.f32 %v3603_v31, %v3437_v27  ;;  %v3984_v7 = vpop.f32.mrf.mxu0  ;;  %v3416_v20 = vpop.f32.mrf.mxu1 }
 0x31f   :  { %v3793_v35 = vpop.f32.mrf.mxu3  ;;  %v3438_v58 = vadd.f32 %v3416_v20, %v8379_v16  ;;  %v5854_v16 = vld [vmem:[%s8800_s0 + $0x2f2] sm:$0xff] }
 0x320   :  { %v3817_v39 = vadd.f32 %v3793_v35, %v3627_v34 }
 0x321   :  { %5881 = vmatmul.msk.f32.gmra.mxu0 %vm74_vm0, %v5853_v63  ;;  %5750 = vmatmul.msk.f32.gmra.mxu1 %vm74_vm0, %v5722_v22 }
 0x322   :  { %v8665_v19 = vadd.f32 %v3984_v7, %v3817_v39  ;;  %5794 = vmatmul.msk.f32.gmra.mxu2 %vm74_vm0, %v5766_v36 }
 0x323   :  { %5838 = vmatmul.msk.f32.gmra.mxu3 %vm74_vm0, %v5810_v9 }
 0x325   :  { %v3606_v11 = vpop.f32.mrf.mxu2 }
 0x326   :  { %v3628_v41 = vadd.f32 %v3606_v11, %v3438_v58  ;;  %v3987_v45 = vpop.f32.mrf.mxu0  ;;  %v3419_v46 = vpop.f32.mrf.mxu1 }
 0x327   :  { %v3796_v48 = vpop.f32.mrf.mxu3  ;;  %v3439_v12 = vadd.f32 %v3419_v46, %v8398_v50  ;;  %v5855_v50 = vld [vmem:[%s8800_s0 + $0x302] sm:$0xff] }
 0x328   :  { %v3818_v51 = vadd.f32 %v3796_v48, %v3628_v41 }
 0x329   :  { %5882 = vmatmul.msk.f32.gmra.mxu0 %vm74_vm0, %v5854_v16  ;;  %5751 = vmatmul.msk.f32.gmra.mxu1 %vm74_vm0, %v5723_v47 }
 0x32a   :  { %v8684_v38 = vadd.f32 %v3987_v45, %v3818_v51  ;;  %5795 = vmatmul.msk.f32.gmra.mxu2 %vm74_vm0, %v5767_v21 }
 0x32b   :  { %5839 = vmatmul.msk.f32.gmra.mxu3 %vm74_vm0, %v5811_v56 }
 0x32d   :  { %v3609_v57 = vpop.f32.mrf.mxu2 }
 0x32e   :  { %v3629_v52 = vadd.f32 %v3609_v57, %v3439_v12  ;;  %v3990_v59 = vpop.f32.mrf.mxu0  ;;  %v3422_v30 = vpop.f32.mrf.mxu1 }
 0x32f   :  { %v3799_v3 = vpop.f32.mrf.mxu3  ;;  %v3440_v61 = vadd.f32 %v3422_v30, %v8417_v10  ;;  %v5856_v10 = vld [vmem:[%s8800_s0 + $0x312] sm:$0xff] }
 0x330   :  { %v3819_v54 = vadd.f32 %v3799_v3, %v3629_v52 }
 0x331   :  { %5883 = vmatmul.msk.f32.gmra.mxu0 %vm74_vm0, %v5855_v50  ;;  %5752 = vmatmul.msk.f32.gmra.mxu1 %vm74_vm0, %v5724_v62 }
 0x332   :  { %v8703_v1 = vadd.f32 %v3990_v59, %v3819_v54  ;;  %5796 = vmatmul.msk.f32.gmra.mxu2 %vm74_vm0, %v5768_v4 }
 0x333   :  { %5840 = vmatmul.msk.f32.gmra.mxu3 %vm74_vm0, %v5812_v2 }
 0x335   :  { %v3612_v6 = vpop.f32.mrf.mxu2 }
 0x336   :  { %v3630_v13 = vadd.f32 %v3612_v6, %v3440_v61  ;;  %v3993_v8 = vpop.f32.mrf.mxu0  ;;  %v4139_v14 = vpop.f32.mrf.mxu1 }
 0x337   :  { %v3802_v60 = vpop.f32.mrf.mxu3  ;;  %v4187_v44 = vadd.f32 %v4139_v14, %v8436_v53 }
 0x338   :  { %v3820_v49 = vadd.f32 %v3802_v60, %v3630_v13 }
 0x339   :  { %5884 = vmatmul.msk.f32.gmra.mxu0 %vm74_vm0, %v5856_v10 }
 0x33a   :  { %v8712_v17 = vadd.f32 %v3993_v8, %v3820_v49 }
 0x33d   :  { %v4329_v24 = vpop.f32.mrf.mxu2 }
 0x33e   :  { %v4377_v0 = vadd.f32 %v4329_v24, %v4187_v44  ;;  %v4709_v40 = vpop.f32.mrf.mxu0  ;;  %v4142_v23 = vpop.f32.mrf.mxu1 }
 0x33f   :  { %v4519_v27 = vpop.f32.mrf.mxu3  ;;  %v4188_v34 = vadd.f32 %v4142_v23, %v8455_v37 }
 0x340   :  { %v4567_v25 = vadd.f32 %v4519_v27, %v4377_v0 }
 0x342   :  { %v4757_v31 = vadd.f32 %v4709_v40, %v4567_v25 }
 0x344   :  { %v4809_v7 = vadd.f32 %v8718_v32, %v4757_v31 }
 0x345   :  { %v4332_v63 = vpop.f32.mrf.mxu2 }
 0x346   :  { %4825 = vst [vmem:[%s8802_s3] sm:$0xff] %v4809_v7  ;;  %v4378_v53 = vadd.f32 %v4332_v63, %v4188_v34  ;;  %v4712_v20 = vpop.f32.mrf.mxu0  ;;  %v4145_v35 = vpop.f32.mrf.mxu1 }
 0x347   :  { %v4522_v22 = vpop.f32.mrf.mxu3  ;;  %v4189_v39 = vadd.f32 %v4145_v35, %v8474_v26 }
 0x348   :  { %v4568_v36 = vadd.f32 %v4522_v22, %v4378_v53 }
 0x34a   :  { %v4758_v58 = vadd.f32 %v4712_v20, %v4568_v36 }
 0x34c   :  { %v4810_v9 = vadd.f32 %v8718_v32, %v4758_v58 }
 0x34d   :  { %v4335_v11 = vpop.f32.mrf.mxu2 }
 0x34e   :  { %4826 = vst [vmem:[%s8802_s3 + $0x8] sm:$0xff] %v4810_v9  ;;  %v4379_v37 = vadd.f32 %v4335_v11, %v4189_v39  ;;  %v4715_v41 = vpop.f32.mrf.mxu0  ;;  %v4148_v45 = vpop.f32.mrf.mxu1 }
 0x34f   :  { %v4525_v16 = vpop.f32.mrf.mxu3  ;;  %v4190_v47 = vadd.f32 %v4148_v45, %v8493_v55 }
 0x350   :  { %v4569_v46 = vadd.f32 %v4525_v16, %v4379_v37 }
 0x352   :  { %v4759_v48 = vadd.f32 %v4715_v41, %v4569_v46 }
 0x354   :  { %v4811_v21 = vadd.f32 %v8718_v32, %v4759_v48 }
 0x355   :  { %v4338_v12 = vpop.f32.mrf.mxu2 }
 0x356   :  { %4827 = vst [vmem:[%s8802_s3 + $0x10] sm:$0xff] %v4811_v21  ;;  %v4380_v26 = vadd.f32 %v4338_v12, %v4190_v47  ;;  %v4718_v51 = vpop.f32.mrf.mxu0  ;;  %v4151_v56 = vpop.f32.mrf.mxu1 }
 0x357   :  { %v4528_v57 = vpop.f32.mrf.mxu3  ;;  %v4191_v50 = vadd.f32 %v4151_v56, %v8512_v18 }
 0x358   :  { %v4570_v52 = vadd.f32 %v4528_v57, %v4380_v26 }
 0x35a   :  { %v4760_v59 = vadd.f32 %v4718_v51, %v4570_v52 }
 0x35c   :  { %v4812_v30 = vadd.f32 %v8718_v32, %v4760_v59 }
 0x35d   :  { %v4341_v3 = vpop.f32.mrf.mxu2 }
 0x35e   :  { %4828 = vst [vmem:[%s8802_s3 + $0x18] sm:$0xff] %v4812_v30  ;;  %v4381_v55 = vadd.f32 %v4341_v3, %v4191_v50  ;;  %v4721_v62 = vpop.f32.mrf.mxu0  ;;  %v4154_v4 = vpop.f32.mrf.mxu1 }
 0x35f   :  { %v4531_v61 = vpop.f32.mrf.mxu3  ;;  %v4192_v6 = vadd.f32 %v4154_v4, %v8531_v5 }
 0x360   :  { %v4571_v54 = vadd.f32 %v4531_v61, %v4381_v55 }
 0x362   :  { %v4761_v2 = vadd.f32 %v4721_v62, %v4571_v54 }
 0x364   :  { %v4813_v13 = vadd.f32 %v8718_v32, %v4761_v2 }
 0x365   :  { %v4344_v8 = vpop.f32.mrf.mxu2 }
 0x366   :  { %4829 = vst [vmem:[%s8802_s3 + $0x20] sm:$0xff] %v4813_v13  ;;  %v4382_v18 = vadd.f32 %v4344_v8, %v4192_v6  ;;  %v4724_v10 = vpop.f32.mrf.mxu0  ;;  %v4157_v60 = vpop.f32.mrf.mxu1 }
 0x367   :  { %v4534_v14 = vpop.f32.mrf.mxu3  ;;  %v4193_v24 = vadd.f32 %v4157_v60, %v8550_v43 }
 0x368   :  { %v4572_v49 = vadd.f32 %v4534_v14, %v4382_v18 }
 0x36a   :  { %v4762_v44 = vadd.f32 %v4724_v10, %v4572_v49 }
 0x36c   :  { %v4814_v0 = vadd.f32 %v8718_v32, %v4762_v44 }
 0x36d   :  { %v4347_v40 = vpop.f32.mrf.mxu2 }
 0x36e   :  { %4830 = vst [vmem:[%s8802_s3 + $0x28] sm:$0xff] %v4814_v0  ;;  %v4383_v5 = vadd.f32 %v4347_v40, %v4193_v24  ;;  %v4727_v23 = vpop.f32.mrf.mxu0  ;;  %v4160_v27 = vpop.f32.mrf.mxu1 }
 0x36f   :  { %v4537_v25 = vpop.f32.mrf.mxu3  ;;  %v4194_v7 = vadd.f32 %v4160_v27, %v8570_v33 }
 0x370   :  { %v4573_v31 = vadd.f32 %v4537_v25, %v4383_v5 }
 0x372   :  { %v4763_v34 = vadd.f32 %v4727_v23, %v4573_v31 }
 0x374   :  { %v4815_v63 = vadd.f32 %v8718_v32, %v4763_v34 }
 0x375   :  { %v4350_v53 = vpop.f32.mrf.mxu2 }
 0x376   :  { %4831 = vst [vmem:[%s8802_s3 + $0x30] sm:$0xff] %v4815_v63  ;;  %v4384_v43 = vadd.f32 %v4350_v53, %v4194_v7  ;;  %v4730_v20 = vpop.f32.mrf.mxu0  ;;  %v4163_v35 = vpop.f32.mrf.mxu1 }
 0x377   :  { %v4540_v22 = vpop.f32.mrf.mxu3  ;;  %v4195_v39 = vadd.f32 %v4163_v35, %v8589_v42 }
 0x378   :  { %v4574_v36 = vadd.f32 %v4540_v22, %v4384_v43 }
 0x37a   :  { %v4764_v58 = vadd.f32 %v4730_v20, %v4574_v36 }
 0x37c   :  { %v4816_v9 = vadd.f32 %v8718_v32, %v4764_v58 }
 0x37d   :  { %v4353_v11 = vpop.f32.mrf.mxu2 }
 0x37e   :  { %4832 = vst [vmem:[%s8802_s3 + $0x38] sm:$0xff] %v4816_v9  ;;  %v4385_v33 = vadd.f32 %v4353_v11, %v4195_v39  ;;  %v4733_v37 = vpop.f32.mrf.mxu0  ;;  %v4166_v41 = vpop.f32.mrf.mxu1 }
 0x37f   :  { %v4543_v45 = vpop.f32.mrf.mxu3  ;;  %v4196_v48 = vadd.f32 %v4166_v41, %v8608_v29 }
 0x380   :  { %v4575_v16 = vadd.f32 %v4543_v45, %v4385_v33 }
 0x382   :  { %v4765_v46 = vadd.f32 %v4733_v37, %v4575_v16 }
 0x384   :  { %v4817_v47 = vadd.f32 %v8718_v32, %v4765_v46 }
 0x385   :  { %v4356_v21 = vpop.f32.mrf.mxu2 }
 0x386   :  { %4833 = vst [vmem:[%s8802_s3 + $0x40] sm:$0xff] %v4817_v47  ;;  %v4386_v42 = vadd.f32 %v4356_v21, %v4196_v48  ;;  %v4736_v12 = vpop.f32.mrf.mxu0  ;;  %v4169_v26 = vpop.f32.mrf.mxu1 }
 0x387   :  { %v4546_v51 = vpop.f32.mrf.mxu3  ;;  %v4197_v52 = vadd.f32 %v4169_v26, %v8627_v15 }
 0x388   :  { %v4576_v56 = vadd.f32 %v4546_v51, %v4386_v42 }
 0x38a   :  { %v4766_v57 = vadd.f32 %v4736_v12, %v4576_v56 }
 0x38c   :  { %v4818_v59 = vadd.f32 %v8718_v32, %v4766_v57 }
 0x38d   :  { %v4359_v50 = vpop.f32.mrf.mxu2 }
 0x38e   :  { %4834 = vst [vmem:[%s8802_s3 + $0x48] sm:$0xff] %v4818_v59  ;;  %v4387_v29 = vadd.f32 %v4359_v50, %v4197_v52  ;;  %v4739_v30 = vpop.f32.mrf.mxu0  ;;  %v4172_v3 = vpop.f32.mrf.mxu1 }
 0x38f   :  { %v4549_v55 = vpop.f32.mrf.mxu3  ;;  %v4198_v61 = vadd.f32 %v4172_v3, %v8646_v28 }
 0x390   :  { %v4577_v62 = vadd.f32 %v4549_v55, %v4387_v29 }
 0x392   :  { %v4767_v4 = vadd.f32 %v4739_v30, %v4577_v62 }
 0x394   :  { %v4819_v54 = vadd.f32 %v8718_v32, %v4767_v4 }
 0x395   :  { %v4362_v2 = vpop.f32.mrf.mxu2 }
 0x396   :  { %4835 = vst [vmem:[%s8802_s3 + $0x50] sm:$0xff] %v4819_v54  ;;  %v4388_v15 = vadd.f32 %v4362_v2, %v4198_v61  ;;  %v4742_v6 = vpop.f32.mrf.mxu0  ;;  %v4175_v13 = vpop.f32.mrf.mxu1 }
 0x397   :  { %v4552_v8 = vpop.f32.mrf.mxu3  ;;  %v4199_v60 = vadd.f32 %v4175_v13, %v8665_v19 }
 0x398   :  { %v4578_v18 = vadd.f32 %v4552_v8, %v4388_v15 }
 0x39a   :  { %v4768_v10 = vadd.f32 %v4742_v6, %v4578_v18 }
 0x39c   :  { %v4820_v14 = vadd.f32 %v8718_v32, %v4768_v10 }
 0x39d   :  { %v4365_v49 = vpop.f32.mrf.mxu2 }
 0x39e   :  { %4836 = vst [vmem:[%s8802_s3 + $0x58] sm:$0xff] %v4820_v14  ;;  %v4389_v28 = vadd.f32 %v4365_v49, %v4199_v60  ;;  %v4745_v44 = vpop.f32.mrf.mxu0  ;;  %v4178_v24 = vpop.f32.mrf.mxu1 }
 0x39f   :  { %v4555_v0 = vpop.f32.mrf.mxu3  ;;  %v4200_v23 = vadd.f32 %v4178_v24, %v8684_v38 }
 0x3a0   :  { %v4579_v40 = vadd.f32 %v4555_v0, %v4389_v28 }
 0x3a2   :  { %v4769_v5 = vadd.f32 %v4745_v44, %v4579_v40 }
 0x3a4   :  { %v4821_v27 = vadd.f32 %v8718_v32, %v4769_v5 }
 0x3a5   :  { %v4368_v25 = vpop.f32.mrf.mxu2 }
 0x3a6   :  { %4837 = vst [vmem:[%s8802_s3 + $0x60] sm:$0xff] %v4821_v27  ;;  %v4390_v19 = vadd.f32 %v4368_v25, %v4200_v23  ;;  %v4748_v31 = vpop.f32.mrf.mxu0  ;;  %v4181_v34 = vpop.f32.mrf.mxu1 }
 0x3a7   :  { %v4558_v7 = vpop.f32.mrf.mxu3  ;;  %v4201_v43 = vadd.f32 %v4181_v34, %v8703_v1 }
 0x3a8   :  { %v4580_v63 = vadd.f32 %v4558_v7, %v4390_v19 }
 0x3aa   :  { %v4770_v53 = vadd.f32 %v4748_v31, %v4580_v63 }
 0x3ac   :  { %v4822_v20 = vadd.f32 %v8718_v32, %v4770_v53 }
 0x3ad   :  { %v4371_v35 = vpop.f32.mrf.mxu2 }
 0x3ae   :  { %4838 = vst [vmem:[%s8802_s3 + $0x68] sm:$0xff] %v4822_v20  ;;  %v4391_v38 = vadd.f32 %v4371_v35, %v4201_v43  ;;  %v4751_v22 = vpop.f32.mrf.mxu0  ;;  %v4184_v39 = vpop.f32.mrf.mxu1 }
 0x3af   :  { %v4561_v36 = vpop.f32.mrf.mxu3  ;;  %v4202_v11 = vadd.f32 %v4184_v39, %v8712_v17 }
 0x3b0   :  { %v4581_v58 = vadd.f32 %v4561_v36, %v4391_v38 }
 0x3b2   :  { %v4771_v9 = vadd.f32 %v4751_v22, %v4581_v58 }
 0x3b4   :  { %v4823_v33 = vadd.f32 %v8718_v32, %v4771_v9 }
 0x3b5   :  { %v4374_v37 = vpop.f32.mrf.mxu2 }
 0x3b6   :  { %4839 = vst [vmem:[%s8802_s3 + $0x70] sm:$0xff] %v4823_v33  ;;  %v4392_v1 = vadd.f32 %v4374_v37, %v4202_v11  ;;  %v4754_v45 = vpop.f32.mrf.mxu0 }
 0x3b7   :  { %v4564_v41 = vpop.f32.mrf.mxu3 }
 0x3b8   :  { %v4582_v16 = vadd.f32 %v4564_v41, %v4392_v1 }
 0x3ba   :  { %v4772_v46 = vadd.f32 %v4754_v45, %v4582_v16 }
 0x3bc   :  { %v4824_v48 = vadd.f32 %v8718_v32, %v4772_v46 }
 0x3be   :  { %4840 = vst [vmem:[%s8802_s3 + $0x78] sm:$0xff] %v4824_v48 }

</bundles_post_ra>
